<compile_context>
chip_gen: v6e
topology: v6e:2x2x1
jax: 0.10.0
libtpu: 0.0.40
codegen_flags: <defaults>
</compile_context>

<pallas_src>
from functools import lru_cache, partial

import jax
import jax.numpy as jnp
from jax import lax
from jax.experimental import pallas as pl
from jax.experimental.pallas import tpu as pltpu

_EPS = 1e-5          # InstanceNorm2d default eps
_NEG_SLOPE = 0.2     # LeakyReLU slope


@lru_cache(maxsize=1)
def _vmem_limit():
    """~3/4 of physical VMEM, capped at 96 MiB (None -> compiler default)."""
    try:
        cap = int(pltpu.get_tpu_info().vmem_capacity_bytes)
    except Exception:
        return None
    if cap < 64 * 1024 * 1024:
        return None
    return min((cap * 3) // 4, 96 * 1024 * 1024)


def _compiler_params():
    return pltpu.CompilerParams(
        dimension_semantics=("parallel",),   # split samples across v7x's 2 TCs
        vmem_limit_bytes=_vmem_limit())


# ---------------------------------------------------------------------------
# In-kernel helpers
# ---------------------------------------------------------------------------
def _conv_rows(x_ref, w_ref, b_ref, y_ref, *, KH, KW, Ho, Wo):
    """Stride-1 KHxKW conv of the padded channels-last tile in `x_ref`.

    x_ref: (Hp, Wp, Cin) bf16   w_ref: (KH*KW, Cin, Cout) bf16
    b_ref: (1, Cout)  f32       y_ref: (Ho, Wo, Cout) f32   (conv+bias, pre-norm)
    One output row per loop step: KH row loads + KH*KW MXU matmuls, f32 acc.
    """
    Wp, Cin = x_ref.shape[1], x_ref.shape[2]
    Cout = y_ref.shape[2]
    bias = b_ref[...]                                          # (1, Cout) f32

    def row_body(oh, carry):
        acc = jnp.zeros((Wo, Cout), jnp.float32)
        for kh in range(KH):
            xrow = x_ref[pl.ds(oh + kh, 1), :, :].reshape(Wp, Cin)
            for kw in range(KW):
                xs = xrow[kw:kw + Wo, :]                       # (Wo, Cin) bf16
                wk = w_ref[kh * KW + kw]                       # (Cin, Cout) bf16
                acc = acc + jnp.dot(xs, wk, preferred_element_type=jnp.float32)
        y_ref[pl.ds(oh, 1), :, :] = (acc + bias).reshape(1, Wo, Cout)
        return carry

    lax.fori_loop(0, Ho, row_body, 0)


def _sum01(y):
    """Sum over the two leading (spatial) axes, keepdims -> (1, 1, C)."""
    return jnp.sum(jnp.sum(y, axis=0, keepdims=True), axis=1, keepdims=True)


def _norm_lrelu(y, *, do_norm, count):
    if do_norm:                                  # InstanceNorm2d (biased var)
        mean = _sum01(y) * (1.0 / count)
        d = y - mean
        var = _sum01(d * d) * (1.0 / count)
        y = d * lax.rsqrt(var + _EPS)
    return jnp.where(y >= 0, y, _NEG_SLOPE * y)  # LeakyReLU(0.2)


# ---------------------------------------------------------------------------
# Kernels
# ---------------------------------------------------------------------------
def _conv_block_kernel(x_ref, w_ref, b_ref, o_ref, y_acc, *,
                       KH, KW, Ho, Wo, do_norm):
    _conv_rows(x_ref, w_ref, b_ref, y_acc, KH=KH, KW=KW, Ho=Ho, Wo=Wo)
    y = _norm_lrelu(y_acc[...], do_norm=do_norm, count=float(Ho * Wo))
    o_ref[...] = y.astype(o_ref.dtype)


def _final_block_kernel(x_ref, w4_ref, b4_ref, w5_ref, b5_ref, o_ref, y_acc, *,
                        Ho, Wo):
    # Layer 4: Conv2d(256,512,4,p=1) + InstanceNorm + LeakyReLU (f32, VMEM only).
    _conv_rows(x_ref, w4_ref, b4_ref, y_acc, KH=4, KW=4, Ho=Ho, Wo=Wo)
    y_acc[...] = _norm_lrelu(y_acc[...], do_norm=True, count=float(Ho * Wo))

    # Layer 5 (Conv2d(512,1,4,p=1)) + global avg-pool, fused analytically:
    #   mean_{oh,ow} conv5 = b5 + 1/(Ho5*Wo5) * sum_{kh,kw,c} W5[kh,kw,c] *
    #                        (sum of zero-padded y4 over window [kh:kh+Ho5, kw:kw+Wo5])
    Ho5, Wo5 = Ho - 1, Wo - 1
    C5 = w5_ref.shape[1]
    acc = jnp.zeros((1, C5), jnp.float32)
    for kh in range(4):
        r0, r1 = max(kh - 1, 0), min(kh + Ho5 - 1, Ho)
        if r1 <= r0:
            continue
        for kw in range(4):
            c0, c1 = max(kw - 1, 0), min(kw + Wo5 - 1, Wo)
            if c1 <= c0:
                continue
            pos = kh * 4 + kw
            win_sum = _sum01(y_acc[r0:r1, c0:c1, :]).reshape(1, C5)
            acc = acc + win_sum * w5_ref[pos:pos + 1, :]
    out = jnp.sum(acc, axis=1, keepdims=True) * (1.0 / (Ho5 * Wo5)) + b5_ref[...]
    o_ref[...] = out


# ---------------------------------------------------------------------------
# Wrappers (layout-only glue; no im2col blow-up, no transposes between layers)
# ---------------------------------------------------------------------------
def _conv_block_s2(x_nhwc, w_eff, b, *, do_norm):
    """Conv2d(4x4, stride 2, pad 1) [+ InstanceNorm] + LeakyReLU(0.2).

    Expressed as a stride-1 2x2 conv over a space-to-depth view so the kernel
    only needs contiguous slices of the resident tile.
    """
    N, H, W, C = x_nhwc.shape
    Hp, Wp = H + 2, W + 2
    xp = jnp.pad(x_nhwc, ((0, 0), (1, 1), (1, 1), (0, 0)))
    x2 = (xp.reshape(N, Hp // 2, 2, Wp // 2, 2, C)
            .transpose(0, 1, 3, 2, 4, 5)
            .reshape(N, Hp // 2, Wp // 2, 4 * C))
    Ho, Wo = H // 2, W // 2
    Cout = w_eff.shape[-1]
    kernel = partial(_conv_block_kernel, KH=2, KW=2, Ho=Ho, Wo=Wo,
                     do_norm=do_norm)
    return pl.pallas_call(
        kernel,
        out_shape=jax.ShapeDtypeStruct((N, Ho, Wo, Cout), jnp.bfloat16),
        grid=(N,),
        in_specs=[
            pl.BlockSpec((None,) + x2.shape[1:], lambda n: (n, 0, 0, 0)),
            pl.BlockSpec(w_eff.shape, lambda n: (0, 0, 0)),
            pl.BlockSpec(b.shape, lambda n: (0, 0)),
        ],
        out_specs=pl.BlockSpec((None, Ho, Wo, Cout), lambda n: (n, 0, 0, 0)),
        scratch_shapes=[pltpu.VMEM((Ho, Wo, Cout), jnp.float32)],
        compiler_params=_compiler_params(),
    )(x2, w_eff, b)


def _final_block(x_nhwc, w4, b4, w5, b5):
    """Conv4(256->512,4,p=1)+IN+LReLU then Conv5(512->1,4,p=1)+global avg-pool."""
    N, H, W, C = x_nhwc.shape
    xp = jnp.pad(x_nhwc, ((0, 0), (1, 1), (1, 1), (0, 0)))
    Ho, Wo = H - 1, W - 1
    Cout = w4.shape[-1]
    kernel = partial(_final_block_kernel, Ho=Ho, Wo=Wo)
    return pl.pallas_call(
        kernel,
        out_shape=jax.ShapeDtypeStruct((N, 1, 1), jnp.float32),
        grid=(N,),
        in_specs=[
            pl.BlockSpec((None,) + xp.shape[1:], lambda n: (n, 0, 0, 0)),
            pl.BlockSpec(w4.shape, lambda n: (0, 0, 0)),
            pl.BlockSpec(b4.shape, lambda n: (0, 0)),
            pl.BlockSpec(w5.shape, lambda n: (0, 0)),
            pl.BlockSpec(b5.shape, lambda n: (0, 0)),
        ],
        out_specs=pl.BlockSpec((None, 1, 1), lambda n: (n, 0, 0)),
        scratch_shapes=[pltpu.VMEM((Ho, Wo, Cout), jnp.float32)],
        compiler_params=_compiler_params(),
    )(xp, w4, b4, w5, b5)


# ---------------------------------------------------------------------------
# Parameters (PyTorch layout in, kernel-ready layout out)
# ---------------------------------------------------------------------------
_CFG = [(3, 64), (64, 128), (128, 256), (256, 512), (512, 1)]


def init_params(key):
    """Random parameters in the PyTorch Conv2d layout (Cout, Cin, 4, 4)."""
    params = []
    for i, (cin, cout) in enumerate(_CFG):
        kw_, kb_ = jax.random.split(jax.random.fold_in(key, i))
        w = 0.05 * jax.random.normal(kw_, (cout, cin, 4, 4), jnp.float32)
        b = 0.05 * jax.random.normal(kb_, (cout,), jnp.float32)
        params.append((w, b))
    return params


def _s2d_weight(w_pt):
    """(Cout,Cin,4,4) stride-2 weight -> (4, 4*Cin, Cout) bf16 (2x2 eff. conv)."""
    cout, cin = w_pt.shape[:2]
    w = jnp.transpose(w_pt, (2, 3, 1, 0))          # (kh, kw, Cin, Cout)
    w = w.reshape(2, 2, 2, 2, cin, cout)           # (ph, rh, pw, rw, Cin, Cout)
    w = jnp.transpose(w, (0, 2, 1, 3, 4, 5))       # (ph, pw, rh, rw, Cin, Cout)
    return w.reshape(4, 4 * cin, cout).astype(jnp.bfloat16)


def _s1_weight(w_pt):
    """(Cout,Cin,4,4) stride-1 weight -> (16, Cin, Cout) bf16."""
    cout, cin = w_pt.shape[:2]
    return jnp.transpose(w_pt, (2, 3, 1, 0)).reshape(16, cin, cout).astype(jnp.bfloat16)


def prepare_params(pt_params):
    (w1, b1), (w2, b2), (w3, b3), (w4, b4), (w5, b5) = pt_params
    row = lambda b: b.reshape(1, -1).astype(jnp.float32)
    l1 = (_s2d_weight(w1), row(b1))
    l2 = (_s2d_weight(w2), row(b2))
    l3 = (_s2d_weight(w3), row(b3))
    w5_eff = jnp.transpose(w5, (2, 3, 1, 0)).reshape(16, w5.shape[1]).astype(jnp.float32)
    l45 = (_s1_weight(w4), row(b4), w5_eff, b5.reshape(1, 1).astype(jnp.float32))
    return (l1, l2, l3, l45)


# ---------------------------------------------------------------------------
# Forward
# ---------------------------------------------------------------------------
@jax.jit
def discriminator_forward(x, eff_params):
    """x: (N, 3, H, W) f32 (H, W divisible by 8) -> (N, 1) f32."""
    (w1, b1), (w2, b2), (w3, b3), (w4, b4, w5, b5) = eff_params
    y = jnp.transpose(x, (0, 2, 3, 1)).astype(jnp.bfloat16)    # NHWC, bf16
    y = _conv_block_s2(y, w1, b1, do_norm=False)               # (N, H/2, W/2, 64)
    y = _conv_block_s2(y, w2, b2, do_norm=True)                # (N, H/4, W/4, 128)
    y = _conv_block_s2(y, w3, b3, do_norm=True)                # (N, H/8, W/8, 256)
    out = _final_block(y, w4, b4, w5, b5)                      # (N, 1, 1)
    return out.reshape(x.shape[0], 1)


if __name__ == "__main__":
    key = jax.random.PRNGKey(0)
    k_x, k_p = jax.random.split(key)
    # 32x32 input: 32 -> 16 -> 8 -> 4 -> 3 (conv4) -> 2 (conv5) -> avg pool -> (N, 1)
    x = jax.random.normal(k_x, (2, 3, 32, 32), jnp.float32)
    params = prepare_params(init_params(k_p))

    out = jax.block_until_ready(discriminator_forward(x, params))

    assert out.shape == (2, 1), out.shape
    assert bool(jnp.all(jnp.isfinite(out)))
    print("KERNEL_OK")
</pallas_src>

<mosaic_0001>
module attributes {stable_mosaic.version = 11 : i64} {
  func.func @_conv_block_kernel(%arg0: i32, %arg1: memref<1x17x17x12xbf16, #tpu.memory_space<vmem>>, %arg2: memref<4x12x64xbf16, #tpu.memory_space<vmem>>, %arg3: memref<1x64xf32, #tpu.memory_space<vmem>>, %arg4: memref<1x16x16x64xbf16, #tpu.memory_space<vmem>>, %arg5: memref<16x16x64xf32, #tpu.memory_space<vmem>>) attributes {dimension_semantics = [#tpu.dimension_semantics<parallel>], iteration_bounds = array<i64: 2>, scalar_prefetch = 0 : i64, scratch_operands = 1 : i64, tpu.core_type = #tpu.core_type<tc>, window_params = [{transform_indices = @transform_0, window_bounds = array<i64: 1, 17, 17, 12>}, {pipeline_mode = #tpu.pipeline_mode<synchronous>, transform_indices = @transform_1, window_bounds = array<i64: 4, 12, 64>}, {pipeline_mode = #tpu.pipeline_mode<synchronous>, transform_indices = @transform_2, window_bounds = array<i64: 1, 64>}, {transform_indices = @transform_3, window_bounds = array<i64: 1, 16, 16, 64>}]} {
    %c0 = arith.constant 0 : index
    %c0_0 = arith.constant 0 : index
    %0 = vector.load %arg3[%c0, %c0_0] : memref<1x64xf32, #tpu.memory_space<vmem>>, vector<1x64xf32>
    %c0_i32 = arith.constant 0 : i32
    %c16_i32 = arith.constant 16 : i32
    %1 = arith.addi %c0_i32, %c16_i32 : i32
    %c1_i32 = arith.constant 1 : i32
    scf.for %arg6 = %c0_i32 to %1 step %c1_i32  : i32 {
      %cst_10 = arith.constant 0.000000e+00 : f32
      %12 = vector.broadcast %cst_10 : f32 to vector<16x64xf32>
      %c0_i32_11 = arith.constant 0 : i32
      %13 = arith.addi %arg6, %c0_i32_11 : i32
      %c0_12 = arith.constant 0 : index
      %14 = arith.index_cast %13 : i32 to index
      %c0_13 = arith.constant 0 : index
      %c0_14 = arith.constant 0 : index
      %15 = vector.load %arg1[%c0_12, %14, %c0_13, %c0_14] : memref<1x17x17x12xbf16, #tpu.memory_space<vmem>>, vector<1x1x17x12xbf16>
      %16 = vector.shape_cast %15 : vector<1x1x17x12xbf16> to vector<1x17x12xbf16>
      %17 = vector.shape_cast %16 : vector<1x17x12xbf16> to vector<17x12xbf16>
      %18 = vector.extract_strided_slice %17 {offsets = [0, 0], sizes = [16, 12], strides = [1, 1]} : vector<17x12xbf16> to vector<16x12xbf16>
      %c0_15 = arith.constant 0 : index
      %c0_16 = arith.constant 0 : index
      %c0_17 = arith.constant 0 : index
      %19 = vector.load %arg2[%c0_15, %c0_16, %c0_17] : memref<4x12x64xbf16, #tpu.memory_space<vmem>>, vector<1x12x64xbf16>
      %20 = vector.shape_cast %19 : vector<1x12x64xbf16> to vector<12x64xbf16>
      %cst_18 = arith.constant dense<0.000000e+00> : vector<16x64xf32>
      %21 = tpu.matmul %18, %20, %cst_18 {dimension_numbers = #tpu.dot_dimension_numbers<[1], [0], [0], [1], [0, 0, 1, 1], [], []>} : vector<16x12xbf16>, vector<12x64xbf16>, vector<16x64xf32> -> vector<16x64xf32>
      %22 = arith.addf %12, %21 : vector<16x64xf32>
      %23 = vector.extract_strided_slice %17 {offsets = [1, 0], sizes = [16, 12], strides = [1, 1]} : vector<17x12xbf16> to vector<16x12xbf16>
      %c1 = arith.constant 1 : index
      %c0_19 = arith.constant 0 : index
      %c0_20 = arith.constant 0 : index
      %24 = vector.load %arg2[%c1, %c0_19, %c0_20] : memref<4x12x64xbf16, #tpu.memory_space<vmem>>, vector<1x12x64xbf16>
      %25 = vector.shape_cast %24 : vector<1x12x64xbf16> to vector<12x64xbf16>
      %cst_21 = arith.constant dense<0.000000e+00> : vector<16x64xf32>
      %26 = tpu.matmul %23, %25, %cst_21 {dimension_numbers = #tpu.dot_dimension_numbers<[1], [0], [0], [1], [0, 0, 1, 1], [], []>} : vector<16x12xbf16>, vector<12x64xbf16>, vector<16x64xf32> -> vector<16x64xf32>
      %27 = arith.addf %22, %26 : vector<16x64xf32>
      %c1_i32_22 = arith.constant 1 : i32
      %28 = arith.addi %arg6, %c1_i32_22 : i32
      %c0_23 = arith.constant 0 : index
      %29 = arith.index_cast %28 : i32 to index
      %c0_24 = arith.constant 0 : index
      %c0_25 = arith.constant 0 : index
      %30 = vector.load %arg1[%c0_23, %29, %c0_24, %c0_25] : memref<1x17x17x12xbf16, #tpu.memory_space<vmem>>, vector<1x1x17x12xbf16>
      %31 = vector.shape_cast %30 : vector<1x1x17x12xbf16> to vector<1x17x12xbf16>
      %32 = vector.shape_cast %31 : vector<1x17x12xbf16> to vector<17x12xbf16>
      %33 = vector.extract_strided_slice %32 {offsets = [0, 0], sizes = [16, 12], strides = [1, 1]} : vector<17x12xbf16> to vector<16x12xbf16>
      %c2 = arith.constant 2 : index
      %c0_26 = arith.constant 0 : index
      %c0_27 = arith.constant 0 : index
      %34 = vector.load %arg2[%c2, %c0_26, %c0_27] : memref<4x12x64xbf16, #tpu.memory_space<vmem>>, vector<1x12x64xbf16>
      %35 = vector.shape_cast %34 : vector<1x12x64xbf16> to vector<12x64xbf16>
      %cst_28 = arith.constant dense<0.000000e+00> : vector<16x64xf32>
      %36 = tpu.matmul %33, %35, %cst_28 {dimension_numbers = #tpu.dot_dimension_numbers<[1], [0], [0], [1], [0, 0, 1, 1], [], []>} : vector<16x12xbf16>, vector<12x64xbf16>, vector<16x64xf32> -> vector<16x64xf32>
      %37 = arith.addf %27, %36 : vector<16x64xf32>
      %38 = vector.extract_strided_slice %32 {offsets = [1, 0], sizes = [16, 12], strides = [1, 1]} : vector<17x12xbf16> to vector<16x12xbf16>
      %c3 = arith.constant 3 : index
      %c0_29 = arith.constant 0 : index
      %c0_30 = arith.constant 0 : index
      %39 = vector.load %arg2[%c3, %c0_29, %c0_30] : memref<4x12x64xbf16, #tpu.memory_space<vmem>>, vector<1x12x64xbf16>
      %40 = vector.shape_cast %39 : vector<1x12x64xbf16> to vector<12x64xbf16>
      %cst_31 = arith.constant dense<0.000000e+00> : vector<16x64xf32>
      %41 = tpu.matmul %38, %40, %cst_31 {dimension_numbers = #tpu.dot_dimension_numbers<[1], [0], [0], [1], [0, 0, 1, 1], [], []>} : vector<16x12xbf16>, vector<12x64xbf16>, vector<16x64xf32> -> vector<16x64xf32>
      %42 = arith.addf %37, %41 : vector<16x64xf32>
      %43 = vector.broadcast %0 : vector<1x64xf32> to vector<16x64xf32>
      %44 = arith.addf %42, %43 : vector<16x64xf32>
      %45 = vector.shape_cast %44 : vector<16x64xf32> to vector<1x16x64xf32>
      %46 = arith.index_cast %arg6 : i32 to index
      %c0_32 = arith.constant 0 : index
      %c0_33 = arith.constant 0 : index
      %47 = vector.load %arg5[%46, %c0_32, %c0_33] : memref<16x16x64xf32, #tpu.memory_space<vmem>>, vector<1x16x64xf32>
      tpu.vector_store %arg5[%46, %c0_32, %c0_33], %45 {strides = array<i32>} : memref<16x16x64xf32, #tpu.memory_space<vmem>>, vector<1x16x64xf32>,
    }
    %c16_i32_1 = arith.constant 16 : i32
    %c0_2 = arith.constant 0 : index
    %c0_3 = arith.constant 0 : index
    %c0_4 = arith.constant 0 : index
    %2 = vector.load %arg5[%c0_2, %c0_3, %c0_4] : memref<16x16x64xf32, #tpu.memory_space<vmem>>, vector<16x16x64xf32>
    %cst = arith.constant 0.000000e+00 : f32
    %3 = vector.broadcast %cst : f32 to vector<16x16x64xf32>
    %4 = arith.cmpf oge, %2, %3 : vector<16x16x64xf32>
    %cst_5 = arith.constant 2.000000e-01 : f32
    %5 = vector.broadcast %cst_5 : f32 to vector<16x16x64xf32>
    %6 = arith.mulf %5, %2 : vector<16x16x64xf32>
    %7 = arith.select %4, %2, %6 : vector<16x16x64xi1>, vector<16x16x64xf32>
    %8 = arith.truncf %7 : vector<16x16x64xf32> to vector<16x16x64xbf16>
    %c0_6 = arith.constant 0 : index
    %c0_7 = arith.constant 0 : index
    %c0_8 = arith.constant 0 : index
    %c0_9 = arith.constant 0 : index
    %9 = vector.load %arg4[%c0_6, %c0_7, %c0_8, %c0_9] : memref<1x16x16x64xbf16, #tpu.memory_space<vmem>>, vector<1x16x16x64xbf16>
    %10 = vector.shape_cast %9 : vector<1x16x16x64xbf16> to vector<16x16x64xbf16>
    %11 = vector.shape_cast %8 : vector<16x16x64xbf16> to vector<1x16x16x64xbf16>
    tpu.vector_store %arg4[%c0_6, %c0_7, %c0_8, %c0_9], %11 {strides = array<i32>} : memref<1x16x16x64xbf16, #tpu.memory_space<vmem>>, vector<1x16x16x64xbf16>,
    return
  }
  func.func @transform_0(%arg0: i32) -> (i32, i32, i32, i32) {
    %c0_i32 = arith.constant 0 : i32
    %c0_i32_0 = arith.constant 0 : i32
    %c0_i32_1 = arith.constant 0 : i32
    %c0_i32_2 = arith.constant 0 : i32
    return %arg0, %c0_i32, %c0_i32_0, %c0_i32_1 : i32, i32, i32, i32
  }
  func.func @transform_1(%arg0: i32) -> (i32, i32, i32) {
    %c0_i32 = arith.constant 0 : i32
    %c0_i32_0 = arith.constant 0 : i32
    %c0_i32_1 = arith.constant 0 : i32
    %c0_i32_2 = arith.constant 0 : i32
    return %c0_i32, %c0_i32_0, %c0_i32_1 : i32, i32, i32
  }
  func.func @transform_2(%arg0: i32) -> (i32, i32) {
    %c0_i32 = arith.constant 0 : i32
    %c0_i32_0 = arith.constant 0 : i32
    %c0_i32_1 = arith.constant 0 : i32
    return %c0_i32, %c0_i32_0 : i32, i32
  }
  func.func @transform_3(%arg0: i32) -> (i32, i32, i32, i32) {
    %c0_i32 = arith.constant 0 : i32
    %c0_i32_0 = arith.constant 0 : i32
    %c0_i32_1 = arith.constant 0 : i32
    %c0_i32_2 = arith.constant 0 : i32
    return %arg0, %c0_i32, %c0_i32_0, %c0_i32_1 : i32, i32, i32, i32
  }
}

module attributes {stable_mosaic.version = 11 : i64} {
  func.func @_conv_block_kernel(%arg0: i32, %arg1: memref<1x9x9x256xbf16, #tpu.memory_space<vmem>>, %arg2: memref<4x256x128xbf16, #tpu.memory_space<vmem>>, %arg3: memref<1x128xf32, #tpu.memory_space<vmem>>, %arg4: memref<1x8x8x128xbf16, #tpu.memory_space<vmem>>, %arg5: memref<8x8x128xf32, #tpu.memory_space<vmem>>) attributes {dimension_semantics = [#tpu.dimension_semantics<parallel>], iteration_bounds = array<i64: 2>, scalar_prefetch = 0 : i64, scratch_operands = 1 : i64, tpu.core_type = #tpu.core_type<tc>, window_params = [{transform_indices = @transform_0, window_bounds = array<i64: 1, 9, 9, 256>}, {pipeline_mode = #tpu.pipeline_mode<synchronous>, transform_indices = @transform_1, window_bounds = array<i64: 4, 256, 128>}, {pipeline_mode = #tpu.pipeline_mode<synchronous>, transform_indices = @transform_2, window_bounds = array<i64: 1, 128>}, {transform_indices = @transform_3, window_bounds = array<i64: 1, 8, 8, 128>}]} {
    %c0 = arith.constant 0 : index
    %c0_0 = arith.constant 0 : index
    %0 = vector.load %arg3[%c0, %c0_0] : memref<1x128xf32, #tpu.memory_space<vmem>>, vector<1x128xf32>
    %c0_i32 = arith.constant 0 : i32
    %c8_i32 = arith.constant 8 : i32
    %1 = arith.addi %c0_i32, %c8_i32 : i32
    %c1_i32 = arith.constant 1 : i32
    scf.for %arg6 = %c0_i32 to %1 step %c1_i32  : i32 {
      %cst_17 = arith.constant 0.000000e+00 : f32
      %32 = vector.broadcast %cst_17 : f32 to vector<8x128xf32>
      %c0_i32_18 = arith.constant 0 : i32
      %33 = arith.addi %arg6, %c0_i32_18 : i32
      %c0_19 = arith.constant 0 : index
      %34 = arith.index_cast %33 : i32 to index
      %c0_20 = arith.constant 0 : index
      %c0_21 = arith.constant 0 : index
      %35 = vector.load %arg1[%c0_19, %34, %c0_20, %c0_21] : memref<1x9x9x256xbf16, #tpu.memory_space<vmem>>, vector<1x1x9x256xbf16>
      %36 = vector.shape_cast %35 : vector<1x1x9x256xbf16> to vector<1x9x256xbf16>
      %37 = vector.shape_cast %36 : vector<1x9x256xbf16> to vector<9x256xbf16>
      %38 = vector.extract_strided_slice %37 {offsets = [0, 0], sizes = [8, 256], strides = [1, 1]} : vector<9x256xbf16> to vector<8x256xbf16>
      %c0_22 = arith.constant 0 : index
      %c0_23 = arith.constant 0 : index
      %c0_24 = arith.constant 0 : index
      %39 = vector.load %arg2[%c0_22, %c0_23, %c0_24] : memref<4x256x128xbf16, #tpu.memory_space<vmem>>, vector<1x256x128xbf16>
      %40 = vector.shape_cast %39 : vector<1x256x128xbf16> to vector<256x128xbf16>
      %cst_25 = arith.constant dense<0.000000e+00> : vector<8x128xf32>
      %41 = tpu.matmul %38, %40, %cst_25 {dimension_numbers = #tpu.dot_dimension_numbers<[1], [0], [0], [1], [0, 0, 1, 1], [], []>} : vector<8x256xbf16>, vector<256x128xbf16>, vector<8x128xf32> -> vector<8x128xf32>
      %42 = arith.addf %32, %41 : vector<8x128xf32>
      %43 = vector.extract_strided_slice %37 {offsets = [1, 0], sizes = [8, 256], strides = [1, 1]} : vector<9x256xbf16> to vector<8x256xbf16>
      %c1 = arith.constant 1 : index
      %c0_26 = arith.constant 0 : index
      %c0_27 = arith.constant 0 : index
      %44 = vector.load %arg2[%c1, %c0_26, %c0_27] : memref<4x256x128xbf16, #tpu.memory_space<vmem>>, vector<1x256x128xbf16>
      %45 = vector.shape_cast %44 : vector<1x256x128xbf16> to vector<256x128xbf16>
      %cst_28 = arith.constant dense<0.000000e+00> : vector<8x128xf32>
      %46 = tpu.matmul %43, %45, %cst_28 {dimension_numbers = #tpu.dot_dimension_numbers<[1], [0], [0], [1], [0, 0, 1, 1], [], []>} : vector<8x256xbf16>, vector<256x128xbf16>, vector<8x128xf32> -> vector<8x128xf32>
      %47 = arith.addf %42, %46 : vector<8x128xf32>
      %c1_i32_29 = arith.constant 1 : i32
      %48 = arith.addi %arg6, %c1_i32_29 : i32
      %c0_30 = arith.constant 0 : index
      %49 = arith.index_cast %48 : i32 to index
      %c0_31 = arith.constant 0 : index
      %c0_32 = arith.constant 0 : index
      %50 = vector.load %arg1[%c0_30, %49, %c0_31, %c0_32] : memref<1x9x9x256xbf16, #tpu.memory_space<vmem>>, vector<1x1x9x256xbf16>
      %51 = vector.shape_cast %50 : vector<1x1x9x256xbf16> to vector<1x9x256xbf16>
      %52 = vector.shape_cast %51 : vector<1x9x256xbf16> to vector<9x256xbf16>
      %53 = vector.extract_strided_slice %52 {offsets = [0, 0], sizes = [8, 256], strides = [1, 1]} : vector<9x256xbf16> to vector<8x256xbf16>
      %c2 = arith.constant 2 : index
      %c0_33 = arith.constant 0 : index
      %c0_34 = arith.constant 0 : index
      %54 = vector.load %arg2[%c2, %c0_33, %c0_34] : memref<4x256x128xbf16, #tpu.memory_space<vmem>>, vector<1x256x128xbf16>
      %55 = vector.shape_cast %54 : vector<1x256x128xbf16> to vector<256x128xbf16>
      %cst_35 = arith.constant dense<0.000000e+00> : vector<8x128xf32>
      %56 = tpu.matmul %53, %55, %cst_35 {dimension_numbers = #tpu.dot_dimension_numbers<[1], [0], [0], [1], [0, 0, 1, 1], [], []>} : vector<8x256xbf16>, vector<256x128xbf16>, vector<8x128xf32> -> vector<8x128xf32>
      %57 = arith.addf %47, %56 : vector<8x128xf32>
      %58 = vector.extract_strided_slice %52 {offsets = [1, 0], sizes = [8, 256], strides = [1, 1]} : vector<9x256xbf16> to vector<8x256xbf16>
      %c3 = arith.constant 3 : index
      %c0_36 = arith.constant 0 : index
      %c0_37 = arith.constant 0 : index
      %59 = vector.load %arg2[%c3, %c0_36, %c0_37] : memref<4x256x128xbf16, #tpu.memory_space<vmem>>, vector<1x256x128xbf16>
      %60 = vector.shape_cast %59 : vector<1x256x128xbf16> to vector<256x128xbf16>
      %cst_38 = arith.constant dense<0.000000e+00> : vector<8x128xf32>
      %61 = tpu.matmul %58, %60, %cst_38 {dimension_numbers = #tpu.dot_dimension_numbers<[1], [0], [0], [1], [0, 0, 1, 1], [], []>} : vector<8x256xbf16>, vector<256x128xbf16>, vector<8x128xf32> -> vector<8x128xf32>
      %62 = arith.addf %57, %61 : vector<8x128xf32>
      %63 = vector.broadcast %0 : vector<1x128xf32> to vector<8x128xf32>
      %64 = arith.addf %62, %63 : vector<8x128xf32>
      %65 = vector.shape_cast %64 : vector<8x128xf32> to vector<1x8x128xf32>
      %66 = arith.index_cast %arg6 : i32 to index
      %c0_39 = arith.constant 0 : index
      %c0_40 = arith.constant 0 : index
      %67 = vector.load %arg5[%66, %c0_39, %c0_40] : memref<8x8x128xf32, #tpu.memory_space<vmem>>, vector<1x8x128xf32>
      tpu.vector_store %arg5[%66, %c0_39, %c0_40], %65 {strides = array<i32>} : memref<8x8x128xf32, #tpu.memory_space<vmem>>, vector<1x8x128xf32>,
    }
    %c8_i32_1 = arith.constant 8 : i32
    %c0_2 = arith.constant 0 : index
    %c0_3 = arith.constant 0 : index
    %c0_4 = arith.constant 0 : index
    %2 = vector.load %arg5[%c0_2, %c0_3, %c0_4] : memref<8x8x128xf32, #tpu.memory_space<vmem>>, vector<8x8x128xf32>
    %cst = arith.constant dense<0.000000e+00> : vector<8x128xf32>
    %3 = vector.multi_reduction <add>, %2, %cst [0] : vector<8x8x128xf32> to vector<8x128xf32>
    %4 = vector.shape_cast %3 : vector<8x128xf32> to vector<1x8x128xf32>
    %cst_5 = arith.constant dense<0.000000e+00> : vector<1x128xf32>
    %5 = vector.multi_reduction <add>, %4, %cst_5 [1] : vector<1x8x128xf32> to vector<1x128xf32>
    %6 = vector.shape_cast %5 : vector<1x128xf32> to vector<1x1x128xf32>
    %cst_6 = arith.constant 1.562500e-02 : f32
    %7 = vector.broadcast %cst_6 : f32 to vector<1x1x128xf32>
    %8 = arith.mulf %6, %7 : vector<1x1x128xf32>
    %9 = vector.broadcast %8 : vector<1x1x128xf32> to vector<8x8x128xf32>
    %10 = arith.subf %2, %9 : vector<8x8x128xf32>
    %11 = arith.mulf %10, %10 : vector<8x8x128xf32>
    %cst_7 = arith.constant dense<0.000000e+00> : vector<8x128xf32>
    %12 = vector.multi_reduction <add>, %11, %cst_7 [0] : vector<8x8x128xf32> to vector<8x128xf32>
    %13 = vector.shape_cast %12 : vector<8x128xf32> to vector<1x8x128xf32>
    %cst_8 = arith.constant dense<0.000000e+00> : vector<1x128xf32>
    %14 = vector.multi_reduction <add>, %13, %cst_8 [1] : vector<1x8x128xf32> to vector<1x128xf32>
    %15 = vector.shape_cast %14 : vector<1x128xf32> to vector<1x1x128xf32>
    %cst_9 = arith.constant 1.562500e-02 : f32
    %16 = vector.broadcast %cst_9 : f32 to vector<1x1x128xf32>
    %17 = arith.mulf %15, %16 : vector<1x1x128xf32>
    %cst_10 = arith.constant 9.99999974E-6 : f32
    %18 = vector.broadcast %cst_10 : f32 to vector<1x1x128xf32>
    %19 = arith.addf %17, %18 : vector<1x1x128xf32>
    %20 = math.rsqrt %19 : vector<1x1x128xf32>
    %21 = vector.broadcast %20 : vector<1x1x128xf32> to vector<8x8x128xf32>
    %22 = arith.mulf %10, %21 : vector<8x8x128xf32>
    %cst_11 = arith.constant 0.000000e+00 : f32
    %23 = vector.broadcast %cst_11 : f32 to vector<8x8x128xf32>
    %24 = arith.cmpf oge, %22, %23 : vector<8x8x128xf32>
    %cst_12 = arith.constant 2.000000e-01 : f32
    %25 = vector.broadcast %cst_12 : f32 to vector<8x8x128xf32>
    %26 = arith.mulf %25, %22 : vector<8x8x128xf32>
    %27 = arith.select %24, %22, %26 : vector<8x8x128xi1>, vector<8x8x128xf32>
    %28 = arith.truncf %27 : vector<8x8x128xf32> to vector<8x8x128xbf16>
    %c0_13 = arith.constant 0 : index
    %c0_14 = arith.constant 0 : index
    %c0_15 = arith.constant 0 : index
    %c0_16 = arith.constant 0 : index
    %29 = vector.load %arg4[%c0_13, %c0_14, %c0_15, %c0_16] : memref<1x8x8x128xbf16, #tpu.memory_space<vmem>>, vector<1x8x8x128xbf16>
    %30 = vector.shape_cast %29 : vector<1x8x8x128xbf16> to vector<8x8x128xbf16>
    %31 = vector.shape_cast %28 : vector<8x8x128xbf16> to vector<1x8x8x128xbf16>
    tpu.vector_store %arg4[%c0_13, %c0_14, %c0_15, %c0_16], %31 {strides = array<i32>} : memref<1x8x8x128xbf16, #tpu.memory_space<vmem>>, vector<1x8x8x128xbf16>,
    return
  }
  func.func @transform_0(%arg0: i32) -> (i32, i32, i32, i32) {
    %c0_i32 = arith.constant 0 : i32
    %c0_i32_0 = arith.constant 0 : i32
    %c0_i32_1 = arith.constant 0 : i32
    %c0_i32_2 = arith.constant 0 : i32
    return %arg0, %c0_i32, %c0_i32_0, %c0_i32_1 : i32, i32, i32, i32
  }
  func.func @transform_1(%arg0: i32) -> (i32, i32, i32) {
    %c0_i32 = arith.constant 0 : i32
    %c0_i32_0 = arith.constant 0 : i32
    %c0_i32_1 = arith.constant 0 : i32
    %c0_i32_2 = arith.constant 0 : i32
    return %c0_i32, %c0_i32_0, %c0_i32_1 : i32, i32, i32
  }
  func.func @transform_2(%arg0: i32) -> (i32, i32) {
    %c0_i32 = arith.constant 0 : i32
    %c0_i32_0 = arith.constant 0 : i32
    %c0_i32_1 = arith.constant 0 : i32
    return %c0_i32, %c0_i32_0 : i32, i32
  }
  func.func @transform_3(%arg0: i32) -> (i32, i32, i32, i32) {
    %c0_i32 = arith.constant 0 : i32
    %c0_i32_0 = arith.constant 0 : i32
    %c0_i32_1 = arith.constant 0 : i32
    %c0_i32_2 = arith.constant 0 : i32
    return %arg0, %c0_i32, %c0_i32_0, %c0_i32_1 : i32, i32, i32, i32
  }
}

module attributes {stable_mosaic.version = 11 : i64} {
  func.func @_conv_block_kernel(%arg0: i32, %arg1: memref<1x5x5x512xbf16, #tpu.memory_space<vmem>>, %arg2: memref<4x512x256xbf16, #tpu.memory_space<vmem>>, %arg3: memref<1x256xf32, #tpu.memory_space<vmem>>, %arg4: memref<1x4x4x256xbf16, #tpu.memory_space<vmem>>, %arg5: memref<4x4x256xf32, #tpu.memory_space<vmem>>) attributes {dimension_semantics = [#tpu.dimension_semantics<parallel>], iteration_bounds = array<i64: 2>, scalar_prefetch = 0 : i64, scratch_operands = 1 : i64, tpu.core_type = #tpu.core_type<tc>, window_params = [{transform_indices = @transform_0, window_bounds = array<i64: 1, 5, 5, 512>}, {pipeline_mode = #tpu.pipeline_mode<synchronous>, transform_indices = @transform_1, window_bounds = array<i64: 4, 512, 256>}, {pipeline_mode = #tpu.pipeline_mode<synchronous>, transform_indices = @transform_2, window_bounds = array<i64: 1, 256>}, {transform_indices = @transform_3, window_bounds = array<i64: 1, 4, 4, 256>}]} {
    %c0 = arith.constant 0 : index
    %c0_0 = arith.constant 0 : index
    %0 = vector.load %arg3[%c0, %c0_0] : memref<1x256xf32, #tpu.memory_space<vmem>>, vector<1x256xf32>
    %c0_i32 = arith.constant 0 : i32
    %c4_i32 = arith.constant 4 : i32
    %1 = arith.addi %c0_i32, %c4_i32 : i32
    %c1_i32 = arith.constant 1 : i32
    scf.for %arg6 = %c0_i32 to %1 step %c1_i32  : i32 {
      %cst_17 = arith.constant 0.000000e+00 : f32
      %32 = vector.broadcast %cst_17 : f32 to vector<4x256xf32>
      %c0_i32_18 = arith.constant 0 : i32
      %33 = arith.addi %arg6, %c0_i32_18 : i32
      %c0_19 = arith.constant 0 : index
      %34 = arith.index_cast %33 : i32 to index
      %c0_20 = arith.constant 0 : index
      %c0_21 = arith.constant 0 : index
      %35 = vector.load %arg1[%c0_19, %34, %c0_20, %c0_21] : memref<1x5x5x512xbf16, #tpu.memory_space<vmem>>, vector<1x1x5x512xbf16>
      %36 = vector.shape_cast %35 : vector<1x1x5x512xbf16> to vector<1x5x512xbf16>
      %37 = vector.shape_cast %36 : vector<1x5x512xbf16> to vector<5x512xbf16>
      %38 = vector.extract_strided_slice %37 {offsets = [0, 0], sizes = [4, 512], strides = [1, 1]} : vector<5x512xbf16> to vector<4x512xbf16>
      %c0_22 = arith.constant 0 : index
      %c0_23 = arith.constant 0 : index
      %c0_24 = arith.constant 0 : index
      %39 = vector.load %arg2[%c0_22, %c0_23, %c0_24] : memref<4x512x256xbf16, #tpu.memory_space<vmem>>, vector<1x512x256xbf16>
      %40 = vector.shape_cast %39 : vector<1x512x256xbf16> to vector<512x256xbf16>
      %cst_25 = arith.constant dense<0.000000e+00> : vector<4x256xf32>
      %41 = tpu.matmul %38, %40, %cst_25 {dimension_numbers = #tpu.dot_dimension_numbers<[1], [0], [0], [1], [0, 0, 1, 1], [], []>} : vector<4x512xbf16>, vector<512x256xbf16>, vector<4x256xf32> -> vector<4x256xf32>
      %42 = arith.addf %32, %41 : vector<4x256xf32>
      %43 = vector.extract_strided_slice %37 {offsets = [1, 0], sizes = [4, 512], strides = [1, 1]} : vector<5x512xbf16> to vector<4x512xbf16>
      %c1 = arith.constant 1 : index
      %c0_26 = arith.constant 0 : index
      %c0_27 = arith.constant 0 : index
      %44 = vector.load %arg2[%c1, %c0_26, %c0_27] : memref<4x512x256xbf16, #tpu.memory_space<vmem>>, vector<1x512x256xbf16>
      %45 = vector.shape_cast %44 : vector<1x512x256xbf16> to vector<512x256xbf16>
      %cst_28 = arith.constant dense<0.000000e+00> : vector<4x256xf32>
      %46 = tpu.matmul %43, %45, %cst_28 {dimension_numbers = #tpu.dot_dimension_numbers<[1], [0], [0], [1], [0, 0, 1, 1], [], []>} : vector<4x512xbf16>, vector<512x256xbf16>, vector<4x256xf32> -> vector<4x256xf32>
      %47 = arith.addf %42, %46 : vector<4x256xf32>
      %c1_i32_29 = arith.constant 1 : i32
      %48 = arith.addi %arg6, %c1_i32_29 : i32
      %c0_30 = arith.constant 0 : index
      %49 = arith.index_cast %48 : i32 to index
      %c0_31 = arith.constant 0 : index
      %c0_32 = arith.constant 0 : index
      %50 = vector.load %arg1[%c0_30, %49, %c0_31, %c0_32] : memref<1x5x5x512xbf16, #tpu.memory_space<vmem>>, vector<1x1x5x512xbf16>
      %51 = vector.shape_cast %50 : vector<1x1x5x512xbf16> to vector<1x5x512xbf16>
      %52 = vector.shape_cast %51 : vector<1x5x512xbf16> to vector<5x512xbf16>
      %53 = vector.extract_strided_slice %52 {offsets = [0, 0], sizes = [4, 512], strides = [1, 1]} : vector<5x512xbf16> to vector<4x512xbf16>
      %c2 = arith.constant 2 : index
      %c0_33 = arith.constant 0 : index
      %c0_34 = arith.constant 0 : index
      %54 = vector.load %arg2[%c2, %c0_33, %c0_34] : memref<4x512x256xbf16, #tpu.memory_space<vmem>>, vector<1x512x256xbf16>
      %55 = vector.shape_cast %54 : vector<1x512x256xbf16> to vector<512x256xbf16>
      %cst_35 = arith.constant dense<0.000000e+00> : vector<4x256xf32>
      %56 = tpu.matmul %53, %55, %cst_35 {dimension_numbers = #tpu.dot_dimension_numbers<[1], [0], [0], [1], [0, 0, 1, 1], [], []>} : vector<4x512xbf16>, vector<512x256xbf16>, vector<4x256xf32> -> vector<4x256xf32>
      %57 = arith.addf %47, %56 : vector<4x256xf32>
      %58 = vector.extract_strided_slice %52 {offsets = [1, 0], sizes = [4, 512], strides = [1, 1]} : vector<5x512xbf16> to vector<4x512xbf16>
      %c3 = arith.constant 3 : index
      %c0_36 = arith.constant 0 : index
      %c0_37 = arith.constant 0 : index
      %59 = vector.load %arg2[%c3, %c0_36, %c0_37] : memref<4x512x256xbf16, #tpu.memory_space<vmem>>, vector<1x512x256xbf16>
      %60 = vector.shape_cast %59 : vector<1x512x256xbf16> to vector<512x256xbf16>
      %cst_38 = arith.constant dense<0.000000e+00> : vector<4x256xf32>
      %61 = tpu.matmul %58, %60, %cst_38 {dimension_numbers = #tpu.dot_dimension_numbers<[1], [0], [0], [1], [0, 0, 1, 1], [], []>} : vector<4x512xbf16>, vector<512x256xbf16>, vector<4x256xf32> -> vector<4x256xf32>
      %62 = arith.addf %57, %61 : vector<4x256xf32>
      %63 = vector.broadcast %0 : vector<1x256xf32> to vector<4x256xf32>
      %64 = arith.addf %62, %63 : vector<4x256xf32>
      %65 = vector.shape_cast %64 : vector<4x256xf32> to vector<1x4x256xf32>
      %66 = arith.index_cast %arg6 : i32 to index
      %c0_39 = arith.constant 0 : index
      %c0_40 = arith.constant 0 : index
      %67 = vector.load %arg5[%66, %c0_39, %c0_40] : memref<4x4x256xf32, #tpu.memory_space<vmem>>, vector<1x4x256xf32>
      tpu.vector_store %arg5[%66, %c0_39, %c0_40], %65 {strides = array<i32>} : memref<4x4x256xf32, #tpu.memory_space<vmem>>, vector<1x4x256xf32>,
    }
    %c4_i32_1 = arith.constant 4 : i32
    %c0_2 = arith.constant 0 : index
    %c0_3 = arith.constant 0 : index
    %c0_4 = arith.constant 0 : index
    %2 = vector.load %arg5[%c0_2, %c0_3, %c0_4] : memref<4x4x256xf32, #tpu.memory_space<vmem>>, vector<4x4x256xf32>
    %cst = arith.constant dense<0.000000e+00> : vector<4x256xf32>
    %3 = vector.multi_reduction <add>, %2, %cst [0] : vector<4x4x256xf32> to vector<4x256xf32>
    %4 = vector.shape_cast %3 : vector<4x256xf32> to vector<1x4x256xf32>
    %cst_5 = arith.constant dense<0.000000e+00> : vector<1x256xf32>
    %5 = vector.multi_reduction <add>, %4, %cst_5 [1] : vector<1x4x256xf32> to vector<1x256xf32>
    %6 = vector.shape_cast %5 : vector<1x256xf32> to vector<1x1x256xf32>
    %cst_6 = arith.constant 6.250000e-02 : f32
    %7 = vector.broadcast %cst_6 : f32 to vector<1x1x256xf32>
    %8 = arith.mulf %6, %7 : vector<1x1x256xf32>
    %9 = vector.broadcast %8 : vector<1x1x256xf32> to vector<4x4x256xf32>
    %10 = arith.subf %2, %9 : vector<4x4x256xf32>
    %11 = arith.mulf %10, %10 : vector<4x4x256xf32>
    %cst_7 = arith.constant dense<0.000000e+00> : vector<4x256xf32>
    %12 = vector.multi_reduction <add>, %11, %cst_7 [0] : vector<4x4x256xf32> to vector<4x256xf32>
    %13 = vector.shape_cast %12 : vector<4x256xf32> to vector<1x4x256xf32>
    %cst_8 = arith.constant dense<0.000000e+00> : vector<1x256xf32>
    %14 = vector.multi_reduction <add>, %13, %cst_8 [1] : vector<1x4x256xf32> to vector<1x256xf32>
    %15 = vector.shape_cast %14 : vector<1x256xf32> to vector<1x1x256xf32>
    %cst_9 = arith.constant 6.250000e-02 : f32
    %16 = vector.broadcast %cst_9 : f32 to vector<1x1x256xf32>
    %17 = arith.mulf %15, %16 : vector<1x1x256xf32>
    %cst_10 = arith.constant 9.99999974E-6 : f32
    %18 = vector.broadcast %cst_10 : f32 to vector<1x1x256xf32>
    %19 = arith.addf %17, %18 : vector<1x1x256xf32>
    %20 = math.rsqrt %19 : vector<1x1x256xf32>
    %21 = vector.broadcast %20 : vector<1x1x256xf32> to vector<4x4x256xf32>
    %22 = arith.mulf %10, %21 : vector<4x4x256xf32>
    %cst_11 = arith.constant 0.000000e+00 : f32
    %23 = vector.broadcast %cst_11 : f32 to vector<4x4x256xf32>
    %24 = arith.cmpf oge, %22, %23 : vector<4x4x256xf32>
    %cst_12 = arith.constant 2.000000e-01 : f32
    %25 = vector.broadcast %cst_12 : f32 to vector<4x4x256xf32>
    %26 = arith.mulf %25, %22 : vector<4x4x256xf32>
    %27 = arith.select %24, %22, %26 : vector<4x4x256xi1>, vector<4x4x256xf32>
    %28 = arith.truncf %27 : vector<4x4x256xf32> to vector<4x4x256xbf16>
    %c0_13 = arith.constant 0 : index
    %c0_14 = arith.constant 0 : index
    %c0_15 = arith.constant 0 : index
    %c0_16 = arith.constant 0 : index
    %29 = vector.load %arg4[%c0_13, %c0_14, %c0_15, %c0_16] : memref<1x4x4x256xbf16, #tpu.memory_space<vmem>>, vector<1x4x4x256xbf16>
    %30 = vector.shape_cast %29 : vector<1x4x4x256xbf16> to vector<4x4x256xbf16>
    %31 = vector.shape_cast %28 : vector<4x4x256xbf16> to vector<1x4x4x256xbf16>
    tpu.vector_store %arg4[%c0_13, %c0_14, %c0_15, %c0_16], %31 {strides = array<i32>} : memref<1x4x4x256xbf16, #tpu.memory_space<vmem>>, vector<1x4x4x256xbf16>,
    return
  }
  func.func @transform_0(%arg0: i32) -> (i32, i32, i32, i32) {
    %c0_i32 = arith.constant 0 : i32
    %c0_i32_0 = arith.constant 0 : i32
    %c0_i32_1 = arith.constant 0 : i32
    %c0_i32_2 = arith.constant 0 : i32
    return %arg0, %c0_i32, %c0_i32_0, %c0_i32_1 : i32, i32, i32, i32
  }
  func.func @transform_1(%arg0: i32) -> (i32, i32, i32) {
    %c0_i32 = arith.constant 0 : i32
    %c0_i32_0 = arith.constant 0 : i32
    %c0_i32_1 = arith.constant 0 : i32
    %c0_i32_2 = arith.constant 0 : i32
    return %c0_i32, %c0_i32_0, %c0_i32_1 : i32, i32, i32
  }
  func.func @transform_2(%arg0: i32) -> (i32, i32) {
    %c0_i32 = arith.constant 0 : i32
    %c0_i32_0 = arith.constant 0 : i32
    %c0_i32_1 = arith.constant 0 : i32
    return %c0_i32, %c0_i32_0 : i32, i32
  }
  func.func @transform_3(%arg0: i32) -> (i32, i32, i32, i32) {
    %c0_i32 = arith.constant 0 : i32
    %c0_i32_0 = arith.constant 0 : i32
    %c0_i32_1 = arith.constant 0 : i32
    %c0_i32_2 = arith.constant 0 : i32
    return %arg0, %c0_i32, %c0_i32_0, %c0_i32_1 : i32, i32, i32, i32
  }
}

module attributes {stable_mosaic.version = 11 : i64} {
  func.func @_final_block_kernel(%arg0: i32, %arg1: memref<1x6x6x256xbf16, #tpu.memory_space<vmem>>, %arg2: memref<16x256x512xbf16, #tpu.memory_space<vmem>>, %arg3: memref<1x512xf32, #tpu.memory_space<vmem>>, %arg4: memref<16x512xf32, #tpu.memory_space<vmem>>, %arg5: memref<1x1xf32, #tpu.memory_space<vmem>>, %arg6: memref<1x1x1xf32, #tpu.memory_space<vmem>>, %arg7: memref<3x3x512xf32, #tpu.memory_space<vmem>>) attributes {dimension_semantics = [#tpu.dimension_semantics<parallel>], iteration_bounds = array<i64: 2>, scalar_prefetch = 0 : i64, scratch_operands = 1 : i64, tpu.core_type = #tpu.core_type<tc>, window_params = [{transform_indices = @transform_0, window_bounds = array<i64: 1, 6, 6, 256>}, {pipeline_mode = #tpu.pipeline_mode<synchronous>, transform_indices = @transform_1, window_bounds = array<i64: 16, 256, 512>}, {pipeline_mode = #tpu.pipeline_mode<synchronous>, transform_indices = @transform_2, window_bounds = array<i64: 1, 512>}, {pipeline_mode = #tpu.pipeline_mode<synchronous>, transform_indices = @transform_3, window_bounds = array<i64: 16, 512>}, {pipeline_mode = #tpu.pipeline_mode<synchronous>, transform_indices = @transform_4, window_bounds = array<i64: 1, 1>}, {transform_indices = @transform_5, window_bounds = array<i64: 1, 1, 1>}]} {
    %c0 = arith.constant 0 : index
    %c0_0 = arith.constant 0 : index
    %0 = vector.load %arg3[%c0, %c0_0] : memref<1x512xf32, #tpu.memory_space<vmem>>, vector<1x512xf32>
    %c0_i32 = arith.constant 0 : i32
    %c3_i32 = arith.constant 3 : i32
    %1 = arith.addi %c0_i32, %c3_i32 : i32
    %c1_i32 = arith.constant 1 : i32
    scf.for %arg8 = %c0_i32 to %1 step %c1_i32  : i32 {
      %cst_121 = arith.constant 0.000000e+00 : f32
      %183 = vector.broadcast %cst_121 : f32 to vector<3x512xf32>
      %c0_i32_122 = arith.constant 0 : i32
      %184 = arith.addi %arg8, %c0_i32_122 : i32
      %c0_123 = arith.constant 0 : index
      %185 = arith.index_cast %184 : i32 to index
      %c0_124 = arith.constant 0 : index
      %c0_125 = arith.constant 0 : index
      %186 = vector.load %arg1[%c0_123, %185, %c0_124, %c0_125] : memref<1x6x6x256xbf16, #tpu.memory_space<vmem>>, vector<1x1x6x256xbf16>
      %187 = vector.shape_cast %186 : vector<1x1x6x256xbf16> to vector<1x6x256xbf16>
      %188 = vector.shape_cast %187 : vector<1x6x256xbf16> to vector<6x256xbf16>
      %189 = vector.extract_strided_slice %188 {offsets = [0, 0], sizes = [3, 256], strides = [1, 1]} : vector<6x256xbf16> to vector<3x256xbf16>
      %c0_126 = arith.constant 0 : index
      %c0_127 = arith.constant 0 : index
      %c0_128 = arith.constant 0 : index
      %190 = vector.load %arg2[%c0_126, %c0_127, %c0_128] : memref<16x256x512xbf16, #tpu.memory_space<vmem>>, vector<1x256x512xbf16>
      %191 = vector.shape_cast %190 : vector<1x256x512xbf16> to vector<256x512xbf16>
      %cst_129 = arith.constant dense<0.000000e+00> : vector<3x512xf32>
      %192 = tpu.matmul %189, %191, %cst_129 {dimension_numbers = #tpu.dot_dimension_numbers<[1], [0], [0], [1], [0, 0, 1, 1], [], []>} : vector<3x256xbf16>, vector<256x512xbf16>, vector<3x512xf32> -> vector<3x512xf32>
      %193 = arith.addf %183, %192 : vector<3x512xf32>
      %194 = vector.extract_strided_slice %188 {offsets = [1, 0], sizes = [3, 256], strides = [1, 1]} : vector<6x256xbf16> to vector<3x256xbf16>
      %c1_130 = arith.constant 1 : index
      %c0_131 = arith.constant 0 : index
      %c0_132 = arith.constant 0 : index
      %195 = vector.load %arg2[%c1_130, %c0_131, %c0_132] : memref<16x256x512xbf16, #tpu.memory_space<vmem>>, vector<1x256x512xbf16>
      %196 = vector.shape_cast %195 : vector<1x256x512xbf16> to vector<256x512xbf16>
      %cst_133 = arith.constant dense<0.000000e+00> : vector<3x512xf32>
      %197 = tpu.matmul %194, %196, %cst_133 {dimension_numbers = #tpu.dot_dimension_numbers<[1], [0], [0], [1], [0, 0, 1, 1], [], []>} : vector<3x256xbf16>, vector<256x512xbf16>, vector<3x512xf32> -> vector<3x512xf32>
      %198 = arith.addf %193, %197 : vector<3x512xf32>
      %199 = vector.extract_strided_slice %188 {offsets = [2, 0], sizes = [3, 256], strides = [1, 1]} : vector<6x256xbf16> to vector<3x256xbf16>
      %c2_134 = arith.constant 2 : index
      %c0_135 = arith.constant 0 : index
      %c0_136 = arith.constant 0 : index
      %200 = vector.load %arg2[%c2_134, %c0_135, %c0_136] : memref<16x256x512xbf16, #tpu.memory_space<vmem>>, vector<1x256x512xbf16>
      %201 = vector.shape_cast %200 : vector<1x256x512xbf16> to vector<256x512xbf16>
      %cst_137 = arith.constant dense<0.000000e+00> : vector<3x512xf32>
      %202 = tpu.matmul %199, %201, %cst_137 {dimension_numbers = #tpu.dot_dimension_numbers<[1], [0], [0], [1], [0, 0, 1, 1], [], []>} : vector<3x256xbf16>, vector<256x512xbf16>, vector<3x512xf32> -> vector<3x512xf32>
      %203 = arith.addf %198, %202 : vector<3x512xf32>
      %204 = vector.extract_strided_slice %188 {offsets = [3, 0], sizes = [3, 256], strides = [1, 1]} : vector<6x256xbf16> to vector<3x256xbf16>
      %c3_138 = arith.constant 3 : index
      %c0_139 = arith.constant 0 : index
      %c0_140 = arith.constant 0 : index
      %205 = vector.load %arg2[%c3_138, %c0_139, %c0_140] : memref<16x256x512xbf16, #tpu.memory_space<vmem>>, vector<1x256x512xbf16>
      %206 = vector.shape_cast %205 : vector<1x256x512xbf16> to vector<256x512xbf16>
      %cst_141 = arith.constant dense<0.000000e+00> : vector<3x512xf32>
      %207 = tpu.matmul %204, %206, %cst_141 {dimension_numbers = #tpu.dot_dimension_numbers<[1], [0], [0], [1], [0, 0, 1, 1], [], []>} : vector<3x256xbf16>, vector<256x512xbf16>, vector<3x512xf32> -> vector<3x512xf32>
      %208 = arith.addf %203, %207 : vector<3x512xf32>
      %c1_i32_142 = arith.constant 1 : i32
      %209 = arith.addi %arg8, %c1_i32_142 : i32
      %c0_143 = arith.constant 0 : index
      %210 = arith.index_cast %209 : i32 to index
      %c0_144 = arith.constant 0 : index
      %c0_145 = arith.constant 0 : index
      %211 = vector.load %arg1[%c0_143, %210, %c0_144, %c0_145] : memref<1x6x6x256xbf16, #tpu.memory_space<vmem>>, vector<1x1x6x256xbf16>
      %212 = vector.shape_cast %211 : vector<1x1x6x256xbf16> to vector<1x6x256xbf16>
      %213 = vector.shape_cast %212 : vector<1x6x256xbf16> to vector<6x256xbf16>
      %214 = vector.extract_strided_slice %213 {offsets = [0, 0], sizes = [3, 256], strides = [1, 1]} : vector<6x256xbf16> to vector<3x256xbf16>
      %c4_146 = arith.constant 4 : index
      %c0_147 = arith.constant 0 : index
      %c0_148 = arith.constant 0 : index
      %215 = vector.load %arg2[%c4_146, %c0_147, %c0_148] : memref<16x256x512xbf16, #tpu.memory_space<vmem>>, vector<1x256x512xbf16>
      %216 = vector.shape_cast %215 : vector<1x256x512xbf16> to vector<256x512xbf16>
      %cst_149 = arith.constant dense<0.000000e+00> : vector<3x512xf32>
      %217 = tpu.matmul %214, %216, %cst_149 {dimension_numbers = #tpu.dot_dimension_numbers<[1], [0], [0], [1], [0, 0, 1, 1], [], []>} : vector<3x256xbf16>, vector<256x512xbf16>, vector<3x512xf32> -> vector<3x512xf32>
      %218 = arith.addf %208, %217 : vector<3x512xf32>
      %219 = vector.extract_strided_slice %213 {offsets = [1, 0], sizes = [3, 256], strides = [1, 1]} : vector<6x256xbf16> to vector<3x256xbf16>
      %c5_150 = arith.constant 5 : index
      %c0_151 = arith.constant 0 : index
      %c0_152 = arith.constant 0 : index
      %220 = vector.load %arg2[%c5_150, %c0_151, %c0_152] : memref<16x256x512xbf16, #tpu.memory_space<vmem>>, vector<1x256x512xbf16>
      %221 = vector.shape_cast %220 : vector<1x256x512xbf16> to vector<256x512xbf16>
      %cst_153 = arith.constant dense<0.000000e+00> : vector<3x512xf32>
      %222 = tpu.matmul %219, %221, %cst_153 {dimension_numbers = #tpu.dot_dimension_numbers<[1], [0], [0], [1], [0, 0, 1, 1], [], []>} : vector<3x256xbf16>, vector<256x512xbf16>, vector<3x512xf32> -> vector<3x512xf32>
      %223 = arith.addf %218, %222 : vector<3x512xf32>
      %224 = vector.extract_strided_slice %213 {offsets = [2, 0], sizes = [3, 256], strides = [1, 1]} : vector<6x256xbf16> to vector<3x256xbf16>
      %c6_154 = arith.constant 6 : index
      %c0_155 = arith.constant 0 : index
      %c0_156 = arith.constant 0 : index
      %225 = vector.load %arg2[%c6_154, %c0_155, %c0_156] : memref<16x256x512xbf16, #tpu.memory_space<vmem>>, vector<1x256x512xbf16>
      %226 = vector.shape_cast %225 : vector<1x256x512xbf16> to vector<256x512xbf16>
      %cst_157 = arith.constant dense<0.000000e+00> : vector<3x512xf32>
      %227 = tpu.matmul %224, %226, %cst_157 {dimension_numbers = #tpu.dot_dimension_numbers<[1], [0], [0], [1], [0, 0, 1, 1], [], []>} : vector<3x256xbf16>, vector<256x512xbf16>, vector<3x512xf32> -> vector<3x512xf32>
      %228 = arith.addf %223, %227 : vector<3x512xf32>
      %229 = vector.extract_strided_slice %213 {offsets = [3, 0], sizes = [3, 256], strides = [1, 1]} : vector<6x256xbf16> to vector<3x256xbf16>
      %c7_158 = arith.constant 7 : index
      %c0_159 = arith.constant 0 : index
      %c0_160 = arith.constant 0 : index
      %230 = vector.load %arg2[%c7_158, %c0_159, %c0_160] : memref<16x256x512xbf16, #tpu.memory_space<vmem>>, vector<1x256x512xbf16>
      %231 = vector.shape_cast %230 : vector<1x256x512xbf16> to vector<256x512xbf16>
      %cst_161 = arith.constant dense<0.000000e+00> : vector<3x512xf32>
      %232 = tpu.matmul %229, %231, %cst_161 {dimension_numbers = #tpu.dot_dimension_numbers<[1], [0], [0], [1], [0, 0, 1, 1], [], []>} : vector<3x256xbf16>, vector<256x512xbf16>, vector<3x512xf32> -> vector<3x512xf32>
      %233 = arith.addf %228, %232 : vector<3x512xf32>
      %c2_i32 = arith.constant 2 : i32
      %234 = arith.addi %arg8, %c2_i32 : i32
      %c0_162 = arith.constant 0 : index
      %235 = arith.index_cast %234 : i32 to index
      %c0_163 = arith.constant 0 : index
      %c0_164 = arith.constant 0 : index
      %236 = vector.load %arg1[%c0_162, %235, %c0_163, %c0_164] : memref<1x6x6x256xbf16, #tpu.memory_space<vmem>>, vector<1x1x6x256xbf16>
      %237 = vector.shape_cast %236 : vector<1x1x6x256xbf16> to vector<1x6x256xbf16>
      %238 = vector.shape_cast %237 : vector<1x6x256xbf16> to vector<6x256xbf16>
      %239 = vector.extract_strided_slice %238 {offsets = [0, 0], sizes = [3, 256], strides = [1, 1]} : vector<6x256xbf16> to vector<3x256xbf16>
      %c8_165 = arith.constant 8 : index
      %c0_166 = arith.constant 0 : index
      %c0_167 = arith.constant 0 : index
      %240 = vector.load %arg2[%c8_165, %c0_166, %c0_167] : memref<16x256x512xbf16, #tpu.memory_space<vmem>>, vector<1x256x512xbf16>
      %241 = vector.shape_cast %240 : vector<1x256x512xbf16> to vector<256x512xbf16>
      %cst_168 = arith.constant dense<0.000000e+00> : vector<3x512xf32>
      %242 = tpu.matmul %239, %241, %cst_168 {dimension_numbers = #tpu.dot_dimension_numbers<[1], [0], [0], [1], [0, 0, 1, 1], [], []>} : vector<3x256xbf16>, vector<256x512xbf16>, vector<3x512xf32> -> vector<3x512xf32>
      %243 = arith.addf %233, %242 : vector<3x512xf32>
      %244 = vector.extract_strided_slice %238 {offsets = [1, 0], sizes = [3, 256], strides = [1, 1]} : vector<6x256xbf16> to vector<3x256xbf16>
      %c9_169 = arith.constant 9 : index
      %c0_170 = arith.constant 0 : index
      %c0_171 = arith.constant 0 : index
      %245 = vector.load %arg2[%c9_169, %c0_170, %c0_171] : memref<16x256x512xbf16, #tpu.memory_space<vmem>>, vector<1x256x512xbf16>
      %246 = vector.shape_cast %245 : vector<1x256x512xbf16> to vector<256x512xbf16>
      %cst_172 = arith.constant dense<0.000000e+00> : vector<3x512xf32>
      %247 = tpu.matmul %244, %246, %cst_172 {dimension_numbers = #tpu.dot_dimension_numbers<[1], [0], [0], [1], [0, 0, 1, 1], [], []>} : vector<3x256xbf16>, vector<256x512xbf16>, vector<3x512xf32> -> vector<3x512xf32>
      %248 = arith.addf %243, %247 : vector<3x512xf32>
      %249 = vector.extract_strided_slice %238 {offsets = [2, 0], sizes = [3, 256], strides = [1, 1]} : vector<6x256xbf16> to vector<3x256xbf16>
      %c10_173 = arith.constant 10 : index
      %c0_174 = arith.constant 0 : index
      %c0_175 = arith.constant 0 : index
      %250 = vector.load %arg2[%c10_173, %c0_174, %c0_175] : memref<16x256x512xbf16, #tpu.memory_space<vmem>>, vector<1x256x512xbf16>
      %251 = vector.shape_cast %250 : vector<1x256x512xbf16> to vector<256x512xbf16>
      %cst_176 = arith.constant dense<0.000000e+00> : vector<3x512xf32>
      %252 = tpu.matmul %249, %251, %cst_176 {dimension_numbers = #tpu.dot_dimension_numbers<[1], [0], [0], [1], [0, 0, 1, 1], [], []>} : vector<3x256xbf16>, vector<256x512xbf16>, vector<3x512xf32> -> vector<3x512xf32>
      %253 = arith.addf %248, %252 : vector<3x512xf32>
      %254 = vector.extract_strided_slice %238 {offsets = [3, 0], sizes = [3, 256], strides = [1, 1]} : vector<6x256xbf16> to vector<3x256xbf16>
      %c11_177 = arith.constant 11 : index
      %c0_178 = arith.constant 0 : index
      %c0_179 = arith.constant 0 : index
      %255 = vector.load %arg2[%c11_177, %c0_178, %c0_179] : memref<16x256x512xbf16, #tpu.memory_space<vmem>>, vector<1x256x512xbf16>
      %256 = vector.shape_cast %255 : vector<1x256x512xbf16> to vector<256x512xbf16>
      %cst_180 = arith.constant dense<0.000000e+00> : vector<3x512xf32>
      %257 = tpu.matmul %254, %256, %cst_180 {dimension_numbers = #tpu.dot_dimension_numbers<[1], [0], [0], [1], [0, 0, 1, 1], [], []>} : vector<3x256xbf16>, vector<256x512xbf16>, vector<3x512xf32> -> vector<3x512xf32>
      %258 = arith.addf %253, %257 : vector<3x512xf32>
      %c3_i32_181 = arith.constant 3 : i32
      %259 = arith.addi %arg8, %c3_i32_181 : i32
      %c0_182 = arith.constant 0 : index
      %260 = arith.index_cast %259 : i32 to index
      %c0_183 = arith.constant 0 : index
      %c0_184 = arith.constant 0 : index
      %261 = vector.load %arg1[%c0_182, %260, %c0_183, %c0_184] : memref<1x6x6x256xbf16, #tpu.memory_space<vmem>>, vector<1x1x6x256xbf16>
      %262 = vector.shape_cast %261 : vector<1x1x6x256xbf16> to vector<1x6x256xbf16>
      %263 = vector.shape_cast %262 : vector<1x6x256xbf16> to vector<6x256xbf16>
      %264 = vector.extract_strided_slice %263 {offsets = [0, 0], sizes = [3, 256], strides = [1, 1]} : vector<6x256xbf16> to vector<3x256xbf16>
      %c12_185 = arith.constant 12 : index
      %c0_186 = arith.constant 0 : index
      %c0_187 = arith.constant 0 : index
      %265 = vector.load %arg2[%c12_185, %c0_186, %c0_187] : memref<16x256x512xbf16, #tpu.memory_space<vmem>>, vector<1x256x512xbf16>
      %266 = vector.shape_cast %265 : vector<1x256x512xbf16> to vector<256x512xbf16>
      %cst_188 = arith.constant dense<0.000000e+00> : vector<3x512xf32>
      %267 = tpu.matmul %264, %266, %cst_188 {dimension_numbers = #tpu.dot_dimension_numbers<[1], [0], [0], [1], [0, 0, 1, 1], [], []>} : vector<3x256xbf16>, vector<256x512xbf16>, vector<3x512xf32> -> vector<3x512xf32>
      %268 = arith.addf %258, %267 : vector<3x512xf32>
      %269 = vector.extract_strided_slice %263 {offsets = [1, 0], sizes = [3, 256], strides = [1, 1]} : vector<6x256xbf16> to vector<3x256xbf16>
      %c13_189 = arith.constant 13 : index
      %c0_190 = arith.constant 0 : index
      %c0_191 = arith.constant 0 : index
      %270 = vector.load %arg2[%c13_189, %c0_190, %c0_191] : memref<16x256x512xbf16, #tpu.memory_space<vmem>>, vector<1x256x512xbf16>
      %271 = vector.shape_cast %270 : vector<1x256x512xbf16> to vector<256x512xbf16>
      %cst_192 = arith.constant dense<0.000000e+00> : vector<3x512xf32>
      %272 = tpu.matmul %269, %271, %cst_192 {dimension_numbers = #tpu.dot_dimension_numbers<[1], [0], [0], [1], [0, 0, 1, 1], [], []>} : vector<3x256xbf16>, vector<256x512xbf16>, vector<3x512xf32> -> vector<3x512xf32>
      %273 = arith.addf %268, %272 : vector<3x512xf32>
      %274 = vector.extract_strided_slice %263 {offsets = [2, 0], sizes = [3, 256], strides = [1, 1]} : vector<6x256xbf16> to vector<3x256xbf16>
      %c14_193 = arith.constant 14 : index
      %c0_194 = arith.constant 0 : index
      %c0_195 = arith.constant 0 : index
      %275 = vector.load %arg2[%c14_193, %c0_194, %c0_195] : memref<16x256x512xbf16, #tpu.memory_space<vmem>>, vector<1x256x512xbf16>
      %276 = vector.shape_cast %275 : vector<1x256x512xbf16> to vector<256x512xbf16>
      %cst_196 = arith.constant dense<0.000000e+00> : vector<3x512xf32>
      %277 = tpu.matmul %274, %276, %cst_196 {dimension_numbers = #tpu.dot_dimension_numbers<[1], [0], [0], [1], [0, 0, 1, 1], [], []>} : vector<3x256xbf16>, vector<256x512xbf16>, vector<3x512xf32> -> vector<3x512xf32>
      %278 = arith.addf %273, %277 : vector<3x512xf32>
      %279 = vector.extract_strided_slice %263 {offsets = [3, 0], sizes = [3, 256], strides = [1, 1]} : vector<6x256xbf16> to vector<3x256xbf16>
      %c15_197 = arith.constant 15 : index
      %c0_198 = arith.constant 0 : index
      %c0_199 = arith.constant 0 : index
      %280 = vector.load %arg2[%c15_197, %c0_198, %c0_199] : memref<16x256x512xbf16, #tpu.memory_space<vmem>>, vector<1x256x512xbf16>
      %281 = vector.shape_cast %280 : vector<1x256x512xbf16> to vector<256x512xbf16>
      %cst_200 = arith.constant dense<0.000000e+00> : vector<3x512xf32>
      %282 = tpu.matmul %279, %281, %cst_200 {dimension_numbers = #tpu.dot_dimension_numbers<[1], [0], [0], [1], [0, 0, 1, 1], [], []>} : vector<3x256xbf16>, vector<256x512xbf16>, vector<3x512xf32> -> vector<3x512xf32>
      %283 = arith.addf %278, %282 : vector<3x512xf32>
      %284 = vector.broadcast %0 : vector<1x512xf32> to vector<3x512xf32>
      %285 = arith.addf %283, %284 : vector<3x512xf32>
      %286 = vector.shape_cast %285 : vector<3x512xf32> to vector<1x3x512xf32>
      %287 = arith.index_cast %arg8 : i32 to index
      %c0_201 = arith.constant 0 : index
      %c0_202 = arith.constant 0 : index
      %288 = vector.load %arg7[%287, %c0_201, %c0_202] : memref<3x3x512xf32, #tpu.memory_space<vmem>>, vector<1x3x512xf32>
      tpu.vector_store %arg7[%287, %c0_201, %c0_202], %286 {strides = array<i32>} : memref<3x3x512xf32, #tpu.memory_space<vmem>>, vector<1x3x512xf32>,
    }
    %c3_i32_1 = arith.constant 3 : i32
    %c0_2 = arith.constant 0 : index
    %c0_3 = arith.constant 0 : index
    %c0_4 = arith.constant 0 : index
    %2 = vector.load %arg7[%c0_2, %c0_3, %c0_4] : memref<3x3x512xf32, #tpu.memory_space<vmem>>, vector<3x3x512xf32>
    %cst = arith.constant dense<0.000000e+00> : vector<3x512xf32>
    %3 = vector.multi_reduction <add>, %2, %cst [0] : vector<3x3x512xf32> to vector<3x512xf32>
    %4 = vector.shape_cast %3 : vector<3x512xf32> to vector<1x3x512xf32>
    %cst_5 = arith.constant dense<0.000000e+00> : vector<1x512xf32>
    %5 = vector.multi_reduction <add>, %4, %cst_5 [1] : vector<1x3x512xf32> to vector<1x512xf32>
    %6 = vector.shape_cast %5 : vector<1x512xf32> to vector<1x1x512xf32>
    %cst_6 = arith.constant 0.111111112 : f32
    %7 = vector.broadcast %cst_6 : f32 to vector<1x1x512xf32>
    %8 = arith.mulf %6, %7 : vector<1x1x512xf32>
    %9 = vector.broadcast %8 : vector<1x1x512xf32> to vector<3x3x512xf32>
    %10 = arith.subf %2, %9 : vector<3x3x512xf32>
    %11 = arith.mulf %10, %10 : vector<3x3x512xf32>
    %cst_7 = arith.constant dense<0.000000e+00> : vector<3x512xf32>
    %12 = vector.multi_reduction <add>, %11, %cst_7 [0] : vector<3x3x512xf32> to vector<3x512xf32>
    %13 = vector.shape_cast %12 : vector<3x512xf32> to vector<1x3x512xf32>
    %cst_8 = arith.constant dense<0.000000e+00> : vector<1x512xf32>
    %14 = vector.multi_reduction <add>, %13, %cst_8 [1] : vector<1x3x512xf32> to vector<1x512xf32>
    %15 = vector.shape_cast %14 : vector<1x512xf32> to vector<1x1x512xf32>
    %cst_9 = arith.constant 0.111111112 : f32
    %16 = vector.broadcast %cst_9 : f32 to vector<1x1x512xf32>
    %17 = arith.mulf %15, %16 : vector<1x1x512xf32>
    %cst_10 = arith.constant 9.99999974E-6 : f32
    %18 = vector.broadcast %cst_10 : f32 to vector<1x1x512xf32>
    %19 = arith.addf %17, %18 : vector<1x1x512xf32>
    %20 = math.rsqrt %19 : vector<1x1x512xf32>
    %21 = vector.broadcast %20 : vector<1x1x512xf32> to vector<3x3x512xf32>
    %22 = arith.mulf %10, %21 : vector<3x3x512xf32>
    %cst_11 = arith.constant 0.000000e+00 : f32
    %23 = vector.broadcast %cst_11 : f32 to vector<3x3x512xf32>
    %24 = arith.cmpf oge, %22, %23 : vector<3x3x512xf32>
    %cst_12 = arith.constant 2.000000e-01 : f32
    %25 = vector.broadcast %cst_12 : f32 to vector<3x3x512xf32>
    %26 = arith.mulf %25, %22 : vector<3x3x512xf32>
    %27 = arith.select %24, %22, %26 : vector<3x3x512xi1>, vector<3x3x512xf32>
    %c0_13 = arith.constant 0 : index
    %c0_14 = arith.constant 0 : index
    %c0_15 = arith.constant 0 : index
    %28 = vector.load %arg7[%c0_13, %c0_14, %c0_15] : memref<3x3x512xf32, #tpu.memory_space<vmem>>, vector<3x3x512xf32>
    tpu.vector_store %arg7[%c0_13, %c0_14, %c0_15], %27 {strides = array<i32>} : memref<3x3x512xf32, #tpu.memory_space<vmem>>, vector<3x3x512xf32>,
    %cst_16 = arith.constant 0.000000e+00 : f32
    %29 = vector.broadcast %cst_16 : f32 to vector<1x512xf32>
    %c0_17 = arith.constant 0 : index
    %c0_18 = arith.constant 0 : index
    %c0_19 = arith.constant 0 : index
    %30 = vector.load %arg7[%c0_17, %c0_18, %c0_19] : memref<3x3x512xf32, #tpu.memory_space<vmem>>, vector<1x1x512xf32>
    %cst_20 = arith.constant dense<0.000000e+00> : vector<1x512xf32>
    %31 = vector.multi_reduction <add>, %30, %cst_20 [0] : vector<1x1x512xf32> to vector<1x512xf32>
    %32 = vector.shape_cast %31 : vector<1x512xf32> to vector<1x1x512xf32>
    %cst_21 = arith.constant dense<0.000000e+00> : vector<1x512xf32>
    %33 = vector.multi_reduction <add>, %32, %cst_21 [1] : vector<1x1x512xf32> to vector<1x512xf32>
    %34 = vector.shape_cast %33 : vector<1x512xf32> to vector<1x1x512xf32>
    %35 = vector.shape_cast %34 : vector<1x1x512xf32> to vector<1x512xf32>
    %c0_22 = arith.constant 0 : index
    %c0_23 = arith.constant 0 : index
    %36 = vector.load %arg4[%c0_22, %c0_23] : memref<16x512xf32, #tpu.memory_space<vmem>>, vector<1x512xf32>
    %37 = arith.mulf %35, %36 : vector<1x512xf32>
    %38 = arith.addf %29, %37 : vector<1x512xf32>
    %c0_24 = arith.constant 0 : index
    %c0_25 = arith.constant 0 : index
    %c0_26 = arith.constant 0 : index
    %39 = vector.load %arg7[%c0_24, %c0_25, %c0_26] : memref<3x3x512xf32, #tpu.memory_space<vmem>>, vector<1x2x512xf32>
    %cst_27 = arith.constant dense<0.000000e+00> : vector<2x512xf32>
    %40 = vector.multi_reduction <add>, %39, %cst_27 [0] : vector<1x2x512xf32> to vector<2x512xf32>
    %41 = vector.shape_cast %40 : vector<2x512xf32> to vector<1x2x512xf32>
    %cst_28 = arith.constant dense<0.000000e+00> : vector<1x512xf32>
    %42 = vector.multi_reduction <add>, %41, %cst_28 [1] : vector<1x2x512xf32> to vector<1x512xf32>
    %43 = vector.shape_cast %42 : vector<1x512xf32> to vector<1x1x512xf32>
    %44 = vector.shape_cast %43 : vector<1x1x512xf32> to vector<1x512xf32>
    %c1 = arith.constant 1 : index
    %c0_29 = arith.constant 0 : index
    %45 = vector.load %arg4[%c1, %c0_29] : memref<16x512xf32, #tpu.memory_space<vmem>>, vector<1x512xf32>
    %46 = arith.mulf %44, %45 : vector<1x512xf32>
    %47 = arith.addf %38, %46 : vector<1x512xf32>
    %c0_30 = arith.constant 0 : index
    %c1_31 = arith.constant 1 : index
    %c0_32 = arith.constant 0 : index
    %48 = vector.load %arg7[%c0_30, %c1_31, %c0_32] : memref<3x3x512xf32, #tpu.memory_space<vmem>>, vector<1x2x512xf32>
    %cst_33 = arith.constant dense<0.000000e+00> : vector<2x512xf32>
    %49 = vector.multi_reduction <add>, %48, %cst_33 [0] : vector<1x2x512xf32> to vector<2x512xf32>
    %50 = vector.shape_cast %49 : vector<2x512xf32> to vector<1x2x512xf32>
    %cst_34 = arith.constant dense<0.000000e+00> : vector<1x512xf32>
    %51 = vector.multi_reduction <add>, %50, %cst_34 [1] : vector<1x2x512xf32> to vector<1x512xf32>
    %52 = vector.shape_cast %51 : vector<1x512xf32> to vector<1x1x512xf32>
    %53 = vector.shape_cast %52 : vector<1x1x512xf32> to vector<1x512xf32>
    %c2 = arith.constant 2 : index
    %c0_35 = arith.constant 0 : index
    %54 = vector.load %arg4[%c2, %c0_35] : memref<16x512xf32, #tpu.memory_space<vmem>>, vector<1x512xf32>
    %55 = arith.mulf %53, %54 : vector<1x512xf32>
    %56 = arith.addf %47, %55 : vector<1x512xf32>
    %c0_36 = arith.constant 0 : index
    %c2_37 = arith.constant 2 : index
    %c0_38 = arith.constant 0 : index
    %57 = vector.load %arg7[%c0_36, %c2_37, %c0_38] : memref<3x3x512xf32, #tpu.memory_space<vmem>>, vector<1x1x512xf32>
    %cst_39 = arith.constant dense<0.000000e+00> : vector<1x512xf32>
    %58 = vector.multi_reduction <add>, %57, %cst_39 [0] : vector<1x1x512xf32> to vector<1x512xf32>
    %59 = vector.shape_cast %58 : vector<1x512xf32> to vector<1x1x512xf32>
    %cst_40 = arith.constant dense<0.000000e+00> : vector<1x512xf32>
    %60 = vector.multi_reduction <add>, %59, %cst_40 [1] : vector<1x1x512xf32> to vector<1x512xf32>
    %61 = vector.shape_cast %60 : vector<1x512xf32> to vector<1x1x512xf32>
    %62 = vector.shape_cast %61 : vector<1x1x512xf32> to vector<1x512xf32>
    %c3 = arith.constant 3 : index
    %c0_41 = arith.constant 0 : index
    %63 = vector.load %arg4[%c3, %c0_41] : memref<16x512xf32, #tpu.memory_space<vmem>>, vector<1x512xf32>
    %64 = arith.mulf %62, %63 : vector<1x512xf32>
    %65 = arith.addf %56, %64 : vector<1x512xf32>
    %c0_42 = arith.constant 0 : index
    %c0_43 = arith.constant 0 : index
    %c0_44 = arith.constant 0 : index
    %66 = vector.load %arg7[%c0_42, %c0_43, %c0_44] : memref<3x3x512xf32, #tpu.memory_space<vmem>>, vector<2x1x512xf32>
    %cst_45 = arith.constant dense<0.000000e+00> : vector<1x512xf32>
    %67 = vector.multi_reduction <add>, %66, %cst_45 [0] : vector<2x1x512xf32> to vector<1x512xf32>
    %68 = vector.shape_cast %67 : vector<1x512xf32> to vector<1x1x512xf32>
    %cst_46 = arith.constant dense<0.000000e+00> : vector<1x512xf32>
    %69 = vector.multi_reduction <add>, %68, %cst_46 [1] : vector<1x1x512xf32> to vector<1x512xf32>
    %70 = vector.shape_cast %69 : vector<1x512xf32> to vector<1x1x512xf32>
    %71 = vector.shape_cast %70 : vector<1x1x512xf32> to vector<1x512xf32>
    %c4 = arith.constant 4 : index
    %c0_47 = arith.constant 0 : index
    %72 = vector.load %arg4[%c4, %c0_47] : memref<16x512xf32, #tpu.memory_space<vmem>>, vector<1x512xf32>
    %73 = arith.mulf %71, %72 : vector<1x512xf32>
    %74 = arith.addf %65, %73 : vector<1x512xf32>
    %c0_48 = arith.constant 0 : index
    %c0_49 = arith.constant 0 : index
    %c0_50 = arith.constant 0 : index
    %75 = vector.load %arg7[%c0_48, %c0_49, %c0_50] : memref<3x3x512xf32, #tpu.memory_space<vmem>>, vector<2x2x512xf32>
    %cst_51 = arith.constant dense<0.000000e+00> : vector<2x512xf32>
    %76 = vector.multi_reduction <add>, %75, %cst_51 [0] : vector<2x2x512xf32> to vector<2x512xf32>
    %77 = vector.shape_cast %76 : vector<2x512xf32> to vector<1x2x512xf32>
    %cst_52 = arith.constant dense<0.000000e+00> : vector<1x512xf32>
    %78 = vector.multi_reduction <add>, %77, %cst_52 [1] : vector<1x2x512xf32> to vector<1x512xf32>
    %79 = vector.shape_cast %78 : vector<1x512xf32> to vector<1x1x512xf32>
    %80 = vector.shape_cast %79 : vector<1x1x512xf32> to vector<1x512xf32>
    %c5 = arith.constant 5 : index
    %c0_53 = arith.constant 0 : index
    %81 = vector.load %arg4[%c5, %c0_53] : memref<16x512xf32, #tpu.memory_space<vmem>>, vector<1x512xf32>
    %82 = arith.mulf %80, %81 : vector<1x512xf32>
    %83 = arith.addf %74, %82 : vector<1x512xf32>
    %c0_54 = arith.constant 0 : index
    %c1_55 = arith.constant 1 : index
    %c0_56 = arith.constant 0 : index
    %84 = vector.load %arg7[%c0_54, %c1_55, %c0_56] : memref<3x3x512xf32, #tpu.memory_space<vmem>>, vector<2x2x512xf32>
    %cst_57 = arith.constant dense<0.000000e+00> : vector<2x512xf32>
    %85 = vector.multi_reduction <add>, %84, %cst_57 [0] : vector<2x2x512xf32> to vector<2x512xf32>
    %86 = vector.shape_cast %85 : vector<2x512xf32> to vector<1x2x512xf32>
    %cst_58 = arith.constant dense<0.000000e+00> : vector<1x512xf32>
    %87 = vector.multi_reduction <add>, %86, %cst_58 [1] : vector<1x2x512xf32> to vector<1x512xf32>
    %88 = vector.shape_cast %87 : vector<1x512xf32> to vector<1x1x512xf32>
    %89 = vector.shape_cast %88 : vector<1x1x512xf32> to vector<1x512xf32>
    %c6 = arith.constant 6 : index
    %c0_59 = arith.constant 0 : index
    %90 = vector.load %arg4[%c6, %c0_59] : memref<16x512xf32, #tpu.memory_space<vmem>>, vector<1x512xf32>
    %91 = arith.mulf %89, %90 : vector<1x512xf32>
    %92 = arith.addf %83, %91 : vector<1x512xf32>
    %c0_60 = arith.constant 0 : index
    %c2_61 = arith.constant 2 : index
    %c0_62 = arith.constant 0 : index
    %93 = vector.load %arg7[%c0_60, %c2_61, %c0_62] : memref<3x3x512xf32, #tpu.memory_space<vmem>>, vector<2x1x512xf32>
    %cst_63 = arith.constant dense<0.000000e+00> : vector<1x512xf32>
    %94 = vector.multi_reduction <add>, %93, %cst_63 [0] : vector<2x1x512xf32> to vector<1x512xf32>
    %95 = vector.shape_cast %94 : vector<1x512xf32> to vector<1x1x512xf32>
    %cst_64 = arith.constant dense<0.000000e+00> : vector<1x512xf32>
    %96 = vector.multi_reduction <add>, %95, %cst_64 [1] : vector<1x1x512xf32> to vector<1x512xf32>
    %97 = vector.shape_cast %96 : vector<1x512xf32> to vector<1x1x512xf32>
    %98 = vector.shape_cast %97 : vector<1x1x512xf32> to vector<1x512xf32>
    %c7 = arith.constant 7 : index
    %c0_65 = arith.constant 0 : index
    %99 = vector.load %arg4[%c7, %c0_65] : memref<16x512xf32, #tpu.memory_space<vmem>>, vector<1x512xf32>
    %100 = arith.mulf %98, %99 : vector<1x512xf32>
    %101 = arith.addf %92, %100 : vector<1x512xf32>
    %c1_66 = arith.constant 1 : index
    %c0_67 = arith.constant 0 : index
    %c0_68 = arith.constant 0 : index
    %102 = vector.load %arg7[%c1_66, %c0_67, %c0_68] : memref<3x3x512xf32, #tpu.memory_space<vmem>>, vector<2x1x512xf32>
    %cst_69 = arith.constant dense<0.000000e+00> : vector<1x512xf32>
    %103 = vector.multi_reduction <add>, %102, %cst_69 [0] : vector<2x1x512xf32> to vector<1x512xf32>
    %104 = vector.shape_cast %103 : vector<1x512xf32> to vector<1x1x512xf32>
    %cst_70 = arith.constant dense<0.000000e+00> : vector<1x512xf32>
    %105 = vector.multi_reduction <add>, %104, %cst_70 [1] : vector<1x1x512xf32> to vector<1x512xf32>
    %106 = vector.shape_cast %105 : vector<1x512xf32> to vector<1x1x512xf32>
    %107 = vector.shape_cast %106 : vector<1x1x512xf32> to vector<1x512xf32>
    %c8 = arith.constant 8 : index
    %c0_71 = arith.constant 0 : index
    %108 = vector.load %arg4[%c8, %c0_71] : memref<16x512xf32, #tpu.memory_space<vmem>>, vector<1x512xf32>
    %109 = arith.mulf %107, %108 : vector<1x512xf32>
    %110 = arith.addf %101, %109 : vector<1x512xf32>
    %c1_72 = arith.constant 1 : index
    %c0_73 = arith.constant 0 : index
    %c0_74 = arith.constant 0 : index
    %111 = vector.load %arg7[%c1_72, %c0_73, %c0_74] : memref<3x3x512xf32, #tpu.memory_space<vmem>>, vector<2x2x512xf32>
    %cst_75 = arith.constant dense<0.000000e+00> : vector<2x512xf32>
    %112 = vector.multi_reduction <add>, %111, %cst_75 [0] : vector<2x2x512xf32> to vector<2x512xf32>
    %113 = vector.shape_cast %112 : vector<2x512xf32> to vector<1x2x512xf32>
    %cst_76 = arith.constant dense<0.000000e+00> : vector<1x512xf32>
    %114 = vector.multi_reduction <add>, %113, %cst_76 [1] : vector<1x2x512xf32> to vector<1x512xf32>
    %115 = vector.shape_cast %114 : vector<1x512xf32> to vector<1x1x512xf32>
    %116 = vector.shape_cast %115 : vector<1x1x512xf32> to vector<1x512xf32>
    %c9 = arith.constant 9 : index
    %c0_77 = arith.constant 0 : index
    %117 = vector.load %arg4[%c9, %c0_77] : memref<16x512xf32, #tpu.memory_space<vmem>>, vector<1x512xf32>
    %118 = arith.mulf %116, %117 : vector<1x512xf32>
    %119 = arith.addf %110, %118 : vector<1x512xf32>
    %c1_78 = arith.constant 1 : index
    %c1_79 = arith.constant 1 : index
    %c0_80 = arith.constant 0 : index
    %120 = vector.load %arg7[%c1_78, %c1_79, %c0_80] : memref<3x3x512xf32, #tpu.memory_space<vmem>>, vector<2x2x512xf32>
    %cst_81 = arith.constant dense<0.000000e+00> : vector<2x512xf32>
    %121 = vector.multi_reduction <add>, %120, %cst_81 [0] : vector<2x2x512xf32> to vector<2x512xf32>
    %122 = vector.shape_cast %121 : vector<2x512xf32> to vector<1x2x512xf32>
    %cst_82 = arith.constant dense<0.000000e+00> : vector<1x512xf32>
    %123 = vector.multi_reduction <add>, %122, %cst_82 [1] : vector<1x2x512xf32> to vector<1x512xf32>
    %124 = vector.shape_cast %123 : vector<1x512xf32> to vector<1x1x512xf32>
    %125 = vector.shape_cast %124 : vector<1x1x512xf32> to vector<1x512xf32>
    %c10 = arith.constant 10 : index
    %c0_83 = arith.constant 0 : index
    %126 = vector.load %arg4[%c10, %c0_83] : memref<16x512xf32, #tpu.memory_space<vmem>>, vector<1x512xf32>
    %127 = arith.mulf %125, %126 : vector<1x512xf32>
    %128 = arith.addf %119, %127 : vector<1x512xf32>
    %c1_84 = arith.constant 1 : index
    %c2_85 = arith.constant 2 : index
    %c0_86 = arith.constant 0 : index
    %129 = vector.load %arg7[%c1_84, %c2_85, %c0_86] : memref<3x3x512xf32, #tpu.memory_space<vmem>>, vector<2x1x512xf32>
    %cst_87 = arith.constant dense<0.000000e+00> : vector<1x512xf32>
    %130 = vector.multi_reduction <add>, %129, %cst_87 [0] : vector<2x1x512xf32> to vector<1x512xf32>
    %131 = vector.shape_cast %130 : vector<1x512xf32> to vector<1x1x512xf32>
    %cst_88 = arith.constant dense<0.000000e+00> : vector<1x512xf32>
    %132 = vector.multi_reduction <add>, %131, %cst_88 [1] : vector<1x1x512xf32> to vector<1x512xf32>
    %133 = vector.shape_cast %132 : vector<1x512xf32> to vector<1x1x512xf32>
    %134 = vector.shape_cast %133 : vector<1x1x512xf32> to vector<1x512xf32>
    %c11 = arith.constant 11 : index
    %c0_89 = arith.constant 0 : index
    %135 = vector.load %arg4[%c11, %c0_89] : memref<16x512xf32, #tpu.memory_space<vmem>>, vector<1x512xf32>
    %136 = arith.mulf %134, %135 : vector<1x512xf32>
    %137 = arith.addf %128, %136 : vector<1x512xf32>
    %c2_90 = arith.constant 2 : index
    %c0_91 = arith.constant 0 : index
    %c0_92 = arith.constant 0 : index
    %138 = vector.load %arg7[%c2_90, %c0_91, %c0_92] : memref<3x3x512xf32, #tpu.memory_space<vmem>>, vector<1x1x512xf32>
    %cst_93 = arith.constant dense<0.000000e+00> : vector<1x512xf32>
    %139 = vector.multi_reduction <add>, %138, %cst_93 [0] : vector<1x1x512xf32> to vector<1x512xf32>
    %140 = vector.shape_cast %139 : vector<1x512xf32> to vector<1x1x512xf32>
    %cst_94 = arith.constant dense<0.000000e+00> : vector<1x512xf32>
    %141 = vector.multi_reduction <add>, %140, %cst_94 [1] : vector<1x1x512xf32> to vector<1x512xf32>
    %142 = vector.shape_cast %141 : vector<1x512xf32> to vector<1x1x512xf32>
    %143 = vector.shape_cast %142 : vector<1x1x512xf32> to vector<1x512xf32>
    %c12 = arith.constant 12 : index
    %c0_95 = arith.constant 0 : index
    %144 = vector.load %arg4[%c12, %c0_95] : memref<16x512xf32, #tpu.memory_space<vmem>>, vector<1x512xf32>
    %145 = arith.mulf %143, %144 : vector<1x512xf32>
    %146 = arith.addf %137, %145 : vector<1x512xf32>
    %c2_96 = arith.constant 2 : index
    %c0_97 = arith.constant 0 : index
    %c0_98 = arith.constant 0 : index
    %147 = vector.load %arg7[%c2_96, %c0_97, %c0_98] : memref<3x3x512xf32, #tpu.memory_space<vmem>>, vector<1x2x512xf32>
    %cst_99 = arith.constant dense<0.000000e+00> : vector<2x512xf32>
    %148 = vector.multi_reduction <add>, %147, %cst_99 [0] : vector<1x2x512xf32> to vector<2x512xf32>
    %149 = vector.shape_cast %148 : vector<2x512xf32> to vector<1x2x512xf32>
    %cst_100 = arith.constant dense<0.000000e+00> : vector<1x512xf32>
    %150 = vector.multi_reduction <add>, %149, %cst_100 [1] : vector<1x2x512xf32> to vector<1x512xf32>
    %151 = vector.shape_cast %150 : vector<1x512xf32> to vector<1x1x512xf32>
    %152 = vector.shape_cast %151 : vector<1x1x512xf32> to vector<1x512xf32>
    %c13 = arith.constant 13 : index
    %c0_101 = arith.constant 0 : index
    %153 = vector.load %arg4[%c13, %c0_101] : memref<16x512xf32, #tpu.memory_space<vmem>>, vector<1x512xf32>
    %154 = arith.mulf %152, %153 : vector<1x512xf32>
    %155 = arith.addf %146, %154 : vector<1x512xf32>
    %c2_102 = arith.constant 2 : index
    %c1_103 = arith.constant 1 : index
    %c0_104 = arith.constant 0 : index
    %156 = vector.load %arg7[%c2_102, %c1_103, %c0_104] : memref<3x3x512xf32, #tpu.memory_space<vmem>>, vector<1x2x512xf32>
    %cst_105 = arith.constant dense<0.000000e+00> : vector<2x512xf32>
    %157 = vector.multi_reduction <add>, %156, %cst_105 [0] : vector<1x2x512xf32> to vector<2x512xf32>
    %158 = vector.shape_cast %157 : vector<2x512xf32> to vector<1x2x512xf32>
    %cst_106 = arith.constant dense<0.000000e+00> : vector<1x512xf32>
    %159 = vector.multi_reduction <add>, %158, %cst_106 [1] : vector<1x2x512xf32> to vector<1x512xf32>
    %160 = vector.shape_cast %159 : vector<1x512xf32> to vector<1x1x512xf32>
    %161 = vector.shape_cast %160 : vector<1x1x512xf32> to vector<1x512xf32>
    %c14 = arith.constant 14 : index
    %c0_107 = arith.constant 0 : index
    %162 = vector.load %arg4[%c14, %c0_107] : memref<16x512xf32, #tpu.memory_space<vmem>>, vector<1x512xf32>
    %163 = arith.mulf %161, %162 : vector<1x512xf32>
    %164 = arith.addf %155, %163 : vector<1x512xf32>
    %c2_108 = arith.constant 2 : index
    %c2_109 = arith.constant 2 : index
    %c0_110 = arith.constant 0 : index
    %165 = vector.load %arg7[%c2_108, %c2_109, %c0_110] : memref<3x3x512xf32, #tpu.memory_space<vmem>>, vector<1x1x512xf32>
    %cst_111 = arith.constant dense<0.000000e+00> : vector<1x512xf32>
    %166 = vector.multi_reduction <add>, %165, %cst_111 [0] : vector<1x1x512xf32> to vector<1x512xf32>
    %167 = vector.shape_cast %166 : vector<1x512xf32> to vector<1x1x512xf32>
    %cst_112 = arith.constant dense<0.000000e+00> : vector<1x512xf32>
    %168 = vector.multi_reduction <add>, %167, %cst_112 [1] : vector<1x1x512xf32> to vector<1x512xf32>
    %169 = vector.shape_cast %168 : vector<1x512xf32> to vector<1x1x512xf32>
    %170 = vector.shape_cast %169 : vector<1x1x512xf32> to vector<1x512xf32>
    %c15 = arith.constant 15 : index
    %c0_113 = arith.constant 0 : index
    %171 = vector.load %arg4[%c15, %c0_113] : memref<16x512xf32, #tpu.memory_space<vmem>>, vector<1x512xf32>
    %172 = arith.mulf %170, %171 : vector<1x512xf32>
    %173 = arith.addf %164, %172 : vector<1x512xf32>
    %cst_114 = arith.constant dense<0.000000e+00> : vector<1xf32>
    %174 = vector.multi_reduction <add>, %173, %cst_114 [1] : vector<1x512xf32> to vector<1xf32>
    %175 = vector.shape_cast %174 : vector<1xf32> to vector<1x1xf32>
    %cst_115 = arith.constant 2.500000e-01 : f32
    %176 = vector.broadcast %cst_115 : f32 to vector<1x1xf32>
    %177 = arith.mulf %175, %176 : vector<1x1xf32>
    %c0_116 = arith.constant 0 : index
    %c0_117 = arith.constant 0 : index
    %178 = vector.load %arg5[%c0_116, %c0_117] : memref<1x1xf32, #tpu.memory_space<vmem>>, vector<1x1xf32>
    %179 = arith.addf %177, %178 : vector<1x1xf32>
    %c0_118 = arith.constant 0 : index
    %c0_119 = arith.constant 0 : index
    %c0_120 = arith.constant 0 : index
    %180 = vector.load %arg6[%c0_118, %c0_119, %c0_120] : memref<1x1x1xf32, #tpu.memory_space<vmem>>, vector<1x1x1xf32>
    %181 = vector.shape_cast %180 : vector<1x1x1xf32> to vector<1x1xf32>
    %182 = vector.shape_cast %179 : vector<1x1xf32> to vector<1x1x1xf32>
    tpu.vector_store %arg6[%c0_118, %c0_119, %c0_120], %182 {strides = array<i32>} : memref<1x1x1xf32, #tpu.memory_space<vmem>>, vector<1x1x1xf32>,
    return
  }
  func.func @transform_0(%arg0: i32) -> (i32, i32, i32, i32) {
    %c0_i32 = arith.constant 0 : i32
    %c0_i32_0 = arith.constant 0 : i32
    %c0_i32_1 = arith.constant 0 : i32
    %c0_i32_2 = arith.constant 0 : i32
    return %arg0, %c0_i32, %c0_i32_0, %c0_i32_1 : i32, i32, i32, i32
  }
  func.func @transform_1(%arg0: i32) -> (i32, i32, i32) {
    %c0_i32 = arith.constant 0 : i32
    %c0_i32_0 = arith.constant 0 : i32
    %c0_i32_1 = arith.constant 0 : i32
    %c0_i32_2 = arith.constant 0 : i32
    return %c0_i32, %c0_i32_0, %c0_i32_1 : i32, i32, i32
  }
  func.func @transform_2(%arg0: i32) -> (i32, i32) {
    %c0_i32 = arith.constant 0 : i32
    %c0_i32_0 = arith.constant 0 : i32
    %c0_i32_1 = arith.constant 0 : i32
    return %c0_i32, %c0_i32_0 : i32, i32
  }
  func.func @transform_3(%arg0: i32) -> (i32, i32) {
    %c0_i32 = arith.constant 0 : i32
    %c0_i32_0 = arith.constant 0 : i32
    %c0_i32_1 = arith.constant 0 : i32
    return %c0_i32, %c0_i32_0 : i32, i32
  }
  func.func @transform_4(%arg0: i32) -> (i32, i32) {
    %c0_i32 = arith.constant 0 : i32
    %c0_i32_0 = arith.constant 0 : i32
    %c0_i32_1 = arith.constant 0 : i32
    return %c0_i32, %c0_i32_0 : i32, i32
  }
  func.func @transform_5(%arg0: i32) -> (i32, i32, i32) {
    %c0_i32 = arith.constant 0 : i32
    %c0_i32_0 = arith.constant 0 : i32
    %c0_i32_1 = arith.constant 0 : i32
    return %arg0, %c0_i32, %c0_i32_0 : i32, i32, i32
  }
}

</mosaic_0001>

<bundles_post_ra>
// kernel: discriminator_forward.4
= control target key start
LH: loop header
LB: loop body
LE: loop exit
PB: predicated region body
PF: predicated region fallthrough
CT: control target
= control target key end

     0   :  { %8 = vsyncpa [#allocation4], 0  ;;  %s1091_s12 = smov 0   ;;  %s1244_s0 = inlined_call_operand.vmem [shape: bf16[2,17,17,12], index: 0, kind: input, shape index: {}]   ;;  %s1245_s1 = inlined_call_operand.vmem [shape: bf16[4,12,64], index: 1, kind: input, shape index: {}]   ;;  %s1246_s2 = inlined_call_operand.hbm [shape: f32[1,64], index: 2, kind: input, shape index: {}]   ;;  %s1247_s3 = inlined_call_operand.vmem [shape: bf16[2,16,16,64], index: 3, kind: output, shape index: {}]  }
   0x1 LB: > { %s850_s13 = sadd.s32 4294967295, %s1062_s12   ;;  %p852_p0 = scmp.ge.s32.totalorder %s1062_s12, 1  ;;  %s1062_s12 = sphi %s1091_s12, %s14_s12  }
   0x2   : > { %p113_p1 = scmp.lt.s32.totalorder %s1062_s12, 3  ;;  %p993_p3 = scmp.eq.s32.totalorder %s850_s13, 0 }
   0x3   : > { %s1068_s15 = smov [#allocation3]  }
   0x4   : > { %p1099_p2 = pnand %p852_p0, %p113_p1  ;;  %s129_s16 = sshll.u32 %s1068_s15, 4  ;;  %s130_s16 = int_to_ptr.vmem [resolvable:$true] %s129_s16 }
   0x5   : > { %s1033_s17 = scalar_lea.vmem %s130_s16, 16  ;;  %s1040_s18 = scalar_lea.vmem %s130_s16, 32 }
   0x6   : > { %p989_p4 = pneg %p1099_p2  ;;  %p1034_p7 = scmp.ne.s32.totalorder %s130_s16, %s1033_s17 }
   0x7   : > { %p1041_p10 = scmp.lt.s32.totalorder %s130_s16, %s130_s16  ;;  %p1042_p11 = scmp.lt.s32.totalorder %s1040_s18, %s1033_s17 }
   0x8   : > { %p990_p5 = pnand %p993_p3, %p989_p4 }
   0x9   : > { %p1043_p12 = por %p1042_p11, %p1041_p10 }
   0xa   : > { %p1024_p6 = pneg %p990_p5 }
   0xc   : > { %p1036_p8 = pnand %p1034_p7, %p1024_p6 }
   0xe   : > { %p1037_p9 = pneg %p1036_p8 }
  0x10   : > { %p1044_p13 = pnand %p1043_p12, %p1037_p9 }
  0x12   : > { %1047 = shalt.err (!%p1044_p13)
}
  0x13   : > { %992 = dma.hbm_to_vmem [thread:$0]  (!%p990_p5), %s1246_s2, 16, %s130_s16, [#allocation4]  }
  0x14   : > { %150 = sbr.rel (%p1099_p2) target bundleno = 299 (0x12b), region = 32 }
  0x19   : > { %1057 = dma.done.wait (%p993_p3), [#allocation4], 16  }
  0x1a   : > { %1059 = vsyncadd (%p993_p3), [#allocation4], 4294967280  ;;  %p174_p0 = scmp.lt.s32.totalorder %s850_s13, 1  ;;  %v1123_v0 = vld [vmem:[#allocation3] ss:$0 sm:$0xff]  ;;  %s1125_s29 = smov 0  }
  0x1c   : > { %s1250_s13 = smov (!%p174_p0, %s850_s13), 1 }
  0x1d   : > { %s984_s21 = smul.u32 204, %s1250_s13  ;;  %s918_s22 = sshll.u32 %s1250_s13, 7 }
  0x1e   : > { %s1116_s25 = scalar_lea.vmem %s1247_s3, %s918_s22 }
  0x1f   : > { %s1121_s28 = scalar_lea.vmem %s1244_s0, %s984_s21 }
  0x20 LB: >> { %vm233_vm0 = vcmask 1045504   ;;  %v1069_v1 = vmov 0.0   ;;  %v1014_v2 = vld [vmem:[%s1245_s1] sm:$0x3f]   ;;  %vm1070_vm1 = vmmov 0   ;;  %s919_s7 = smul.u32 12, %s1066_s29  ;;  %s1066_s29 = sphi %s1125_s29, %s191_s29  }
  0x21   : >> { %966 = vmatprep.subr.bf16.mxu1 %v1069_v1  ;;  %960 = vmatprep.subr.bf16.mxu0 %v1069_v1  ;;  %v1015_v3 = vld [vmem:[%s1245_s1 + $0x8] sm:$0x3f]   ;;  %v286_v4 = vsel %vm233_vm0, %v1014_v2, 0  ;;  %vm229_vm2 = vcmask 97280   ;;  %vm211_vm3 = vsmask.f32 7424 }
  0x22   : >> { %968 = vmatprep.mubr.msk.bf16.mxu1 %vm1070_vm1, %v1069_v1  ;;  %962 = vmatprep.mubr.msk.bf16.mxu0 %vm1070_vm1, %v1069_v1  ;;  %v235_v5 = vsel %vm233_vm0, %v1015_v3, 0  ;;  %s194_s8 = scalar_lea.vmem %s1121_s28, %s919_s7  ;;  %v1018_v8 = vld [vmem:[%s1245_s1 + $0x10] sm:$0x3f]   ;;  %v1019_v12 = vld [vmem:[%s1245_s1 + $0x18] sm:$0x3f]   ;;  %s883_s14 = sshll.u32 %s1066_s29, 4 }
  0x23   : >> { %967 = vmatpush3.bf16.msra.mxu1 %v286_v4  ;;  %961 = vmatpush3.bf16.msra.mxu0 %v235_v5  ;;  %v1016_v6 = vld [vmem:[%s194_s8] sm:$0xff]   ;;  %v1017_v7 = vld [vmem:[%s194_s8 + $0x8] ss:$0 sps:$4 sm:$0x11]   ;;  %v1020_v13 = vld [vmem:[%s194_s8 + $0xc] sm:$0xff]   ;;  %v424_v16 = vsel %vm233_vm0, %v1019_v12, 0 }
  0x24   : >> { %978 = vmatprep.subr.bf16.mxu1 %v1069_v1  ;;  %972 = vmatprep.subr.bf16.mxu0 %v1069_v1  ;;  %v213_v9 = vshrl.u32 %v1016_v6, 16  ;;  %v215_v10 = vshll.u32 %v1016_v6, 16  ;;  %v220_v11 = vshll.u32 %v1017_v7, 16  ;;  %v1021_v17 = vld [vmem:[%s194_s8 + $0x14] ss:$0 sps:$4 sm:$0x11]  }
  0x25   : >> { %v404_v19 = vshrl.u32 %v1020_v13, 16  ;;  %v406_v20 = vshll.u32 %v1020_v13, 16  ;;  %v353_v21 = vsel %vm233_vm0, %v1018_v8, 0  ;;  %v411_v22 = vshll.u32 %v1021_v17, 16  ;;  %s478_s15 = scalar_lea.vmem [#allocation2], %s883_s14  ;;  %s191_s29 = sadd.s32 1, %s1066_s29  }
  0x26   : >> { %969 = vmatmul.mubr.msk.bf16.vlgmr.msra.gmra.mxu1 %vm229_vm2, %v1016_v6  ;;  %v217_v14 = vrot.slane %v215_v10, 1  ;;  %v222_v15 = vrot.slane %v220_v11, 1  ;;  %vm479_vm4 = vcmask 523264   ;;  %p188_p1 = scmp.ge.s32.totalorder %s191_s29, 16  }
  0x27   : >> { %980 = vmatprep.mubr.msk.bf16.mxu1 %vm1070_vm1, %v1069_v1  ;;  %979 = vmatpush3.bf16.msra.mxu1 %v424_v16  ;;  %v408_v24 = vrot.slane %v406_v20, 1  ;;  %v413_v25 = vrot.slane %v411_v22, 1  ;;  %vm738_vm5 = vcmask (%p188_p1), 519168  }
  0x28   : >> { %v218_v18 = vor.u32 %v217_v14, %v213_v9 }
  0x29   : >> { %v409_v26 = vor.u32 %v408_v24, %v404_v19 }
  0x2a   : >> { %v223_v23 = vsel %vm211_vm3, %v218_v18, %v222_v15 }
  0x2b   : >> { %963 = vmatmul.mubr.msk.bf16.vlgmr.msra.gmra.mxu0 %vm229_vm2, %v223_v23  ;;  %v414_v27 = vsel %vm211_vm3, %v409_v26, %v413_v25 }
  0x2c   : >> { %973 = vmatpush3.bf16.msra.mxu0 %v353_v21  ;;  %974 = vmatprep.mubr.msk.bf16.mxu0 %vm1070_vm1, %v1069_v1 }
  0x2e   : >> { %981 = vmatmul.mubr.msk.bf16.vlgmr.msra.gmra.mxu1 %vm229_vm2, %v414_v27 }
  0x33   : >> { %975 = vmatmul.mubr.msk.bf16.vlgmr.msra.gmra.mxu0 %vm229_vm2, %v1020_v13 }
  0xe6   : >> { %v322_v28 = vpop.f32.mrf.mxu1 }
  0xe8   : >> { %v970_v29 = vpop.f32.mrf.mxu1 }
  0xea   : >> { %v325_v30 = vpop.f32.mrf.mxu1 }
  0xeb   : >> { %v271_v32 = vpop.f32.mrf.mxu0 }
  0xec   : >> { %v971_v31 = vpop.f32.mrf.mxu1  ;;  %v323_v38 = vadd.f32 %v322_v28, %v271_v32 }
  0xed   : >> { %v964_v33 = vpop.f32.mrf.mxu0 }
  0xee   : >> { %v460_v35 = vpop.f32.mrf.mxu1 }
  0xef   : >> { %v274_v34 = vpop.f32.mrf.mxu0 }
  0xf0   : >> { %v982_v37 = vpop.f32.mrf.mxu1  ;;  %v326_v44 = vadd.f32 %v325_v30, %v274_v34 }
  0xf1   : >> { %v965_v36 = vpop.f32.mrf.mxu0 }
  0xf2   : >> { %v463_v40 = vpop.f32.mrf.mxu1 }
  0xf3   : >> { %v389_v39 = vpop.f32.mrf.mxu0 }
  0xf4   : >> { %v396_v41 = vadd.f32 %v389_v39, %v323_v38  ;;  %v983_v43 = vpop.f32.mrf.mxu1 }
  0xf5   : >> { %v976_v42 = vpop.f32.mrf.mxu0 }
  0xf6   : >> { %v467_v45 = vadd.f32 %v460_v35, %v396_v41 }
  0xf7   : >> { %v392_v46 = vpop.f32.mrf.mxu0 }
  0xf8   : >> { %v475_v47 = vadd.f32 %v1123_v0, %v467_v45  ;;  %v397_v48 = vadd.f32 %v392_v46, %v326_v44 }
  0xf9   : >> { %v977_v49 = vpop.f32.mrf.mxu0 }
  0xfa   : >> { %480 = vst.msk [vmem:[%s478_s15] sm:$0xff] %vm479_vm4, %v475_v47  ;;  %v468_v50 = vadd.f32 %v463_v40, %v397_v48  ;;  %190 = sbr.rel (!%p188_p1) target bundleno = 32 (0x20), region = 80 }
  0xfc   : >> { %v476_v51 = vadd.f32 %v1123_v0, %v468_v50 }
  0xfe   : >> { %481 = vst.msk [vmem:[%s478_s15 + $0x8] sm:$0xff] %vm479_vm4, %v476_v51 }
 0x105   : > { %v482_v52 = vld [vmem:[#allocation2] sm:$0xff]  ;;  %v483_v53 = vld [vmem:[#allocation2 + $0x8] sm:$0xff]  ;;  %v484_v54 = vld [vmem:[#allocation2 + $0x10] sm:$0xff] }
 0x106   : > { %vm514_vm6 = vcmp.ge.f32.partialorder %v482_v52, 0.0  ;;  %v546_v55 = vmul.f32 0.2, %v482_v52  ;;  %vm515_vm7 = vcmp.ge.f32.partialorder %v483_v53, 0.0  ;;  %v547_v56 = vmul.f32 0.2, %v483_v53 }
 0x107   : > { %vm516_vm8 = vcmp.ge.f32.partialorder %v484_v54, 0.0  ;;  %v548_v57 = vmul.f32 0.2, %v484_v54  ;;  %v485_v58 = vld [vmem:[#allocation2 + $0x18] sm:$0xff]  ;;  %v486_v59 = vld [vmem:[#allocation2 + $0x20] sm:$0xff]  ;;  %v487_v60 = vld [vmem:[#allocation2 + $0x28] sm:$0xff] }
 0x108   : > { %v578_v61 = vsel %vm514_vm6, %v482_v52, %v546_v55  ;;  %v579_v62 = vsel %vm515_vm7, %v483_v53, %v547_v56  ;;  %vm517_vm9 = vcmp.ge.f32.partialorder %v485_v58, 0.0  ;;  %v549_v63 = vmul.f32 0.2, %v485_v58  ;;  %v488_v1 = vld [vmem:[#allocation2 + $0x30] sm:$0xff]  ;;  %v489_v4 = vld [vmem:[#allocation2 + $0x38] sm:$0xff]  ;;  %v490_v5 = vld [vmem:[#allocation2 + $0x40] sm:$0xff] }
 0x109   : > { %v920_v0 = vpack.c.bf16 %v578_v61, %v578_v61  ;;  %v921_v2 = vpack.c.bf16 %v579_v62, %v579_v62  ;;  %v580_v3 = vsel %vm516_vm8, %v484_v54, %v548_v57  ;;  %vm518_vm10 = vcmp.ge.f32.partialorder %v486_v59, 0.0  ;;  %v491_v12 = vld [vmem:[#allocation2 + $0x48] sm:$0xff]  ;;  %v492_v15 = vld [vmem:[#allocation2 + $0x50] sm:$0xff]  ;;  %v493_v20 = vld [vmem:[#allocation2 + $0x58] sm:$0xff] }
 0x10a   : > { %v922_v6 = vpack.c.bf16 %v580_v3, %v580_v3  ;;  %v581_v7 = vsel %vm517_vm9, %v485_v58, %v549_v63  ;;  %v550_v8 = vmul.f32 0.2, %v486_v59  ;;  %vm519_vm11 = vcmp.ge.f32.partialorder %v487_v60, 0.0  ;;  %v494_v24 = vld [vmem:[#allocation2 + $0x60] sm:$0xff]  ;;  %v495_v25 = vld [vmem:[#allocation2 + $0x68] sm:$0xff]  ;;  %v496_v32 = vld [vmem:[#allocation2 + $0x70] sm:$0xff] }
 0x10b   : > { %739 = vst.msk [vmem:[%s1116_s25] sm:$0xf] %vm738_vm5, %v920_v0  ;;  %740 = vst.msk [vmem:[%s1116_s25 + $0x4] sm:$0xf] %vm738_vm5, %v921_v2  ;;  %v923_v9 = vpack.c.bf16 %v581_v7, %v581_v7  ;;  %v551_v10 = vmul.f32 0.2, %v487_v60 }
 0x10c   : > { %vm520_vm12 = vcmp.ge.f32.partialorder %v488_v1, 0.0  ;;  %v552_v11 = vmul.f32 0.2, %v488_v1  ;;  %741 = vst.msk [vmem:[%s1116_s25 + $0x8] sm:$0xf] %vm738_vm5, %v922_v6  ;;  %v582_v13 = vsel %vm518_vm10, %v486_v59, %v550_v8  ;;  %vm521_vm13 = vcmp.ge.f32.partialorder %v489_v4, 0.0 }
 0x10d   : > { %v553_v14 = vmul.f32 0.2, %v489_v4  ;;  %vm522_vm14 = vcmp.ge.f32.partialorder %v490_v5, 0.0  ;;  %742 = vst.msk [vmem:[%s1116_s25 + $0xc] sm:$0xf] %vm738_vm5, %v923_v9  ;;  %v924_v16 = vpack.c.bf16 %v582_v13, %v582_v13  ;;  %v583_v17 = vsel %vm519_vm11, %v487_v60, %v551_v10  ;;  %v497_v35 = vld [vmem:[#allocation2 + $0x78] sm:$0xff] }
 0x10e   : > { %v584_v18 = vsel %vm520_vm12, %v488_v1, %v552_v11  ;;  %v554_v19 = vmul.f32 0.2, %v490_v5  ;;  %v925_v21 = vpack.c.bf16 %v583_v17, %v583_v17  ;;  %vm523_vm15 = vcmp.ge.f32.partialorder %v491_v12, 0.0  ;;  %v498_v40 = vld [vmem:[#allocation2 + $0x80] sm:$0xff]  ;;  %v499_v44 = vld [vmem:[#allocation2 + $0x88] sm:$0xff]  ;;  %v500_v45 = vld [vmem:[#allocation2 + $0x90] sm:$0xff] }
 0x10f   : > { %v926_v22 = vpack.c.bf16 %v584_v18, %v584_v18  ;;  %v585_v23 = vsel %vm521_vm13, %v489_v4, %v553_v14  ;;  %743 = vst.msk [vmem:[%s1116_s25 + $0x10] sm:$0xf] %vm738_vm5, %v924_v16  ;;  %v555_v28 = vmul.f32 0.2, %v491_v12  ;;  %vm524_vm0 = vcmp.ge.f32.partialorder %v492_v15, 0.0  ;;  %v501_v52 = vld [vmem:[#allocation2 + $0x98] sm:$0xff] }
 0x110   : > { %v927_v26 = vpack.c.bf16 %v585_v23, %v585_v23  ;;  %v586_v27 = vsel %vm522_vm14, %v490_v5, %v554_v19  ;;  %744 = vst.msk [vmem:[%s1116_s25 + $0x14] sm:$0xf] %vm738_vm5, %v925_v21  ;;  %v556_v30 = vmul.f32 0.2, %v492_v15  ;;  %vm525_vm1 = vcmp.ge.f32.partialorder %v493_v20, 0.0  ;;  %v502_v55 = vld [vmem:[#allocation2 + $0xa0] sm:$0xff] }
 0x111   : > { %745 = vst.msk [vmem:[%s1116_s25 + $0x18] sm:$0xf] %vm738_vm5, %v926_v22  ;;  %v928_v29 = vpack.c.bf16 %v586_v27, %v586_v27  ;;  %v557_v31 = vmul.f32 0.2, %v493_v20  ;;  %v587_v33 = vsel %vm523_vm15, %v491_v12, %v555_v28  ;;  %vm526_vm2 = vcmp.ge.f32.partialorder %v494_v24, 0.0  ;;  %v503_v60 = vld [vmem:[#allocation2 + $0xa8] sm:$0xff] }
 0x112   : > { %746 = vst.msk [vmem:[%s1116_s25 + $0x1c] sm:$0xf] %vm738_vm5, %v927_v26  ;;  %v558_v34 = vmul.f32 0.2, %v494_v24  ;;  %vm527_vm3 = vcmp.ge.f32.partialorder %v495_v25, 0.0  ;;  %v929_v36 = vpack.c.bf16 %v587_v33, %v587_v33  ;;  %v588_v37 = vsel %vm524_vm0, %v492_v15, %v556_v30  ;;  %v504_v1 = vld [vmem:[#allocation2 + $0xb0] sm:$0xff] }
 0x113   : > { %747 = vst.msk [vmem:[%s1116_s25 + $0x20] sm:$0xf] %vm738_vm5, %v928_v29  ;;  %v589_v38 = vsel %vm525_vm1, %v493_v20, %v557_v31  ;;  %v559_v39 = vmul.f32 0.2, %v495_v25  ;;  %v930_v41 = vpack.c.bf16 %v588_v37, %v588_v37  ;;  %vm528_vm4 = vcmp.ge.f32.partialorder %v496_v32, 0.0  ;;  %v505_v0 = vld [vmem:[#allocation2 + $0xb8] sm:$0xff] }
 0x114   : > { %v931_v42 = vpack.c.bf16 %v589_v38, %v589_v38  ;;  %v590_v43 = vsel %vm526_vm2, %v494_v24, %v558_v34  ;;  %748 = vst.msk [vmem:[%s1116_s25 + $0x24] sm:$0xf] %vm738_vm5, %v929_v36  ;;  %v560_v48 = vmul.f32 0.2, %v496_v32  ;;  %vm529_vm6 = vcmp.ge.f32.partialorder %v497_v35, 0.0  ;;  %v506_v8 = vld [vmem:[#allocation2 + $0xc0] sm:$0xff] }
 0x115   : > { %v932_v46 = vpack.c.bf16 %v590_v43, %v590_v43  ;;  %v591_v47 = vsel %vm527_vm3, %v495_v25, %v559_v39  ;;  %749 = vst.msk [vmem:[%s1116_s25 + $0x28] sm:$0xf] %vm738_vm5, %v930_v41  ;;  %v561_v50 = vmul.f32 0.2, %v497_v35  ;;  %vm530_vm7 = vcmp.ge.f32.partialorder %v498_v40, 0.0  ;;  %v507_v11 = vld [vmem:[#allocation2 + $0xc8] sm:$0xff] }
 0x116   : > { %750 = vst.msk [vmem:[%s1116_s25 + $0x2c] sm:$0xf] %vm738_vm5, %v931_v42  ;;  %v933_v49 = vpack.c.bf16 %v591_v47, %v591_v47  ;;  %v562_v51 = vmul.f32 0.2, %v498_v40  ;;  %v592_v53 = vsel %vm528_vm4, %v496_v32, %v560_v48  ;;  %vm531_vm8 = vcmp.ge.f32.partialorder %v499_v44, 0.0  ;;  %v508_v16 = vld [vmem:[#allocation2 + $0xd0] sm:$0xff] }
 0x117   : > { %751 = vst.msk [vmem:[%s1116_s25 + $0x30] sm:$0xf] %vm738_vm5, %v932_v46  ;;  %v563_v54 = vmul.f32 0.2, %v499_v44  ;;  %vm532_vm9 = vcmp.ge.f32.partialorder %v500_v45, 0.0  ;;  %v934_v56 = vpack.c.bf16 %v592_v53, %v592_v53  ;;  %v593_v57 = vsel %vm529_vm6, %v497_v35, %v561_v50  ;;  %v509_v20 = vld [vmem:[#allocation2 + $0xd8] sm:$0xff] }
 0x118   : > { %752 = vst.msk [vmem:[%s1116_s25 + $0x34] sm:$0xf] %vm738_vm5, %v933_v49  ;;  %v594_v58 = vsel %vm530_vm7, %v498_v40, %v562_v51  ;;  %v564_v59 = vmul.f32 0.2, %v500_v45  ;;  %v935_v61 = vpack.c.bf16 %v593_v57, %v593_v57  ;;  %vm533_vm10 = vcmp.ge.f32.partialorder %v501_v52, 0.0  ;;  %v510_v21 = vld [vmem:[#allocation2 + $0xe0] sm:$0xff] }
 0x119   : > { %v936_v62 = vpack.c.bf16 %v594_v58, %v594_v58  ;;  %v595_v63 = vsel %vm531_vm8, %v499_v44, %v563_v54  ;;  %753 = vst.msk [vmem:[%s1116_s25 + $0x38] sm:$0xf] %vm738_vm5, %v934_v56  ;;  %v565_v4 = vmul.f32 0.2, %v501_v52  ;;  %vm534_vm11 = vcmp.ge.f32.partialorder %v502_v55, 0.0  ;;  %v511_v28 = vld [vmem:[#allocation2 + $0xe8] sm:$0xff] }
 0x11a   : > { %v937_v2 = vpack.c.bf16 %v595_v63, %v595_v63  ;;  %v596_v3 = vsel %vm532_vm9, %v500_v45, %v564_v59  ;;  %754 = vst.msk [vmem:[%s1116_s25 + $0x3c] sm:$0xf] %vm738_vm5, %v935_v61  ;;  %v566_v6 = vmul.f32 0.2, %v502_v55  ;;  %vm535_vm12 = vcmp.ge.f32.partialorder %v503_v60, 0.0  ;;  %v512_v31 = vld [vmem:[#allocation2 + $0xf0] sm:$0xff] }
 0x11b   : > { %755 = vst.msk [vmem:[%s1116_s25 + $0x40] sm:$0xf] %vm738_vm5, %v936_v62  ;;  %v938_v5 = vpack.c.bf16 %v596_v3, %v596_v3  ;;  %v567_v7 = vmul.f32 0.2, %v503_v60  ;;  %v597_v9 = vsel %vm533_vm10, %v501_v52, %v565_v4  ;;  %vm536_vm13 = vcmp.ge.f32.partialorder %v504_v1, 0.0  ;;  %v513_v36 = vld [vmem:[#allocation2 + $0xf8] sm:$0xff] }
 0x11c   : > { %756 = vst.msk [vmem:[%s1116_s25 + $0x44] sm:$0xf] %vm738_vm5, %v937_v2  ;;  %v568_v10 = vmul.f32 0.2, %v504_v1  ;;  %vm537_vm14 = vcmp.ge.f32.partialorder %v505_v0, 0.0  ;;  %v939_v12 = vpack.c.bf16 %v597_v9, %v597_v9  ;;  %v598_v13 = vsel %vm534_vm11, %v502_v55, %v566_v6 }
 0x11d   : > { %757 = vst.msk [vmem:[%s1116_s25 + $0x48] sm:$0xf] %vm738_vm5, %v938_v5  ;;  %v599_v14 = vsel %vm535_vm12, %v503_v60, %v567_v7  ;;  %v569_v15 = vmul.f32 0.2, %v505_v0  ;;  %v940_v17 = vpack.c.bf16 %v598_v13, %v598_v13  ;;  %vm538_vm15 = vcmp.ge.f32.partialorder %v506_v8, 0.0 }
 0x11e   : > { %v941_v18 = vpack.c.bf16 %v599_v14, %v599_v14  ;;  %v600_v19 = vsel %vm536_vm13, %v504_v1, %v568_v10  ;;  %758 = vst.msk [vmem:[%s1116_s25 + $0x4c] sm:$0xf] %vm738_vm5, %v939_v12  ;;  %v570_v24 = vmul.f32 0.2, %v506_v8  ;;  %vm539_vm0 = vcmp.ge.f32.partialorder %v507_v11, 0.0 }
 0x11f   : > { %v942_v22 = vpack.c.bf16 %v600_v19, %v600_v19  ;;  %v601_v23 = vsel %vm537_vm14, %v505_v0, %v569_v15  ;;  %759 = vst.msk [vmem:[%s1116_s25 + $0x50] sm:$0xf] %vm738_vm5, %v940_v17  ;;  %v571_v26 = vmul.f32 0.2, %v507_v11  ;;  %vm540_vm1 = vcmp.ge.f32.partialorder %v508_v16, 0.0 }
 0x120   : > { %760 = vst.msk [vmem:[%s1116_s25 + $0x54] sm:$0xf] %vm738_vm5, %v941_v18  ;;  %v943_v25 = vpack.c.bf16 %v601_v23, %v601_v23  ;;  %v572_v27 = vmul.f32 0.2, %v508_v16  ;;  %v602_v29 = vsel %vm538_vm15, %v506_v8, %v570_v24  ;;  %vm541_vm2 = vcmp.ge.f32.partialorder %v509_v20, 0.0 }
 0x121   : > { %761 = vst.msk [vmem:[%s1116_s25 + $0x58] sm:$0xf] %vm738_vm5, %v942_v22  ;;  %v573_v30 = vmul.f32 0.2, %v509_v20  ;;  %vm542_vm3 = vcmp.ge.f32.partialorder %v510_v21, 0.0  ;;  %v944_v32 = vpack.c.bf16 %v602_v29, %v602_v29  ;;  %v603_v33 = vsel %vm539_vm0, %v507_v11, %v571_v26 }
 0x122   : > { %762 = vst.msk [vmem:[%s1116_s25 + $0x5c] sm:$0xf] %vm738_vm5, %v943_v25  ;;  %v604_v34 = vsel %vm540_vm1, %v508_v16, %v572_v27  ;;  %v574_v35 = vmul.f32 0.2, %v510_v21  ;;  %v945_v37 = vpack.c.bf16 %v603_v33, %v603_v33  ;;  %vm543_vm4 = vcmp.ge.f32.partialorder %v511_v28, 0.0 }
 0x123   : > { %v946_v38 = vpack.c.bf16 %v604_v34, %v604_v34  ;;  %v605_v39 = vsel %vm541_vm2, %v509_v20, %v573_v30  ;;  %763 = vst.msk [vmem:[%s1116_s25 + $0x60] sm:$0xf] %vm738_vm5, %v944_v32  ;;  %v575_v42 = vmul.f32 0.2, %v511_v28  ;;  %vm544_vm6 = vcmp.ge.f32.partialorder %v512_v31, 0.0 }
 0x124   : > { %v947_v40 = vpack.c.bf16 %v605_v39, %v605_v39  ;;  %v606_v41 = vsel %vm542_vm3, %v510_v21, %v574_v35  ;;  %764 = vst.msk [vmem:[%s1116_s25 + $0x64] sm:$0xf] %vm738_vm5, %v945_v37  ;;  %v576_v44 = vmul.f32 0.2, %v512_v31  ;;  %vm545_vm7 = vcmp.ge.f32.partialorder %v513_v36, 0.0 }
 0x125   : > { %765 = vst.msk [vmem:[%s1116_s25 + $0x68] sm:$0xf] %vm738_vm5, %v946_v38  ;;  %v948_v43 = vpack.c.bf16 %v606_v41, %v606_v41  ;;  %v577_v45 = vmul.f32 0.2, %v513_v36  ;;  %v607_v46 = vsel %vm543_vm4, %v511_v28, %v575_v42 }
 0x126   : > { %766 = vst.msk [vmem:[%s1116_s25 + $0x6c] sm:$0xf] %vm738_vm5, %v947_v40  ;;  %v949_v47 = vpack.c.bf16 %v607_v46, %v607_v46  ;;  %v608_v48 = vsel %vm544_vm6, %v512_v31, %v576_v44 }
 0x127   : > { %767 = vst.msk [vmem:[%s1116_s25 + $0x70] sm:$0xf] %vm738_vm5, %v948_v43  ;;  %v609_v49 = vsel %vm545_vm7, %v513_v36, %v577_v45  ;;  %v950_v50 = vpack.c.bf16 %v608_v48, %v608_v48 }
 0x128   : > { %v951_v51 = vpack.c.bf16 %v609_v49, %v609_v49  ;;  %768 = vst.msk [vmem:[%s1116_s25 + $0x74] sm:$0xf] %vm738_vm5, %v949_v47 }
 0x129   : > { %769 = vst.msk [vmem:[%s1116_s25 + $0x78] sm:$0xf] %vm738_vm5, %v950_v50 }
 0x12a   : > { %770 = vst.msk [vmem:[%s1116_s25 + $0x7c] sm:$0xf] %vm738_vm5, %v951_v51 }
 0x12b PF: > { %s14_s12 = sadd.s32 1, %s1062_s12  }
 0x12c   : > { %p11_p2 = scmp.ge.s32.totalorder %s14_s12, 4  }
 0x12e   :  { %13 = sbr.rel (!%p11_p2) target bundleno = 1 (0x1), region = 91 }
 0x133   :  { %792 = vsyncpa [#allocation4], 1 }
 0x134   :  { %794 = vsyncpa [#allocation4 + $0x1], 1 }

// kernel: discriminator_forward.5
= control target key start
LH: loop header
LB: loop body
LE: loop exit
PB: predicated region body
PF: predicated region fallthrough
CT: control target
= control target key end

     0   :  { %s1527_s12 = smov 0   ;;  %s1767_s0 = inlined_call_operand.vmem [shape: bf16[2,9,9,256], index: 0, kind: input, shape index: {}]   ;;  %s1768_s1 = inlined_call_operand.vmem [shape: bf16[4,256,128], index: 1, kind: input, shape index: {}]   ;;  %s1769_s2 = inlined_call_operand.vmem [shape: f32[1,128], index: 2, kind: input, shape index: {}]   ;;  %s1770_s3 = inlined_call_operand.vmem [shape: bf16[2,8,8,128], index: 3, kind: output, shape index: {}]  }
   0x1 LB: > { %s1102_s13 = sadd.s32 4294967295, %s1501_s12   ;;  %p1106_p0 = scmp.ge.s32.totalorder %s1501_s12, 1  ;;  %s1501_s12 = sphi %s1527_s12, %s13_s12  }
   0x2   : > { %p137_p1 = scmp.lt.s32.totalorder %s1501_s12, 3 }
   0x4   : > { %p138_p2 = pnand %p1106_p0, %p137_p1 }
   0x5   : > { %p161_p3 = scmp.lt.s32.totalorder (!%p138_p2), %s1102_s13, 1  ;;  %s1550_s24 = smov (!%p138_p2), 0  }
   0x6   : > { %141 = sbr.rel (%p138_p2) target bundleno = 381 (0x17d), region = 32 }
   0xb   : > { %v1538_v0 = vld [vmem:[%s1769_s2] ss:$0 sm:$0xff]  ;;  %s1772_s13 = smov (!%p161_p3, %s1102_s13), 1 }
   0xc   : > { %s1400_s16 = smul.u32 144, %s1772_s13  ;;  %s1287_s17 = sshll.u32 %s1772_s13, 5 }
   0xd   : > { %s1543_s20 = scalar_lea.vmem %s1770_s3, %s1287_s17 }
   0xe   : > { %s1548_s23 = scalar_lea.vmem %s1767_s0, %s1400_s16 }
   0xf LB: >> { %v1417_v1 = vld [vmem:[%s1768_s1 + $0xf8] sm:$0xff]   ;;  %v1421_v5 = vld [vmem:[%s1768_s1 + $0xf0] sm:$0xff]   ;;  %v1425_v9 = vld [vmem:[%s1768_s1 + $0xe8] sm:$0xff]   ;;  %s1288_s6 = sshll.u32 %s1505_s24, 4  ;;  %s1505_s24 = sphi %s1550_s24, %s178_s24  }
  0x10   : >> { %v1418_v2 = vld [vmem:[%s1768_s1 + $0x78] sm:$0xff]   ;;  %1312 = vmatprep.subr.bf16.mxu0 %v1417_v1  ;;  %v1422_v6 = vld [vmem:[%s1768_s1 + $0x70] sm:$0xff]   ;;  %v1426_v10 = vld [vmem:[%s1768_s1 + $0x68] sm:$0xff]   ;;  %s1647_s14 = scalar_lea.vmem %s1548_s23, %s1288_s6 }
  0x11   : >> { %v1419_v3 = vld [vmem:[%s1768_s1 + $0xb8] sm:$0xff]   ;;  %1334 = vmatprep.subr.bf16.mxu1 %v1418_v2  ;;  %v1423_v7 = vld [vmem:[%s1768_s1 + $0xb0] sm:$0xff]   ;;  %v1427_v11 = vld [vmem:[%s1768_s1 + $0xa8] sm:$0xff]  }
  0x12   : >> { %v1420_v4 = vld [vmem:[%s1768_s1 + $0x38] sm:$0xff]   ;;  %1313 = vmatpush3.bf16.msra.mxu0 %v1419_v3  ;;  %v1424_v8 = vld [vmem:[%s1768_s1 + $0x30] sm:$0xff]   ;;  %v1428_v12 = vld [vmem:[%s1768_s1 + $0x28] sm:$0xff]  }
  0x13   : >> { %1335 = vmatpush3.bf16.msra.mxu1 %v1420_v4  ;;  %1314 = vmatprep.subr.bf16.mxu0 %v1421_v5  ;;  %v1429_v13 = vld [vmem:[%s1768_s1 + $0xe0] sm:$0xff]   ;;  %v1433_v17 = vld [vmem:[%s1768_s1 + $0xd8] sm:$0xff]   ;;  %v1437_v21 = vld [vmem:[%s1768_s1 + $0xd0] sm:$0xff]  }
  0x14   : >> { %1336 = vmatprep.subr.bf16.mxu1 %v1422_v6  ;;  %v1430_v14 = vld [vmem:[%s1768_s1 + $0x60] sm:$0xff]   ;;  %v1434_v18 = vld [vmem:[%s1768_s1 + $0x58] sm:$0xff]   ;;  %v1438_v22 = vld [vmem:[%s1768_s1 + $0x50] sm:$0xff]  }
  0x15   : >> { %v1431_v15 = vld [vmem:[%s1768_s1 + $0xa0] sm:$0xff]   ;;  %v1435_v19 = vld [vmem:[%s1768_s1 + $0x98] sm:$0xff]   ;;  %v1439_v23 = vld [vmem:[%s1768_s1 + $0x90] sm:$0xff]  }
  0x16   : >> { %1315 = vmatpush3.bf16.msra.mxu0 %v1423_v7  ;;  %v1432_v16 = vld [vmem:[%s1768_s1 + $0x20] sm:$0xff]   ;;  %v1436_v20 = vld [vmem:[%s1768_s1 + $0x18] sm:$0xff]   ;;  %v1440_v24 = vld [vmem:[%s1768_s1 + $0x10] sm:$0xff]  }
  0x17   : >> { %1337 = vmatpush3.bf16.msra.mxu1 %v1424_v8  ;;  %1316 = vmatprep.subr.bf16.mxu0 %v1425_v9  ;;  %v1441_v25 = vld [vmem:[%s1768_s1 + $0xc8] sm:$0xff]   ;;  %v1445_v29 = vld [vmem:[%s1768_s1 + $0xc0] sm:$0xff]   ;;  %v1453_v39 = vld [vmem:[%s1768_s1 + $0x178] sm:$0xff]  }
  0x18   : >> { %1338 = vmatprep.subr.bf16.mxu1 %v1426_v10  ;;  %v1442_v26 = vld [vmem:[%s1768_s1 + $0x48] sm:$0xff]   ;;  %v1446_v30 = vld [vmem:[%s1768_s1 + $0x40] sm:$0xff]   ;;  %v1454_v40 = vld [vmem:[%s1768_s1 + $0x1f8] sm:$0xff]  }
  0x19   : >> { %v1443_v27 = vld [vmem:[%s1768_s1 + $0x88] sm:$0xff]   ;;  %v1447_v31 = vld [vmem:[%s1768_s1 + $0x80] sm:$0xff]   ;;  %v1455_v47 = vld [vmem:[%s1768_s1 + $0x138] sm:$0xff]  }
  0x1a   : >> { %1317 = vmatpush3.bf16.msra.mxu0 %v1427_v11  ;;  %v1444_v28 = vld [vmem:[%s1768_s1 + $0x8] sm:$0xff]   ;;  %v1448_v32 = vld [vmem:[%s1768_s1] sm:$0xff]   ;;  %v1456_v48 = vld [vmem:[%s1768_s1 + $0x1b8] sm:$0xff]  }
  0x1b   : >> { %1339 = vmatpush3.bf16.msra.mxu1 %v1428_v12  ;;  %1318 = vmatprep.subr.bf16.mxu0 %v1429_v13  ;;  %v182_v33 = vld [vmem:[%s1647_s14] sm:$0xff]  ;;  %v183_v34 = vld [vmem:[%s1647_s14 + $0x8] sm:$0x11]  ;;  %v1458_v51 = vld [vmem:[%s1768_s1 + $0x1f0] sm:$0xff]  }
  0x1c   : >> { %1340 = vmatprep.subr.bf16.mxu1 %v1430_v14  ;;  %v1144_v35 = vcombine.low %v182_v33, %v183_v34  ;;  %v1145_v36 = vcombine.high %v182_v33, %v183_v34  ;;  %v1163_v37 = vcombine.high %v182_v33, %v182_v33  ;;  %v1162_v38 = vcombine.low %v182_v33, %v182_v33  ;;  %v1457_v52 = vld [vmem:[%s1768_s1 + $0x170] sm:$0xff]   ;;  %v1462_v55 = vld [vmem:[%s1768_s1 + $0x1e8] sm:$0xff]   ;;  %v1466_v59 = vld [vmem:[%s1768_s1 + $0x1e0] sm:$0xff]  }
  0x1d   : >> { %v1460_v53 = vld [vmem:[%s1768_s1 + $0x1b0] sm:$0xff]   ;;  %v1461_v56 = vld [vmem:[%s1768_s1 + $0x168] sm:$0xff]   ;;  %v1465_v60 = vld [vmem:[%s1768_s1 + $0x160] sm:$0xff]  }
  0x1e   : >> { %1319 = vmatpush3.bf16.msra.mxu0 %v1431_v15  ;;  %v265_v41 = vshrl.u32 %v1145_v36, 16  ;;  %v267_v42 = vshll.u32 %v1145_v36, 16  ;;  %541 = vmatprep.mubr.bf16.mxu1 %v1163_v37  ;;  %v258_v43 = vshrl.u32 %v1144_v35, 16  ;;  %v260_v44 = vshll.u32 %v1144_v35, 16  ;;  %v1459_v54 = vld [vmem:[%s1768_s1 + $0x130] sm:$0xff]   ;;  %v1464_v57 = vld [vmem:[%s1768_s1 + $0x1a8] sm:$0xff]  }
  0x1f   : >> { %1341 = vmatpush3.bf16.msra.mxu1 %v1432_v16  ;;  %1320 = vmatprep.subr.bf16.mxu0 %v1433_v17  ;;  %v1463_v58 = vld [vmem:[%s1768_s1 + $0x128] sm:$0xff]   ;;  %v1468_v61 = vld [vmem:[%s1768_s1 + $0x1a0] sm:$0xff]   ;;  %v1470_v63 = vld [vmem:[%s1768_s1 + $0x1d8] sm:$0xff]  }
  0x20   : >> { %1342 = vmatprep.subr.bf16.mxu1 %v1434_v18  ;;  %v269_v45 = vrot.slane %v267_v42, 1  ;;  %v262_v46 = vrot.slane %v260_v44, 1  ;;  %v1467_v62 = vld [vmem:[%s1768_s1 + $0x120] sm:$0xff]   ;;  %v1469_v1 = vld [vmem:[%s1768_s1 + $0x158] sm:$0xff]   ;;  %v1474_v4 = vld [vmem:[%s1768_s1 + $0x1d0] sm:$0xff]  }
  0x21   : >> { %v1472_v2 = vld [vmem:[%s1768_s1 + $0x198] sm:$0xff]   ;;  %v1473_v5 = vld [vmem:[%s1768_s1 + $0x150] sm:$0xff]   ;;  %v1478_v8 = vld [vmem:[%s1768_s1 + $0x1c8] sm:$0xff]  }
  0x22   : >> { %1321 = vmatpush3.bf16.msra.mxu0 %v1435_v19  ;;  %v270_v49 = vor.u32 %v269_v45, %v265_v41  ;;  %v263_v50 = vor.u32 %v262_v46, %v258_v43  ;;  %v1471_v3 = vld [vmem:[%s1768_s1 + $0x118] sm:$0xff]   ;;  %v1476_v6 = vld [vmem:[%s1768_s1 + $0x190] sm:$0xff]   ;;  %v1477_v9 = vld [vmem:[%s1768_s1 + $0x148] sm:$0xff]  }
  0x23   : >> { %1343 = vmatpush3.bf16.msra.mxu1 %v1436_v20  ;;  %1322 = vmatprep.subr.bf16.mxu0 %v1437_v21  ;;  %v1475_v7 = vld [vmem:[%s1768_s1 + $0x110] sm:$0xff]   ;;  %v1480_v10 = vld [vmem:[%s1768_s1 + $0x188] sm:$0xff]   ;;  %v1482_v12 = vld [vmem:[%s1768_s1 + $0x1c0] sm:$0xff]  }
  0x24   : >> { %1344 = vmatprep.subr.bf16.mxu1 %v1438_v22  ;;  %401 = vmatprep.mubr.bf16.mxu0 %v270_v49  ;;  %v1479_v11 = vld [vmem:[%s1768_s1 + $0x108] sm:$0xff]   ;;  %v1481_v13 = vld [vmem:[%s1768_s1 + $0x140] sm:$0xff]   ;;  %v1181_v15 = vld [vmem:[%s1647_s14 + $0x10] sm:$0xff] }
  0x25   : >> { %v1484_v14 = vld [vmem:[%s1768_s1 + $0x180] sm:$0xff]   ;;  %v1182_v16 = vld [vmem:[%s1647_s14 + $0x18] sm:$0x11]  ;;  %v1216_v17 = vcombine.high %v1181_v15, %v1181_v15  ;;  %s1284_s14 = sshll.u32 %s1505_s24, 3  ;;  %s178_s24 = sadd.s32 1, %s1505_s24  }
  0x26   : >> { %1323 = vmatpush3.bf16.msra.mxu0 %v1439_v23  ;;  %v1265_v18 = vcombine.low %v1181_v15, %v1182_v16  ;;  %v1266_v19 = vcombine.high %v1181_v15, %v1182_v16  ;;  %v1483_v20 = vld [vmem:[%s1768_s1 + $0x100] sm:$0xff]   ;;  %s931_s17 = scalar_lea.vmem [#allocation2], %s1284_s14  ;;  %p175_p4 = scmp.ge.s32.totalorder %s178_s24, 8  }
  0x27   : >> { %1345 = vmatpush3.bf16.msra.mxu1 %v1440_v24  ;;  %1324 = vmatprep.subr.bf16.mxu0 %v1441_v25 }
  0x28   : >> { %1346 = vmatprep.subr.bf16.mxu1 %v1442_v26  ;;  %v778_v21 = vshrl.u32 %v1266_v19, 16  ;;  %v780_v22 = vshll.u32 %v1266_v19, 16  ;;  %v771_v23 = vshrl.u32 %v1265_v18, 16  ;;  %v773_v24 = vshll.u32 %v1265_v18, 16 }
  0x29   : >> { %v1215_v26 = vcombine.low %v1181_v15, %v1181_v15 }
  0x2a   : >> { %1325 = vmatpush3.bf16.msra.mxu0 %v1443_v27  ;;  %v782_v25 = vrot.slane %v780_v22, 1  ;;  %v775_v27 = vrot.slane %v773_v24, 1 }
  0x2b   : >> { %1347 = vmatpush3.bf16.msra.mxu1 %v1444_v28  ;;  %1326 = vmatprep.subr.bf16.mxu0 %v1445_v29 }
  0x2c   : >> { %1348 = vmatprep.subr.bf16.mxu1 %v1446_v30  ;;  %v783_v28 = vor.u32 %v782_v25, %v778_v21  ;;  %v776_v29 = vor.u32 %v775_v27, %v771_v23 }
  0x2e   : >> { %1327 = vmatpush3.bf16.msra.mxu0 %v1447_v31 }
  0x2f   : >> { %1349 = vmatpush3.bf16.msra.mxu1 %v1448_v32  ;;  %1356 = vmatprep.subr.bf16.mxu0 %v1453_v39 }
  0x30   : >> { %1378 = vmatprep.subr.bf16.mxu1 %v1454_v40 }
  0x31   : >> { %402 = vmatmul.mubr.bf16.vlgmr.msra.gmra.mxu0 %v263_v50 }
  0x32   : >> { %542 = vmatmul.mubr.bf16.vlgmr.msra.gmra.mxu1 %v1162_v38  ;;  %1357 = vmatpush3.bf16.msra.mxu0 %v1455_v47 }
  0x33   : >> { %1379 = vmatpush3.bf16.msra.mxu1 %v1456_v48  ;;  %1358 = vmatprep.subr.bf16.mxu0 %v1457_v52 }
  0x34   : >> { %1380 = vmatprep.subr.bf16.mxu1 %v1458_v51  ;;  %723 = vmatprep.mubr.bf16.mxu0 %v1216_v17 }
  0x35   : >> { %914 = vmatprep.mubr.bf16.mxu1 %v783_v28 }
  0x36   : >> { %1359 = vmatpush3.bf16.msra.mxu0 %v1459_v54 }
  0x37   : >> { %1381 = vmatpush3.bf16.msra.mxu1 %v1460_v53  ;;  %1360 = vmatprep.subr.bf16.mxu0 %v1461_v56 }
  0x38   : >> { %1382 = vmatprep.subr.bf16.mxu1 %v1462_v55 }
  0x3a   : >> { %1361 = vmatpush3.bf16.msra.mxu0 %v1463_v58 }
  0x3b   : >> { %1383 = vmatpush3.bf16.msra.mxu1 %v1464_v57  ;;  %1362 = vmatprep.subr.bf16.mxu0 %v1465_v60 }
  0x3c   : >> { %1384 = vmatprep.subr.bf16.mxu1 %v1466_v59 }
  0x3e   : >> { %1363 = vmatpush3.bf16.msra.mxu0 %v1467_v62 }
  0x3f   : >> { %1385 = vmatpush3.bf16.msra.mxu1 %v1468_v61  ;;  %1364 = vmatprep.subr.bf16.mxu0 %v1469_v1 }
  0x40   : >> { %1386 = vmatprep.subr.bf16.mxu1 %v1470_v63 }
  0x42   : >> { %1365 = vmatpush3.bf16.msra.mxu0 %v1471_v3 }
  0x43   : >> { %1387 = vmatpush3.bf16.msra.mxu1 %v1472_v2  ;;  %1366 = vmatprep.subr.bf16.mxu0 %v1473_v5 }
  0x44   : >> { %1388 = vmatprep.subr.bf16.mxu1 %v1474_v4 }
  0x46   : >> { %1367 = vmatpush3.bf16.msra.mxu0 %v1475_v7 }
  0x47   : >> { %1389 = vmatpush3.bf16.msra.mxu1 %v1476_v6  ;;  %1368 = vmatprep.subr.bf16.mxu0 %v1477_v9 }
  0x48   : >> { %1390 = vmatprep.subr.bf16.mxu1 %v1478_v8 }
  0x4a   : >> { %1369 = vmatpush3.bf16.msra.mxu0 %v1479_v11 }
  0x4b   : >> { %1391 = vmatpush3.bf16.msra.mxu1 %v1480_v10  ;;  %1370 = vmatprep.subr.bf16.mxu0 %v1481_v13 }
  0x4c   : >> { %1392 = vmatprep.subr.bf16.mxu1 %v1482_v12 }
  0x4e   : >> { %1371 = vmatpush3.bf16.msra.mxu0 %v1483_v20 }
  0x4f   : >> { %1393 = vmatpush3.bf16.msra.mxu1 %v1484_v14 }
  0x51   : >> { %724 = vmatmul.mubr.bf16.vlgmr.msra.gmra.mxu0 %v1215_v26 }
  0x52   : >> { %915 = vmatmul.mubr.bf16.vlgmr.msra.gmra.mxu1 %v776_v29 }
  0xf1   : >> { %v1328_v33 = vpop.f32.mrf.mxu0 }
  0xf2   : >> { %v1350_v30 = vpop.f32.mrf.mxu1 }
  0xf3   : >> { %v1329_v35 = vpop.f32.mrf.mxu0 }
  0xf4   : >> { %v1351_v31 = vpop.f32.mrf.mxu1  ;;  %v1330_v38 = vadd.f32 %v1329_v35, %v1328_v33 }
  0xf5   : >> { %v1331_v36 = vpop.f32.mrf.mxu0  ;;  %v1352_v39 = vadd.f32 %v1351_v31, %v1350_v30 }
  0xf6   : >> { %v1353_v32 = vpop.f32.mrf.mxu1 }
  0xf7   : >> { %v1332_v37 = vpop.f32.mrf.mxu0  ;;  %v544_v43 = vadd.f32 %v1352_v39, %v1330_v38 }
  0xf8   : >> { %v1354_v34 = vpop.f32.mrf.mxu1 }
 0x111   : >> { %v1372_v40 = vpop.f32.mrf.mxu0 }
 0x112   : >> { %v1394_v41 = vpop.f32.mrf.mxu1 }
 0x113   : >> { %v1373_v42 = vpop.f32.mrf.mxu0 }
 0x114   : >> { %v1374_v44 = vadd.f32 %v1373_v42, %v1372_v40  ;;  %v1395_v45 = vpop.f32.mrf.mxu1 }
 0x115   : >> { %v1375_v46 = vpop.f32.mrf.mxu0  ;;  %v1396_v48 = vadd.f32 %v1395_v45, %v1394_v41 }
 0x116   : >> { %v731_v47 = vadd.f32 %v1374_v44, %v544_v43  ;;  %v1397_v49 = vpop.f32.mrf.mxu1 }
 0x117   : >> { %v1376_v50 = vpop.f32.mrf.mxu0 }
 0x118   : >> { %v922_v51 = vadd.f32 %v1396_v48, %v731_v47  ;;  %v1398_v52 = vpop.f32.mrf.mxu1  ;;  %177 = sbr.rel (!%p175_p4) target bundleno = 15 (0xf), region = 75 }
 0x11a   : >> { %v929_v53 = vadd.f32 %v1538_v0, %v922_v51 }
 0x11c   : >> { %932 = vst [vmem:[%s931_s17] sm:$0xff] %v929_v53 }
 0x123   : > { %v933_v54 = vld [vmem:[#allocation2] sm:$0xff]  ;;  %v934_v55 = vld [vmem:[#allocation2 + $0x8] sm:$0xff]  ;;  %v935_v56 = vld [vmem:[#allocation2 + $0x10] sm:$0xff] }
 0x124   : > { %v941_v57 = vadd.f32 %v934_v55, %v933_v54  ;;  %v936_v58 = vld [vmem:[#allocation2 + $0x18] sm:$0xff]  ;;  %v937_v60 = vld [vmem:[#allocation2 + $0x20] sm:$0xff]  ;;  %v938_v62 = vld [vmem:[#allocation2 + $0x28] sm:$0xff] }
 0x125   : > { %v939_v1 = vld [vmem:[#allocation2 + $0x30] sm:$0xff]  ;;  %v940_v3 = vld [vmem:[#allocation2 + $0x38] sm:$0xff] }
 0x126   : > { %v942_v59 = vadd.f32 %v941_v57, %v935_v56 }
 0x128   : > { %v943_v61 = vadd.f32 %v942_v59, %v936_v58 }
 0x12a   : > { %v944_v63 = vadd.f32 %v943_v61, %v937_v60 }
 0x12c   : > { %v945_v2 = vadd.f32 %v944_v63, %v938_v62 }
 0x12e   : > { %v946_v4 = vadd.f32 %v945_v2, %v939_v1 }
 0x130   : > { %v947_v5 = vadd.f32 %v946_v4, %v940_v3 }
 0x132   : > { %v948_v6 = vrot.slane %v947_v5, 4 }
 0x134   : > { %v949_v7 = vadd.f32 %v948_v6, %v947_v5 }
 0x136   : > { %v950_v8 = vrot.slane %v949_v7, 2 }
 0x138   : > { %v951_v9 = vadd.f32 %v950_v8, %v949_v7 }
 0x13a   : > { %v952_v10 = vrot.slane %v951_v9, 1 }
 0x13c   : > { %v953_v0 = vadd.f32 %v952_v10, %v951_v9 }
 0x13e   : > { %v954_v11 = vmul.f32 0.015625, %v953_v0 }
 0x140   : > { %v955_v12 = vsub.f32 %v933_v54, %v954_v11  ;;  %v956_v13 = vsub.f32 %v934_v55, %v954_v11  ;;  %v957_v14 = vsub.f32 %v935_v56, %v954_v11  ;;  %v958_v15 = vsub.f32 %v936_v58, %v954_v11 }
 0x141   : > { %v959_v16 = vsub.f32 %v937_v60, %v954_v11  ;;  %v960_v20 = vsub.f32 %v938_v62, %v954_v11  ;;  %v961_v23 = vsub.f32 %v939_v1, %v954_v11  ;;  %v962_v26 = vsub.f32 %v940_v3, %v954_v11 }
 0x142   : > { %v963_v17 = vmul.f32 %v955_v12, %v955_v12  ;;  %v964_v18 = vmul.f32 %v956_v13, %v956_v13  ;;  %v965_v19 = vmul.f32 %v957_v14, %v957_v14  ;;  %v966_v21 = vmul.f32 %v958_v15, %v958_v15 }
 0x143   : > { %v967_v24 = vmul.f32 %v959_v16, %v959_v16  ;;  %v968_v27 = vmul.f32 %v960_v20, %v960_v20  ;;  %v969_v29 = vmul.f32 %v961_v23, %v961_v23  ;;  %v970_v31 = vmul.f32 %v962_v26, %v962_v26 }
 0x144   : > { %v971_v22 = vadd.f32 %v964_v18, %v963_v17 }
 0x146   : > { %v972_v25 = vadd.f32 %v971_v22, %v965_v19 }
 0x148   : > { %v973_v28 = vadd.f32 %v972_v25, %v966_v21 }
 0x14a   : > { %v974_v30 = vadd.f32 %v973_v28, %v967_v24 }
 0x14c   : > { %v975_v32 = vadd.f32 %v974_v30, %v968_v27 }
 0x14e   : > { %v976_v33 = vadd.f32 %v975_v32, %v969_v29 }
 0x150   : > { %v977_v34 = vadd.f32 %v976_v33, %v970_v31 }
 0x152   : > { %v978_v35 = vrot.slane %v977_v34, 4 }
 0x154   : > { %v979_v36 = vadd.f32 %v978_v35, %v977_v34 }
 0x156   : > { %v980_v37 = vrot.slane %v979_v36, 2 }
 0x158   : > { %v981_v38 = vadd.f32 %v980_v37, %v979_v36 }
 0x15a   : > { %v982_v39 = vrot.slane %v981_v38, 1 }
 0x15c   : > { %v983_v40 = vadd.f32 %v982_v39, %v981_v38 }
 0x15e   : > { %v984_v41 = vmul.f32 0.015625, %v983_v40 }
 0x160   : > { %v985_v42 = vadd.f32 1e-05, %v984_v41 }
 0x162   : > { %1489 = vrsqrt.f32 %v985_v42 }
 0x16f   : > { %v1490_v43 = vpop.eup %1489 }
 0x170   : > { %v987_v44 = vmul.f32 %v1490_v43, %v955_v12  ;;  %v988_v45 = vmul.f32 %v1490_v43, %v956_v13  ;;  %v989_v46 = vmul.f32 %v1490_v43, %v957_v14  ;;  %v990_v47 = vmul.f32 %v1490_v43, %v958_v15 }
 0x171   : > { %v991_v48 = vmul.f32 %v1490_v43, %v959_v16  ;;  %v992_v49 = vmul.f32 %v1490_v43, %v960_v20  ;;  %v993_v50 = vmul.f32 %v1490_v43, %v961_v23  ;;  %v994_v51 = vmul.f32 %v1490_v43, %v962_v26 }
 0x172   : > { %vm995_vm0 = vcmp.ge.f32.partialorder %v987_v44, 0.0  ;;  %vm996_vm1 = vcmp.ge.f32.partialorder %v988_v45, 0.0  ;;  %v1003_v52 = vmul.f32 0.2, %v987_v44  ;;  %v1004_v53 = vmul.f32 0.2, %v988_v45 }
 0x173   : > { %vm997_vm2 = vcmp.ge.f32.partialorder %v989_v46, 0.0  ;;  %vm998_vm3 = vcmp.ge.f32.partialorder %v990_v47, 0.0  ;;  %v1005_v54 = vmul.f32 0.2, %v989_v46  ;;  %v1006_v55 = vmul.f32 0.2, %v990_v47 }
 0x174   : > { %v1011_v56 = vsel %vm995_vm0, %v987_v44, %v1003_v52  ;;  %v1012_v57 = vsel %vm996_vm1, %v988_v45, %v1004_v53  ;;  %vm999_vm4 = vcmp.ge.f32.partialorder %v991_v48, 0.0  ;;  %vm1000_vm5 = vcmp.ge.f32.partialorder %v992_v49, 0.0 }
 0x175   : > { %v1292_v58 = vpack.c.bf16 %v1012_v57, %v1011_v56  ;;  %v1013_v59 = vsel %vm997_vm2, %v989_v46, %v1005_v54  ;;  %v1014_v60 = vsel %vm998_vm3, %v990_v47, %v1006_v55  ;;  %v1007_v61 = vmul.f32 0.2, %v991_v48 }
 0x176   : > { %v1297_v62 = vpack.c.bf16 %v1014_v60, %v1013_v59  ;;  %v1008_v63 = vmul.f32 0.2, %v992_v49  ;;  %vm1001_vm6 = vcmp.ge.f32.partialorder %v993_v50, 0.0  ;;  %vm1002_vm7 = vcmp.ge.f32.partialorder %v994_v51, 0.0 }
 0x177   : > { %1293 = vst [vmem:[%s1543_s20] sm:$0xff] %v1292_v58   ;;  %v1015_v1 = vsel %vm999_vm4, %v991_v48, %v1007_v61  ;;  %v1009_v2 = vmul.f32 0.2, %v993_v50  ;;  %v1010_v3 = vmul.f32 0.2, %v994_v51 }
 0x178   : > { %1309 = vst [vmem:[%s1543_s20 + $0x8] sm:$0xff] %v1297_v62   ;;  %v1016_v4 = vsel %vm1000_vm5, %v992_v49, %v1008_v63 }
 0x179   : > { %v1302_v5 = vpack.c.bf16 %v1016_v4, %v1015_v1  ;;  %v1017_v6 = vsel %vm1001_vm6, %v993_v50, %v1009_v2  ;;  %v1018_v7 = vsel %vm1002_vm7, %v994_v51, %v1010_v3 }
 0x17a   : > { %v1307_v8 = vpack.c.bf16 %v1018_v7, %v1017_v6 }
 0x17b   : > { %1310 = vst [vmem:[%s1543_s20 + $0x10] sm:$0xff] %v1302_v5  }
 0x17c   : > { %1311 = vst [vmem:[%s1543_s20 + $0x18] sm:$0xff] %v1307_v8  }
 0x17d PF: > { %s13_s12 = sadd.s32 1, %s1501_s12  }
 0x17e   : > { %p10_p5 = scmp.ge.s32.totalorder %s13_s12, 4  }
 0x180   :  { %12 = sbr.rel (!%p10_p5) target bundleno = 1 (0x1), region = 86 }

// kernel: discriminator_forward.6
= control target key start
LH: loop header
LB: loop body
LE: loop exit
PB: predicated region body
PF: predicated region fallthrough
CT: control target
= control target key end

     0   :  { %s3370_s12 = smov 0   ;;  %s4259_s0 = inlined_call_operand.vmem [shape: bf16[2,5,5,512], index: 0, kind: input, shape index: {}]   ;;  %s4260_s1 = inlined_call_operand.vmem [shape: bf16[4,512,256], index: 1, kind: input, shape index: {}]   ;;  %s4261_s2 = inlined_call_operand.vmem [shape: f32[1,256], index: 2, kind: input, shape index: {}]   ;;  %s4262_s3 = inlined_call_operand.vmem [shape: bf16[2,4,4,256], index: 3, kind: output, shape index: {}]  }
   0x1 LB: > { %s2433_s13 = sadd.s32 4294967295, %s3344_s12   ;;  %p2437_p0 = scmp.ge.s32.totalorder %s3344_s12, 1  ;;  %s3344_s12 = sphi %s3370_s12, %s13_s12  }
   0x2   : > { %p137_p1 = scmp.lt.s32.totalorder %s3344_s12, 3 }
   0x4   : > { %p138_p2 = pnand %p2437_p0, %p137_p1 }
   0x5   : > { %p161_p3 = scmp.lt.s32.totalorder (!%p138_p2), %s2433_s13, 1  ;;  %s3393_s24 = smov (!%p138_p2), 0  }
   0x6   : > { %141 = sbr.rel (%p138_p2) target bundleno = 569 (0x239), region = 32 }
   0xb   : > { %v3381_v0 = vld [vmem:[%s4261_s2] sm:$0x3]  ;;  %s4264_s13 = smov (!%p161_p3, %s2433_s13), 1 }
   0xc   : > { %s2917_s16 = smul.u32 80, %s4264_s13  ;;  %s2914_s17 = sshll.u32 %s4264_s13, 4 }
   0xd   : > { %s3386_s20 = scalar_lea.vmem %s4262_s3, %s2914_s17 }
   0xe   : > { %s3391_s23 = scalar_lea.vmem %s4259_s0, %s2917_s16 }
   0xf LB: >> { %v2934_v1 = vld [vmem:[%s4260_s1 + $0x274] ss:$8 sps:$4 sm:$0xff]   ;;  %v2938_v3 = vld [vmem:[%s4260_s1 + $0x270] ss:$8 sps:$4 sm:$0xff]   ;;  %v2940_v5 = vld [vmem:[%s4260_s1 + $0x264] ss:$8 sps:$4 sm:$0xff]   ;;  %s3348_s24 = sphi %s3393_s24, %s177_s24  }
  0x10   : >> { %v2936_v2 = vld [vmem:[%s4260_s1 + $0x374] ss:$8 sps:$4 sm:$0xff]   ;;  %674 = vmatprep.subr.bf16.mxu0 %v2934_v1  ;;  %v2939_v4 = vld [vmem:[%s4260_s1 + $0x370] ss:$8 sps:$4 sm:$0xff]   ;;  %v2942_v6 = vld [vmem:[%s4260_s1 + $0x364] ss:$8 sps:$4 sm:$0xff]  }
  0x11   : >> { %715 = vmatprep.subr.bf16.mxu1 %v2936_v2  ;;  %675 = vmatpush1.bf16.msra.mxu0 %v2938_v3  ;;  %v2944_v7 = vld [vmem:[%s4260_s1 + $0x260] ss:$8 sps:$4 sm:$0xff]   ;;  %v2946_v9 = vld [vmem:[%s4260_s1 + $0x254] ss:$8 sps:$4 sm:$0xff]   ;;  %v2950_v11 = vld [vmem:[%s4260_s1 + $0x250] ss:$8 sps:$4 sm:$0xff]  }
  0x12   : >> { %716 = vmatpush1.bf16.msra.mxu1 %v2939_v4  ;;  %676 = vmatprep.subr.bf16.mxu0 %v2940_v5  ;;  %v2945_v8 = vld [vmem:[%s4260_s1 + $0x360] ss:$8 sps:$4 sm:$0xff]   ;;  %v2948_v10 = vld [vmem:[%s4260_s1 + $0x354] ss:$8 sps:$4 sm:$0xff]   ;;  %v2951_v12 = vld [vmem:[%s4260_s1 + $0x350] ss:$8 sps:$4 sm:$0xff]  }
  0x13   : >> { %717 = vmatprep.subr.bf16.mxu1 %v2942_v6  ;;  %v2952_v13 = vld [vmem:[%s4260_s1 + $0x244] ss:$8 sps:$4 sm:$0xff]   ;;  %v2956_v15 = vld [vmem:[%s4260_s1 + $0x240] ss:$8 sps:$4 sm:$0xff]   ;;  %v2958_v17 = vld [vmem:[%s4260_s1 + $0x234] ss:$8 sps:$4 sm:$0xff]  }
  0x14   : >> { %v2954_v14 = vld [vmem:[%s4260_s1 + $0x344] ss:$8 sps:$4 sm:$0xff]   ;;  %v2957_v16 = vld [vmem:[%s4260_s1 + $0x340] ss:$8 sps:$4 sm:$0xff]   ;;  %v2960_v18 = vld [vmem:[%s4260_s1 + $0x334] ss:$8 sps:$4 sm:$0xff]  }
  0x15   : >> { %677 = vmatpush1.bf16.msra.mxu0 %v2944_v7  ;;  %v2962_v19 = vld [vmem:[%s4260_s1 + $0x230] ss:$8 sps:$4 sm:$0xff]   ;;  %v2964_v21 = vld [vmem:[%s4260_s1 + $0x224] ss:$8 sps:$4 sm:$0xff]   ;;  %v2968_v23 = vld [vmem:[%s4260_s1 + $0x220] ss:$8 sps:$4 sm:$0xff]  }
  0x16   : >> { %718 = vmatpush1.bf16.msra.mxu1 %v2945_v8  ;;  %678 = vmatprep.subr.bf16.mxu0 %v2946_v9  ;;  %v2963_v20 = vld [vmem:[%s4260_s1 + $0x330] ss:$8 sps:$4 sm:$0xff]   ;;  %v2966_v22 = vld [vmem:[%s4260_s1 + $0x324] ss:$8 sps:$4 sm:$0xff]   ;;  %v2969_v24 = vld [vmem:[%s4260_s1 + $0x320] ss:$8 sps:$4 sm:$0xff]  }
  0x17   : >> { %719 = vmatprep.subr.bf16.mxu1 %v2948_v10  ;;  %v2970_v25 = vld [vmem:[%s4260_s1 + $0x214] ss:$8 sps:$4 sm:$0xff]   ;;  %v2974_v27 = vld [vmem:[%s4260_s1 + $0x210] ss:$8 sps:$4 sm:$0xff]   ;;  %v2976_v29 = vld [vmem:[%s4260_s1 + $0x204] ss:$8 sps:$4 sm:$0xff]  }
  0x18   : >> { %v2972_v26 = vld [vmem:[%s4260_s1 + $0x314] ss:$8 sps:$4 sm:$0xff]   ;;  %v2975_v28 = vld [vmem:[%s4260_s1 + $0x310] ss:$8 sps:$4 sm:$0xff]   ;;  %v2978_v30 = vld [vmem:[%s4260_s1 + $0x304] ss:$8 sps:$4 sm:$0xff]  }
  0x19   : >> { %679 = vmatpush1.bf16.msra.mxu0 %v2950_v11  ;;  %v2980_v31 = vld [vmem:[%s4260_s1 + $0x200] ss:$8 sps:$4 sm:$0xff]   ;;  %v2982_v33 = vld [vmem:[%s4260_s1 + $0x2f4] ss:$8 sps:$4 sm:$0xff]   ;;  %v2986_v35 = vld [vmem:[%s4260_s1 + $0x2f0] ss:$8 sps:$4 sm:$0xff]  }
  0x1a   : >> { %720 = vmatpush1.bf16.msra.mxu1 %v2951_v12  ;;  %680 = vmatprep.subr.bf16.mxu0 %v2952_v13  ;;  %v2981_v32 = vld [vmem:[%s4260_s1 + $0x300] ss:$8 sps:$4 sm:$0xff]   ;;  %v2984_v34 = vld [vmem:[%s4260_s1 + $0x3f4] ss:$8 sps:$4 sm:$0xff]   ;;  %v2987_v36 = vld [vmem:[%s4260_s1 + $0x3f0] ss:$8 sps:$4 sm:$0xff]  }
  0x1b   : >> { %721 = vmatprep.subr.bf16.mxu1 %v2954_v14  ;;  %v2988_v37 = vld [vmem:[%s4260_s1 + $0x2e4] ss:$8 sps:$4 sm:$0xff]   ;;  %v2992_v39 = vld [vmem:[%s4260_s1 + $0x2e0] ss:$8 sps:$4 sm:$0xff]   ;;  %v2994_v41 = vld [vmem:[%s4260_s1 + $0x2d4] ss:$8 sps:$4 sm:$0xff]  }
  0x1c   : >> { %v2990_v38 = vld [vmem:[%s4260_s1 + $0x3e4] ss:$8 sps:$4 sm:$0xff]   ;;  %v2993_v40 = vld [vmem:[%s4260_s1 + $0x3e0] ss:$8 sps:$4 sm:$0xff]   ;;  %s2915_s11 = sshll.u32 %s3348_s24, 4  ;;  %s2916_s14 = sshll.u32 %s3348_s24, 3 }
  0x1d   : >> { %681 = vmatpush1.bf16.msra.mxu0 %v2956_v15  ;;  %v2996_v42 = vld [vmem:[%s4260_s1 + $0x3d4] ss:$8 sps:$4 sm:$0xff]   ;;  %v2998_v43 = vld [vmem:[%s4260_s1 + $0x2d0] ss:$8 sps:$4 sm:$0xff]   ;;  %s3532_s19 = scalar_lea.vmem %s3391_s23, %s2915_s11  ;;  %v3000_v45 = vld [vmem:[%s4260_s1 + $0x2c4] ss:$8 sps:$4 sm:$0xff]  }
  0x1e   : >> { %722 = vmatpush1.bf16.msra.mxu1 %v2957_v16  ;;  %682 = vmatprep.subr.bf16.mxu0 %v2958_v17  ;;  %v2999_v44 = vld [vmem:[%s4260_s1 + $0x3d0] ss:$8 sps:$4 sm:$0xff]   ;;  %v3002_v46 = vld [vmem:[%s4260_s1 + $0x3c4] ss:$8 sps:$4 sm:$0xff]   ;;  %v3004_v47 = vld [vmem:[%s4260_s1 + $0x2c0] ss:$8 sps:$4 sm:$0xff]  }
  0x1f   : >> { %723 = vmatprep.subr.bf16.mxu1 %v2960_v18  ;;  %v181_v48 = vld [vmem:[%s3532_s19] sm:$0x77]  ;;  %v182_v50 = vld [vmem:[%s3532_s19 + $0x8] sm:$0x77]  ;;  %v3006_v52 = vld [vmem:[%s4260_s1 + $0x2b4] ss:$8 sps:$4 sm:$0xff]  }
  0x20   : >> { %v3544_v49 = vcombine.high %v181_v48, %v181_v48  ;;  %v3005_v51 = vld [vmem:[%s4260_s1 + $0x3c0] ss:$8 sps:$4 sm:$0xff]   ;;  %v3553_v53 = vcombine.high %v182_v50, %v182_v50  ;;  %v3008_v54 = vld [vmem:[%s4260_s1 + $0x3b4] ss:$8 sps:$4 sm:$0xff]   ;;  %v3010_v60 = vld [vmem:[%s4260_s1 + $0x2b0] ss:$8 sps:$4 sm:$0xff]   ;;  %v3574_v4 = vcombine.low %v181_v48, %v181_v48  ;;  %v3576_v5 = vcombine.low %v182_v50, %v182_v50 }
  0x21   : >> { %683 = vmatpush1.bf16.msra.mxu0 %v2962_v19  ;;  %v3011_v61 = vld [vmem:[%s4260_s1 + $0x3b0] ss:$8 sps:$4 sm:$0xff]   ;;  %v3012_v63 = vld [vmem:[%s4260_s1 + $0x2a4] ss:$8 sps:$4 sm:$0xff]   ;;  %v3016_v6 = vld [vmem:[%s4260_s1 + $0x2a0] ss:$8 sps:$4 sm:$0xff]  }
  0x22   : >> { %724 = vmatpush1.bf16.msra.mxu1 %v2963_v20  ;;  %684 = vmatprep.subr.bf16.mxu0 %v2964_v21  ;;  %v330_v55 = vshrl.u32 %v3544_v49, 16  ;;  %v332_v56 = vshll.u32 %v3544_v49, 16  ;;  %v344_v57 = vshrl.u32 %v3553_v53, 16  ;;  %v346_v58 = vshll.u32 %v3553_v53, 16  ;;  %v3014_v1 = vld [vmem:[%s4260_s1 + $0x3a4] ss:$8 sps:$4 sm:$0xff]  }
  0x23   : >> { %725 = vmatprep.subr.bf16.mxu1 %v2966_v22  ;;  %v3017_v7 = vld [vmem:[%s4260_s1 + $0x3a0] ss:$8 sps:$4 sm:$0xff]   ;;  %v3018_v8 = vld [vmem:[%s4260_s1 + $0x294] ss:$8 sps:$4 sm:$0xff]   ;;  %v325_v10 = vshll.u32 %v3574_v4, 16  ;;  %v339_v11 = vshll.u32 %v3576_v5, 16 }
  0x24   : >> { %v334_v59 = vrot.slane %v332_v56, 1  ;;  %v348_v62 = vrot.slane %v346_v58, 1  ;;  %v3020_v9 = vld [vmem:[%s4260_s1 + $0x394] ss:$8 sps:$4 sm:$0xff]   ;;  %v3022_v12 = vld [vmem:[%s4260_s1 + $0x290] ss:$8 sps:$4 sm:$0xff]  }
  0x25   : >> { %685 = vmatpush1.bf16.msra.mxu0 %v2968_v23  ;;  %v3023_v13 = vld [vmem:[%s4260_s1 + $0x390] ss:$8 sps:$4 sm:$0xff]   ;;  %v3024_v14 = vld [vmem:[%s4260_s1 + $0x284] ss:$8 sps:$4 sm:$0xff]   ;;  %v323_v16 = vshrl.u32 %v3574_v4, 16  ;;  %v327_v17 = vrot.slane %v325_v10, 1 }
  0x26   : >> { %726 = vmatpush1.bf16.msra.mxu1 %v2969_v24  ;;  %686 = vmatprep.subr.bf16.mxu0 %v2970_v25  ;;  %v335_v2 = vor.u32 %v334_v59, %v330_v55  ;;  %v349_v3 = vor.u32 %v348_v62, %v344_v57  ;;  %v3026_v15 = vld [vmem:[%s4260_s1 + $0x384] ss:$8 sps:$4 sm:$0xff]   ;;  %v337_v18 = vshrl.u32 %v3576_v5, 16  ;;  %v341_v19 = vrot.slane %v339_v11, 1  ;;  %v3028_v20 = vld [vmem:[%s4260_s1 + $0x280] ss:$8 sps:$4 sm:$0xff]  }
  0x27   : >> { %727 = vmatprep.subr.bf16.mxu1 %v2972_v26  ;;  %v3029_v21 = vld [vmem:[%s4260_s1 + $0x380] ss:$8 sps:$4 sm:$0xff]   ;;  %v3036_v22 = vld [vmem:[%s4260_s1 + $0x74] ss:$8 sps:$4 sm:$0xff]   ;;  %v328_v24 = vor.u32 %v327_v17, %v323_v16  ;;  %v3034_v26 = vld [vmem:[%s4260_s1 + $0x70] ss:$8 sps:$4 sm:$0xff]  }
  0x28   : >> { %706 = vmatprep.mubr.bf16.mxu0 %v335_v2  ;;  %747 = vmatprep.mubr.bf16.mxu1 %v349_v3  ;;  %v3039_v23 = vld [vmem:[%s4260_s1 + $0x174] ss:$8 sps:$4 sm:$0xff]   ;;  %v342_v25 = vor.u32 %v341_v19, %v337_v18  ;;  %v3070_v50 = vld [vmem:[%s4260_s1 + $0x10] ss:$8 sps:$4 sm:$0xff]   ;;  %v3079_v55 = vld [vmem:[%s4260_s1 + $0x100] ss:$8 sps:$4 sm:$0xff]  }
  0x29   : >> { %687 = vmatpush1.bf16.msra.mxu0 %v2974_v27  ;;  %v3037_v27 = vld [vmem:[%s4260_s1 + $0x170] ss:$8 sps:$4 sm:$0xff]   ;;  %v3072_v48 = vld [vmem:[%s4260_s1 + $0x14] ss:$8 sps:$4 sm:$0xff]   ;;  %v3088_v62 = vld [vmem:[%s4260_s1 + $0xe0] ss:$8 sps:$4 sm:$0xff]  }
  0x2a   : >> { %728 = vmatpush1.bf16.msra.mxu1 %v2975_v28  ;;  %688 = vmatprep.subr.bf16.mxu0 %v2976_v29  ;;  %v3042_v28 = vld [vmem:[%s4260_s1 + $0x64] ss:$8 sps:$4 sm:$0xff]   ;;  %v3084_v56 = vld [vmem:[%s4260_s1 + $0xf4] ss:$8 sps:$4 sm:$0xff]   ;;  %v3082_v58 = vld [vmem:[%s4260_s1 + $0xf0] ss:$8 sps:$4 sm:$0xff]  }
  0x2b   : >> { %729 = vmatprep.subr.bf16.mxu1 %v2978_v30  ;;  %v3045_v29 = vld [vmem:[%s4260_s1 + $0x164] ss:$8 sps:$4 sm:$0xff]   ;;  %v3040_v30 = vld [vmem:[%s4260_s1 + $0x60] ss:$8 sps:$4 sm:$0xff]   ;;  %v3087_v57 = vld [vmem:[%s4260_s1 + $0x1f4] ss:$8 sps:$4 sm:$0xff]  }
  0x2c   : >> { %v3085_v59 = vld [vmem:[%s4260_s1 + $0x1f0] ss:$8 sps:$4 sm:$0xff]   ;;  %v3099_v2 = vld [vmem:[%s4260_s1 + $0x1d4] ss:$8 sps:$4 sm:$0xff]   ;;  %v3103_v10 = vld [vmem:[%s4260_s1 + $0x1c0] ss:$8 sps:$4 sm:$0xff]  }
  0x2d   : >> { %689 = vmatpush1.bf16.msra.mxu0 %v2980_v31  ;;  %v3043_v31 = vld [vmem:[%s4260_s1 + $0x160] ss:$8 sps:$4 sm:$0xff]   ;;  %v3094_v3 = vld [vmem:[%s4260_s1 + $0xd0] ss:$8 sps:$4 sm:$0xff]   ;;  %v3108_v11 = vld [vmem:[%s4260_s1 + $0xb4] ss:$8 sps:$4 sm:$0xff]  }
  0x2e   : >> { %730 = vmatpush1.bf16.msra.mxu1 %v2981_v32  ;;  %690 = vmatprep.subr.bf16.mxu0 %v2982_v33  ;;  %v3048_v32 = vld [vmem:[%s4260_s1 + $0x54] ss:$8 sps:$4 sm:$0xff]   ;;  %v3117_v16 = vld [vmem:[%s4260_s1 + $0x1a4] ss:$8 sps:$4 sm:$0xff]   ;;  %v3112_v17 = vld [vmem:[%s4260_s1 + $0xa0] ss:$8 sps:$4 sm:$0xff]  }
  0x2f   : >> { %731 = vmatprep.subr.bf16.mxu1 %v2984_v34  ;;  %v3051_v33 = vld [vmem:[%s4260_s1 + $0x154] ss:$8 sps:$4 sm:$0xff]   ;;  %v3046_v34 = vld [vmem:[%s4260_s1 + $0x50] ss:$8 sps:$4 sm:$0xff]   ;;  %v3115_v18 = vld [vmem:[%s4260_s1 + $0x1a0] ss:$8 sps:$4 sm:$0xff]  }
  0x30   : >> { %v3120_v19 = vld [vmem:[%s4260_s1 + $0x94] ss:$8 sps:$4 sm:$0xff]   ;;  %s2171_s15 = scalar_lea.vmem [#allocation2], %s2916_s14  ;;  %s177_s24 = sadd.s32 1, %s3348_s24  }
  0x31   : >> { %691 = vmatpush2.bf16.msra.mxu0 %v2986_v35  ;;  %v3049_v35 = vld [vmem:[%s4260_s1 + $0x150] ss:$8 sps:$4 sm:$0xff]   ;;  %p174_p4 = scmp.ge.s32.totalorder %s177_s24, 4  }
  0x32   : >> { %732 = vmatpush2.bf16.msra.mxu1 %v2987_v36  ;;  %692 = vmatprep.subr.bf16.mxu0 %v2988_v37  ;;  %v3054_v36 = vld [vmem:[%s4260_s1 + $0x44] ss:$8 sps:$4 sm:$0xff]   ;;  %vm2189_vm0 = vcmask (%p174_p4), 1043456  }
  0x33   : >> { %733 = vmatprep.subr.bf16.mxu1 %v2990_v38  ;;  %v3057_v37 = vld [vmem:[%s4260_s1 + $0x144] ss:$8 sps:$4 sm:$0xff]   ;;  %v3052_v38 = vld [vmem:[%s4260_s1 + $0x40] ss:$8 sps:$4 sm:$0xff]  }
  0x35   : >> { %693 = vmatpush2.bf16.msra.mxu0 %v2992_v39  ;;  %v3055_v39 = vld [vmem:[%s4260_s1 + $0x140] ss:$8 sps:$4 sm:$0xff]  }
  0x36   : >> { %734 = vmatpush2.bf16.msra.mxu1 %v2993_v40  ;;  %694 = vmatprep.subr.bf16.mxu0 %v2994_v41  ;;  %v3060_v40 = vld [vmem:[%s4260_s1 + $0x34] ss:$8 sps:$4 sm:$0xff]  }
  0x37   : >> { %735 = vmatprep.subr.bf16.mxu1 %v2996_v42  ;;  %v3063_v41 = vld [vmem:[%s4260_s1 + $0x134] ss:$8 sps:$4 sm:$0xff]   ;;  %v3058_v42 = vld [vmem:[%s4260_s1 + $0x30] ss:$8 sps:$4 sm:$0xff]  }
  0x39   : >> { %695 = vmatpush2.bf16.msra.mxu0 %v2998_v43  ;;  %v3061_v43 = vld [vmem:[%s4260_s1 + $0x130] ss:$8 sps:$4 sm:$0xff]  }
  0x3a   : >> { %736 = vmatpush2.bf16.msra.mxu1 %v2999_v44  ;;  %696 = vmatprep.subr.bf16.mxu0 %v3000_v45  ;;  %v3066_v44 = vld [vmem:[%s4260_s1 + $0x24] ss:$8 sps:$4 sm:$0xff]  }
  0x3b   : >> { %737 = vmatprep.subr.bf16.mxu1 %v3002_v46  ;;  %v3069_v45 = vld [vmem:[%s4260_s1 + $0x124] ss:$8 sps:$4 sm:$0xff]   ;;  %v3064_v46 = vld [vmem:[%s4260_s1 + $0x20] ss:$8 sps:$4 sm:$0xff]  }
  0x3d   : >> { %697 = vmatpush2.bf16.msra.mxu0 %v3004_v47  ;;  %v3067_v47 = vld [vmem:[%s4260_s1 + $0x120] ss:$8 sps:$4 sm:$0xff]  }
  0x3e   : >> { %738 = vmatpush2.bf16.msra.mxu1 %v3005_v51  ;;  %698 = vmatprep.subr.bf16.mxu0 %v3006_v52  ;;  %v3073_v51 = vld [vmem:[%s4260_s1 + $0x110] ss:$8 sps:$4 sm:$0xff]   ;;  %v3078_v52 = vld [vmem:[%s4260_s1 + $0x4] ss:$8 sps:$4 sm:$0xff]  }
  0x3f   : >> { %739 = vmatprep.subr.bf16.mxu1 %v3008_v54  ;;  %v3076_v54 = vld [vmem:[%s4260_s1] ss:$8 sps:$4 sm:$0xff]  }
  0x41   : >> { %699 = vmatpush2.bf16.msra.mxu0 %v3010_v60  ;;  %v3090_v60 = vld [vmem:[%s4260_s1 + $0xe4] ss:$8 sps:$4 sm:$0xff]  }
  0x42   : >> { %740 = vmatpush2.bf16.msra.mxu1 %v3011_v61  ;;  %700 = vmatprep.subr.bf16.mxu0 %v3012_v63  ;;  %v3093_v61 = vld [vmem:[%s4260_s1 + $0x1e4] ss:$8 sps:$4 sm:$0xff]   ;;  %v3091_v63 = vld [vmem:[%s4260_s1 + $0x1e0] ss:$8 sps:$4 sm:$0xff]  }
  0x43   : >> { %741 = vmatprep.subr.bf16.mxu1 %v3014_v1  ;;  %v3096_v1 = vld [vmem:[%s4260_s1 + $0xd4] ss:$8 sps:$4 sm:$0xff]  }
  0x45   : >> { %701 = vmatpush2.bf16.msra.mxu0 %v3016_v6  ;;  %v3097_v6 = vld [vmem:[%s4260_s1 + $0x1d0] ss:$8 sps:$4 sm:$0xff]  }
  0x46   : >> { %742 = vmatpush2.bf16.msra.mxu1 %v3017_v7  ;;  %702 = vmatprep.subr.bf16.mxu0 %v3018_v8  ;;  %v3102_v7 = vld [vmem:[%s4260_s1 + $0xc4] ss:$8 sps:$4 sm:$0xff]  }
  0x47   : >> { %743 = vmatprep.subr.bf16.mxu1 %v3020_v9  ;;  %v3105_v8 = vld [vmem:[%s4260_s1 + $0x1c4] ss:$8 sps:$4 sm:$0xff]   ;;  %v3100_v9 = vld [vmem:[%s4260_s1 + $0xc0] ss:$8 sps:$4 sm:$0xff]  }
  0x49   : >> { %703 = vmatpush2.bf16.msra.mxu0 %v3022_v12  ;;  %v3111_v12 = vld [vmem:[%s4260_s1 + $0x1b4] ss:$8 sps:$4 sm:$0xff]  }
  0x4a   : >> { %744 = vmatpush2.bf16.msra.mxu1 %v3023_v13  ;;  %704 = vmatprep.subr.bf16.mxu0 %v3024_v14  ;;  %v3106_v13 = vld [vmem:[%s4260_s1 + $0xb0] ss:$8 sps:$4 sm:$0xff]  }
  0x4b   : >> { %745 = vmatprep.subr.bf16.mxu1 %v3026_v15  ;;  %v3109_v14 = vld [vmem:[%s4260_s1 + $0x1b0] ss:$8 sps:$4 sm:$0xff]   ;;  %v3114_v15 = vld [vmem:[%s4260_s1 + $0xa4] ss:$8 sps:$4 sm:$0xff]  }
  0x4d   : >> { %705 = vmatpush2.bf16.msra.mxu0 %v3028_v20  ;;  %v3123_v20 = vld [vmem:[%s4260_s1 + $0x194] ss:$8 sps:$4 sm:$0xff]  }
  0x4e   : >> { %746 = vmatpush2.bf16.msra.mxu1 %v3029_v21  ;;  %1080 = vmatprep.subr.bf16.mxu0 %v3036_v22  ;;  %v3118_v21 = vld [vmem:[%s4260_s1 + $0x90] ss:$8 sps:$4 sm:$0xff]  }
  0x4f   : >> { %1121 = vmatprep.subr.bf16.mxu1 %v3039_v23  ;;  %v3121_v22 = vld [vmem:[%s4260_s1 + $0x190] ss:$8 sps:$4 sm:$0xff]   ;;  %v3126_v23 = vld [vmem:[%s4260_s1 + $0x84] ss:$8 sps:$4 sm:$0xff]  }
  0x50   : >> { %707 = vmatmul.mubr.bf16.vlgmr.msra.gmra.mxu0 %v328_v24  ;;  %v3129_v24 = vld [vmem:[%s4260_s1 + $0x184] ss:$8 sps:$4 sm:$0xff]  }
  0x51   : >> { %748 = vmatmul.mubr.bf16.vlgmr.msra.gmra.mxu1 %v342_v25  ;;  %1081 = vmatpush1.bf16.msra.mxu0 %v3034_v26  ;;  %v3124_v25 = vld [vmem:[%s4260_s1 + $0x80] ss:$8 sps:$4 sm:$0xff]  }
  0x52   : >> { %1122 = vmatpush1.bf16.msra.mxu1 %v3037_v27  ;;  %1082 = vmatprep.subr.bf16.mxu0 %v3042_v28  ;;  %v3127_v26 = vld [vmem:[%s4260_s1 + $0x180] ss:$8 sps:$4 sm:$0xff]   ;;  %v3132_v27 = vld [vmem:[%s4260_s1 + $0x474] ss:$8 sps:$4 sm:$0xff]  }
  0x53   : >> { %1123 = vmatprep.subr.bf16.mxu1 %v3045_v29  ;;  %1112 = vmatprep.mubr.bf16.mxu0 %v3544_v49  ;;  %v3075_v49 = vld [vmem:[%s4260_s1 + $0x114] ss:$8 sps:$4 sm:$0xff]   ;;  %v3130_v29 = vld [vmem:[%s4260_s1 + $0x470] ss:$8 sps:$4 sm:$0xff]  }
  0x54   : >> { %1153 = vmatprep.mubr.bf16.mxu1 %v3553_v53  ;;  %v3081_v53 = vld [vmem:[%s4260_s1 + $0x104] ss:$8 sps:$4 sm:$0xff]   ;;  %v3135_v28 = vld [vmem:[%s4260_s1 + $0x574] ss:$8 sps:$4 sm:$0xff]  }
  0x55   : >> { %1083 = vmatpush1.bf16.msra.mxu0 %v3040_v30  ;;  %v3133_v30 = vld [vmem:[%s4260_s1 + $0x570] ss:$8 sps:$4 sm:$0xff]  }
  0x56   : >> { %1124 = vmatpush1.bf16.msra.mxu1 %v3043_v31  ;;  %1084 = vmatprep.subr.bf16.mxu0 %v3048_v32  ;;  %v3138_v31 = vld [vmem:[%s4260_s1 + $0x464] ss:$8 sps:$4 sm:$0xff]  }
  0x57   : >> { %1125 = vmatprep.subr.bf16.mxu1 %v3051_v33  ;;  %v3141_v32 = vld [vmem:[%s4260_s1 + $0x564] ss:$8 sps:$4 sm:$0xff]   ;;  %v3825_v33 = vld [vmem:[%s3532_s19 + $0x10] sm:$0x77] }
  0x59   : >> { %1085 = vmatpush1.bf16.msra.mxu0 %v3046_v34  ;;  %v3828_v34 = vld [vmem:[%s3532_s19 + $0x18] sm:$0x77] }
  0x5a   : >> { %1126 = vmatpush1.bf16.msra.mxu1 %v3049_v35  ;;  %1086 = vmatprep.subr.bf16.mxu0 %v3054_v36  ;;  %v3136_v35 = vld [vmem:[%s4260_s1 + $0x460] ss:$8 sps:$4 sm:$0xff]  }
  0x5b   : >> { %1127 = vmatprep.subr.bf16.mxu1 %v3057_v37  ;;  %v3139_v36 = vld [vmem:[%s4260_s1 + $0x560] ss:$8 sps:$4 sm:$0xff]   ;;  %v3840_v37 = vcombine.high %v3825_v33, %v3825_v33 }
  0x5d   : >> { %1087 = vmatpush1.bf16.msra.mxu0 %v3052_v38  ;;  %v3147_v38 = vld [vmem:[%s4260_s1 + $0x554] ss:$8 sps:$4 sm:$0xff]  }
  0x5e   : >> { %1128 = vmatpush1.bf16.msra.mxu1 %v3055_v39  ;;  %1088 = vmatprep.subr.bf16.mxu0 %v3060_v40  ;;  %v3142_v39 = vld [vmem:[%s4260_s1 + $0x450] ss:$8 sps:$4 sm:$0xff]  }
  0x5f   : >> { %1129 = vmatprep.subr.bf16.mxu1 %v3063_v41  ;;  %v3145_v40 = vld [vmem:[%s4260_s1 + $0x550] ss:$8 sps:$4 sm:$0xff]   ;;  %v3150_v41 = vld [vmem:[%s4260_s1 + $0x444] ss:$8 sps:$4 sm:$0xff]  }
  0x61   : >> { %1089 = vmatpush1.bf16.msra.mxu0 %v3058_v42  ;;  %v3153_v42 = vld [vmem:[%s4260_s1 + $0x544] ss:$8 sps:$4 sm:$0xff]  }
  0x62   : >> { %1130 = vmatpush1.bf16.msra.mxu1 %v3061_v43  ;;  %1090 = vmatprep.subr.bf16.mxu0 %v3066_v44  ;;  %v3148_v43 = vld [vmem:[%s4260_s1 + $0x440] ss:$8 sps:$4 sm:$0xff]  }
  0x63   : >> { %1131 = vmatprep.subr.bf16.mxu1 %v3069_v45  ;;  %v3151_v44 = vld [vmem:[%s4260_s1 + $0x540] ss:$8 sps:$4 sm:$0xff]   ;;  %v3156_v45 = vld [vmem:[%s4260_s1 + $0x434] ss:$8 sps:$4 sm:$0xff]  }
  0x65   : >> { %1091 = vmatpush1.bf16.msra.mxu0 %v3064_v46  ;;  %v3159_v46 = vld [vmem:[%s4260_s1 + $0x534] ss:$8 sps:$4 sm:$0xff]  }
  0x66   : >> { %1132 = vmatpush1.bf16.msra.mxu1 %v3067_v47  ;;  %1092 = vmatprep.subr.bf16.mxu0 %v3072_v48  ;;  %v3154_v47 = vld [vmem:[%s4260_s1 + $0x430] ss:$8 sps:$4 sm:$0xff]  }
  0x67   : >> { %1133 = vmatprep.subr.bf16.mxu1 %v3075_v49  ;;  %v3157_v48 = vld [vmem:[%s4260_s1 + $0x530] ss:$8 sps:$4 sm:$0xff]   ;;  %v3162_v49 = vld [vmem:[%s4260_s1 + $0x424] ss:$8 sps:$4 sm:$0xff]  }
  0x69   : >> { %1093 = vmatpush1.bf16.msra.mxu0 %v3070_v50  ;;  %v3165_v50 = vld [vmem:[%s4260_s1 + $0x524] ss:$8 sps:$4 sm:$0xff]  }
  0x6a   : >> { %1134 = vmatpush1.bf16.msra.mxu1 %v3073_v51  ;;  %1094 = vmatprep.subr.bf16.mxu0 %v3078_v52  ;;  %v3160_v51 = vld [vmem:[%s4260_s1 + $0x420] ss:$8 sps:$4 sm:$0xff]  }
  0x6b   : >> { %1135 = vmatprep.subr.bf16.mxu1 %v3081_v53  ;;  %v3163_v52 = vld [vmem:[%s4260_s1 + $0x520] ss:$8 sps:$4 sm:$0xff]   ;;  %v3168_v53 = vld [vmem:[%s4260_s1 + $0x414] ss:$8 sps:$4 sm:$0xff]  }
  0x6d   : >> { %1095 = vmatpush1.bf16.msra.mxu0 %v3076_v54  ;;  %v3171_v54 = vld [vmem:[%s4260_s1 + $0x514] ss:$8 sps:$4 sm:$0xff]  }
  0x6e   : >> { %1136 = vmatpush1.bf16.msra.mxu1 %v3079_v55  ;;  %1096 = vmatprep.subr.bf16.mxu0 %v3084_v56  ;;  %v3166_v55 = vld [vmem:[%s4260_s1 + $0x410] ss:$8 sps:$4 sm:$0xff]  }
  0x6f   : >> { %1137 = vmatprep.subr.bf16.mxu1 %v3087_v57  ;;  %v3169_v56 = vld [vmem:[%s4260_s1 + $0x510] ss:$8 sps:$4 sm:$0xff]   ;;  %v3174_v57 = vld [vmem:[%s4260_s1 + $0x404] ss:$8 sps:$4 sm:$0xff]  }
  0x71   : >> { %1097 = vmatpush2.bf16.msra.mxu0 %v3082_v58  ;;  %v3177_v58 = vld [vmem:[%s4260_s1 + $0x504] ss:$8 sps:$4 sm:$0xff]  }
  0x72   : >> { %1138 = vmatpush2.bf16.msra.mxu1 %v3085_v59  ;;  %1098 = vmatprep.subr.bf16.mxu0 %v3090_v60  ;;  %v3172_v59 = vld [vmem:[%s4260_s1 + $0x400] ss:$8 sps:$4 sm:$0xff]  }
  0x73   : >> { %1139 = vmatprep.subr.bf16.mxu1 %v3093_v61  ;;  %v3175_v60 = vld [vmem:[%s4260_s1 + $0x500] ss:$8 sps:$4 sm:$0xff]   ;;  %v3180_v61 = vld [vmem:[%s4260_s1 + $0x4f4] ss:$8 sps:$4 sm:$0xff]  }
  0x75   : >> { %1099 = vmatpush2.bf16.msra.mxu0 %v3088_v62  ;;  %v3183_v62 = vld [vmem:[%s4260_s1 + $0x5f4] ss:$8 sps:$4 sm:$0xff]  }
  0x76   : >> { %1140 = vmatpush2.bf16.msra.mxu1 %v3091_v63  ;;  %1100 = vmatprep.subr.bf16.mxu0 %v3096_v1  ;;  %v3178_v63 = vld [vmem:[%s4260_s1 + $0x4f0] ss:$8 sps:$4 sm:$0xff]  }
  0x77   : >> { %1141 = vmatprep.subr.bf16.mxu1 %v3099_v2  ;;  %v3181_v1 = vld [vmem:[%s4260_s1 + $0x5f0] ss:$8 sps:$4 sm:$0xff]   ;;  %v3186_v2 = vld [vmem:[%s4260_s1 + $0x4e4] ss:$8 sps:$4 sm:$0xff]  }
  0x79   : >> { %1101 = vmatpush2.bf16.msra.mxu0 %v3094_v3  ;;  %v3189_v3 = vld [vmem:[%s4260_s1 + $0x5e4] ss:$8 sps:$4 sm:$0xff]  }
  0x7a   : >> { %1142 = vmatpush2.bf16.msra.mxu1 %v3097_v6  ;;  %1102 = vmatprep.subr.bf16.mxu0 %v3102_v7  ;;  %v3184_v6 = vld [vmem:[%s4260_s1 + $0x4e0] ss:$8 sps:$4 sm:$0xff]  }
  0x7b   : >> { %1143 = vmatprep.subr.bf16.mxu1 %v3105_v8  ;;  %v3187_v7 = vld [vmem:[%s4260_s1 + $0x5e0] ss:$8 sps:$4 sm:$0xff]   ;;  %v3192_v8 = vld [vmem:[%s4260_s1 + $0x4d4] ss:$8 sps:$4 sm:$0xff]  }
  0x7d   : >> { %1103 = vmatpush2.bf16.msra.mxu0 %v3100_v9  ;;  %v3195_v9 = vld [vmem:[%s4260_s1 + $0x5d4] ss:$8 sps:$4 sm:$0xff]  }
  0x7e   : >> { %1144 = vmatpush2.bf16.msra.mxu1 %v3103_v10  ;;  %1104 = vmatprep.subr.bf16.mxu0 %v3108_v11  ;;  %v3190_v10 = vld [vmem:[%s4260_s1 + $0x4d0] ss:$8 sps:$4 sm:$0xff]  }
  0x7f   : >> { %1145 = vmatprep.subr.bf16.mxu1 %v3111_v12  ;;  %v3193_v11 = vld [vmem:[%s4260_s1 + $0x5d0] ss:$8 sps:$4 sm:$0xff]   ;;  %v3198_v12 = vld [vmem:[%s4260_s1 + $0x4c4] ss:$8 sps:$4 sm:$0xff]  }
  0x81   : >> { %1105 = vmatpush2.bf16.msra.mxu0 %v3106_v13  ;;  %v3201_v13 = vld [vmem:[%s4260_s1 + $0x5c4] ss:$8 sps:$4 sm:$0xff]  }
  0x82   : >> { %1146 = vmatpush2.bf16.msra.mxu1 %v3109_v14  ;;  %1106 = vmatprep.subr.bf16.mxu0 %v3114_v15  ;;  %v3196_v14 = vld [vmem:[%s4260_s1 + $0x4c0] ss:$8 sps:$4 sm:$0xff]  }
  0x83   : >> { %1147 = vmatprep.subr.bf16.mxu1 %v3117_v16  ;;  %v3199_v15 = vld [vmem:[%s4260_s1 + $0x5c0] ss:$8 sps:$4 sm:$0xff]   ;;  %v3204_v16 = vld [vmem:[%s4260_s1 + $0x4b4] ss:$8 sps:$4 sm:$0xff]  }
  0x85   : >> { %1107 = vmatpush2.bf16.msra.mxu0 %v3112_v17  ;;  %v3207_v17 = vld [vmem:[%s4260_s1 + $0x5b4] ss:$8 sps:$4 sm:$0xff]  }
  0x86   : >> { %1148 = vmatpush2.bf16.msra.mxu1 %v3115_v18  ;;  %1108 = vmatprep.subr.bf16.mxu0 %v3120_v19  ;;  %v3202_v18 = vld [vmem:[%s4260_s1 + $0x4b0] ss:$8 sps:$4 sm:$0xff]  }
  0x87   : >> { %1149 = vmatprep.subr.bf16.mxu1 %v3123_v20  ;;  %v3205_v19 = vld [vmem:[%s4260_s1 + $0x5b0] ss:$8 sps:$4 sm:$0xff]   ;;  %v3210_v20 = vld [vmem:[%s4260_s1 + $0x4a4] ss:$8 sps:$4 sm:$0xff]  }
  0x89   : >> { %1109 = vmatpush2.bf16.msra.mxu0 %v3118_v21  ;;  %v3213_v21 = vld [vmem:[%s4260_s1 + $0x5a4] ss:$8 sps:$4 sm:$0xff]  }
  0x8a   : >> { %1150 = vmatpush2.bf16.msra.mxu1 %v3121_v22  ;;  %1110 = vmatprep.subr.bf16.mxu0 %v3126_v23  ;;  %v3208_v22 = vld [vmem:[%s4260_s1 + $0x4a0] ss:$8 sps:$4 sm:$0xff]  }
  0x8b   : >> { %1151 = vmatprep.subr.bf16.mxu1 %v3129_v24  ;;  %v3211_v23 = vld [vmem:[%s4260_s1 + $0x5a0] ss:$8 sps:$4 sm:$0xff]   ;;  %v3216_v24 = vld [vmem:[%s4260_s1 + $0x494] ss:$8 sps:$4 sm:$0xff]  }
  0x8d   : >> { %1111 = vmatpush2.bf16.msra.mxu0 %v3124_v25  ;;  %v3219_v25 = vld [vmem:[%s4260_s1 + $0x594] ss:$8 sps:$4 sm:$0xff]  }
  0x8e   : >> { %1152 = vmatpush2.bf16.msra.mxu1 %v3127_v26  ;;  %1567 = vmatprep.subr.bf16.mxu0 %v3132_v27  ;;  %v3214_v26 = vld [vmem:[%s4260_s1 + $0x490] ss:$8 sps:$4 sm:$0xff]  }
  0x8f   : >> { %1608 = vmatprep.subr.bf16.mxu1 %v3135_v28  ;;  %v3217_v27 = vld [vmem:[%s4260_s1 + $0x590] ss:$8 sps:$4 sm:$0xff]   ;;  %v3222_v28 = vld [vmem:[%s4260_s1 + $0x484] ss:$8 sps:$4 sm:$0xff]  }
  0x90   : >> { %1113 = vmatmul.mubr.bf16.vlgmr.msra.gmra.mxu0 %v3574_v4  ;;  %v3144_v4 = vld [vmem:[%s4260_s1 + $0x454] ss:$8 sps:$4 sm:$0xff]  }
  0x91   : >> { %1154 = vmatmul.mubr.bf16.vlgmr.msra.gmra.mxu1 %v3576_v5  ;;  %1568 = vmatpush1.bf16.msra.mxu0 %v3130_v29  ;;  %v3847_v5 = vcombine.high %v3828_v34, %v3828_v34  ;;  %v3225_v29 = vld [vmem:[%s4260_s1 + $0x584] ss:$8 sps:$4 sm:$0xff]  }
  0x92   : >> { %1609 = vmatpush1.bf16.msra.mxu1 %v3133_v30  ;;  %1569 = vmatprep.subr.bf16.mxu0 %v3138_v31  ;;  %v1726_v30 = vshll.u32 %v3840_v37, 16 }
  0x93   : >> { %1610 = vmatprep.subr.bf16.mxu1 %v3141_v32  ;;  %1599 = vmatprep.mubr.bf16.mxu0 %v3840_v37  ;;  %v1740_v31 = vshll.u32 %v3847_v5, 16  ;;  %v3220_v32 = vld [vmem:[%s4260_s1 + $0x480] ss:$8 sps:$4 sm:$0xff]  }
  0x94   : >> { %1640 = vmatprep.mubr.bf16.mxu1 %v3847_v5 }
  0x95   : >> { %1570 = vmatpush1.bf16.msra.mxu0 %v3136_v35  ;;  %v3223_v35 = vld [vmem:[%s4260_s1 + $0x580] ss:$8 sps:$4 sm:$0xff]  }
  0x96   : >> { %1611 = vmatpush1.bf16.msra.mxu1 %v3139_v36  ;;  %1571 = vmatprep.subr.bf16.mxu0 %v3144_v4  ;;  %v3232_v36 = vld [vmem:[%s4260_s1 + $0x674] ss:$8 sps:$4 sm:$0xff]  }
  0x97   : >> { %1612 = vmatprep.subr.bf16.mxu1 %v3147_v38  ;;  %v3235_v4 = vld [vmem:[%s4260_s1 + $0x774] ss:$8 sps:$4 sm:$0xff]   ;;  %v1724_v38 = vshrl.u32 %v3840_v37, 16  ;;  %v3233_v37 = vld [vmem:[%s4260_s1 + $0x770] ss:$8 sps:$4 sm:$0xff]  }
  0x99   : >> { %1572 = vmatpush1.bf16.msra.mxu0 %v3142_v39  ;;  %v1728_v39 = vrot.slane %v1726_v30, 1  ;;  %v3305_v30 = vld [vmem:[%s4260_s1 + $0x7b0] ss:$8 sps:$4 sm:$0xff]  }
  0x9a   : >> { %1613 = vmatpush1.bf16.msra.mxu1 %v3145_v40  ;;  %1573 = vmatprep.subr.bf16.mxu0 %v3150_v41  ;;  %v1738_v40 = vshrl.u32 %v3847_v5, 16  ;;  %v1742_v41 = vrot.slane %v1740_v31, 1  ;;  %v3310_v31 = vld [vmem:[%s4260_s1 + $0x6a4] ss:$8 sps:$4 sm:$0xff]  }
  0x9b   : >> { %1614 = vmatprep.subr.bf16.mxu1 %v3153_v42  ;;  %v4028_v42 = vcombine.low %v3825_v33, %v3825_v33  ;;  %v3238_v33 = vld [vmem:[%s4260_s1 + $0x664] ss:$8 sps:$4 sm:$0xff]   ;;  %v1729_v5 = vor.u32 %v1728_v39, %v1724_v38  ;;  %v3319_v38 = vld [vmem:[%s4260_s1 + $0x794] ss:$8 sps:$4 sm:$0xff]  }
  0x9d   : >> { %1574 = vmatpush1.bf16.msra.mxu0 %v3148_v43  ;;  %v4032_v43 = vcombine.low %v3828_v34, %v3828_v34  ;;  %v3241_v34 = vld [vmem:[%s4260_s1 + $0x764] ss:$8 sps:$4 sm:$0xff]   ;;  %v1719_v39 = vshll.u32 %v4028_v42, 16 }
  0x9e   : >> { %1615 = vmatpush1.bf16.msra.mxu1 %v3151_v44  ;;  %1575 = vmatprep.subr.bf16.mxu0 %v3156_v45  ;;  %v3230_v44 = vld [vmem:[%s4260_s1 + $0x670] ss:$8 sps:$4 sm:$0xff]   ;;  %v1743_v45 = vor.u32 %v1742_v41, %v1738_v40 }
  0x9f   : >> { %1616 = vmatprep.subr.bf16.mxu1 %v3159_v46  ;;  %v3236_v46 = vld [vmem:[%s4260_s1 + $0x660] ss:$8 sps:$4 sm:$0xff]   ;;  %v1733_v40 = vshll.u32 %v4032_v43, 16  ;;  %v3314_v41 = vld [vmem:[%s4260_s1 + $0x690] ss:$8 sps:$4 sm:$0xff]  }
  0xa1   : >> { %1576 = vmatpush1.bf16.msra.mxu0 %v3154_v47  ;;  %v3239_v47 = vld [vmem:[%s4260_s1 + $0x760] ss:$8 sps:$4 sm:$0xff]  }
  0xa2   : >> { %1617 = vmatpush1.bf16.msra.mxu1 %v3157_v48  ;;  %1577 = vmatprep.subr.bf16.mxu0 %v3162_v49  ;;  %v3244_v48 = vld [vmem:[%s4260_s1 + $0x654] ss:$8 sps:$4 sm:$0xff]  }
  0xa3   : >> { %1618 = vmatprep.subr.bf16.mxu1 %v3165_v50  ;;  %v3247_v49 = vld [vmem:[%s4260_s1 + $0x754] ss:$8 sps:$4 sm:$0xff]   ;;  %v3242_v50 = vld [vmem:[%s4260_s1 + $0x650] ss:$8 sps:$4 sm:$0xff]  }
  0xa5   : >> { %1578 = vmatpush1.bf16.msra.mxu0 %v3160_v51  ;;  %v3245_v51 = vld [vmem:[%s4260_s1 + $0x750] ss:$8 sps:$4 sm:$0xff]  }
  0xa6   : >> { %1619 = vmatpush1.bf16.msra.mxu1 %v3163_v52  ;;  %1579 = vmatprep.subr.bf16.mxu0 %v3168_v53  ;;  %v3250_v52 = vld [vmem:[%s4260_s1 + $0x644] ss:$8 sps:$4 sm:$0xff]  }
  0xa7   : >> { %1620 = vmatprep.subr.bf16.mxu1 %v3171_v54  ;;  %v3253_v53 = vld [vmem:[%s4260_s1 + $0x744] ss:$8 sps:$4 sm:$0xff]   ;;  %v3248_v54 = vld [vmem:[%s4260_s1 + $0x640] ss:$8 sps:$4 sm:$0xff]  }
  0xa9   : >> { %1580 = vmatpush1.bf16.msra.mxu0 %v3166_v55  ;;  %v3251_v55 = vld [vmem:[%s4260_s1 + $0x740] ss:$8 sps:$4 sm:$0xff]  }
  0xaa   : >> { %1621 = vmatpush1.bf16.msra.mxu1 %v3169_v56  ;;  %1581 = vmatprep.subr.bf16.mxu0 %v3174_v57  ;;  %v3256_v56 = vld [vmem:[%s4260_s1 + $0x634] ss:$8 sps:$4 sm:$0xff]  }
  0xab   : >> { %1622 = vmatprep.subr.bf16.mxu1 %v3177_v58  ;;  %v3259_v57 = vld [vmem:[%s4260_s1 + $0x734] ss:$8 sps:$4 sm:$0xff]   ;;  %v3254_v58 = vld [vmem:[%s4260_s1 + $0x630] ss:$8 sps:$4 sm:$0xff]  }
  0xad   : >> { %1582 = vmatpush1.bf16.msra.mxu0 %v3172_v59  ;;  %v3257_v59 = vld [vmem:[%s4260_s1 + $0x730] ss:$8 sps:$4 sm:$0xff]  }
  0xae   : >> { %1623 = vmatpush1.bf16.msra.mxu1 %v3175_v60  ;;  %1583 = vmatprep.subr.bf16.mxu0 %v3180_v61  ;;  %v3262_v60 = vld [vmem:[%s4260_s1 + $0x624] ss:$8 sps:$4 sm:$0xff]  }
  0xaf   : >> { %1624 = vmatprep.subr.bf16.mxu1 %v3183_v62  ;;  %v3265_v61 = vld [vmem:[%s4260_s1 + $0x724] ss:$8 sps:$4 sm:$0xff]   ;;  %v3260_v62 = vld [vmem:[%s4260_s1 + $0x620] ss:$8 sps:$4 sm:$0xff]  }
  0xb1   : >> { %1584 = vmatpush2.bf16.msra.mxu0 %v3178_v63  ;;  %v3263_v63 = vld [vmem:[%s4260_s1 + $0x720] ss:$8 sps:$4 sm:$0xff]  }
  0xb2   : >> { %1625 = vmatpush2.bf16.msra.mxu1 %v3181_v1  ;;  %1585 = vmatprep.subr.bf16.mxu0 %v3186_v2  ;;  %v3268_v1 = vld [vmem:[%s4260_s1 + $0x614] ss:$8 sps:$4 sm:$0xff]  }
  0xb3   : >> { %1626 = vmatprep.subr.bf16.mxu1 %v3189_v3  ;;  %v3271_v2 = vld [vmem:[%s4260_s1 + $0x714] ss:$8 sps:$4 sm:$0xff]   ;;  %v3266_v3 = vld [vmem:[%s4260_s1 + $0x610] ss:$8 sps:$4 sm:$0xff]  }
  0xb5   : >> { %1586 = vmatpush2.bf16.msra.mxu0 %v3184_v6  ;;  %v3269_v6 = vld [vmem:[%s4260_s1 + $0x710] ss:$8 sps:$4 sm:$0xff]  }
  0xb6   : >> { %1627 = vmatpush2.bf16.msra.mxu1 %v3187_v7  ;;  %1587 = vmatprep.subr.bf16.mxu0 %v3192_v8  ;;  %v3274_v7 = vld [vmem:[%s4260_s1 + $0x604] ss:$8 sps:$4 sm:$0xff]  }
  0xb7   : >> { %1628 = vmatprep.subr.bf16.mxu1 %v3195_v9  ;;  %v3277_v8 = vld [vmem:[%s4260_s1 + $0x704] ss:$8 sps:$4 sm:$0xff]   ;;  %v3272_v9 = vld [vmem:[%s4260_s1 + $0x600] ss:$8 sps:$4 sm:$0xff]  }
  0xb9   : >> { %1588 = vmatpush2.bf16.msra.mxu0 %v3190_v10  ;;  %v3275_v10 = vld [vmem:[%s4260_s1 + $0x700] ss:$8 sps:$4 sm:$0xff]  }
  0xba   : >> { %1629 = vmatpush2.bf16.msra.mxu1 %v3193_v11  ;;  %1589 = vmatprep.subr.bf16.mxu0 %v3198_v12  ;;  %v3280_v11 = vld [vmem:[%s4260_s1 + $0x6f4] ss:$8 sps:$4 sm:$0xff]  }
  0xbb   : >> { %1630 = vmatprep.subr.bf16.mxu1 %v3201_v13  ;;  %v3283_v12 = vld [vmem:[%s4260_s1 + $0x7f4] ss:$8 sps:$4 sm:$0xff]   ;;  %v3278_v13 = vld [vmem:[%s4260_s1 + $0x6f0] ss:$8 sps:$4 sm:$0xff]  }
  0xbd   : >> { %1590 = vmatpush2.bf16.msra.mxu0 %v3196_v14  ;;  %v3281_v14 = vld [vmem:[%s4260_s1 + $0x7f0] ss:$8 sps:$4 sm:$0xff]  }
  0xbe   : >> { %1631 = vmatpush2.bf16.msra.mxu1 %v3199_v15  ;;  %1591 = vmatprep.subr.bf16.mxu0 %v3204_v16  ;;  %v3286_v15 = vld [vmem:[%s4260_s1 + $0x6e4] ss:$8 sps:$4 sm:$0xff]  }
  0xbf   : >> { %1632 = vmatprep.subr.bf16.mxu1 %v3207_v17  ;;  %v3289_v16 = vld [vmem:[%s4260_s1 + $0x7e4] ss:$8 sps:$4 sm:$0xff]   ;;  %v3284_v17 = vld [vmem:[%s4260_s1 + $0x6e0] ss:$8 sps:$4 sm:$0xff]  }
  0xc1   : >> { %1592 = vmatpush2.bf16.msra.mxu0 %v3202_v18  ;;  %v3287_v18 = vld [vmem:[%s4260_s1 + $0x7e0] ss:$8 sps:$4 sm:$0xff]  }
  0xc2   : >> { %1633 = vmatpush2.bf16.msra.mxu1 %v3205_v19  ;;  %1593 = vmatprep.subr.bf16.mxu0 %v3210_v20  ;;  %v3292_v19 = vld [vmem:[%s4260_s1 + $0x6d4] ss:$8 sps:$4 sm:$0xff]  }
  0xc3   : >> { %1634 = vmatprep.subr.bf16.mxu1 %v3213_v21  ;;  %v3295_v20 = vld [vmem:[%s4260_s1 + $0x7d4] ss:$8 sps:$4 sm:$0xff]   ;;  %v3290_v21 = vld [vmem:[%s4260_s1 + $0x6d0] ss:$8 sps:$4 sm:$0xff]  }
  0xc5   : >> { %1594 = vmatpush2.bf16.msra.mxu0 %v3208_v22  ;;  %v3293_v22 = vld [vmem:[%s4260_s1 + $0x7d0] ss:$8 sps:$4 sm:$0xff]  }
  0xc6   : >> { %1635 = vmatpush2.bf16.msra.mxu1 %v3211_v23  ;;  %1595 = vmatprep.subr.bf16.mxu0 %v3216_v24  ;;  %v3298_v23 = vld [vmem:[%s4260_s1 + $0x6c4] ss:$8 sps:$4 sm:$0xff]  }
  0xc7   : >> { %1636 = vmatprep.subr.bf16.mxu1 %v3219_v25  ;;  %v3301_v24 = vld [vmem:[%s4260_s1 + $0x7c4] ss:$8 sps:$4 sm:$0xff]   ;;  %v3296_v25 = vld [vmem:[%s4260_s1 + $0x6c0] ss:$8 sps:$4 sm:$0xff]  }
  0xc9   : >> { %1596 = vmatpush2.bf16.msra.mxu0 %v3214_v26  ;;  %v3299_v26 = vld [vmem:[%s4260_s1 + $0x7c0] ss:$8 sps:$4 sm:$0xff]  }
  0xca   : >> { %1637 = vmatpush2.bf16.msra.mxu1 %v3217_v27  ;;  %1597 = vmatprep.subr.bf16.mxu0 %v3222_v28  ;;  %v3304_v27 = vld [vmem:[%s4260_s1 + $0x6b4] ss:$8 sps:$4 sm:$0xff]  }
  0xcb   : >> { %1638 = vmatprep.subr.bf16.mxu1 %v3225_v29  ;;  %v3307_v28 = vld [vmem:[%s4260_s1 + $0x7b4] ss:$8 sps:$4 sm:$0xff]   ;;  %v3302_v29 = vld [vmem:[%s4260_s1 + $0x6b0] ss:$8 sps:$4 sm:$0xff]  }
  0xcd   : >> { %1598 = vmatpush2.bf16.msra.mxu0 %v3220_v32  ;;  %v3313_v32 = vld [vmem:[%s4260_s1 + $0x7a4] ss:$8 sps:$4 sm:$0xff]  }
  0xce   : >> { %1639 = vmatpush2.bf16.msra.mxu1 %v3223_v35  ;;  %2068 = vmatprep.subr.bf16.mxu0 %v3232_v36  ;;  %v3308_v35 = vld [vmem:[%s4260_s1 + $0x6a0] ss:$8 sps:$4 sm:$0xff]  }
  0xcf   : >> { %2109 = vmatprep.subr.bf16.mxu1 %v3235_v4  ;;  %v3311_v36 = vld [vmem:[%s4260_s1 + $0x7a0] ss:$8 sps:$4 sm:$0xff]   ;;  %v3316_v4 = vld [vmem:[%s4260_s1 + $0x694] ss:$8 sps:$4 sm:$0xff]  }
  0xd0   : >> { %1600 = vmatmul.mubr.bf16.vlgmr.msra.gmra.mxu0 %v4028_v42 }
  0xd1   : >> { %1641 = vmatmul.mubr.bf16.vlgmr.msra.gmra.mxu1 %v4032_v43  ;;  %2069 = vmatpush1.bf16.msra.mxu0 %v3230_v44  ;;  %v3317_v44 = vld [vmem:[%s4260_s1 + $0x790] ss:$8 sps:$4 sm:$0xff]  }
  0xd2   : >> { %2110 = vmatpush1.bf16.msra.mxu1 %v3233_v37  ;;  %2070 = vmatprep.subr.bf16.mxu0 %v3238_v33  ;;  %v3322_v37 = vld [vmem:[%s4260_s1 + $0x684] ss:$8 sps:$4 sm:$0xff]  }
  0xd3   : >> { %2111 = vmatprep.subr.bf16.mxu1 %v3241_v34  ;;  %2100 = vmatprep.mubr.bf16.mxu0 %v1729_v5  ;;  %v3325_v33 = vld [vmem:[%s4260_s1 + $0x784] ss:$8 sps:$4 sm:$0xff]   ;;  %v1717_v34 = vshrl.u32 %v4028_v42, 16  ;;  %v1721_v5 = vrot.slane %v1719_v39, 1 }
  0xd4   : >> { %2141 = vmatprep.mubr.bf16.mxu1 %v1743_v45  ;;  %v1731_v45 = vshrl.u32 %v4032_v43, 16 }
  0xd5   : >> { %2071 = vmatpush1.bf16.msra.mxu0 %v3236_v46  ;;  %v1735_v46 = vrot.slane %v1733_v40, 1 }
  0xd6   : >> { %2112 = vmatpush1.bf16.msra.mxu1 %v3239_v47  ;;  %2072 = vmatprep.subr.bf16.mxu0 %v3244_v48  ;;  %v3320_v47 = vld [vmem:[%s4260_s1 + $0x680] ss:$8 sps:$4 sm:$0xff]  }
  0xd7   : >> { %2113 = vmatprep.subr.bf16.mxu1 %v3247_v49  ;;  %v3323_v48 = vld [vmem:[%s4260_s1 + $0x780] ss:$8 sps:$4 sm:$0xff]   ;;  %v1722_v49 = vor.u32 %v1721_v5, %v1717_v34 }
  0xd9   : >> { %2073 = vmatpush1.bf16.msra.mxu0 %v3242_v50  ;;  %v1736_v50 = vor.u32 %v1735_v46, %v1731_v45 }
  0xda   : >> { %2114 = vmatpush1.bf16.msra.mxu1 %v3245_v51  ;;  %2074 = vmatprep.subr.bf16.mxu0 %v3250_v52 }
  0xdb   : >> { %2115 = vmatprep.subr.bf16.mxu1 %v3253_v53 }
  0xdd   : >> { %2075 = vmatpush1.bf16.msra.mxu0 %v3248_v54 }
  0xde   : >> { %2116 = vmatpush1.bf16.msra.mxu1 %v3251_v55  ;;  %2076 = vmatprep.subr.bf16.mxu0 %v3256_v56 }
  0xdf   : >> { %2117 = vmatprep.subr.bf16.mxu1 %v3259_v57 }
  0xe1   : >> { %2077 = vmatpush1.bf16.msra.mxu0 %v3254_v58 }
  0xe2   : >> { %2118 = vmatpush1.bf16.msra.mxu1 %v3257_v59  ;;  %2078 = vmatprep.subr.bf16.mxu0 %v3262_v60 }
  0xe3   : >> { %2119 = vmatprep.subr.bf16.mxu1 %v3265_v61 }
  0xe5   : >> { %2079 = vmatpush1.bf16.msra.mxu0 %v3260_v62 }
  0xe6   : >> { %2120 = vmatpush1.bf16.msra.mxu1 %v3263_v63  ;;  %2080 = vmatprep.subr.bf16.mxu0 %v3268_v1 }
  0xe7   : >> { %2121 = vmatprep.subr.bf16.mxu1 %v3271_v2 }
  0xe9   : >> { %2081 = vmatpush1.bf16.msra.mxu0 %v3266_v3 }
  0xea   : >> { %2122 = vmatpush1.bf16.msra.mxu1 %v3269_v6  ;;  %2082 = vmatprep.subr.bf16.mxu0 %v3274_v7 }
  0xeb   : >> { %2123 = vmatprep.subr.bf16.mxu1 %v3277_v8 }
  0xed   : >> { %2083 = vmatpush1.bf16.msra.mxu0 %v3272_v9 }
  0xee   : >> { %2124 = vmatpush1.bf16.msra.mxu1 %v3275_v10  ;;  %2084 = vmatprep.subr.bf16.mxu0 %v3280_v11 }
  0xef   : >> { %2125 = vmatprep.subr.bf16.mxu1 %v3283_v12 }
  0xf1   : >> { %2085 = vmatpush2.bf16.msra.mxu0 %v3278_v13 }
  0xf2   : >> { %2126 = vmatpush2.bf16.msra.mxu1 %v3281_v14  ;;  %2086 = vmatprep.subr.bf16.mxu0 %v3286_v15 }
  0xf3   : >> { %2127 = vmatprep.subr.bf16.mxu1 %v3289_v16 }
  0xf5   : >> { %2087 = vmatpush2.bf16.msra.mxu0 %v3284_v17 }
  0xf6   : >> { %2128 = vmatpush2.bf16.msra.mxu1 %v3287_v18  ;;  %2088 = vmatprep.subr.bf16.mxu0 %v3292_v19 }
  0xf7   : >> { %2129 = vmatprep.subr.bf16.mxu1 %v3295_v20  ;;  %v2153_v20 = vlaneseq }
  0xf9   : >> { %2089 = vmatpush2.bf16.msra.mxu0 %v3290_v21  ;;  %v2154_v21 = vshrl.u32 %v2153_v20, 7 }
  0xfa   : >> { %2130 = vmatpush2.bf16.msra.mxu1 %v3293_v22  ;;  %2090 = vmatprep.subr.bf16.mxu0 %v3298_v23 }
  0xfb   : >> { %2131 = vmatprep.subr.bf16.mxu1 %v3301_v24  ;;  %v2155_v22 = vsub.s32 0, %v2154_v21  ;;  %v2159_v24 = vsub.s32 1, %v2154_v21 }
  0xfd   : >> { %2091 = vmatpush2.bf16.msra.mxu0 %v3296_v25 }
  0xfe   : >> { %2132 = vmatpush2.bf16.msra.mxu1 %v3299_v26  ;;  %2092 = vmatprep.subr.bf16.mxu0 %v3304_v27 }
  0xff   : >> { %2133 = vmatprep.subr.bf16.mxu1 %v3307_v28  ;;  %v2156_v28 = vrot.slane %v3381_v0, %v2155_v22 }
 0x101   : >> { %2093 = vmatpush2.bf16.msra.mxu0 %v3302_v29 }
 0x102   : >> { %2134 = vmatpush2.bf16.msra.mxu1 %v3305_v30  ;;  %2094 = vmatprep.subr.bf16.mxu0 %v3310_v31 }
 0x103   : >> { %2135 = vmatprep.subr.bf16.mxu1 %v3313_v32 }
 0x105   : >> { %2095 = vmatpush2.bf16.msra.mxu0 %v3308_v35 }
 0x106   : >> { %2136 = vmatpush2.bf16.msra.mxu1 %v3311_v36  ;;  %2096 = vmatprep.subr.bf16.mxu0 %v3316_v4  ;;  %v2160_v36 = vrot.slane %v3381_v0, %v2159_v24 }
 0x107   : >> { %2137 = vmatprep.subr.bf16.mxu1 %v3319_v38 }
 0x109   : >> { %2097 = vmatpush2.bf16.msra.mxu0 %v3314_v41 }
 0x10a   : >> { %2138 = vmatpush2.bf16.msra.mxu1 %v3317_v44  ;;  %2098 = vmatprep.subr.bf16.mxu0 %v3322_v37 }
 0x10b   : >> { %2139 = vmatprep.subr.bf16.mxu1 %v3325_v33 }
 0x10d   : >> { %2099 = vmatpush2.bf16.msra.mxu0 %v3320_v47 }
 0x10e   : >> { %2140 = vmatpush2.bf16.msra.mxu1 %v3323_v48 }
 0x110   : >> { %v708_v42 = vpop.f32.mrf.mxu0  ;;  %2101 = vmatmul.mubr.bf16.vlgmr.msra.gmra.mxu0 %v1722_v49 }
 0x111   : >> { %v749_v51 = vpop.f32.mrf.mxu1  ;;  %2142 = vmatmul.mubr.bf16.vlgmr.msra.gmra.mxu1 %v1736_v50 }
 0x112   : >> { %v750_v43 = vadd.f32 %v749_v51, %v708_v42  ;;  %v710_v52 = vpop.f32.mrf.mxu0 }
 0x113   : >> { %v751_v53 = vpop.f32.mrf.mxu1 }
 0x114   : >> { %v752_v54 = vadd.f32 %v751_v53, %v710_v52  ;;  %v712_v55 = vpop.f32.mrf.mxu0 }
 0x115   : >> { %v753_v56 = vpop.f32.mrf.mxu1 }
 0x116   : >> { %v713_v57 = vpop.f32.mrf.mxu0 }
 0x117   : >> { %v754_v58 = vpop.f32.mrf.mxu1 }
 0x150   : >> { %v1114_v59 = vpop.f32.mrf.mxu0 }
 0x151   : >> { %v1155_v60 = vpop.f32.mrf.mxu1  ;;  %v1115_v61 = vadd.f32 %v1114_v59, %v750_v43 }
 0x152   : >> { %v1116_v62 = vpop.f32.mrf.mxu0 }
 0x153   : >> { %v1157_v63 = vpop.f32.mrf.mxu1  ;;  %v1156_v1 = vadd.f32 %v1155_v60, %v1115_v61  ;;  %v1117_v2 = vadd.f32 %v1116_v62, %v752_v54 }
 0x154   : >> { %v1118_v3 = vpop.f32.mrf.mxu0 }
 0x155   : >> { %v1159_v6 = vpop.f32.mrf.mxu1  ;;  %v1158_v7 = vadd.f32 %v1157_v63, %v1117_v2 }
 0x156   : >> { %v1119_v8 = vpop.f32.mrf.mxu0 }
 0x157   : >> { %v1160_v9 = vpop.f32.mrf.mxu1 }
 0x190   : >> { %v1601_v10 = vpop.f32.mrf.mxu0 }
 0x191   : >> { %v1642_v11 = vpop.f32.mrf.mxu1 }
 0x192   : >> { %v1643_v12 = vadd.f32 %v1642_v11, %v1601_v10  ;;  %v1603_v13 = vpop.f32.mrf.mxu0 }
 0x193   : >> { %v1644_v14 = vpop.f32.mrf.mxu1 }
 0x194   : >> { %v1649_v15 = vadd.f32 %v1643_v12, %v1156_v1  ;;  %v1605_v16 = vpop.f32.mrf.mxu0  ;;  %v1645_v23 = vadd.f32 %v1644_v14, %v1603_v13 }
 0x195   : >> { %v1646_v17 = vpop.f32.mrf.mxu1 }
 0x196   : >> { %v1606_v18 = vpop.f32.mrf.mxu0  ;;  %v1650_v31 = vadd.f32 %v1645_v23, %v1158_v7 }
 0x197   : >> { %v1647_v19 = vpop.f32.mrf.mxu1 }
 0x1d0   : >> { %v2102_v25 = vpop.f32.mrf.mxu0 }
 0x1d1   : >> { %v2143_v26 = vpop.f32.mrf.mxu1 }
 0x1d2   : >> { %v2144_v27 = vadd.f32 %v2143_v26, %v2102_v25  ;;  %v2104_v29 = vpop.f32.mrf.mxu0 }
 0x1d3   : >> { %v2145_v30 = vpop.f32.mrf.mxu1 }
 0x1d4   : >> { %v2150_v32 = vadd.f32 %v2144_v27, %v1649_v15  ;;  %v2146_v35 = vadd.f32 %v2145_v30, %v2104_v29  ;;  %v2106_v4 = vpop.f32.mrf.mxu0 }
 0x1d5   : >> { %v2147_v38 = vpop.f32.mrf.mxu1 }
 0x1d6   : >> { %v2151_v39 = vadd.f32 %v2146_v35, %v1650_v31  ;;  %v2107_v40 = vpop.f32.mrf.mxu0  ;;  %v2163_v44 = vadd.f32 %v2156_v28, %v2150_v32 }
 0x1d7   : >> { %v2148_v41 = vpop.f32.mrf.mxu1 }
 0x1d8   : >> { %v2164_v37 = vadd.f32 %v2160_v36, %v2151_v39  ;;  %176 = sbr.rel (!%p174_p4) target bundleno = 15 (0xf), region = 75 }
 0x1da   : >> { %v2167_v33 = vcombine.low %v2163_v44, %v2164_v37 }
 0x1dc   : >> { %2172 = vst [vmem:[%s2171_s15] sm:$0xff] %v2167_v33 }
 0x1e3   : > { %v2173_v34 = vld [vmem:[#allocation2] sm:$0xff]  ;;  %v2174_v5 = vld [vmem:[#allocation2 + $0x8] sm:$0xff]  ;;  %v2175_v45 = vld [vmem:[#allocation2 + $0x10] sm:$0xff] }
 0x1e4   : > { %v2176_v46 = vld [vmem:[#allocation2 + $0x18] sm:$0xff]  ;;  %v2181_v47 = vcombine.high %v2173_v34, %v2173_v34  ;;  %v2182_v48 = vcombine.high %v2174_v5, %v2174_v5  ;;  %v2183_v49 = vcombine.high %v2175_v45, %v2175_v45  ;;  %v2190_v50 = vsel %vm2189_vm0, %v2173_v34, 0.0 }
 0x1e5   : > { %v2184_v42 = vcombine.high %v2176_v46, %v2176_v46  ;;  %v2191_v51 = vsel %vm2189_vm0, %v2174_v5, 0.0  ;;  %v2193_v43 = vsel %vm2189_vm0, %v2175_v45, 0.0  ;;  %v2195_v55 = vsel %vm2189_vm0, %v2176_v46, 0.0 }
 0x1e6   : > { %v2192_v52 = vadd.f32 %v2191_v51, %v2190_v50  ;;  %v2197_v53 = vsel %vm2189_vm0, %v2181_v47, 0.0  ;;  %v2198_v54 = vsel %vm2189_vm0, %v2182_v48, 0.0  ;;  %v2200_v0 = vsel %vm2189_vm0, %v2183_v49, 0.0 }
 0x1e7   : > { %v2199_v56 = vadd.f32 %v2198_v54, %v2197_v53  ;;  %v2202_v58 = vsel %vm2189_vm0, %v2184_v42, 0.0 }
 0x1e8   : > { %v2194_v57 = vadd.f32 %v2193_v43, %v2192_v52 }
 0x1e9   : > { %v2201_v59 = vadd.f32 %v2200_v0, %v2199_v56 }
 0x1ea   : > { %v2196_v60 = vadd.f32 %v2195_v55, %v2194_v57 }
 0x1eb   : > { %v2203_v61 = vadd.f32 %v2202_v58, %v2201_v59 }
 0x1ec   : > { %v2204_v62 = vsel %vm2189_vm0, %v2196_v60, 0.0 }
 0x1ed   : > { %v2205_v63 = vrot.slane %v2204_v62, 4  ;;  %v2211_v1 = vsel %vm2189_vm0, %v2203_v61, 0.0 }
 0x1ee   : > { %v2212_v2 = vrot.slane %v2211_v1, 4 }
 0x1ef   : > { %v2206_v3 = vadd.f32 %v2205_v63, %v2204_v62 }
 0x1f0   : > { %v2213_v6 = vadd.f32 %v2212_v2, %v2211_v1 }
 0x1f1   : > { %v2207_v7 = vrot.slane %v2206_v3, 2 }
 0x1f2   : > { %v2214_v8 = vrot.slane %v2213_v6, 2 }
 0x1f3   : > { %v2208_v9 = vadd.f32 %v2207_v7, %v2206_v3 }
 0x1f4   : > { %v2215_v10 = vadd.f32 %v2214_v8, %v2213_v6 }
 0x1f5   : > { %v2209_v11 = vrot.slane %v2208_v9, 1 }
 0x1f6   : > { %v2216_v12 = vrot.slane %v2215_v10, 1 }
 0x1f7   : > { %v2210_v13 = vadd.f32 %v2209_v11, %v2208_v9 }
 0x1f8   : > { %v2217_v14 = vadd.f32 %v2216_v12, %v2215_v10 }
 0x1f9   : > { %v2218_v15 = vmul.f32 0.0625, %v2210_v13 }
 0x1fa   : > { %v2219_v16 = vmul.f32 0.0625, %v2217_v14 }
 0x1fc   : > { %v2222_v17 = vcombine.low %v2218_v15, %v2219_v16 }
 0x1fe   : > { %v2224_v18 = vsub.f32 %v2173_v34, %v2222_v17  ;;  %v2225_v19 = vsub.f32 %v2174_v5, %v2222_v17  ;;  %v2226_v20 = vsub.f32 %v2175_v45, %v2222_v17  ;;  %v2227_v21 = vsub.f32 %v2176_v46, %v2222_v17 }
 0x200   : > { %v2228_v22 = vmul.f32 %v2224_v18, %v2224_v18  ;;  %v2229_v23 = vmul.f32 %v2225_v19, %v2225_v19  ;;  %v2230_v24 = vmul.f32 %v2226_v20, %v2226_v20  ;;  %v2231_v25 = vmul.f32 %v2227_v21, %v2227_v21 }
 0x202   : > { %v2236_v26 = vcombine.high %v2228_v22, %v2228_v22  ;;  %v2237_v27 = vcombine.high %v2229_v23, %v2229_v23  ;;  %v2238_v28 = vcombine.high %v2230_v24, %v2230_v24  ;;  %v2239_v29 = vcombine.high %v2231_v25, %v2231_v25 }
 0x203   : > { %v2244_v30 = vsel %vm2189_vm0, %v2228_v22, 0.0  ;;  %v2245_v31 = vsel %vm2189_vm0, %v2229_v23, 0.0  ;;  %v2247_v32 = vsel %vm2189_vm0, %v2230_v24, 0.0  ;;  %v2249_v39 = vsel %vm2189_vm0, %v2231_v25, 0.0 }
 0x204   : > { %v2246_v35 = vadd.f32 %v2245_v31, %v2244_v30  ;;  %v2251_v36 = vsel %vm2189_vm0, %v2236_v26, 0.0  ;;  %v2252_v4 = vsel %vm2189_vm0, %v2237_v27, 0.0  ;;  %v2254_v38 = vsel %vm2189_vm0, %v2238_v28, 0.0 }
 0x205   : > { %v2253_v40 = vadd.f32 %v2252_v4, %v2251_v36  ;;  %v2256_v44 = vsel %vm2189_vm0, %v2239_v29, 0.0 }
 0x206   : > { %v2248_v41 = vadd.f32 %v2247_v32, %v2246_v35 }
 0x207   : > { %v2255_v37 = vadd.f32 %v2254_v38, %v2253_v40 }
 0x208   : > { %v2250_v33 = vadd.f32 %v2249_v39, %v2248_v41 }
 0x209   : > { %v2257_v34 = vadd.f32 %v2256_v44, %v2255_v37 }
 0x20a   : > { %v2258_v5 = vsel %vm2189_vm0, %v2250_v33, 0.0 }
 0x20b   : > { %v2259_v45 = vrot.slane %v2258_v5, 4  ;;  %v2265_v46 = vsel %vm2189_vm0, %v2257_v34, 0.0 }
 0x20c   : > { %v2266_v47 = vrot.slane %v2265_v46, 4 }
 0x20d   : > { %v2260_v48 = vadd.f32 %v2259_v45, %v2258_v5 }
 0x20e   : > { %v2267_v49 = vadd.f32 %v2266_v47, %v2265_v46 }
 0x20f   : > { %v2261_v50 = vrot.slane %v2260_v48, 2 }
 0x210   : > { %v2268_v42 = vrot.slane %v2267_v49, 2 }
 0x211   : > { %v2262_v51 = vadd.f32 %v2261_v50, %v2260_v48 }
 0x212   : > { %v2269_v43 = vadd.f32 %v2268_v42, %v2267_v49 }
 0x213   : > { %v2263_v52 = vrot.slane %v2262_v51, 1 }
 0x214   : > { %v2270_v53 = vrot.slane %v2269_v43, 1 }
 0x215   : > { %v2264_v54 = vadd.f32 %v2263_v52, %v2262_v51 }
 0x216   : > { %v2271_v0 = vadd.f32 %v2270_v53, %v2269_v43 }
 0x217   : > { %v2272_v55 = vmul.f32 0.0625, %v2264_v54 }
 0x218   : > { %v2273_v56 = vmul.f32 0.0625, %v2271_v0 }
 0x219   : > { %v2274_v57 = vadd.f32 1e-05, %v2272_v55 }
 0x21a   : > { %v2275_v58 = vadd.f32 1e-05, %v2273_v56 }
 0x21b   : > { %3330 = vrsqrt.f32 %v2274_v57 }
 0x21c   : > { %3332 = vrsqrt.f32 %v2275_v58 }
 0x228   : > { %v3331_v59 = vpop.eup %3330 }
 0x229   : > { %v3333_v60 = vpop.eup %3332 }
 0x22a   : > { %v2280_v61 = vcombine.low %v3331_v59, %v3333_v60 }
 0x22c   : > { %v2282_v62 = vmul.f32 %v2280_v61, %v2224_v18  ;;  %v2283_v63 = vmul.f32 %v2280_v61, %v2225_v19  ;;  %v2284_v1 = vmul.f32 %v2280_v61, %v2226_v20  ;;  %v2285_v2 = vmul.f32 %v2280_v61, %v2227_v21 }
 0x22e   : > { %vm2286_vm1 = vcmp.ge.f32.partialorder %v2282_v62, 0.0  ;;  %v2290_v3 = vmul.f32 0.2, %v2282_v62  ;;  %vm2287_vm2 = vcmp.ge.f32.partialorder %v2283_v63, 0.0  ;;  %v2291_v6 = vmul.f32 0.2, %v2283_v63 }
 0x22f   : > { %vm2288_vm3 = vcmp.ge.f32.partialorder %v2284_v1, 0.0  ;;  %v2292_v7 = vmul.f32 0.2, %v2284_v1  ;;  %vm2289_vm4 = vcmp.ge.f32.partialorder %v2285_v2, 0.0  ;;  %v2293_v8 = vmul.f32 0.2, %v2285_v2 }
 0x230   : > { %v2294_v9 = vsel %vm2286_vm1, %v2282_v62, %v2290_v3  ;;  %v2295_v10 = vsel %vm2287_vm2, %v2283_v63, %v2291_v6 }
 0x231   : > { %v2302_v11 = vcombine.high %v2294_v9, %v2294_v9  ;;  %v2303_v12 = vcombine.high %v2295_v10, %v2295_v10  ;;  %v2296_v13 = vsel %vm2288_vm3, %v2284_v1, %v2292_v7  ;;  %v2297_v14 = vsel %vm2289_vm4, %v2285_v2, %v2293_v8 }
 0x232   : > { %v2304_v15 = vcombine.high %v2296_v13, %v2296_v13  ;;  %v2305_v16 = vcombine.high %v2297_v14, %v2297_v14 }
 0x233   : > { %v2904_v17 = vpack.c.bf16 %v2302_v11, %v2294_v9  ;;  %v2905_v18 = vpack.c.bf16 %v2303_v12, %v2295_v10 }
 0x234   : > { %v2906_v19 = vpack.c.bf16 %v2304_v15, %v2296_v13  ;;  %v2907_v20 = vpack.c.bf16 %v2305_v16, %v2297_v14 }
 0x235   : > { %2908 = vst.sshfl [vmem:[%s3386_s20] sm:$0x33 pattern:$0x76325410] %v2904_v17 }
 0x236   : > { %2909 = vst.sshfl [vmem:[%s3386_s20 + $0x4] sm:$0x33 pattern:$0x76325410] %v2905_v18 }
 0x237   : > { %2910 = vst.sshfl [vmem:[%s3386_s20 + $0x8] sm:$0x33 pattern:$0x76325410] %v2906_v19 }
 0x238   : > { %2911 = vst.sshfl [vmem:[%s3386_s20 + $0xc] sm:$0x33 pattern:$0x76325410] %v2907_v20 }
 0x239 PF: > { %s13_s12 = sadd.s32 1, %s3344_s12  }
 0x23a   : > { %p10_p5 = scmp.ge.s32.totalorder %s13_s12, 4  }
 0x23c   :  { %12 = sbr.rel (!%p10_p5) target bundleno = 1 (0x1), region = 86 }

// kernel: discriminator_forward.7
= control target key start
LH: loop header
LB: loop body
LE: loop exit
PB: predicated region body
PF: predicated region fallthrough
CT: control target
= control target key end

     0   :  { %s13313_s20 = smov 0   ;;  %s17375_s0 = inlined_call_operand.vmem [shape: bf16[2,6,6,256], index: 0, kind: input, shape index: {}]   ;;  %s17376_s1 = inlined_call_operand.vmem [shape: bf16[16,256,512], index: 1, kind: input, shape index: {}]   ;;  %s17377_s2 = inlined_call_operand.vmem [shape: f32[1,512], index: 2, kind: input, shape index: {}]   ;;  %s17378_s3 = inlined_call_operand.vmem [shape: f32[16,512], index: 3, kind: input, shape index: {}]   ;;  %s17379_s4 = inlined_call_operand.<no memory space> [shape: f32[1,1], index: 4, kind: input, shape index: {}]   ;;  %s17380_s5 = inlined_call_operand.vmem [shape: f32[2,1,1], index: 5, kind: output, shape index: {}]  }
   0x1   :  { %v10_v0 = vstv %s17379_s4 }
   0x2   :  { %11 = vst [vmem:[#allocation3] sm:$0x1] %v10_v0 }
   0x3 LB: > { %s9640_s21 = sadd.s32 4294967295, %s13273_s20   ;;  %p9644_p0 = scmp.ge.s32.totalorder %s13273_s20, 1  ;;  %s13273_s20 = sphi %s13313_s20, %s17_s20  }
   0x4   : > { %p189_p1 = scmp.lt.s32.totalorder %s13273_s20, 3 }
   0x6   : > { %p190_p2 = pnand %p9644_p0, %p189_p1 }
   0x7   : > { %p215_p3 = scmp.lt.s32.totalorder (!%p190_p2), %s9640_s21, 1  ;;  %s13338_s30 = smov (!%p190_p2), 0  }
   0x8   : > { %193 = sbr.rel (%p190_p2) target bundleno = 1641 (0x669), region = 40 }
   0xd   : > { %v13324_v1 = vld [vmem:[%s17377_s2] sm:$0xf]  ;;  %s17412_s21 = smov (!%p215_p3, %s9640_s21), 1 }
   0xe   : > { %s11667_s4 = smul.u32 48, %s17412_s21  ;;  %s222_s26 = scalar_lea.vmem %s17380_s5, %s17412_s21 }
  0x10   : > { %s13336_s29 = scalar_lea.vmem %s17375_s0, %s11667_s4 }
  0x11 LB: >> { %v11685_v2 = vld [vmem:[%s17376_s1 + $0x2e4] ss:$16 sps:$4 sm:$0xff]   ;;  %v11687_v3 = vld [vmem:[%s17376_s1 + $0x2ec] ss:$16 sps:$4 sm:$0xff]   ;;  %v11689_v4 = vld [vmem:[%s17376_s1 + $0x2e0] ss:$16 sps:$4 sm:$0xff]   ;;  %s13277_s30 = sphi %s13338_s30, %s229_s30  }
  0x12   : >> { %704 = vmatprep.subr.bf16.mxu0 %v11685_v2  ;;  %v11690_v5 = vld [vmem:[%s17376_s1 + $0x2e8] ss:$16 sps:$4 sm:$0xff]   ;;  %745 = vmatprep.subr.bf16.mxu1 %v11687_v3  ;;  %v11691_v6 = vld [vmem:[%s17376_s1 + $0x2c4] ss:$16 sps:$4 sm:$0xff]   ;;  %v11693_v7 = vld [vmem:[%s17376_s1 + $0x2cc] ss:$16 sps:$4 sm:$0xff]  }
  0x13   : >> { %705 = vmatpush1.bf16.msra.mxu0 %v11689_v4  ;;  %746 = vmatpush1.bf16.msra.mxu1 %v11690_v5  ;;  %v11695_v8 = vld [vmem:[%s17376_s1 + $0x2c0] ss:$16 sps:$4 sm:$0xff]   ;;  %v11696_v9 = vld [vmem:[%s17376_s1 + $0x2c8] ss:$16 sps:$4 sm:$0xff]   ;;  %v11697_v10 = vld [vmem:[%s17376_s1 + $0x2a4] ss:$16 sps:$4 sm:$0xff]  }
  0x14   : >> { %706 = vmatprep.subr.bf16.mxu0 %v11691_v6  ;;  %747 = vmatprep.subr.bf16.mxu1 %v11693_v7  ;;  %v11699_v11 = vld [vmem:[%s17376_s1 + $0x2ac] ss:$16 sps:$4 sm:$0xff]   ;;  %v11701_v12 = vld [vmem:[%s17376_s1 + $0x2a0] ss:$16 sps:$4 sm:$0xff]   ;;  %v11702_v13 = vld [vmem:[%s17376_s1 + $0x2a8] ss:$16 sps:$4 sm:$0xff]  }
  0x15   : >> { %v11703_v14 = vld [vmem:[%s17376_s1 + $0x284] ss:$16 sps:$4 sm:$0xff]   ;;  %v11705_v15 = vld [vmem:[%s17376_s1 + $0x28c] ss:$16 sps:$4 sm:$0xff]   ;;  %v11707_v16 = vld [vmem:[%s17376_s1 + $0x280] ss:$16 sps:$4 sm:$0xff]  }
  0x16   : >> { %v11708_v17 = vld [vmem:[%s17376_s1 + $0x288] ss:$16 sps:$4 sm:$0xff]   ;;  %v11709_v18 = vld [vmem:[%s17376_s1 + $0x264] ss:$16 sps:$4 sm:$0xff]   ;;  %v11711_v19 = vld [vmem:[%s17376_s1 + $0x26c] ss:$16 sps:$4 sm:$0xff]  }
  0x17   : >> { %707 = vmatpush1.bf16.msra.mxu0 %v11695_v8  ;;  %748 = vmatpush1.bf16.msra.mxu1 %v11696_v9  ;;  %v11713_v20 = vld [vmem:[%s17376_s1 + $0x260] ss:$16 sps:$4 sm:$0xff]   ;;  %v11714_v21 = vld [vmem:[%s17376_s1 + $0x268] ss:$16 sps:$4 sm:$0xff]   ;;  %v11715_v22 = vld [vmem:[%s17376_s1 + $0x244] ss:$16 sps:$4 sm:$0xff]  }
  0x18   : >> { %708 = vmatprep.subr.bf16.mxu0 %v11697_v10  ;;  %749 = vmatprep.subr.bf16.mxu1 %v11699_v11  ;;  %v11717_v23 = vld [vmem:[%s17376_s1 + $0x24c] ss:$16 sps:$4 sm:$0xff]   ;;  %v11719_v24 = vld [vmem:[%s17376_s1 + $0x240] ss:$16 sps:$4 sm:$0xff]   ;;  %v11720_v25 = vld [vmem:[%s17376_s1 + $0x248] ss:$16 sps:$4 sm:$0xff]  }
  0x19   : >> { %v11721_v26 = vld [vmem:[%s17376_s1 + $0x224] ss:$16 sps:$4 sm:$0xff]   ;;  %v11723_v27 = vld [vmem:[%s17376_s1 + $0x22c] ss:$16 sps:$4 sm:$0xff]   ;;  %v11725_v28 = vld [vmem:[%s17376_s1 + $0x220] ss:$16 sps:$4 sm:$0xff]  }
  0x1a   : >> { %v11726_v29 = vld [vmem:[%s17376_s1 + $0x228] ss:$16 sps:$4 sm:$0xff]   ;;  %v11727_v30 = vld [vmem:[%s17376_s1 + $0x204] ss:$16 sps:$4 sm:$0xff]   ;;  %v11729_v31 = vld [vmem:[%s17376_s1 + $0x20c] ss:$16 sps:$4 sm:$0xff]  }
  0x1b   : >> { %709 = vmatpush1.bf16.msra.mxu0 %v11701_v12  ;;  %750 = vmatpush1.bf16.msra.mxu1 %v11702_v13  ;;  %v11731_v32 = vld [vmem:[%s17376_s1 + $0x200] ss:$16 sps:$4 sm:$0xff]   ;;  %v11732_v33 = vld [vmem:[%s17376_s1 + $0x208] ss:$16 sps:$4 sm:$0xff]   ;;  %v11733_v34 = vld [vmem:[%s17376_s1 + $0x3e4] ss:$16 sps:$4 sm:$0xff]  }
  0x1c   : >> { %710 = vmatprep.subr.bf16.mxu0 %v11703_v14  ;;  %751 = vmatprep.subr.bf16.mxu1 %v11705_v15  ;;  %v11735_v35 = vld [vmem:[%s17376_s1 + $0x3ec] ss:$16 sps:$4 sm:$0xff]   ;;  %v11737_v36 = vld [vmem:[%s17376_s1 + $0x3e0] ss:$16 sps:$4 sm:$0xff]   ;;  %v11738_v37 = vld [vmem:[%s17376_s1 + $0x3e8] ss:$16 sps:$4 sm:$0xff]  }
  0x1d   : >> { %v11739_v38 = vld [vmem:[%s17376_s1 + $0x3c4] ss:$16 sps:$4 sm:$0xff]   ;;  %v11741_v39 = vld [vmem:[%s17376_s1 + $0x3cc] ss:$16 sps:$4 sm:$0xff]   ;;  %v11743_v40 = vld [vmem:[%s17376_s1 + $0x3c0] ss:$16 sps:$4 sm:$0xff]  }
  0x1e   : >> { %v11744_v41 = vld [vmem:[%s17376_s1 + $0x3c8] ss:$16 sps:$4 sm:$0xff]   ;;  %v11745_v42 = vld [vmem:[%s17376_s1 + $0x3a4] ss:$16 sps:$4 sm:$0xff]   ;;  %s11665_s27 = sshll.u32 %s13277_s30, 3  ;;  %s11666_s7 = sshll.u32 %s13277_s30, 4 }
  0x1f   : >> { %711 = vmatpush1.bf16.msra.mxu0 %v11707_v16  ;;  %752 = vmatpush1.bf16.msra.mxu1 %v11708_v17  ;;  %v11747_v43 = vld [vmem:[%s17376_s1 + $0x3ac] ss:$16 sps:$4 sm:$0xff]   ;;  %v11749_v44 = vld [vmem:[%s17376_s1 + $0x3a0] ss:$16 sps:$4 sm:$0xff]   ;;  %v11750_v45 = vld [vmem:[%s17376_s1 + $0x3a8] ss:$16 sps:$4 sm:$0xff]   ;;  %s13477_s11 = scalar_lea.vmem %s13336_s29, %s11665_s27 }
  0x20   : >> { %712 = vmatprep.subr.bf16.mxu0 %v11709_v18  ;;  %753 = vmatprep.subr.bf16.mxu1 %v11711_v19  ;;  %v11751_v46 = vld [vmem:[%s17376_s1 + $0x384] ss:$16 sps:$4 sm:$0xff]   ;;  %v11753_v47 = vld [vmem:[%s17376_s1 + $0x38c] ss:$16 sps:$4 sm:$0xff]   ;;  %v11755_v49 = vld [vmem:[%s17376_s1 + $0x380] ss:$16 sps:$4 sm:$0xff]  }
  0x21   : >> { %v233_v48 = vld [vmem:[%s13477_s11] sm:$0x77]  ;;  %v11756_v51 = vld [vmem:[%s17376_s1 + $0x388] ss:$16 sps:$4 sm:$0xff]   ;;  %v11759_v53 = vld [vmem:[%s17376_s1 + $0x36c] ss:$16 sps:$4 sm:$0xff]  }
  0x22   : >> { %v13489_v50 = vcombine.high %v233_v48, %v233_v48  ;;  %v11757_v52 = vld [vmem:[%s17376_s1 + $0x364] ss:$16 sps:$4 sm:$0xff]   ;;  %v11761_v56 = vld [vmem:[%s17376_s1 + $0x360] ss:$16 sps:$4 sm:$0xff]   ;;  %v11762_v58 = vld [vmem:[%s17376_s1 + $0x368] ss:$16 sps:$4 sm:$0xff]   ;;  %v13521_v63 = vcombine.low %v233_v48, %v233_v48 }
  0x23   : >> { %713 = vmatpush1.bf16.msra.mxu0 %v11713_v20  ;;  %754 = vmatpush1.bf16.msra.mxu1 %v11714_v21  ;;  %v11763_v59 = vld [vmem:[%s17376_s1 + $0x344] ss:$16 sps:$4 sm:$0xff]   ;;  %v11765_v60 = vld [vmem:[%s17376_s1 + $0x34c] ss:$16 sps:$4 sm:$0xff]   ;;  %v11767_v62 = vld [vmem:[%s17376_s1 + $0x340] ss:$16 sps:$4 sm:$0xff]  }
  0x24   : >> { %714 = vmatprep.subr.bf16.mxu0 %v11715_v22  ;;  %755 = vmatprep.subr.bf16.mxu1 %v11717_v23  ;;  %v376_v54 = vshrl.u32 %v13489_v50, 16  ;;  %v378_v55 = vshll.u32 %v13489_v50, 16  ;;  %v11768_v0 = vld [vmem:[%s17376_s1 + $0x348] ss:$16 sps:$4 sm:$0xff]   ;;  %v11769_v2 = vld [vmem:[%s17376_s1 + $0x324] ss:$16 sps:$4 sm:$0xff]  }
  0x25   : >> { %v11771_v3 = vld [vmem:[%s17376_s1 + $0x32c] ss:$16 sps:$4 sm:$0xff]   ;;  %v11773_v4 = vld [vmem:[%s17376_s1 + $0x320] ss:$16 sps:$4 sm:$0xff]   ;;  %v371_v5 = vshll.u32 %v13521_v63, 16  ;;  %v369_v10 = vshrl.u32 %v13521_v63, 16 }
  0x26   : >> { %v380_v57 = vrot.slane %v378_v55, 1  ;;  %v11774_v6 = vld [vmem:[%s17376_s1 + $0x328] ss:$16 sps:$4 sm:$0xff]   ;;  %v11775_v7 = vld [vmem:[%s17376_s1 + $0x304] ss:$16 sps:$4 sm:$0xff]   ;;  %s7951_s8 = scalar_lea.vmem [#allocation2], %s11666_s7 }
  0x27   : >> { %715 = vmatpush1.bf16.msra.mxu0 %v11719_v24  ;;  %756 = vmatpush1.bf16.msra.mxu1 %v11720_v25  ;;  %v11777_v8 = vld [vmem:[%s17376_s1 + $0x30c] ss:$16 sps:$4 sm:$0xff]   ;;  %v11779_v9 = vld [vmem:[%s17376_s1 + $0x300] ss:$16 sps:$4 sm:$0xff]   ;;  %v373_v11 = vrot.slane %v371_v5, 1  ;;  %s229_s30 = sadd.s32 1, %s13277_s30  }
  0x28   : >> { %716 = vmatprep.subr.bf16.mxu0 %v11721_v26  ;;  %757 = vmatprep.subr.bf16.mxu1 %v11723_v27  ;;  %v381_v61 = vor.u32 %v380_v57, %v376_v54  ;;  %v11780_v12 = vld [vmem:[%s17376_s1 + $0x308] ss:$16 sps:$4 sm:$0xff]   ;;  %v11785_v13 = vld [vmem:[%s17376_s1 + $0xe4] ss:$16 sps:$4 sm:$0xff]   ;;  %v11788_v14 = vld [vmem:[%s17376_s1 + $0xec] ss:$16 sps:$4 sm:$0xff]  }
  0x29   : >> { %v374_v15 = vor.u32 %v373_v11, %v369_v10  ;;  %v11783_v16 = vld [vmem:[%s17376_s1 + $0xe0] ss:$16 sps:$4 sm:$0xff]   ;;  %v11786_v17 = vld [vmem:[%s17376_s1 + $0xe8] ss:$16 sps:$4 sm:$0xff]   ;;  %v11791_v18 = vld [vmem:[%s17376_s1 + $0xc4] ss:$16 sps:$4 sm:$0xff]  }
  0x2a   : >> { %736 = vmatprep.mubr.bf16.mxu0 %v381_v61  ;;  %777 = vmatprep.mubr.bf16.mxu1 %v381_v61  ;;  %v11794_v19 = vld [vmem:[%s17376_s1 + $0xcc] ss:$16 sps:$4 sm:$0xff]   ;;  %v11789_v20 = vld [vmem:[%s17376_s1 + $0xc0] ss:$16 sps:$4 sm:$0xff]   ;;  %v11792_v21 = vld [vmem:[%s17376_s1 + $0xc8] ss:$16 sps:$4 sm:$0xff]  }
  0x2b   : >> { %717 = vmatpush1.bf16.msra.mxu0 %v11725_v28  ;;  %758 = vmatpush1.bf16.msra.mxu1 %v11726_v29  ;;  %v11797_v22 = vld [vmem:[%s17376_s1 + $0xa4] ss:$16 sps:$4 sm:$0xff]   ;;  %v11800_v23 = vld [vmem:[%s17376_s1 + $0xac] ss:$16 sps:$4 sm:$0xff]   ;;  %v11795_v24 = vld [vmem:[%s17376_s1 + $0xa0] ss:$16 sps:$4 sm:$0xff]  }
  0x2c   : >> { %718 = vmatprep.subr.bf16.mxu0 %v11727_v30  ;;  %759 = vmatprep.subr.bf16.mxu1 %v11729_v31  ;;  %v11798_v25 = vld [vmem:[%s17376_s1 + $0xa8] ss:$16 sps:$4 sm:$0xff]   ;;  %v11803_v26 = vld [vmem:[%s17376_s1 + $0x84] ss:$16 sps:$4 sm:$0xff]   ;;  %v11806_v27 = vld [vmem:[%s17376_s1 + $0x8c] ss:$16 sps:$4 sm:$0xff]  }
  0x2d   : >> { %v11801_v28 = vld [vmem:[%s17376_s1 + $0x80] ss:$16 sps:$4 sm:$0xff]   ;;  %v11804_v29 = vld [vmem:[%s17376_s1 + $0x88] ss:$16 sps:$4 sm:$0xff]   ;;  %v11809_v30 = vld [vmem:[%s17376_s1 + $0x64] ss:$16 sps:$4 sm:$0xff]  }
  0x2e   : >> { %v11812_v31 = vld [vmem:[%s17376_s1 + $0x6c] ss:$16 sps:$4 sm:$0xff]   ;;  %v11831_v48 = vld [vmem:[%s17376_s1 + $0x1e0] ss:$16 sps:$4 sm:$0xff]   ;;  %v11845_v57 = vld [vmem:[%s17376_s1 + $0x1a4] ss:$16 sps:$4 sm:$0xff]  }
  0x2f   : >> { %719 = vmatpush1.bf16.msra.mxu0 %v11731_v32  ;;  %760 = vmatpush1.bf16.msra.mxu1 %v11732_v33  ;;  %v11807_v32 = vld [vmem:[%s17376_s1 + $0x60] ss:$16 sps:$4 sm:$0xff]   ;;  %v11810_v33 = vld [vmem:[%s17376_s1 + $0x68] ss:$16 sps:$4 sm:$0xff]   ;;  %v11851_v61 = vld [vmem:[%s17376_s1 + $0x184] ss:$16 sps:$4 sm:$0xff]  }
  0x30   : >> { %720 = vmatprep.subr.bf16.mxu0 %v11733_v34  ;;  %761 = vmatprep.subr.bf16.mxu1 %v11735_v35  ;;  %v11815_v34 = vld [vmem:[%s17376_s1 + $0x44] ss:$16 sps:$4 sm:$0xff]   ;;  %v11818_v35 = vld [vmem:[%s17376_s1 + $0x4c] ss:$16 sps:$4 sm:$0xff]   ;;  %v11861_v11 = vld [vmem:[%s17376_s1 + $0x140] ss:$16 sps:$4 sm:$0xff]  }
  0x31   : >> { %p226_p4 = scmp.ge.s32.totalorder %s229_s30, 3  }
  0x32   : > { %vm7978_vm0 = vcmask (%p226_p4), 1042432   ;;  %vm8183_vm4 = vcmask (%p226_p4), 1041408   ;;  %vm8422_vm8 = vcmask (%p226_p4), 1040384   ;;  %vm8621_vm9 = vcmask (%p226_p4), 1042433  }
  0x33   : >> { %721 = vmatpush2.bf16.msra.mxu0 %v11737_v36  ;;  %762 = vmatpush2.bf16.msra.mxu1 %v11738_v37  ;;  %v11813_v36 = vld [vmem:[%s17376_s1 + $0x40] ss:$16 sps:$4 sm:$0xff]   ;;  %v11816_v37 = vld [vmem:[%s17376_s1 + $0x48] ss:$16 sps:$4 sm:$0xff]   ;;  %vm9569_vm10 = vcmask (%p226_p4), 0  }
  0x34   : >> { %722 = vmatprep.subr.bf16.mxu0 %v11739_v38  ;;  %763 = vmatprep.subr.bf16.mxu1 %v11741_v39  ;;  %v11821_v38 = vld [vmem:[%s17376_s1 + $0x24] ss:$16 sps:$4 sm:$0xff]   ;;  %v11824_v39 = vld [vmem:[%s17376_s1 + $0x2c] ss:$16 sps:$4 sm:$0xff]  }
  0x37   : >> { %723 = vmatpush2.bf16.msra.mxu0 %v11743_v40  ;;  %764 = vmatpush2.bf16.msra.mxu1 %v11744_v41  ;;  %v11819_v40 = vld [vmem:[%s17376_s1 + $0x20] ss:$16 sps:$4 sm:$0xff]   ;;  %v11822_v41 = vld [vmem:[%s17376_s1 + $0x28] ss:$16 sps:$4 sm:$0xff]  }
  0x38   : >> { %724 = vmatprep.subr.bf16.mxu0 %v11745_v42  ;;  %765 = vmatprep.subr.bf16.mxu1 %v11747_v43  ;;  %v11827_v42 = vld [vmem:[%s17376_s1 + $0x4] ss:$16 sps:$4 sm:$0xff]   ;;  %v11830_v43 = vld [vmem:[%s17376_s1 + $0xc] ss:$16 sps:$4 sm:$0xff]  }
  0x3b   : >> { %725 = vmatpush2.bf16.msra.mxu0 %v11749_v44  ;;  %766 = vmatpush2.bf16.msra.mxu1 %v11750_v45  ;;  %v11825_v44 = vld [vmem:[%s17376_s1] ss:$16 sps:$4 sm:$0xff]   ;;  %v11828_v45 = vld [vmem:[%s17376_s1 + $0x8] ss:$16 sps:$4 sm:$0xff]  }
  0x3c   : >> { %726 = vmatprep.subr.bf16.mxu0 %v11751_v46  ;;  %767 = vmatprep.subr.bf16.mxu1 %v11753_v47  ;;  %v11833_v46 = vld [vmem:[%s17376_s1 + $0x1e4] ss:$16 sps:$4 sm:$0xff]   ;;  %v11836_v47 = vld [vmem:[%s17376_s1 + $0x1ec] ss:$16 sps:$4 sm:$0xff]  }
  0x3f   : >> { %727 = vmatpush2.bf16.msra.mxu0 %v11755_v49  ;;  %768 = vmatpush2.bf16.msra.mxu1 %v11756_v51  ;;  %v11834_v49 = vld [vmem:[%s17376_s1 + $0x1e8] ss:$16 sps:$4 sm:$0xff]   ;;  %v11839_v51 = vld [vmem:[%s17376_s1 + $0x1c4] ss:$16 sps:$4 sm:$0xff]  }
  0x40   : >> { %728 = vmatprep.subr.bf16.mxu0 %v11757_v52  ;;  %769 = vmatprep.subr.bf16.mxu1 %v11759_v53  ;;  %v11842_v52 = vld [vmem:[%s17376_s1 + $0x1cc] ss:$16 sps:$4 sm:$0xff]   ;;  %v11837_v53 = vld [vmem:[%s17376_s1 + $0x1c0] ss:$16 sps:$4 sm:$0xff]  }
  0x43   : >> { %729 = vmatpush2.bf16.msra.mxu0 %v11761_v56  ;;  %770 = vmatpush2.bf16.msra.mxu1 %v11762_v58  ;;  %v11840_v56 = vld [vmem:[%s17376_s1 + $0x1c8] ss:$16 sps:$4 sm:$0xff]   ;;  %v11848_v58 = vld [vmem:[%s17376_s1 + $0x1ac] ss:$16 sps:$4 sm:$0xff]  }
  0x44   : >> { %730 = vmatprep.subr.bf16.mxu0 %v11763_v59  ;;  %771 = vmatprep.subr.bf16.mxu1 %v11765_v60  ;;  %v11843_v59 = vld [vmem:[%s17376_s1 + $0x1a0] ss:$16 sps:$4 sm:$0xff]   ;;  %v11846_v60 = vld [vmem:[%s17376_s1 + $0x1a8] ss:$16 sps:$4 sm:$0xff]  }
  0x47   : >> { %731 = vmatpush2.bf16.msra.mxu0 %v11767_v62  ;;  %772 = vmatpush2.bf16.msra.mxu1 %v11768_v0  ;;  %v11854_v62 = vld [vmem:[%s17376_s1 + $0x18c] ss:$16 sps:$4 sm:$0xff]   ;;  %v11849_v0 = vld [vmem:[%s17376_s1 + $0x180] ss:$16 sps:$4 sm:$0xff]  }
  0x48   : >> { %732 = vmatprep.subr.bf16.mxu0 %v11769_v2  ;;  %773 = vmatprep.subr.bf16.mxu1 %v11771_v3  ;;  %v11852_v2 = vld [vmem:[%s17376_s1 + $0x188] ss:$16 sps:$4 sm:$0xff]   ;;  %v11857_v3 = vld [vmem:[%s17376_s1 + $0x164] ss:$16 sps:$4 sm:$0xff]  }
  0x4b   : >> { %733 = vmatpush2.bf16.msra.mxu0 %v11773_v4  ;;  %774 = vmatpush2.bf16.msra.mxu1 %v11774_v6  ;;  %v11860_v4 = vld [vmem:[%s17376_s1 + $0x16c] ss:$16 sps:$4 sm:$0xff]   ;;  %v11855_v6 = vld [vmem:[%s17376_s1 + $0x160] ss:$16 sps:$4 sm:$0xff]  }
  0x4c   : >> { %734 = vmatprep.subr.bf16.mxu0 %v11775_v7  ;;  %775 = vmatprep.subr.bf16.mxu1 %v11777_v8  ;;  %v11858_v7 = vld [vmem:[%s17376_s1 + $0x168] ss:$16 sps:$4 sm:$0xff]   ;;  %v11863_v8 = vld [vmem:[%s17376_s1 + $0x144] ss:$16 sps:$4 sm:$0xff]  }
  0x4f   : >> { %735 = vmatpush2.bf16.msra.mxu0 %v11779_v9  ;;  %776 = vmatpush2.bf16.msra.mxu1 %v11780_v12  ;;  %v11866_v9 = vld [vmem:[%s17376_s1 + $0x14c] ss:$16 sps:$4 sm:$0xff]   ;;  %v11864_v12 = vld [vmem:[%s17376_s1 + $0x148] ss:$16 sps:$4 sm:$0xff]  }
  0x50   : >> { %1108 = vmatprep.subr.bf16.mxu0 %v11785_v13  ;;  %1149 = vmatprep.subr.bf16.mxu1 %v11788_v14  ;;  %v11869_v13 = vld [vmem:[%s17376_s1 + $0x124] ss:$16 sps:$4 sm:$0xff]   ;;  %v11872_v14 = vld [vmem:[%s17376_s1 + $0x12c] ss:$16 sps:$4 sm:$0xff]  }
  0x52   : >> { %737 = vmatmul.mubr.bf16.vlgmr.msra.gmra.mxu0 %v374_v15  ;;  %778 = vmatmul.mubr.bf16.vlgmr.msra.gmra.mxu1 %v374_v15  ;;  %v11867_v15 = vld [vmem:[%s17376_s1 + $0x120] ss:$16 sps:$4 sm:$0xff]  }
  0x53   : >> { %1109 = vmatpush1.bf16.msra.mxu0 %v11783_v16  ;;  %1150 = vmatpush1.bf16.msra.mxu1 %v11786_v17  ;;  %v11870_v16 = vld [vmem:[%s17376_s1 + $0x128] ss:$16 sps:$4 sm:$0xff]   ;;  %v11875_v17 = vld [vmem:[%s17376_s1 + $0x104] ss:$16 sps:$4 sm:$0xff]  }
  0x54   : >> { %1110 = vmatprep.subr.bf16.mxu0 %v11791_v18  ;;  %1151 = vmatprep.subr.bf16.mxu1 %v11794_v19  ;;  %v11878_v18 = vld [vmem:[%s17376_s1 + $0x10c] ss:$16 sps:$4 sm:$0xff]   ;;  %v11873_v19 = vld [vmem:[%s17376_s1 + $0x100] ss:$16 sps:$4 sm:$0xff]  }
  0x55   : >> { %1140 = vmatprep.mubr.bf16.mxu0 %v13489_v50  ;;  %1181 = vmatprep.mubr.bf16.mxu1 %v13489_v50 }
  0x57   : >> { %1111 = vmatpush1.bf16.msra.mxu0 %v11789_v20  ;;  %1152 = vmatpush1.bf16.msra.mxu1 %v11792_v21  ;;  %v11876_v20 = vld [vmem:[%s17376_s1 + $0x108] ss:$16 sps:$4 sm:$0xff]   ;;  %v11881_v21 = vld [vmem:[%s17376_s1 + $0x4e4] ss:$16 sps:$4 sm:$0xff]  }
  0x58   : >> { %1112 = vmatprep.subr.bf16.mxu0 %v11797_v22  ;;  %1153 = vmatprep.subr.bf16.mxu1 %v11800_v23  ;;  %v11884_v22 = vld [vmem:[%s17376_s1 + $0x4ec] ss:$16 sps:$4 sm:$0xff]   ;;  %v11879_v23 = vld [vmem:[%s17376_s1 + $0x4e0] ss:$16 sps:$4 sm:$0xff]  }
  0x5b   : >> { %1113 = vmatpush1.bf16.msra.mxu0 %v11795_v24  ;;  %1154 = vmatpush1.bf16.msra.mxu1 %v11798_v25  ;;  %v11882_v24 = vld [vmem:[%s17376_s1 + $0x4e8] ss:$16 sps:$4 sm:$0xff]   ;;  %v11887_v25 = vld [vmem:[%s17376_s1 + $0x4c4] ss:$16 sps:$4 sm:$0xff]  }
  0x5c   : >> { %1114 = vmatprep.subr.bf16.mxu0 %v11803_v26  ;;  %1155 = vmatprep.subr.bf16.mxu1 %v11806_v27  ;;  %v11890_v26 = vld [vmem:[%s17376_s1 + $0x4cc] ss:$16 sps:$4 sm:$0xff]   ;;  %v1256_v27 = vrot.slane %v13489_v50, 1 }
  0x5d   : >> { %v11986_v50 = vld [vmem:[%s17376_s1 + $0x6cc] ss:$16 sps:$4 sm:$0xff]  }
  0x5f   : >> { %1115 = vmatpush1.bf16.msra.mxu0 %v11801_v28  ;;  %1156 = vmatpush1.bf16.msra.mxu1 %v11804_v29  ;;  %v11885_v28 = vld [vmem:[%s17376_s1 + $0x4c0] ss:$16 sps:$4 sm:$0xff]   ;;  %v11888_v29 = vld [vmem:[%s17376_s1 + $0x4c8] ss:$16 sps:$4 sm:$0xff]  }
  0x60   : >> { %1116 = vmatprep.subr.bf16.mxu0 %v11809_v30  ;;  %1157 = vmatprep.subr.bf16.mxu1 %v11812_v31  ;;  %v11893_v30 = vld [vmem:[%s17376_s1 + $0x4a4] ss:$16 sps:$4 sm:$0xff]   ;;  %v11896_v31 = vld [vmem:[%s17376_s1 + $0x4ac] ss:$16 sps:$4 sm:$0xff]  }
  0x63   : >> { %1117 = vmatpush1.bf16.msra.mxu0 %v11807_v32  ;;  %1158 = vmatpush1.bf16.msra.mxu1 %v11810_v33  ;;  %v11891_v32 = vld [vmem:[%s17376_s1 + $0x4a0] ss:$16 sps:$4 sm:$0xff]   ;;  %v11894_v33 = vld [vmem:[%s17376_s1 + $0x4a8] ss:$16 sps:$4 sm:$0xff]  }
  0x64   : >> { %1118 = vmatprep.subr.bf16.mxu0 %v11815_v34  ;;  %1159 = vmatprep.subr.bf16.mxu1 %v11818_v35  ;;  %v11899_v34 = vld [vmem:[%s17376_s1 + $0x484] ss:$16 sps:$4 sm:$0xff]   ;;  %v11902_v35 = vld [vmem:[%s17376_s1 + $0x48c] ss:$16 sps:$4 sm:$0xff]  }
  0x67   : >> { %1119 = vmatpush1.bf16.msra.mxu0 %v11813_v36  ;;  %1160 = vmatpush1.bf16.msra.mxu1 %v11816_v37  ;;  %v11897_v36 = vld [vmem:[%s17376_s1 + $0x480] ss:$16 sps:$4 sm:$0xff]   ;;  %v11900_v37 = vld [vmem:[%s17376_s1 + $0x488] ss:$16 sps:$4 sm:$0xff]  }
  0x68   : >> { %1120 = vmatprep.subr.bf16.mxu0 %v11821_v38  ;;  %1161 = vmatprep.subr.bf16.mxu1 %v11824_v39  ;;  %v11905_v38 = vld [vmem:[%s17376_s1 + $0x464] ss:$16 sps:$4 sm:$0xff]   ;;  %v11908_v39 = vld [vmem:[%s17376_s1 + $0x46c] ss:$16 sps:$4 sm:$0xff]  }
  0x6b   : >> { %1121 = vmatpush1.bf16.msra.mxu0 %v11819_v40  ;;  %1162 = vmatpush1.bf16.msra.mxu1 %v11822_v41  ;;  %v11903_v40 = vld [vmem:[%s17376_s1 + $0x460] ss:$16 sps:$4 sm:$0xff]   ;;  %v11906_v41 = vld [vmem:[%s17376_s1 + $0x468] ss:$16 sps:$4 sm:$0xff]  }
  0x6c   : >> { %1122 = vmatprep.subr.bf16.mxu0 %v11827_v42  ;;  %1163 = vmatprep.subr.bf16.mxu1 %v11830_v43  ;;  %v11911_v42 = vld [vmem:[%s17376_s1 + $0x444] ss:$16 sps:$4 sm:$0xff]   ;;  %v11914_v43 = vld [vmem:[%s17376_s1 + $0x44c] ss:$16 sps:$4 sm:$0xff]  }
  0x6f   : >> { %1123 = vmatpush1.bf16.msra.mxu0 %v11825_v44  ;;  %1164 = vmatpush1.bf16.msra.mxu1 %v11828_v45  ;;  %v11909_v44 = vld [vmem:[%s17376_s1 + $0x440] ss:$16 sps:$4 sm:$0xff]   ;;  %v11912_v45 = vld [vmem:[%s17376_s1 + $0x448] ss:$16 sps:$4 sm:$0xff]  }
  0x70   : >> { %1124 = vmatprep.subr.bf16.mxu0 %v11833_v46  ;;  %1165 = vmatprep.subr.bf16.mxu1 %v11836_v47  ;;  %v11917_v46 = vld [vmem:[%s17376_s1 + $0x424] ss:$16 sps:$4 sm:$0xff]   ;;  %v11920_v47 = vld [vmem:[%s17376_s1 + $0x42c] ss:$16 sps:$4 sm:$0xff]  }
  0x73   : >> { %1125 = vmatpush2.bf16.msra.mxu0 %v11831_v48  ;;  %1166 = vmatpush2.bf16.msra.mxu1 %v11834_v49  ;;  %v11915_v48 = vld [vmem:[%s17376_s1 + $0x420] ss:$16 sps:$4 sm:$0xff]   ;;  %v11918_v49 = vld [vmem:[%s17376_s1 + $0x428] ss:$16 sps:$4 sm:$0xff]  }
  0x74   : >> { %1126 = vmatprep.subr.bf16.mxu0 %v11839_v51  ;;  %1167 = vmatprep.subr.bf16.mxu1 %v11842_v52  ;;  %v11923_v51 = vld [vmem:[%s17376_s1 + $0x404] ss:$16 sps:$4 sm:$0xff]   ;;  %v11926_v52 = vld [vmem:[%s17376_s1 + $0x40c] ss:$16 sps:$4 sm:$0xff]  }
  0x77   : >> { %1127 = vmatpush2.bf16.msra.mxu0 %v11837_v53  ;;  %1168 = vmatpush2.bf16.msra.mxu1 %v11840_v56  ;;  %v11921_v53 = vld [vmem:[%s17376_s1 + $0x400] ss:$16 sps:$4 sm:$0xff]   ;;  %v11924_v56 = vld [vmem:[%s17376_s1 + $0x408] ss:$16 sps:$4 sm:$0xff]  }
  0x78   : >> { %1128 = vmatprep.subr.bf16.mxu0 %v11845_v57  ;;  %1169 = vmatprep.subr.bf16.mxu1 %v11848_v58  ;;  %v11929_v57 = vld [vmem:[%s17376_s1 + $0x5e4] ss:$16 sps:$4 sm:$0xff]   ;;  %v11932_v58 = vld [vmem:[%s17376_s1 + $0x5ec] ss:$16 sps:$4 sm:$0xff]  }
  0x7b   : >> { %1129 = vmatpush2.bf16.msra.mxu0 %v11843_v59  ;;  %1170 = vmatpush2.bf16.msra.mxu1 %v11846_v60  ;;  %v11927_v59 = vld [vmem:[%s17376_s1 + $0x5e0] ss:$16 sps:$4 sm:$0xff]   ;;  %v11930_v60 = vld [vmem:[%s17376_s1 + $0x5e8] ss:$16 sps:$4 sm:$0xff]  }
  0x7c   : >> { %1130 = vmatprep.subr.bf16.mxu0 %v11851_v61  ;;  %1171 = vmatprep.subr.bf16.mxu1 %v11854_v62  ;;  %v11935_v61 = vld [vmem:[%s17376_s1 + $0x5c4] ss:$16 sps:$4 sm:$0xff]   ;;  %v11938_v62 = vld [vmem:[%s17376_s1 + $0x5cc] ss:$16 sps:$4 sm:$0xff]  }
  0x7f   : >> { %1131 = vmatpush2.bf16.msra.mxu0 %v11849_v0  ;;  %1172 = vmatpush2.bf16.msra.mxu1 %v11852_v2  ;;  %v11933_v0 = vld [vmem:[%s17376_s1 + $0x5c0] ss:$16 sps:$4 sm:$0xff]   ;;  %v11936_v2 = vld [vmem:[%s17376_s1 + $0x5c8] ss:$16 sps:$4 sm:$0xff]  }
  0x80   : >> { %1132 = vmatprep.subr.bf16.mxu0 %v11857_v3  ;;  %1173 = vmatprep.subr.bf16.mxu1 %v11860_v4  ;;  %v11941_v3 = vld [vmem:[%s17376_s1 + $0x5a4] ss:$16 sps:$4 sm:$0xff]   ;;  %v11944_v4 = vld [vmem:[%s17376_s1 + $0x5ac] ss:$16 sps:$4 sm:$0xff]  }
  0x83   : >> { %1133 = vmatpush2.bf16.msra.mxu0 %v11855_v6  ;;  %1174 = vmatpush2.bf16.msra.mxu1 %v11858_v7  ;;  %v11939_v6 = vld [vmem:[%s17376_s1 + $0x5a0] ss:$16 sps:$4 sm:$0xff]   ;;  %v11942_v7 = vld [vmem:[%s17376_s1 + $0x5a8] ss:$16 sps:$4 sm:$0xff]  }
  0x84   : >> { %1134 = vmatprep.subr.bf16.mxu0 %v11863_v8  ;;  %1175 = vmatprep.subr.bf16.mxu1 %v11866_v9  ;;  %v11947_v8 = vld [vmem:[%s17376_s1 + $0x584] ss:$16 sps:$4 sm:$0xff]   ;;  %v11950_v9 = vld [vmem:[%s17376_s1 + $0x58c] ss:$16 sps:$4 sm:$0xff]  }
  0x87   : >> { %1135 = vmatpush2.bf16.msra.mxu0 %v11861_v11  ;;  %1176 = vmatpush2.bf16.msra.mxu1 %v11864_v12  ;;  %v11945_v11 = vld [vmem:[%s17376_s1 + $0x580] ss:$16 sps:$4 sm:$0xff]   ;;  %v11948_v12 = vld [vmem:[%s17376_s1 + $0x588] ss:$16 sps:$4 sm:$0xff]  }
  0x88   : >> { %1136 = vmatprep.subr.bf16.mxu0 %v11869_v13  ;;  %1177 = vmatprep.subr.bf16.mxu1 %v11872_v14  ;;  %v11953_v13 = vld [vmem:[%s17376_s1 + $0x564] ss:$16 sps:$4 sm:$0xff]   ;;  %v11956_v14 = vld [vmem:[%s17376_s1 + $0x56c] ss:$16 sps:$4 sm:$0xff]  }
  0x8b   : >> { %1137 = vmatpush2.bf16.msra.mxu0 %v11867_v15  ;;  %1178 = vmatpush2.bf16.msra.mxu1 %v11870_v16  ;;  %v11951_v15 = vld [vmem:[%s17376_s1 + $0x560] ss:$16 sps:$4 sm:$0xff]   ;;  %v11954_v16 = vld [vmem:[%s17376_s1 + $0x568] ss:$16 sps:$4 sm:$0xff]  }
  0x8c   : >> { %1138 = vmatprep.subr.bf16.mxu0 %v11875_v17  ;;  %1179 = vmatprep.subr.bf16.mxu1 %v11878_v18  ;;  %v11959_v17 = vld [vmem:[%s17376_s1 + $0x544] ss:$16 sps:$4 sm:$0xff]   ;;  %v11962_v18 = vld [vmem:[%s17376_s1 + $0x54c] ss:$16 sps:$4 sm:$0xff]  }
  0x8f   : >> { %1139 = vmatpush2.bf16.msra.mxu0 %v11873_v19  ;;  %1180 = vmatpush2.bf16.msra.mxu1 %v11876_v20  ;;  %v11957_v19 = vld [vmem:[%s17376_s1 + $0x540] ss:$16 sps:$4 sm:$0xff]   ;;  %v11960_v20 = vld [vmem:[%s17376_s1 + $0x548] ss:$16 sps:$4 sm:$0xff]  }
  0x90   : >> { %1579 = vmatprep.subr.bf16.mxu0 %v11881_v21  ;;  %1620 = vmatprep.subr.bf16.mxu1 %v11884_v22  ;;  %v11965_v21 = vld [vmem:[%s17376_s1 + $0x524] ss:$16 sps:$4 sm:$0xff]   ;;  %v11968_v22 = vld [vmem:[%s17376_s1 + $0x52c] ss:$16 sps:$4 sm:$0xff]  }
  0x92   : >> { %1141 = vmatmul.mubr.bf16.vlgmr.msra.gmra.mxu0 %v13521_v63  ;;  %1182 = vmatmul.mubr.bf16.vlgmr.msra.gmra.mxu1 %v13521_v63 }
  0x93   : >> { %1580 = vmatpush1.bf16.msra.mxu0 %v11879_v23  ;;  %1621 = vmatpush1.bf16.msra.mxu1 %v11882_v24  ;;  %v11963_v23 = vld [vmem:[%s17376_s1 + $0x520] ss:$16 sps:$4 sm:$0xff]   ;;  %v11966_v24 = vld [vmem:[%s17376_s1 + $0x528] ss:$16 sps:$4 sm:$0xff]  }
  0x94   : >> { %1581 = vmatprep.subr.bf16.mxu0 %v11887_v25  ;;  %1622 = vmatprep.subr.bf16.mxu1 %v11890_v26  ;;  %v11971_v25 = vld [vmem:[%s17376_s1 + $0x504] ss:$16 sps:$4 sm:$0xff]   ;;  %v11974_v26 = vld [vmem:[%s17376_s1 + $0x50c] ss:$16 sps:$4 sm:$0xff]  }
  0x95   : >> { %1611 = vmatprep.mubr.bf16.mxu0 %v1256_v27  ;;  %1652 = vmatprep.mubr.bf16.mxu1 %v1256_v27  ;;  %v11969_v27 = vld [vmem:[%s17376_s1 + $0x500] ss:$16 sps:$4 sm:$0xff]  }
  0x97   : >> { %1582 = vmatpush1.bf16.msra.mxu0 %v11885_v28  ;;  %1623 = vmatpush1.bf16.msra.mxu1 %v11888_v29  ;;  %v11972_v28 = vld [vmem:[%s17376_s1 + $0x508] ss:$16 sps:$4 sm:$0xff]   ;;  %v11977_v29 = vld [vmem:[%s17376_s1 + $0x6e4] ss:$16 sps:$4 sm:$0xff]  }
  0x98   : >> { %1583 = vmatprep.subr.bf16.mxu0 %v11893_v30  ;;  %1624 = vmatprep.subr.bf16.mxu1 %v11896_v31  ;;  %v11980_v30 = vld [vmem:[%s17376_s1 + $0x6ec] ss:$16 sps:$4 sm:$0xff]   ;;  %v1733_v31 = vrot.slane %v376_v54, 1  ;;  %v11983_v54 = vld [vmem:[%s17376_s1 + $0x6c4] ss:$16 sps:$4 sm:$0xff]  }
  0x9b   : >> { %1584 = vmatpush1.bf16.msra.mxu0 %v11891_v32  ;;  %1625 = vmatpush1.bf16.msra.mxu1 %v11894_v33  ;;  %v1734_v32 = vrot.slane %v378_v55, 2  ;;  %v1255_v33 = vrot.slane %v13521_v63, 1  ;;  %v12076_v63 = vld [vmem:[%s17376_s1 + $0x8ec] ss:$16 sps:$4 sm:$0xff]  }
  0x9c   : >> { %1585 = vmatprep.subr.bf16.mxu0 %v11899_v34  ;;  %1626 = vmatprep.subr.bf16.mxu1 %v11902_v35  ;;  %v11975_v34 = vld [vmem:[%s17376_s1 + $0x6e0] ss:$16 sps:$4 sm:$0xff]   ;;  %v11978_v35 = vld [vmem:[%s17376_s1 + $0x6e8] ss:$16 sps:$4 sm:$0xff]  }
  0x9d   : >> { %v1735_v55 = vor.u32 %v1734_v32, %v1733_v31  ;;  %v12059_v31 = vld [vmem:[%s17376_s1 + $0x720] ss:$16 sps:$4 sm:$0xff]   ;;  %v12062_v32 = vld [vmem:[%s17376_s1 + $0x728] ss:$16 sps:$4 sm:$0xff]  }
  0x9f   : >> { %1586 = vmatpush1.bf16.msra.mxu0 %v11897_v36  ;;  %1627 = vmatpush1.bf16.msra.mxu1 %v11900_v37  ;;  %v11981_v36 = vld [vmem:[%s17376_s1 + $0x6c0] ss:$16 sps:$4 sm:$0xff]   ;;  %v11984_v37 = vld [vmem:[%s17376_s1 + $0x6c8] ss:$16 sps:$4 sm:$0xff]  }
  0xa0   : >> { %1587 = vmatprep.subr.bf16.mxu0 %v11905_v38  ;;  %1628 = vmatprep.subr.bf16.mxu1 %v11908_v39  ;;  %v11989_v38 = vld [vmem:[%s17376_s1 + $0x6a4] ss:$16 sps:$4 sm:$0xff]   ;;  %v11992_v39 = vld [vmem:[%s17376_s1 + $0x6ac] ss:$16 sps:$4 sm:$0xff]  }
  0xa3   : >> { %1588 = vmatpush1.bf16.msra.mxu0 %v11903_v40  ;;  %1629 = vmatpush1.bf16.msra.mxu1 %v11906_v41  ;;  %v11987_v40 = vld [vmem:[%s17376_s1 + $0x6a0] ss:$16 sps:$4 sm:$0xff]   ;;  %v11990_v41 = vld [vmem:[%s17376_s1 + $0x6a8] ss:$16 sps:$4 sm:$0xff]  }
  0xa4   : >> { %1589 = vmatprep.subr.bf16.mxu0 %v11911_v42  ;;  %1630 = vmatprep.subr.bf16.mxu1 %v11914_v43  ;;  %v11995_v42 = vld [vmem:[%s17376_s1 + $0x684] ss:$16 sps:$4 sm:$0xff]   ;;  %v11998_v43 = vld [vmem:[%s17376_s1 + $0x68c] ss:$16 sps:$4 sm:$0xff]  }
  0xa7   : >> { %1590 = vmatpush1.bf16.msra.mxu0 %v11909_v44  ;;  %1631 = vmatpush1.bf16.msra.mxu1 %v11912_v45  ;;  %v11993_v44 = vld [vmem:[%s17376_s1 + $0x680] ss:$16 sps:$4 sm:$0xff]   ;;  %v11996_v45 = vld [vmem:[%s17376_s1 + $0x688] ss:$16 sps:$4 sm:$0xff]  }
  0xa8   : >> { %1591 = vmatprep.subr.bf16.mxu0 %v11917_v46  ;;  %1632 = vmatprep.subr.bf16.mxu1 %v11920_v47  ;;  %v12001_v46 = vld [vmem:[%s17376_s1 + $0x664] ss:$16 sps:$4 sm:$0xff]   ;;  %v12004_v47 = vld [vmem:[%s17376_s1 + $0x66c] ss:$16 sps:$4 sm:$0xff]  }
  0xab   : >> { %1592 = vmatpush1.bf16.msra.mxu0 %v11915_v48  ;;  %1633 = vmatpush1.bf16.msra.mxu1 %v11918_v49  ;;  %v11999_v48 = vld [vmem:[%s17376_s1 + $0x660] ss:$16 sps:$4 sm:$0xff]   ;;  %v12002_v49 = vld [vmem:[%s17376_s1 + $0x668] ss:$16 sps:$4 sm:$0xff]  }
  0xac   : >> { %1593 = vmatprep.subr.bf16.mxu0 %v11923_v51  ;;  %1634 = vmatprep.subr.bf16.mxu1 %v11926_v52  ;;  %v12007_v51 = vld [vmem:[%s17376_s1 + $0x644] ss:$16 sps:$4 sm:$0xff]   ;;  %v12010_v52 = vld [vmem:[%s17376_s1 + $0x64c] ss:$16 sps:$4 sm:$0xff]  }
  0xaf   : >> { %1594 = vmatpush1.bf16.msra.mxu0 %v11921_v53  ;;  %1635 = vmatpush1.bf16.msra.mxu1 %v11924_v56  ;;  %v12005_v53 = vld [vmem:[%s17376_s1 + $0x640] ss:$16 sps:$4 sm:$0xff]   ;;  %v12008_v56 = vld [vmem:[%s17376_s1 + $0x648] ss:$16 sps:$4 sm:$0xff]  }
  0xb0   : >> { %1595 = vmatprep.subr.bf16.mxu0 %v11929_v57  ;;  %1636 = vmatprep.subr.bf16.mxu1 %v11932_v58  ;;  %v12013_v57 = vld [vmem:[%s17376_s1 + $0x624] ss:$16 sps:$4 sm:$0xff]   ;;  %v12016_v58 = vld [vmem:[%s17376_s1 + $0x62c] ss:$16 sps:$4 sm:$0xff]  }
  0xb3   : >> { %1596 = vmatpush2.bf16.msra.mxu0 %v11927_v59  ;;  %1637 = vmatpush2.bf16.msra.mxu1 %v11930_v60  ;;  %v12011_v59 = vld [vmem:[%s17376_s1 + $0x620] ss:$16 sps:$4 sm:$0xff]   ;;  %v12014_v60 = vld [vmem:[%s17376_s1 + $0x628] ss:$16 sps:$4 sm:$0xff]  }
  0xb4   : >> { %1597 = vmatprep.subr.bf16.mxu0 %v11935_v61  ;;  %1638 = vmatprep.subr.bf16.mxu1 %v11938_v62  ;;  %v12019_v61 = vld [vmem:[%s17376_s1 + $0x604] ss:$16 sps:$4 sm:$0xff]   ;;  %v12022_v62 = vld [vmem:[%s17376_s1 + $0x60c] ss:$16 sps:$4 sm:$0xff]  }
  0xb7   : >> { %1598 = vmatpush2.bf16.msra.mxu0 %v11933_v0  ;;  %1639 = vmatpush2.bf16.msra.mxu1 %v11936_v2  ;;  %v12017_v0 = vld [vmem:[%s17376_s1 + $0x600] ss:$16 sps:$4 sm:$0xff]   ;;  %v12020_v2 = vld [vmem:[%s17376_s1 + $0x608] ss:$16 sps:$4 sm:$0xff]  }
  0xb8   : >> { %1599 = vmatprep.subr.bf16.mxu0 %v11941_v3  ;;  %1640 = vmatprep.subr.bf16.mxu1 %v11944_v4  ;;  %v12025_v3 = vld [vmem:[%s17376_s1 + $0x7e4] ss:$16 sps:$4 sm:$0xff]   ;;  %v12028_v4 = vld [vmem:[%s17376_s1 + $0x7ec] ss:$16 sps:$4 sm:$0xff]  }
  0xbb   : >> { %1600 = vmatpush2.bf16.msra.mxu0 %v11939_v6  ;;  %1641 = vmatpush2.bf16.msra.mxu1 %v11942_v7  ;;  %v12023_v6 = vld [vmem:[%s17376_s1 + $0x7e0] ss:$16 sps:$4 sm:$0xff]   ;;  %v12026_v7 = vld [vmem:[%s17376_s1 + $0x7e8] ss:$16 sps:$4 sm:$0xff]  }
  0xbc   : >> { %1601 = vmatprep.subr.bf16.mxu0 %v11947_v8  ;;  %1642 = vmatprep.subr.bf16.mxu1 %v11950_v9  ;;  %v12031_v8 = vld [vmem:[%s17376_s1 + $0x7c4] ss:$16 sps:$4 sm:$0xff]   ;;  %v12034_v9 = vld [vmem:[%s17376_s1 + $0x7cc] ss:$16 sps:$4 sm:$0xff]  }
  0xbf   : >> { %1602 = vmatpush2.bf16.msra.mxu0 %v11945_v11  ;;  %1643 = vmatpush2.bf16.msra.mxu1 %v11948_v12  ;;  %v12029_v11 = vld [vmem:[%s17376_s1 + $0x7c0] ss:$16 sps:$4 sm:$0xff]   ;;  %v12032_v12 = vld [vmem:[%s17376_s1 + $0x7c8] ss:$16 sps:$4 sm:$0xff]  }
  0xc0   : >> { %1603 = vmatprep.subr.bf16.mxu0 %v11953_v13  ;;  %1644 = vmatprep.subr.bf16.mxu1 %v11956_v14  ;;  %v12037_v13 = vld [vmem:[%s17376_s1 + $0x7a4] ss:$16 sps:$4 sm:$0xff]   ;;  %v12040_v14 = vld [vmem:[%s17376_s1 + $0x7ac] ss:$16 sps:$4 sm:$0xff]  }
  0xc3   : >> { %1604 = vmatpush2.bf16.msra.mxu0 %v11951_v15  ;;  %1645 = vmatpush2.bf16.msra.mxu1 %v11954_v16  ;;  %v12035_v15 = vld [vmem:[%s17376_s1 + $0x7a0] ss:$16 sps:$4 sm:$0xff]   ;;  %v12038_v16 = vld [vmem:[%s17376_s1 + $0x7a8] ss:$16 sps:$4 sm:$0xff]  }
  0xc4   : >> { %1605 = vmatprep.subr.bf16.mxu0 %v11959_v17  ;;  %1646 = vmatprep.subr.bf16.mxu1 %v11962_v18  ;;  %v12043_v17 = vld [vmem:[%s17376_s1 + $0x784] ss:$16 sps:$4 sm:$0xff]   ;;  %v12046_v18 = vld [vmem:[%s17376_s1 + $0x78c] ss:$16 sps:$4 sm:$0xff]  }
  0xc7   : >> { %1606 = vmatpush2.bf16.msra.mxu0 %v11957_v19  ;;  %1647 = vmatpush2.bf16.msra.mxu1 %v11960_v20  ;;  %v12041_v19 = vld [vmem:[%s17376_s1 + $0x780] ss:$16 sps:$4 sm:$0xff]   ;;  %v12044_v20 = vld [vmem:[%s17376_s1 + $0x788] ss:$16 sps:$4 sm:$0xff]  }
  0xc8   : >> { %1607 = vmatprep.subr.bf16.mxu0 %v11965_v21  ;;  %1648 = vmatprep.subr.bf16.mxu1 %v11968_v22  ;;  %v12049_v21 = vld [vmem:[%s17376_s1 + $0x764] ss:$16 sps:$4 sm:$0xff]   ;;  %v12052_v22 = vld [vmem:[%s17376_s1 + $0x76c] ss:$16 sps:$4 sm:$0xff]  }
  0xcb   : >> { %1608 = vmatpush2.bf16.msra.mxu0 %v11963_v23  ;;  %1649 = vmatpush2.bf16.msra.mxu1 %v11966_v24  ;;  %v12047_v23 = vld [vmem:[%s17376_s1 + $0x760] ss:$16 sps:$4 sm:$0xff]   ;;  %v12050_v24 = vld [vmem:[%s17376_s1 + $0x768] ss:$16 sps:$4 sm:$0xff]  }
  0xcc   : >> { %1609 = vmatprep.subr.bf16.mxu0 %v11971_v25  ;;  %1650 = vmatprep.subr.bf16.mxu1 %v11974_v26  ;;  %v12055_v25 = vld [vmem:[%s17376_s1 + $0x744] ss:$16 sps:$4 sm:$0xff]   ;;  %v12058_v26 = vld [vmem:[%s17376_s1 + $0x74c] ss:$16 sps:$4 sm:$0xff]  }
  0xcf   : >> { %1610 = vmatpush2.bf16.msra.mxu0 %v11969_v27  ;;  %1651 = vmatpush2.bf16.msra.mxu1 %v11972_v28  ;;  %v12053_v27 = vld [vmem:[%s17376_s1 + $0x740] ss:$16 sps:$4 sm:$0xff]   ;;  %v12056_v28 = vld [vmem:[%s17376_s1 + $0x748] ss:$16 sps:$4 sm:$0xff]  }
  0xd0   : >> { %2058 = vmatprep.subr.bf16.mxu0 %v11977_v29  ;;  %2099 = vmatprep.subr.bf16.mxu1 %v11980_v30  ;;  %v12061_v29 = vld [vmem:[%s17376_s1 + $0x724] ss:$16 sps:$4 sm:$0xff]   ;;  %v12064_v30 = vld [vmem:[%s17376_s1 + $0x72c] ss:$16 sps:$4 sm:$0xff]  }
  0xd2   : >> { %1612 = vmatmul.mubr.bf16.vlgmr.msra.gmra.mxu0 %v1255_v33  ;;  %1653 = vmatmul.mubr.bf16.vlgmr.msra.gmra.mxu1 %v1255_v33  ;;  %v12067_v33 = vld [vmem:[%s17376_s1 + $0x704] ss:$16 sps:$4 sm:$0xff]  }
  0xd3   : >> { %2059 = vmatpush1.bf16.msra.mxu0 %v11975_v34  ;;  %2100 = vmatpush1.bf16.msra.mxu1 %v11978_v35  ;;  %v12070_v34 = vld [vmem:[%s17376_s1 + $0x70c] ss:$16 sps:$4 sm:$0xff]   ;;  %v1730_v35 = vrot.slane %v369_v10, 1 }
  0xd4   : >> { %2060 = vmatprep.subr.bf16.mxu0 %v11983_v54  ;;  %2101 = vmatprep.subr.bf16.mxu1 %v11986_v50  ;;  %v1731_v54 = vrot.slane %v371_v5, 2  ;;  %v12065_v50 = vld [vmem:[%s17376_s1 + $0x700] ss:$16 sps:$4 sm:$0xff]   ;;  %v14153_v10 = vld [vmem:[%s13477_s11 + $0x8] sm:$0x77] }
  0xd5   : >> { %2090 = vmatprep.mubr.bf16.mxu0 %v1735_v55  ;;  %2131 = vmatprep.mubr.bf16.mxu1 %v1735_v55  ;;  %v12068_v55 = vld [vmem:[%s17376_s1 + $0x708] ss:$16 sps:$4 sm:$0xff]  }
  0xd6   : >> { %v1732_v5 = vor.u32 %v1731_v54, %v1730_v35  ;;  %v12145_v35 = vld [vmem:[%s17376_s1 + $0x964] ss:$16 sps:$4 sm:$0xff]   ;;  %v12148_v54 = vld [vmem:[%s17376_s1 + $0x96c] ss:$16 sps:$4 sm:$0xff]  }
  0xd7   : >> { %2061 = vmatpush1.bf16.msra.mxu0 %v11981_v36  ;;  %2102 = vmatpush1.bf16.msra.mxu1 %v11984_v37  ;;  %v12073_v36 = vld [vmem:[%s17376_s1 + $0x8e4] ss:$16 sps:$4 sm:$0xff]   ;;  %v12071_v37 = vld [vmem:[%s17376_s1 + $0x8e0] ss:$16 sps:$4 sm:$0xff]  }
  0xd8   : >> { %2062 = vmatprep.subr.bf16.mxu0 %v11989_v38  ;;  %2103 = vmatprep.subr.bf16.mxu1 %v11992_v39  ;;  %v12074_v38 = vld [vmem:[%s17376_s1 + $0x8e8] ss:$16 sps:$4 sm:$0xff]   ;;  %v12079_v39 = vld [vmem:[%s17376_s1 + $0x8c4] ss:$16 sps:$4 sm:$0xff]  }
  0xdb   : >> { %2063 = vmatpush1.bf16.msra.mxu0 %v11987_v40  ;;  %2104 = vmatpush1.bf16.msra.mxu1 %v11990_v41  ;;  %v12082_v40 = vld [vmem:[%s17376_s1 + $0x8cc] ss:$16 sps:$4 sm:$0xff]   ;;  %v14169_v41 = vcombine.high %v14153_v10, %v14153_v10 }
  0xdc   : >> { %2064 = vmatprep.subr.bf16.mxu0 %v11995_v42  ;;  %2105 = vmatprep.subr.bf16.mxu1 %v11998_v43 }
  0xdf   : >> { %2065 = vmatpush1.bf16.msra.mxu0 %v11993_v44  ;;  %2106 = vmatpush1.bf16.msra.mxu1 %v11996_v45  ;;  %v12077_v44 = vld [vmem:[%s17376_s1 + $0x8c0] ss:$16 sps:$4 sm:$0xff]   ;;  %v12080_v45 = vld [vmem:[%s17376_s1 + $0x8c8] ss:$16 sps:$4 sm:$0xff]  }
  0xe0   : >> { %2066 = vmatprep.subr.bf16.mxu0 %v12001_v46  ;;  %2107 = vmatprep.subr.bf16.mxu1 %v12004_v47  ;;  %v12085_v46 = vld [vmem:[%s17376_s1 + $0x8a4] ss:$16 sps:$4 sm:$0xff]  }
  0xe3   : >> { %2067 = vmatpush1.bf16.msra.mxu0 %v11999_v48  ;;  %2108 = vmatpush1.bf16.msra.mxu1 %v12002_v49  ;;  %v12088_v49 = vld [vmem:[%s17376_s1 + $0x8ac] ss:$16 sps:$4 sm:$0xff]  }
  0xe4   : >> { %2068 = vmatprep.subr.bf16.mxu0 %v12007_v51  ;;  %2109 = vmatprep.subr.bf16.mxu1 %v12010_v52  ;;  %v12083_v51 = vld [vmem:[%s17376_s1 + $0x8a0] ss:$16 sps:$4 sm:$0xff]  }
  0xe7   : >> { %2069 = vmatpush1.bf16.msra.mxu0 %v12005_v53  ;;  %2110 = vmatpush1.bf16.msra.mxu1 %v12008_v56  ;;  %v12086_v56 = vld [vmem:[%s17376_s1 + $0x8a8] ss:$16 sps:$4 sm:$0xff]  }
  0xe8   : >> { %2070 = vmatprep.subr.bf16.mxu0 %v12013_v57  ;;  %2111 = vmatprep.subr.bf16.mxu1 %v12016_v58 }
  0xeb   : >> { %2071 = vmatpush1.bf16.msra.mxu0 %v12011_v59  ;;  %2112 = vmatpush1.bf16.msra.mxu1 %v12014_v60  ;;  %v12091_v59 = vld [vmem:[%s17376_s1 + $0x884] ss:$16 sps:$4 sm:$0xff]   ;;  %v12094_v60 = vld [vmem:[%s17376_s1 + $0x88c] ss:$16 sps:$4 sm:$0xff]  }
  0xec   : >> { %2072 = vmatprep.subr.bf16.mxu0 %v12019_v61  ;;  %2113 = vmatprep.subr.bf16.mxu1 %v12022_v62  ;;  %v12089_v61 = vld [vmem:[%s17376_s1 + $0x880] ss:$16 sps:$4 sm:$0xff]   ;;  %v12092_v62 = vld [vmem:[%s17376_s1 + $0x888] ss:$16 sps:$4 sm:$0xff]  }
  0xef   : >> { %2073 = vmatpush1.bf16.msra.mxu0 %v12017_v0  ;;  %2114 = vmatpush1.bf16.msra.mxu1 %v12020_v2  ;;  %v12097_v0 = vld [vmem:[%s17376_s1 + $0x864] ss:$16 sps:$4 sm:$0xff]   ;;  %v12100_v2 = vld [vmem:[%s17376_s1 + $0x86c] ss:$16 sps:$4 sm:$0xff]  }
  0xf0   : >> { %2074 = vmatprep.subr.bf16.mxu0 %v12025_v3  ;;  %2115 = vmatprep.subr.bf16.mxu1 %v12028_v4  ;;  %v12095_v3 = vld [vmem:[%s17376_s1 + $0x860] ss:$16 sps:$4 sm:$0xff]   ;;  %v12098_v4 = vld [vmem:[%s17376_s1 + $0x868] ss:$16 sps:$4 sm:$0xff]  }
  0xf3   : >> { %2075 = vmatpush2.bf16.msra.mxu0 %v12023_v6  ;;  %2116 = vmatpush2.bf16.msra.mxu1 %v12026_v7  ;;  %v12103_v6 = vld [vmem:[%s17376_s1 + $0x844] ss:$16 sps:$4 sm:$0xff]   ;;  %v12106_v7 = vld [vmem:[%s17376_s1 + $0x84c] ss:$16 sps:$4 sm:$0xff]  }
  0xf4   : >> { %2076 = vmatprep.subr.bf16.mxu0 %v12031_v8  ;;  %2117 = vmatprep.subr.bf16.mxu1 %v12034_v9  ;;  %v12101_v8 = vld [vmem:[%s17376_s1 + $0x840] ss:$16 sps:$4 sm:$0xff]   ;;  %v12104_v9 = vld [vmem:[%s17376_s1 + $0x848] ss:$16 sps:$4 sm:$0xff]  }
  0xf7   : >> { %2077 = vmatpush2.bf16.msra.mxu0 %v12029_v11  ;;  %2118 = vmatpush2.bf16.msra.mxu1 %v12032_v12  ;;  %v12109_v11 = vld [vmem:[%s17376_s1 + $0x824] ss:$16 sps:$4 sm:$0xff]   ;;  %v12112_v12 = vld [vmem:[%s17376_s1 + $0x82c] ss:$16 sps:$4 sm:$0xff]  }
  0xf8   : >> { %2078 = vmatprep.subr.bf16.mxu0 %v12037_v13  ;;  %2119 = vmatprep.subr.bf16.mxu1 %v12040_v14  ;;  %v12107_v13 = vld [vmem:[%s17376_s1 + $0x820] ss:$16 sps:$4 sm:$0xff]   ;;  %v12110_v14 = vld [vmem:[%s17376_s1 + $0x828] ss:$16 sps:$4 sm:$0xff]  }
  0xfb   : >> { %2079 = vmatpush2.bf16.msra.mxu0 %v12035_v15  ;;  %2120 = vmatpush2.bf16.msra.mxu1 %v12038_v16  ;;  %v12115_v15 = vld [vmem:[%s17376_s1 + $0x804] ss:$16 sps:$4 sm:$0xff]   ;;  %v12118_v16 = vld [vmem:[%s17376_s1 + $0x80c] ss:$16 sps:$4 sm:$0xff]  }
  0xfc   : >> { %2080 = vmatprep.subr.bf16.mxu0 %v12043_v17  ;;  %2121 = vmatprep.subr.bf16.mxu1 %v12046_v18  ;;  %v12113_v17 = vld [vmem:[%s17376_s1 + $0x800] ss:$16 sps:$4 sm:$0xff]   ;;  %v12116_v18 = vld [vmem:[%s17376_s1 + $0x808] ss:$16 sps:$4 sm:$0xff]  }
  0xff   : >> { %2081 = vmatpush2.bf16.msra.mxu0 %v12041_v19  ;;  %2122 = vmatpush2.bf16.msra.mxu1 %v12044_v20  ;;  %v12121_v19 = vld [vmem:[%s17376_s1 + $0x9e4] ss:$16 sps:$4 sm:$0xff]   ;;  %v12124_v20 = vld [vmem:[%s17376_s1 + $0x9ec] ss:$16 sps:$4 sm:$0xff]  }
 0x100   : >> { %2082 = vmatprep.subr.bf16.mxu0 %v12049_v21  ;;  %2123 = vmatprep.subr.bf16.mxu1 %v12052_v22  ;;  %v12119_v21 = vld [vmem:[%s17376_s1 + $0x9e0] ss:$16 sps:$4 sm:$0xff]   ;;  %v12122_v22 = vld [vmem:[%s17376_s1 + $0x9e8] ss:$16 sps:$4 sm:$0xff]  }
 0x103   : >> { %2083 = vmatpush2.bf16.msra.mxu0 %v12047_v23  ;;  %2124 = vmatpush2.bf16.msra.mxu1 %v12050_v24  ;;  %v12127_v23 = vld [vmem:[%s17376_s1 + $0x9c4] ss:$16 sps:$4 sm:$0xff]   ;;  %v12130_v24 = vld [vmem:[%s17376_s1 + $0x9cc] ss:$16 sps:$4 sm:$0xff]  }
 0x104   : >> { %2084 = vmatprep.subr.bf16.mxu0 %v12055_v25  ;;  %2125 = vmatprep.subr.bf16.mxu1 %v12058_v26  ;;  %v12125_v25 = vld [vmem:[%s17376_s1 + $0x9c0] ss:$16 sps:$4 sm:$0xff]   ;;  %v12128_v26 = vld [vmem:[%s17376_s1 + $0x9c8] ss:$16 sps:$4 sm:$0xff]  }
 0x107   : >> { %2085 = vmatpush2.bf16.msra.mxu0 %v12053_v27  ;;  %2126 = vmatpush2.bf16.msra.mxu1 %v12056_v28  ;;  %v12133_v27 = vld [vmem:[%s17376_s1 + $0x9a4] ss:$16 sps:$4 sm:$0xff]   ;;  %v12136_v28 = vld [vmem:[%s17376_s1 + $0x9ac] ss:$16 sps:$4 sm:$0xff]  }
 0x108   : >> { %2086 = vmatprep.subr.bf16.mxu0 %v12061_v29  ;;  %2127 = vmatprep.subr.bf16.mxu1 %v12064_v30  ;;  %v12131_v29 = vld [vmem:[%s17376_s1 + $0x9a0] ss:$16 sps:$4 sm:$0xff]   ;;  %v12134_v30 = vld [vmem:[%s17376_s1 + $0x9a8] ss:$16 sps:$4 sm:$0xff]  }
 0x10b   : >> { %2087 = vmatpush2.bf16.msra.mxu0 %v12059_v31  ;;  %2128 = vmatpush2.bf16.msra.mxu1 %v12062_v32  ;;  %v12139_v31 = vld [vmem:[%s17376_s1 + $0x984] ss:$16 sps:$4 sm:$0xff]   ;;  %v12142_v32 = vld [vmem:[%s17376_s1 + $0x98c] ss:$16 sps:$4 sm:$0xff]  }
 0x10c   : >> { %2088 = vmatprep.subr.bf16.mxu0 %v12067_v33  ;;  %2129 = vmatprep.subr.bf16.mxu1 %v12070_v34  ;;  %v12137_v33 = vld [vmem:[%s17376_s1 + $0x980] ss:$16 sps:$4 sm:$0xff]   ;;  %v12140_v34 = vld [vmem:[%s17376_s1 + $0x988] ss:$16 sps:$4 sm:$0xff]  }
 0x10f   : >> { %2089 = vmatpush2.bf16.msra.mxu0 %v12065_v50  ;;  %2130 = vmatpush2.bf16.msra.mxu1 %v12068_v55  ;;  %v12143_v50 = vld [vmem:[%s17376_s1 + $0x960] ss:$16 sps:$4 sm:$0xff]   ;;  %v12146_v55 = vld [vmem:[%s17376_s1 + $0x968] ss:$16 sps:$4 sm:$0xff]  }
 0x110   : >> { %2541 = vmatprep.subr.bf16.mxu0 %v12073_v36  ;;  %2582 = vmatprep.subr.bf16.mxu1 %v12076_v63  ;;  %v12151_v36 = vld [vmem:[%s17376_s1 + $0x944] ss:$16 sps:$4 sm:$0xff]   ;;  %v12154_v63 = vld [vmem:[%s17376_s1 + $0x94c] ss:$16 sps:$4 sm:$0xff]  }
 0x112   : >> { %v14171_v42 = vpop.f32.mrf.mxu0  ;;  %v14173_v43 = vpop.f32.mrf.mxu1  ;;  %2091 = vmatmul.mubr.bf16.vlgmr.msra.gmra.mxu0 %v1732_v5  ;;  %2132 = vmatmul.mubr.bf16.vlgmr.msra.gmra.mxu1 %v1732_v5  ;;  %v12149_v5 = vld [vmem:[%s17376_s1 + $0x940] ss:$16 sps:$4 sm:$0xff]  }
 0x113   : >> { %2542 = vmatpush1.bf16.msra.mxu0 %v12071_v37  ;;  %2583 = vmatpush1.bf16.msra.mxu1 %v12074_v38  ;;  %v12152_v37 = vld [vmem:[%s17376_s1 + $0x948] ss:$16 sps:$4 sm:$0xff]   ;;  %v12157_v38 = vld [vmem:[%s17376_s1 + $0x924] ss:$16 sps:$4 sm:$0xff]  }
 0x114   : >> { %v14184_v47 = vpop.f32.mrf.mxu0  ;;  %v14186_v48 = vpop.f32.mrf.mxu1  ;;  %2543 = vmatprep.subr.bf16.mxu0 %v12079_v39  ;;  %2584 = vmatprep.subr.bf16.mxu1 %v12082_v40  ;;  %v12160_v39 = vld [vmem:[%s17376_s1 + $0x92c] ss:$16 sps:$4 sm:$0xff]   ;;  %v12155_v40 = vld [vmem:[%s17376_s1 + $0x920] ss:$16 sps:$4 sm:$0xff]  }
 0x115   : >> { %2573 = vmatprep.mubr.bf16.mxu0 %v14169_v41  ;;  %2614 = vmatprep.mubr.bf16.mxu1 %v14169_v41 }
 0x116   : >> { %v742_v52 = vpop.f32.mrf.mxu0  ;;  %v783_v53 = vpop.f32.mrf.mxu1 }
 0x117   : >> { %2544 = vmatpush1.bf16.msra.mxu0 %v12077_v44  ;;  %2585 = vmatpush1.bf16.msra.mxu1 %v12080_v45  ;;  %v12158_v44 = vld [vmem:[%s17376_s1 + $0x928] ss:$16 sps:$4 sm:$0xff]   ;;  %v12163_v45 = vld [vmem:[%s17376_s1 + $0x904] ss:$16 sps:$4 sm:$0xff]  }
 0x118   : >> { %v743_v57 = vpop.f32.mrf.mxu0  ;;  %v784_v58 = vpop.f32.mrf.mxu1  ;;  %2545 = vmatprep.subr.bf16.mxu0 %v12085_v46  ;;  %2586 = vmatprep.subr.bf16.mxu1 %v12088_v49  ;;  %v12166_v46 = vld [vmem:[%s17376_s1 + $0x90c] ss:$16 sps:$4 sm:$0xff]   ;;  %v2702_v49 = vshll.u32 %v14169_v41, 16  ;;  %v12164_v52 = vld [vmem:[%s17376_s1 + $0x908] ss:$16 sps:$4 sm:$0xff]  }
 0x119   : >> { %v12171_v53 = vld [vmem:[%s17376_s1 + $0xae4] ss:$16 sps:$4 sm:$0xff]   ;;  %v12169_v57 = vld [vmem:[%s17376_s1 + $0xae0] ss:$16 sps:$4 sm:$0xff]   ;;  %v12172_v58 = vld [vmem:[%s17376_s1 + $0xae8] ss:$16 sps:$4 sm:$0xff]  }
 0x11b   : >> { %2546 = vmatpush1.bf16.msra.mxu0 %v12083_v51  ;;  %2587 = vmatpush1.bf16.msra.mxu1 %v12086_v56  ;;  %v12161_v51 = vld [vmem:[%s17376_s1 + $0x900] ss:$16 sps:$4 sm:$0xff]   ;;  %v12174_v56 = vld [vmem:[%s17376_s1 + $0xaec] ss:$16 sps:$4 sm:$0xff]  }
 0x11c   : >> { %2547 = vmatprep.subr.bf16.mxu0 %v12091_v59  ;;  %2588 = vmatprep.subr.bf16.mxu1 %v12094_v60  ;;  %v2700_v59 = vshrl.u32 %v14169_v41, 16  ;;  %v2704_v60 = vrot.slane %v2702_v49, 1 }
 0x11f   : >> { %2548 = vmatpush1.bf16.msra.mxu0 %v12089_v61  ;;  %2589 = vmatpush1.bf16.msra.mxu1 %v12092_v62  ;;  %v14373_v61 = vcombine.low %v14153_v10, %v14153_v10  ;;  %v12177_v62 = vld [vmem:[%s17376_s1 + $0xac4] ss:$16 sps:$4 sm:$0xff]   ;;  %v12178_v10 = vld [vmem:[%s17376_s1 + $0xac8] ss:$16 sps:$4 sm:$0xff]  }
 0x120   : >> { %2549 = vmatprep.subr.bf16.mxu0 %v12097_v0  ;;  %2590 = vmatprep.subr.bf16.mxu1 %v12100_v2  ;;  %v12180_v0 = vld [vmem:[%s17376_s1 + $0xacc] ss:$16 sps:$4 sm:$0xff]   ;;  %v12175_v2 = vld [vmem:[%s17376_s1 + $0xac0] ss:$16 sps:$4 sm:$0xff]  }
 0x123   : >> { %2550 = vmatpush1.bf16.msra.mxu0 %v12095_v3  ;;  %2591 = vmatpush1.bf16.msra.mxu1 %v12098_v4  ;;  %v2705_v3 = vor.u32 %v2704_v60, %v2700_v59  ;;  %v12246_v60 = vld [vmem:[%s17376_s1 + $0xb6c] ss:$16 sps:$4 sm:$0xff]  }
 0x124   : >> { %2551 = vmatprep.subr.bf16.mxu0 %v12103_v6  ;;  %2592 = vmatprep.subr.bf16.mxu1 %v12106_v7 }
 0x127   : >> { %2552 = vmatpush1.bf16.msra.mxu0 %v12101_v8  ;;  %2593 = vmatpush1.bf16.msra.mxu1 %v12104_v9 }
 0x128   : >> { %2553 = vmatprep.subr.bf16.mxu0 %v12109_v11  ;;  %2594 = vmatprep.subr.bf16.mxu1 %v12112_v12  ;;  %v12183_v12 = vld [vmem:[%s17376_s1 + $0xaa4] ss:$16 sps:$4 sm:$0xff]  }
 0x12b   : >> { %2554 = vmatpush1.bf16.msra.mxu0 %v12107_v13  ;;  %2595 = vmatpush1.bf16.msra.mxu1 %v12110_v14  ;;  %v12186_v13 = vld [vmem:[%s17376_s1 + $0xaac] ss:$16 sps:$4 sm:$0xff]   ;;  %v12181_v14 = vld [vmem:[%s17376_s1 + $0xaa0] ss:$16 sps:$4 sm:$0xff]  }
 0x12c   : >> { %2555 = vmatprep.subr.bf16.mxu0 %v12115_v15  ;;  %2596 = vmatprep.subr.bf16.mxu1 %v12118_v16  ;;  %v12184_v15 = vld [vmem:[%s17376_s1 + $0xaa8] ss:$16 sps:$4 sm:$0xff]  }
 0x12f   : >> { %2556 = vmatpush1.bf16.msra.mxu0 %v12113_v17  ;;  %2597 = vmatpush1.bf16.msra.mxu1 %v12116_v18 }
 0x130   : >> { %2557 = vmatprep.subr.bf16.mxu0 %v12121_v19  ;;  %2598 = vmatprep.subr.bf16.mxu1 %v12124_v20  ;;  %v12192_v19 = vld [vmem:[%s17376_s1 + $0xa8c] ss:$16 sps:$4 sm:$0xff]   ;;  %v12187_v20 = vld [vmem:[%s17376_s1 + $0xa80] ss:$16 sps:$4 sm:$0xff]  }
 0x133   : >> { %2558 = vmatpush2.bf16.msra.mxu0 %v12119_v21  ;;  %2599 = vmatpush2.bf16.msra.mxu1 %v12122_v22  ;;  %v12190_v21 = vld [vmem:[%s17376_s1 + $0xa88] ss:$16 sps:$4 sm:$0xff]   ;;  %v12195_v22 = vld [vmem:[%s17376_s1 + $0xa64] ss:$16 sps:$4 sm:$0xff]  }
 0x134   : >> { %2559 = vmatprep.subr.bf16.mxu0 %v12127_v23  ;;  %2600 = vmatprep.subr.bf16.mxu1 %v12130_v24  ;;  %v12198_v23 = vld [vmem:[%s17376_s1 + $0xa6c] ss:$16 sps:$4 sm:$0xff]   ;;  %v12193_v24 = vld [vmem:[%s17376_s1 + $0xa60] ss:$16 sps:$4 sm:$0xff]  }
 0x137   : >> { %2560 = vmatpush2.bf16.msra.mxu0 %v12125_v25  ;;  %2601 = vmatpush2.bf16.msra.mxu1 %v12128_v26  ;;  %v12196_v25 = vld [vmem:[%s17376_s1 + $0xa68] ss:$16 sps:$4 sm:$0xff]   ;;  %v12201_v26 = vld [vmem:[%s17376_s1 + $0xa44] ss:$16 sps:$4 sm:$0xff]  }
 0x138   : >> { %2561 = vmatprep.subr.bf16.mxu0 %v12133_v27  ;;  %2602 = vmatprep.subr.bf16.mxu1 %v12136_v28  ;;  %v12204_v27 = vld [vmem:[%s17376_s1 + $0xa4c] ss:$16 sps:$4 sm:$0xff]   ;;  %v12199_v28 = vld [vmem:[%s17376_s1 + $0xa40] ss:$16 sps:$4 sm:$0xff]  }
 0x13b   : >> { %2562 = vmatpush2.bf16.msra.mxu0 %v12131_v29  ;;  %2603 = vmatpush2.bf16.msra.mxu1 %v12134_v30  ;;  %v12202_v29 = vld [vmem:[%s17376_s1 + $0xa48] ss:$16 sps:$4 sm:$0xff]   ;;  %v12207_v30 = vld [vmem:[%s17376_s1 + $0xa24] ss:$16 sps:$4 sm:$0xff]  }
 0x13c   : >> { %2563 = vmatprep.subr.bf16.mxu0 %v12139_v31  ;;  %2604 = vmatprep.subr.bf16.mxu1 %v12142_v32  ;;  %v12210_v31 = vld [vmem:[%s17376_s1 + $0xa2c] ss:$16 sps:$4 sm:$0xff]   ;;  %v12205_v32 = vld [vmem:[%s17376_s1 + $0xa20] ss:$16 sps:$4 sm:$0xff]  }
 0x13f   : >> { %2564 = vmatpush2.bf16.msra.mxu0 %v12137_v33  ;;  %2605 = vmatpush2.bf16.msra.mxu1 %v12140_v34  ;;  %v12208_v33 = vld [vmem:[%s17376_s1 + $0xa28] ss:$16 sps:$4 sm:$0xff]   ;;  %v12213_v34 = vld [vmem:[%s17376_s1 + $0xa04] ss:$16 sps:$4 sm:$0xff]  }
 0x140   : >> { %2565 = vmatprep.subr.bf16.mxu0 %v12145_v35  ;;  %2606 = vmatprep.subr.bf16.mxu1 %v12148_v54  ;;  %v12216_v35 = vld [vmem:[%s17376_s1 + $0xa0c] ss:$16 sps:$4 sm:$0xff]   ;;  %v12211_v54 = vld [vmem:[%s17376_s1 + $0xa00] ss:$16 sps:$4 sm:$0xff]  }
 0x143   : >> { %2566 = vmatpush2.bf16.msra.mxu0 %v12143_v50  ;;  %2607 = vmatpush2.bf16.msra.mxu1 %v12146_v55  ;;  %v12214_v50 = vld [vmem:[%s17376_s1 + $0xa08] ss:$16 sps:$4 sm:$0xff]   ;;  %v12219_v55 = vld [vmem:[%s17376_s1 + $0xbe4] ss:$16 sps:$4 sm:$0xff]  }
 0x144   : >> { %2567 = vmatprep.subr.bf16.mxu0 %v12151_v36  ;;  %2608 = vmatprep.subr.bf16.mxu1 %v12154_v63  ;;  %v12222_v36 = vld [vmem:[%s17376_s1 + $0xbec] ss:$16 sps:$4 sm:$0xff]   ;;  %v12217_v63 = vld [vmem:[%s17376_s1 + $0xbe0] ss:$16 sps:$4 sm:$0xff]  }
 0x147   : >> { %2568 = vmatpush2.bf16.msra.mxu0 %v12149_v5  ;;  %2609 = vmatpush2.bf16.msra.mxu1 %v12152_v37  ;;  %v12220_v5 = vld [vmem:[%s17376_s1 + $0xbe8] ss:$16 sps:$4 sm:$0xff]   ;;  %v12225_v37 = vld [vmem:[%s17376_s1 + $0xbc4] ss:$16 sps:$4 sm:$0xff]  }
 0x148   : >> { %2569 = vmatprep.subr.bf16.mxu0 %v12157_v38  ;;  %2610 = vmatprep.subr.bf16.mxu1 %v12160_v39  ;;  %v12228_v38 = vld [vmem:[%s17376_s1 + $0xbcc] ss:$16 sps:$4 sm:$0xff]   ;;  %v12223_v39 = vld [vmem:[%s17376_s1 + $0xbc0] ss:$16 sps:$4 sm:$0xff]  }
 0x14b   : >> { %2570 = vmatpush2.bf16.msra.mxu0 %v12155_v40  ;;  %2611 = vmatpush2.bf16.msra.mxu1 %v12158_v44  ;;  %v12226_v40 = vld [vmem:[%s17376_s1 + $0xbc8] ss:$16 sps:$4 sm:$0xff]   ;;  %v12231_v44 = vld [vmem:[%s17376_s1 + $0xba4] ss:$16 sps:$4 sm:$0xff]  }
 0x14c   : >> { %2571 = vmatprep.subr.bf16.mxu0 %v12163_v45  ;;  %2612 = vmatprep.subr.bf16.mxu1 %v12166_v46  ;;  %v12234_v45 = vld [vmem:[%s17376_s1 + $0xbac] ss:$16 sps:$4 sm:$0xff]   ;;  %v12229_v46 = vld [vmem:[%s17376_s1 + $0xba0] ss:$16 sps:$4 sm:$0xff]  }
 0x14f   : >> { %2572 = vmatpush2.bf16.msra.mxu0 %v12161_v51  ;;  %2613 = vmatpush2.bf16.msra.mxu1 %v12164_v52  ;;  %v12232_v51 = vld [vmem:[%s17376_s1 + $0xba8] ss:$16 sps:$4 sm:$0xff]   ;;  %v12237_v52 = vld [vmem:[%s17376_s1 + $0xb84] ss:$16 sps:$4 sm:$0xff]  }
 0x150   : >> { %3028 = vmatprep.subr.bf16.mxu0 %v12171_v53  ;;  %3069 = vmatprep.subr.bf16.mxu1 %v12174_v56  ;;  %v12240_v53 = vld [vmem:[%s17376_s1 + $0xb8c] ss:$16 sps:$4 sm:$0xff]   ;;  %v12235_v56 = vld [vmem:[%s17376_s1 + $0xb80] ss:$16 sps:$4 sm:$0xff]  }
 0x152   : >> { %v1142_v4 = vpop.f32.mrf.mxu0  ;;  %v1183_v6 = vpop.f32.mrf.mxu1  ;;  %2574 = vmatmul.mubr.bf16.vlgmr.msra.gmra.mxu0 %v14373_v61  ;;  %2615 = vmatmul.mubr.bf16.vlgmr.msra.gmra.mxu1 %v14373_v61 }
 0x153   : >> { %v14392_v7 = vadd.f32 %v1142_v4, %v14171_v42  ;;  %v14395_v8 = vadd.f32 %v1183_v6, %v14173_v43  ;;  %3029 = vmatpush1.bf16.msra.mxu0 %v12169_v57  ;;  %3070 = vmatpush1.bf16.msra.mxu1 %v12172_v58  ;;  %v12238_v57 = vld [vmem:[%s17376_s1 + $0xb88] ss:$16 sps:$4 sm:$0xff]   ;;  %v12243_v58 = vld [vmem:[%s17376_s1 + $0xb64] ss:$16 sps:$4 sm:$0xff]  }
 0x154   : >> { %v1144_v9 = vpop.f32.mrf.mxu0  ;;  %v1185_v11 = vpop.f32.mrf.mxu1  ;;  %3030 = vmatprep.subr.bf16.mxu0 %v12177_v62  ;;  %3071 = vmatprep.subr.bf16.mxu1 %v12180_v0  ;;  %v12241_v62 = vld [vmem:[%s17376_s1 + $0xb60] ss:$16 sps:$4 sm:$0xff]   ;;  %v12244_v0 = vld [vmem:[%s17376_s1 + $0xb68] ss:$16 sps:$4 sm:$0xff]   ;;  %v12255_v6 = vld [vmem:[%s17376_s1 + $0xb24] ss:$16 sps:$4 sm:$0xff]  }
 0x155   : >> { %v14404_v42 = vadd.f32 %v1144_v9, %v14184_v47  ;;  %v14407_v43 = vadd.f32 %v1185_v11, %v14186_v48  ;;  %3060 = vmatprep.mubr.bf16.mxu0 %v2705_v3  ;;  %3101 = vmatprep.mubr.bf16.mxu1 %v2705_v3  ;;  %v12189_v48 = vld [vmem:[%s17376_s1 + $0xa84] ss:$16 sps:$4 sm:$0xff]   ;;  %v12247_v3 = vld [vmem:[%s17376_s1 + $0xb40] ss:$16 sps:$4 sm:$0xff]   ;;  %v12250_v4 = vld [vmem:[%s17376_s1 + $0xb48] ss:$16 sps:$4 sm:$0xff]  }
 0x156   : >> { %v1146_v16 = vpop.f32.mrf.mxu0  ;;  %v1187_v17 = vpop.f32.mrf.mxu1  ;;  %v12258_v9 = vld [vmem:[%s17376_s1 + $0xb2c] ss:$16 sps:$4 sm:$0xff]   ;;  %v2695_v11 = vshll.u32 %v14373_v61, 16 }
 0x157   : >> { %3031 = vmatpush1.bf16.msra.mxu0 %v12175_v2  ;;  %3072 = vmatpush1.bf16.msra.mxu1 %v12178_v10  ;;  %v12249_v2 = vld [vmem:[%s17376_s1 + $0xb44] ss:$16 sps:$4 sm:$0xff]   ;;  %v12252_v10 = vld [vmem:[%s17376_s1 + $0xb4c] ss:$16 sps:$4 sm:$0xff]   ;;  %v2693_v16 = vshrl.u32 %v14373_v61, 16 }
 0x158   : >> { %v1147_v18 = vpop.f32.mrf.mxu0  ;;  %v1188_v47 = vpop.f32.mrf.mxu1  ;;  %3032 = vmatprep.subr.bf16.mxu0 %v12183_v12  ;;  %3073 = vmatprep.subr.bf16.mxu1 %v12186_v13  ;;  %v12253_v12 = vld [vmem:[%s17376_s1 + $0xb20] ss:$16 sps:$4 sm:$0xff]   ;;  %v12256_v13 = vld [vmem:[%s17376_s1 + $0xb28] ss:$16 sps:$4 sm:$0xff]   ;;  %v2697_v17 = vrot.slane %v2695_v11, 1 }
 0x159   : >> { %v12259_v18 = vld [vmem:[%s17376_s1 + $0xb00] ss:$16 sps:$4 sm:$0xff]   ;;  %v12262_v47 = vld [vmem:[%s17376_s1 + $0xb08] ss:$16 sps:$4 sm:$0xff]  }
 0x15b   : >> { %3033 = vmatpush1.bf16.msra.mxu0 %v12181_v14  ;;  %3074 = vmatpush1.bf16.msra.mxu1 %v12184_v15  ;;  %v12261_v14 = vld [vmem:[%s17376_s1 + $0xb04] ss:$16 sps:$4 sm:$0xff]   ;;  %v12264_v15 = vld [vmem:[%s17376_s1 + $0xb0c] ss:$16 sps:$4 sm:$0xff]  }
 0x15c   : >> { %3034 = vmatprep.subr.bf16.mxu0 %v12189_v48  ;;  %3075 = vmatprep.subr.bf16.mxu1 %v12192_v19  ;;  %v12267_v48 = vld [vmem:[%s17376_s1 + $0xce4] ss:$16 sps:$4 sm:$0xff]   ;;  %v12270_v19 = vld [vmem:[%s17376_s1 + $0xcec] ss:$16 sps:$4 sm:$0xff]  }
 0x15f   : >> { %3035 = vmatpush1.bf16.msra.mxu0 %v12187_v20  ;;  %3076 = vmatpush1.bf16.msra.mxu1 %v12190_v21  ;;  %v12265_v20 = vld [vmem:[%s17376_s1 + $0xce0] ss:$16 sps:$4 sm:$0xff]   ;;  %v12268_v21 = vld [vmem:[%s17376_s1 + $0xce8] ss:$16 sps:$4 sm:$0xff]  }
 0x160   : >> { %3036 = vmatprep.subr.bf16.mxu0 %v12195_v22  ;;  %3077 = vmatprep.subr.bf16.mxu1 %v12198_v23  ;;  %v2698_v22 = vor.u32 %v2697_v17, %v2693_v16  ;;  %v12273_v23 = vld [vmem:[%s17376_s1 + $0xcc4] ss:$16 sps:$4 sm:$0xff]  }
 0x161   : >> { %v12327_v17 = vld [vmem:[%s17376_s1 + $0xda4] ss:$16 sps:$4 sm:$0xff]  }
 0x163   : >> { %3037 = vmatpush1.bf16.msra.mxu0 %v12193_v24  ;;  %3078 = vmatpush1.bf16.msra.mxu1 %v12196_v25  ;;  %v12276_v24 = vld [vmem:[%s17376_s1 + $0xccc] ss:$16 sps:$4 sm:$0xff]   ;;  %v12271_v25 = vld [vmem:[%s17376_s1 + $0xcc0] ss:$16 sps:$4 sm:$0xff]  }
 0x164   : >> { %3038 = vmatprep.subr.bf16.mxu0 %v12201_v26  ;;  %3079 = vmatprep.subr.bf16.mxu1 %v12204_v27  ;;  %v12274_v26 = vld [vmem:[%s17376_s1 + $0xcc8] ss:$16 sps:$4 sm:$0xff]   ;;  %v3180_v27 = vrot.slane %v14169_v41, 1  ;;  %v12367_v41 = vld [vmem:[%s17376_s1 + $0xec0] ss:$16 sps:$4 sm:$0xff]  }
 0x167   : >> { %3039 = vmatpush1.bf16.msra.mxu0 %v12199_v28  ;;  %3080 = vmatpush1.bf16.msra.mxu1 %v12202_v29 }
 0x168   : >> { %3040 = vmatprep.subr.bf16.mxu0 %v12207_v30  ;;  %3081 = vmatprep.subr.bf16.mxu1 %v12210_v31 }
 0x16b   : >> { %3041 = vmatpush1.bf16.msra.mxu0 %v12205_v32  ;;  %3082 = vmatpush1.bf16.msra.mxu1 %v12208_v33 }
 0x16c   : >> { %3042 = vmatprep.subr.bf16.mxu0 %v12213_v34  ;;  %3083 = vmatprep.subr.bf16.mxu1 %v12216_v35  ;;  %v12279_v34 = vld [vmem:[%s17376_s1 + $0xca4] ss:$16 sps:$4 sm:$0xff]   ;;  %v12282_v35 = vld [vmem:[%s17376_s1 + $0xcac] ss:$16 sps:$4 sm:$0xff]  }
 0x16f   : >> { %3043 = vmatpush1.bf16.msra.mxu0 %v12211_v54  ;;  %3084 = vmatpush1.bf16.msra.mxu1 %v12214_v50  ;;  %v12277_v54 = vld [vmem:[%s17376_s1 + $0xca0] ss:$16 sps:$4 sm:$0xff]   ;;  %v12280_v50 = vld [vmem:[%s17376_s1 + $0xca8] ss:$16 sps:$4 sm:$0xff]  }
 0x170   : >> { %3044 = vmatprep.subr.bf16.mxu0 %v12219_v55  ;;  %3085 = vmatprep.subr.bf16.mxu1 %v12222_v36 }
 0x173   : >> { %3045 = vmatpush2.bf16.msra.mxu0 %v12217_v63  ;;  %3086 = vmatpush2.bf16.msra.mxu1 %v12220_v5  ;;  %v12288_v5 = vld [vmem:[%s17376_s1 + $0xc8c] ss:$16 sps:$4 sm:$0xff]  }
 0x174   : >> { %3046 = vmatprep.subr.bf16.mxu0 %v12225_v37  ;;  %3087 = vmatprep.subr.bf16.mxu1 %v12228_v38  ;;  %v12283_v37 = vld [vmem:[%s17376_s1 + $0xc80] ss:$16 sps:$4 sm:$0xff]   ;;  %v12286_v38 = vld [vmem:[%s17376_s1 + $0xc88] ss:$16 sps:$4 sm:$0xff]  }
 0x177   : >> { %3047 = vmatpush2.bf16.msra.mxu0 %v12223_v39  ;;  %3088 = vmatpush2.bf16.msra.mxu1 %v12226_v40  ;;  %v12291_v39 = vld [vmem:[%s17376_s1 + $0xc64] ss:$16 sps:$4 sm:$0xff]   ;;  %v12294_v40 = vld [vmem:[%s17376_s1 + $0xc6c] ss:$16 sps:$4 sm:$0xff]  }
 0x178   : >> { %3048 = vmatprep.subr.bf16.mxu0 %v12231_v44  ;;  %3089 = vmatprep.subr.bf16.mxu1 %v12234_v45  ;;  %v12289_v44 = vld [vmem:[%s17376_s1 + $0xc60] ss:$16 sps:$4 sm:$0xff]   ;;  %v12292_v45 = vld [vmem:[%s17376_s1 + $0xc68] ss:$16 sps:$4 sm:$0xff]  }
 0x17b   : >> { %3049 = vmatpush2.bf16.msra.mxu0 %v12229_v46  ;;  %3090 = vmatpush2.bf16.msra.mxu1 %v12232_v51  ;;  %v12297_v46 = vld [vmem:[%s17376_s1 + $0xc44] ss:$16 sps:$4 sm:$0xff]   ;;  %v12300_v51 = vld [vmem:[%s17376_s1 + $0xc4c] ss:$16 sps:$4 sm:$0xff]  }
 0x17c   : >> { %3050 = vmatprep.subr.bf16.mxu0 %v12237_v52  ;;  %3091 = vmatprep.subr.bf16.mxu1 %v12240_v53  ;;  %v12295_v52 = vld [vmem:[%s17376_s1 + $0xc40] ss:$16 sps:$4 sm:$0xff]   ;;  %v12298_v53 = vld [vmem:[%s17376_s1 + $0xc48] ss:$16 sps:$4 sm:$0xff]  }
 0x17f   : >> { %3051 = vmatpush2.bf16.msra.mxu0 %v12235_v56  ;;  %3092 = vmatpush2.bf16.msra.mxu1 %v12238_v57  ;;  %v12303_v56 = vld [vmem:[%s17376_s1 + $0xc24] ss:$16 sps:$4 sm:$0xff]   ;;  %v12306_v57 = vld [vmem:[%s17376_s1 + $0xc2c] ss:$16 sps:$4 sm:$0xff]  }
 0x180   : >> { %3052 = vmatprep.subr.bf16.mxu0 %v12243_v58  ;;  %3093 = vmatprep.subr.bf16.mxu1 %v12246_v60  ;;  %v12301_v58 = vld [vmem:[%s17376_s1 + $0xc20] ss:$16 sps:$4 sm:$0xff]   ;;  %v12304_v60 = vld [vmem:[%s17376_s1 + $0xc28] ss:$16 sps:$4 sm:$0xff]  }
 0x183   : >> { %3053 = vmatpush2.bf16.msra.mxu0 %v12241_v62  ;;  %3094 = vmatpush2.bf16.msra.mxu1 %v12244_v0  ;;  %v12309_v62 = vld [vmem:[%s17376_s1 + $0xc04] ss:$16 sps:$4 sm:$0xff]   ;;  %v12312_v0 = vld [vmem:[%s17376_s1 + $0xc0c] ss:$16 sps:$4 sm:$0xff]  }
 0x184   : >> { %3054 = vmatprep.subr.bf16.mxu0 %v12249_v2  ;;  %3095 = vmatprep.subr.bf16.mxu1 %v12252_v10  ;;  %v12307_v2 = vld [vmem:[%s17376_s1 + $0xc00] ss:$16 sps:$4 sm:$0xff]   ;;  %v12310_v10 = vld [vmem:[%s17376_s1 + $0xc08] ss:$16 sps:$4 sm:$0xff]  }
 0x187   : >> { %3055 = vmatpush2.bf16.msra.mxu0 %v12247_v3  ;;  %3096 = vmatpush2.bf16.msra.mxu1 %v12250_v4  ;;  %v12315_v3 = vld [vmem:[%s17376_s1 + $0xde4] ss:$16 sps:$4 sm:$0xff]   ;;  %v12318_v4 = vld [vmem:[%s17376_s1 + $0xdec] ss:$16 sps:$4 sm:$0xff]  }
 0x188   : >> { %3056 = vmatprep.subr.bf16.mxu0 %v12255_v6  ;;  %3097 = vmatprep.subr.bf16.mxu1 %v12258_v9  ;;  %v12313_v6 = vld [vmem:[%s17376_s1 + $0xde0] ss:$16 sps:$4 sm:$0xff]   ;;  %v12316_v9 = vld [vmem:[%s17376_s1 + $0xde8] ss:$16 sps:$4 sm:$0xff]  }
 0x18b   : >> { %3057 = vmatpush2.bf16.msra.mxu0 %v12253_v12  ;;  %3098 = vmatpush2.bf16.msra.mxu1 %v12256_v13  ;;  %v12321_v12 = vld [vmem:[%s17376_s1 + $0xdc4] ss:$16 sps:$4 sm:$0xff]   ;;  %v12324_v13 = vld [vmem:[%s17376_s1 + $0xdcc] ss:$16 sps:$4 sm:$0xff]  }
 0x18c   : >> { %3058 = vmatprep.subr.bf16.mxu0 %v12261_v14  ;;  %3099 = vmatprep.subr.bf16.mxu1 %v12264_v15  ;;  %v12319_v14 = vld [vmem:[%s17376_s1 + $0xdc0] ss:$16 sps:$4 sm:$0xff]   ;;  %v12322_v15 = vld [vmem:[%s17376_s1 + $0xdc8] ss:$16 sps:$4 sm:$0xff]  }
 0x18f   : >> { %3059 = vmatpush2.bf16.msra.mxu0 %v12259_v18  ;;  %3100 = vmatpush2.bf16.msra.mxu1 %v12262_v47  ;;  %v12330_v18 = vld [vmem:[%s17376_s1 + $0xdac] ss:$16 sps:$4 sm:$0xff]   ;;  %v12325_v47 = vld [vmem:[%s17376_s1 + $0xda0] ss:$16 sps:$4 sm:$0xff]  }
 0x190   : >> { %3503 = vmatprep.subr.bf16.mxu0 %v12267_v48  ;;  %3544 = vmatprep.subr.bf16.mxu1 %v12270_v19  ;;  %v12328_v48 = vld [vmem:[%s17376_s1 + $0xda8] ss:$16 sps:$4 sm:$0xff]   ;;  %v12333_v19 = vld [vmem:[%s17376_s1 + $0xd84] ss:$16 sps:$4 sm:$0xff]  }
 0x192   : >> { %v1613_v28 = vpop.f32.mrf.mxu0  ;;  %v1654_v29 = vpop.f32.mrf.mxu1  ;;  %3061 = vmatmul.mubr.bf16.vlgmr.msra.gmra.mxu0 %v2698_v22  ;;  %3102 = vmatmul.mubr.bf16.vlgmr.msra.gmra.mxu1 %v2698_v22  ;;  %v12334_v22 = vld [vmem:[%s17376_s1 + $0xd88] ss:$16 sps:$4 sm:$0xff]  }
 0x193   : >> { %v14603_v30 = vadd.f32 %v1613_v28, %v14392_v7  ;;  %v14606_v31 = vadd.f32 %v1654_v29, %v14395_v8  ;;  %3504 = vmatpush1.bf16.msra.mxu0 %v12265_v20  ;;  %3545 = vmatpush1.bf16.msra.mxu1 %v12268_v21  ;;  %v12336_v20 = vld [vmem:[%s17376_s1 + $0xd8c] ss:$16 sps:$4 sm:$0xff]   ;;  %v12331_v21 = vld [vmem:[%s17376_s1 + $0xd80] ss:$16 sps:$4 sm:$0xff]  }
 0x194   : >> { %v1615_v32 = vpop.f32.mrf.mxu0  ;;  %v1656_v33 = vpop.f32.mrf.mxu1  ;;  %3505 = vmatprep.subr.bf16.mxu0 %v12273_v23  ;;  %3546 = vmatprep.subr.bf16.mxu1 %v12276_v24  ;;  %v12339_v23 = vld [vmem:[%s17376_s1 + $0xd64] ss:$16 sps:$4 sm:$0xff]   ;;  %v12342_v24 = vld [vmem:[%s17376_s1 + $0xd6c] ss:$16 sps:$4 sm:$0xff]   ;;  %v12343_v29 = vld [vmem:[%s17376_s1 + $0xd40] ss:$16 sps:$4 sm:$0xff]  }
 0x195   : >> { %v14615_v7 = vadd.f32 %v1615_v32, %v14404_v42  ;;  %v14618_v8 = vadd.f32 %v1656_v33, %v14407_v43  ;;  %3535 = vmatprep.mubr.bf16.mxu0 %v3180_v27  ;;  %3576 = vmatprep.mubr.bf16.mxu1 %v3180_v27  ;;  %v12285_v43 = vld [vmem:[%s17376_s1 + $0xc84] ss:$16 sps:$4 sm:$0xff]   ;;  %v12348_v28 = vld [vmem:[%s17376_s1 + $0xd4c] ss:$16 sps:$4 sm:$0xff]   ;;  %v12346_v32 = vld [vmem:[%s17376_s1 + $0xd48] ss:$16 sps:$4 sm:$0xff]  }
 0x196   : >> { %v1617_v55 = vpop.f32.mrf.mxu0  ;;  %v1658_v36 = vpop.f32.mrf.mxu1  ;;  %v12345_v27 = vld [vmem:[%s17376_s1 + $0xd44] ss:$16 sps:$4 sm:$0xff]  }
 0x197   : >> { %3506 = vmatpush1.bf16.msra.mxu0 %v12271_v25  ;;  %3547 = vmatpush1.bf16.msra.mxu1 %v12274_v26  ;;  %v12337_v25 = vld [vmem:[%s17376_s1 + $0xd60] ss:$16 sps:$4 sm:$0xff]   ;;  %v12340_v26 = vld [vmem:[%s17376_s1 + $0xd68] ss:$16 sps:$4 sm:$0xff]   ;;  %v12351_v33 = vld [vmem:[%s17376_s1 + $0xd24] ss:$16 sps:$4 sm:$0xff]  }
 0x198   : >> { %v1618_v63 = vpop.f32.mrf.mxu0  ;;  %v1659_v42 = vpop.f32.mrf.mxu1  ;;  %3507 = vmatprep.subr.bf16.mxu0 %v12279_v34  ;;  %3548 = vmatprep.subr.bf16.mxu1 %v12282_v35  ;;  %v12354_v34 = vld [vmem:[%s17376_s1 + $0xd2c] ss:$16 sps:$4 sm:$0xff]   ;;  %v12349_v35 = vld [vmem:[%s17376_s1 + $0xd20] ss:$16 sps:$4 sm:$0xff]  }
 0x199   : >> { %v12360_v55 = vld [vmem:[%s17376_s1 + $0xd0c] ss:$16 sps:$4 sm:$0xff]   ;;  %v12355_v36 = vld [vmem:[%s17376_s1 + $0xd00] ss:$16 sps:$4 sm:$0xff]   ;;  %v12358_v63 = vld [vmem:[%s17376_s1 + $0xd08] ss:$16 sps:$4 sm:$0xff]  }
 0x19a   : >> { %v12363_v42 = vld [vmem:[%s17376_s1 + $0xee4] ss:$16 sps:$4 sm:$0xff]  }
 0x19b   : >> { %3508 = vmatpush1.bf16.msra.mxu0 %v12277_v54  ;;  %3549 = vmatpush1.bf16.msra.mxu1 %v12280_v50  ;;  %v12352_v54 = vld [vmem:[%s17376_s1 + $0xd28] ss:$16 sps:$4 sm:$0xff]   ;;  %v12357_v50 = vld [vmem:[%s17376_s1 + $0xd04] ss:$16 sps:$4 sm:$0xff]  }
 0x19c   : >> { %3509 = vmatprep.subr.bf16.mxu0 %v12285_v43  ;;  %3550 = vmatprep.subr.bf16.mxu1 %v12288_v5  ;;  %v12366_v43 = vld [vmem:[%s17376_s1 + $0xeec] ss:$16 sps:$4 sm:$0xff]   ;;  %v12361_v5 = vld [vmem:[%s17376_s1 + $0xee0] ss:$16 sps:$4 sm:$0xff]  }
 0x19f   : >> { %3510 = vmatpush1.bf16.msra.mxu0 %v12283_v37  ;;  %3551 = vmatpush1.bf16.msra.mxu1 %v12286_v38  ;;  %v3657_v37 = vrot.slane %v2700_v59, 1  ;;  %v3658_v38 = vrot.slane %v2702_v49, 2  ;;  %v12372_v59 = vld [vmem:[%s17376_s1 + $0xecc] ss:$16 sps:$4 sm:$0xff]   ;;  %v12370_v49 = vld [vmem:[%s17376_s1 + $0xec8] ss:$16 sps:$4 sm:$0xff]  }
 0x1a0   : >> { %3511 = vmatprep.subr.bf16.mxu0 %v12291_v39  ;;  %3552 = vmatprep.subr.bf16.mxu1 %v12294_v40  ;;  %v3179_v39 = vrot.slane %v14373_v61, 1  ;;  %v12364_v40 = vld [vmem:[%s17376_s1 + $0xee8] ss:$16 sps:$4 sm:$0xff]   ;;  %v12457_v61 = vld [vmem:[%s17376_s1 + $0x10e0] ss:$16 sps:$4 sm:$0xff]  }
 0x1a3   : >> { %3512 = vmatpush1.bf16.msra.mxu0 %v12289_v44  ;;  %3553 = vmatpush1.bf16.msra.mxu1 %v12292_v45  ;;  %v12369_v44 = vld [vmem:[%s17376_s1 + $0xec4] ss:$16 sps:$4 sm:$0xff]   ;;  %v3659_v45 = vor.u32 %v3658_v38, %v3657_v37  ;;  %v12430_v37 = vld [vmem:[%s17376_s1 + $0xf88] ss:$16 sps:$4 sm:$0xff]  }
 0x1a4   : >> { %3513 = vmatprep.subr.bf16.mxu0 %v12297_v46  ;;  %3554 = vmatprep.subr.bf16.mxu1 %v12300_v51  ;;  %v12435_v38 = vld [vmem:[%s17376_s1 + $0xf64] ss:$16 sps:$4 sm:$0xff]  }
 0x1a7   : >> { %3514 = vmatpush1.bf16.msra.mxu0 %v12295_v52  ;;  %3555 = vmatpush1.bf16.msra.mxu1 %v12298_v53 }
 0x1a8   : >> { %3515 = vmatprep.subr.bf16.mxu0 %v12303_v56  ;;  %3556 = vmatprep.subr.bf16.mxu1 %v12306_v57 }
 0x1ab   : >> { %3516 = vmatpush1.bf16.msra.mxu0 %v12301_v58  ;;  %3557 = vmatpush1.bf16.msra.mxu1 %v12304_v60  ;;  %v12375_v58 = vld [vmem:[%s17376_s1 + $0xea4] ss:$16 sps:$4 sm:$0xff]   ;;  %v12378_v60 = vld [vmem:[%s17376_s1 + $0xeac] ss:$16 sps:$4 sm:$0xff]  }
 0x1ac   : >> { %3517 = vmatprep.subr.bf16.mxu0 %v12309_v62  ;;  %3558 = vmatprep.subr.bf16.mxu1 %v12312_v0  ;;  %v12373_v62 = vld [vmem:[%s17376_s1 + $0xea0] ss:$16 sps:$4 sm:$0xff]   ;;  %v12376_v0 = vld [vmem:[%s17376_s1 + $0xea8] ss:$16 sps:$4 sm:$0xff]  }
 0x1af   : >> { %3518 = vmatpush1.bf16.msra.mxu0 %v12307_v2  ;;  %3559 = vmatpush1.bf16.msra.mxu1 %v12310_v10 }
 0x1b0   : >> { %3519 = vmatprep.subr.bf16.mxu0 %v12315_v3  ;;  %3560 = vmatprep.subr.bf16.mxu1 %v12318_v4  ;;  %v12384_v4 = vld [vmem:[%s17376_s1 + $0xe8c] ss:$16 sps:$4 sm:$0xff]  }
 0x1b3   : >> { %3520 = vmatpush2.bf16.msra.mxu0 %v12313_v6  ;;  %3561 = vmatpush2.bf16.msra.mxu1 %v12316_v9  ;;  %v12379_v6 = vld [vmem:[%s17376_s1 + $0xe80] ss:$16 sps:$4 sm:$0xff]   ;;  %v12382_v9 = vld [vmem:[%s17376_s1 + $0xe88] ss:$16 sps:$4 sm:$0xff]  }
 0x1b4   : >> { %3521 = vmatprep.subr.bf16.mxu0 %v12321_v12  ;;  %3562 = vmatprep.subr.bf16.mxu1 %v12324_v13  ;;  %v12387_v12 = vld [vmem:[%s17376_s1 + $0xe64] ss:$16 sps:$4 sm:$0xff]   ;;  %v12390_v13 = vld [vmem:[%s17376_s1 + $0xe6c] ss:$16 sps:$4 sm:$0xff]  }
 0x1b7   : >> { %3522 = vmatpush2.bf16.msra.mxu0 %v12319_v14  ;;  %3563 = vmatpush2.bf16.msra.mxu1 %v12322_v15  ;;  %v12385_v14 = vld [vmem:[%s17376_s1 + $0xe60] ss:$16 sps:$4 sm:$0xff]   ;;  %v12388_v15 = vld [vmem:[%s17376_s1 + $0xe68] ss:$16 sps:$4 sm:$0xff]  }
 0x1b8   : >> { %3523 = vmatprep.subr.bf16.mxu0 %v12327_v17  ;;  %3564 = vmatprep.subr.bf16.mxu1 %v12330_v18  ;;  %v12393_v17 = vld [vmem:[%s17376_s1 + $0xe44] ss:$16 sps:$4 sm:$0xff]   ;;  %v12396_v18 = vld [vmem:[%s17376_s1 + $0xe4c] ss:$16 sps:$4 sm:$0xff]  }
 0x1bb   : >> { %3524 = vmatpush2.bf16.msra.mxu0 %v12325_v47  ;;  %3565 = vmatpush2.bf16.msra.mxu1 %v12328_v48  ;;  %v12391_v47 = vld [vmem:[%s17376_s1 + $0xe40] ss:$16 sps:$4 sm:$0xff]   ;;  %v12394_v48 = vld [vmem:[%s17376_s1 + $0xe48] ss:$16 sps:$4 sm:$0xff]  }
 0x1bc   : >> { %3525 = vmatprep.subr.bf16.mxu0 %v12333_v19  ;;  %3566 = vmatprep.subr.bf16.mxu1 %v12336_v20  ;;  %v12399_v19 = vld [vmem:[%s17376_s1 + $0xe24] ss:$16 sps:$4 sm:$0xff]   ;;  %v12402_v20 = vld [vmem:[%s17376_s1 + $0xe2c] ss:$16 sps:$4 sm:$0xff]  }
 0x1bf   : >> { %3526 = vmatpush2.bf16.msra.mxu0 %v12331_v21  ;;  %3567 = vmatpush2.bf16.msra.mxu1 %v12334_v22  ;;  %v12397_v21 = vld [vmem:[%s17376_s1 + $0xe20] ss:$16 sps:$4 sm:$0xff]   ;;  %v12400_v22 = vld [vmem:[%s17376_s1 + $0xe28] ss:$16 sps:$4 sm:$0xff]  }
 0x1c0   : >> { %3527 = vmatprep.subr.bf16.mxu0 %v12339_v23  ;;  %3568 = vmatprep.subr.bf16.mxu1 %v12342_v24  ;;  %v12405_v23 = vld [vmem:[%s17376_s1 + $0xe04] ss:$16 sps:$4 sm:$0xff]   ;;  %v12408_v24 = vld [vmem:[%s17376_s1 + $0xe0c] ss:$16 sps:$4 sm:$0xff]  }
 0x1c3   : >> { %3528 = vmatpush2.bf16.msra.mxu0 %v12337_v25  ;;  %3569 = vmatpush2.bf16.msra.mxu1 %v12340_v26  ;;  %v12403_v25 = vld [vmem:[%s17376_s1 + $0xe00] ss:$16 sps:$4 sm:$0xff]   ;;  %v12406_v26 = vld [vmem:[%s17376_s1 + $0xe08] ss:$16 sps:$4 sm:$0xff]  }
 0x1c4   : >> { %3529 = vmatprep.subr.bf16.mxu0 %v12345_v27  ;;  %3570 = vmatprep.subr.bf16.mxu1 %v12348_v28  ;;  %v12411_v27 = vld [vmem:[%s17376_s1 + $0xfe4] ss:$16 sps:$4 sm:$0xff]   ;;  %v12414_v28 = vld [vmem:[%s17376_s1 + $0xfec] ss:$16 sps:$4 sm:$0xff]  }
 0x1c7   : >> { %3530 = vmatpush2.bf16.msra.mxu0 %v12343_v29  ;;  %3571 = vmatpush2.bf16.msra.mxu1 %v12346_v32  ;;  %v12409_v29 = vld [vmem:[%s17376_s1 + $0xfe0] ss:$16 sps:$4 sm:$0xff]   ;;  %v12412_v32 = vld [vmem:[%s17376_s1 + $0xfe8] ss:$16 sps:$4 sm:$0xff]  }
 0x1c8   : >> { %3531 = vmatprep.subr.bf16.mxu0 %v12351_v33  ;;  %3572 = vmatprep.subr.bf16.mxu1 %v12354_v34  ;;  %v12417_v33 = vld [vmem:[%s17376_s1 + $0xfc4] ss:$16 sps:$4 sm:$0xff]   ;;  %v12420_v34 = vld [vmem:[%s17376_s1 + $0xfcc] ss:$16 sps:$4 sm:$0xff]  }
 0x1cb   : >> { %3532 = vmatpush2.bf16.msra.mxu0 %v12349_v35  ;;  %3573 = vmatpush2.bf16.msra.mxu1 %v12352_v54  ;;  %v12415_v35 = vld [vmem:[%s17376_s1 + $0xfc0] ss:$16 sps:$4 sm:$0xff]   ;;  %v12418_v54 = vld [vmem:[%s17376_s1 + $0xfc8] ss:$16 sps:$4 sm:$0xff]  }
 0x1cc   : >> { %3533 = vmatprep.subr.bf16.mxu0 %v12357_v50  ;;  %3574 = vmatprep.subr.bf16.mxu1 %v12360_v55  ;;  %v12423_v50 = vld [vmem:[%s17376_s1 + $0xfa4] ss:$16 sps:$4 sm:$0xff]   ;;  %v12426_v55 = vld [vmem:[%s17376_s1 + $0xfac] ss:$16 sps:$4 sm:$0xff]  }
 0x1cf   : >> { %3534 = vmatpush2.bf16.msra.mxu0 %v12355_v36  ;;  %3575 = vmatpush2.bf16.msra.mxu1 %v12358_v63  ;;  %v12421_v36 = vld [vmem:[%s17376_s1 + $0xfa0] ss:$16 sps:$4 sm:$0xff]   ;;  %v12424_v63 = vld [vmem:[%s17376_s1 + $0xfa8] ss:$16 sps:$4 sm:$0xff]  }
 0x1d0   : >> { %3982 = vmatprep.subr.bf16.mxu0 %v12363_v42  ;;  %4023 = vmatprep.subr.bf16.mxu1 %v12366_v43  ;;  %v12429_v42 = vld [vmem:[%s17376_s1 + $0xf84] ss:$16 sps:$4 sm:$0xff]   ;;  %v12432_v43 = vld [vmem:[%s17376_s1 + $0xf8c] ss:$16 sps:$4 sm:$0xff]  }
 0x1d2   : >> { %v2092_v46 = vpop.f32.mrf.mxu0  ;;  %v2133_v51 = vpop.f32.mrf.mxu1  ;;  %3536 = vmatmul.mubr.bf16.vlgmr.msra.gmra.mxu0 %v3179_v39  ;;  %3577 = vmatmul.mubr.bf16.vlgmr.msra.gmra.mxu1 %v3179_v39  ;;  %v12438_v39 = vld [vmem:[%s17376_s1 + $0xf6c] ss:$16 sps:$4 sm:$0xff]  }
 0x1d3   : >> { %v14812_v52 = vadd.f32 %v2092_v46, %v14603_v30  ;;  %v14815_v53 = vadd.f32 %v2133_v51, %v14606_v31  ;;  %3983 = vmatpush1.bf16.msra.mxu0 %v12361_v5  ;;  %4024 = vmatpush1.bf16.msra.mxu1 %v12364_v40  ;;  %v12427_v5 = vld [vmem:[%s17376_s1 + $0xf80] ss:$16 sps:$4 sm:$0xff]   ;;  %v12447_v46 = vld [vmem:[%s17376_s1 + $0xf24] ss:$16 sps:$4 sm:$0xff]   ;;  %v12450_v51 = vld [vmem:[%s17376_s1 + $0xf2c] ss:$16 sps:$4 sm:$0xff]  }
 0x1d4   : >> { %v2094_v56 = vpop.f32.mrf.mxu0  ;;  %v2135_v57 = vpop.f32.mrf.mxu1  ;;  %3984 = vmatprep.subr.bf16.mxu0 %v12369_v44  ;;  %4025 = vmatprep.subr.bf16.mxu1 %v12372_v59  ;;  %v12433_v40 = vld [vmem:[%s17376_s1 + $0xf60] ss:$16 sps:$4 sm:$0xff]   ;;  %v12436_v44 = vld [vmem:[%s17376_s1 + $0xf68] ss:$16 sps:$4 sm:$0xff]   ;;  %v12441_v59 = vld [vmem:[%s17376_s1 + $0xf44] ss:$16 sps:$4 sm:$0xff]  }
 0x1d5   : >> { %v14824_v30 = vadd.f32 %v2094_v56, %v14615_v7  ;;  %v14827_v31 = vadd.f32 %v2135_v57, %v14618_v8  ;;  %4014 = vmatprep.mubr.bf16.mxu0 %v3659_v45  ;;  %4055 = vmatprep.mubr.bf16.mxu1 %v3659_v45  ;;  %v12381_v8 = vld [vmem:[%s17376_s1 + $0xe84] ss:$16 sps:$4 sm:$0xff]   ;;  %v12442_v45 = vld [vmem:[%s17376_s1 + $0xf48] ss:$16 sps:$4 sm:$0xff]   ;;  %v12445_v56 = vld [vmem:[%s17376_s1 + $0xf20] ss:$16 sps:$4 sm:$0xff]  }
 0x1d6   : >> { %v2096_v2 = vpop.f32.mrf.mxu0  ;;  %v2137_v10 = vpop.f32.mrf.mxu1  ;;  %v12448_v57 = vld [vmem:[%s17376_s1 + $0xf28] ss:$16 sps:$4 sm:$0xff]  }
 0x1d7   : >> { %3985 = vmatpush1.bf16.msra.mxu0 %v12367_v41  ;;  %4026 = vmatpush1.bf16.msra.mxu1 %v12370_v49  ;;  %v12444_v41 = vld [vmem:[%s17376_s1 + $0xf4c] ss:$16 sps:$4 sm:$0xff]   ;;  %v12439_v49 = vld [vmem:[%s17376_s1 + $0xf40] ss:$16 sps:$4 sm:$0xff]   ;;  %v3655_v2 = vrot.slane %v2695_v11, 2 }
 0x1d8   : >> { %v2097_v3 = vpop.f32.mrf.mxu0  ;;  %v2138_v7 = vpop.f32.mrf.mxu1  ;;  %3986 = vmatprep.subr.bf16.mxu0 %v12375_v58  ;;  %4027 = vmatprep.subr.bf16.mxu1 %v12378_v60  ;;  %v12453_v58 = vld [vmem:[%s17376_s1 + $0xf04] ss:$16 sps:$4 sm:$0xff]   ;;  %v12456_v60 = vld [vmem:[%s17376_s1 + $0xf0c] ss:$16 sps:$4 sm:$0xff]   ;;  %v12454_v10 = vld [vmem:[%s17376_s1 + $0xf08] ss:$16 sps:$4 sm:$0xff]  }
 0x1d9   : >> { %v12459_v3 = vld [vmem:[%s17376_s1 + $0x10e4] ss:$16 sps:$4 sm:$0xff]   ;;  %v12462_v7 = vld [vmem:[%s17376_s1 + $0x10ec] ss:$16 sps:$4 sm:$0xff]   ;;  %v12460_v11 = vld [vmem:[%s17376_s1 + $0x10e8] ss:$16 sps:$4 sm:$0xff]  }
 0x1db   : >> { %3987 = vmatpush1.bf16.msra.mxu0 %v12373_v62  ;;  %4028 = vmatpush1.bf16.msra.mxu1 %v12376_v0  ;;  %v12451_v62 = vld [vmem:[%s17376_s1 + $0xf00] ss:$16 sps:$4 sm:$0xff]   ;;  %v3654_v0 = vrot.slane %v2693_v16, 1 }
 0x1dc   : >> { %3988 = vmatprep.subr.bf16.mxu0 %v12381_v8  ;;  %4029 = vmatprep.subr.bf16.mxu1 %v12384_v4  ;;  %v15002_v16 = vld [vmem:[%s13477_s11 + $0x10] sm:$0x77] }
 0x1dd   : >> { %v3656_v8 = vor.u32 %v3655_v2, %v3654_v0  ;;  %v12465_v4 = vld [vmem:[%s17376_s1 + $0x10c4] ss:$16 sps:$4 sm:$0xff]   ;;  %v12528_v0 = vld [vmem:[%s17376_s1 + $0x118c] ss:$16 sps:$4 sm:$0xff]   ;;  %v12523_v2 = vld [vmem:[%s17376_s1 + $0x1180] ss:$16 sps:$4 sm:$0xff]  }
 0x1df   : >> { %3989 = vmatpush1.bf16.msra.mxu0 %v12379_v6  ;;  %4030 = vmatpush1.bf16.msra.mxu1 %v12382_v9  ;;  %v12468_v6 = vld [vmem:[%s17376_s1 + $0x10cc] ss:$16 sps:$4 sm:$0xff]   ;;  %v12463_v9 = vld [vmem:[%s17376_s1 + $0x10c0] ss:$16 sps:$4 sm:$0xff]  }
 0x1e0   : >> { %3990 = vmatprep.subr.bf16.mxu0 %v12387_v12  ;;  %4031 = vmatprep.subr.bf16.mxu1 %v12390_v13  ;;  %v12466_v12 = vld [vmem:[%s17376_s1 + $0x10c8] ss:$16 sps:$4 sm:$0xff]   ;;  %v15024_v13 = vcombine.high %v15002_v16, %v15002_v16 }
 0x1e3   : >> { %3991 = vmatpush1.bf16.msra.mxu0 %v12385_v14  ;;  %4032 = vmatpush1.bf16.msra.mxu1 %v12388_v15 }
 0x1e4   : >> { %3992 = vmatprep.subr.bf16.mxu0 %v12393_v17  ;;  %4033 = vmatprep.subr.bf16.mxu1 %v12396_v18 }
 0x1e7   : >> { %3993 = vmatpush1.bf16.msra.mxu0 %v12391_v47  ;;  %4034 = vmatpush1.bf16.msra.mxu1 %v12394_v48 }
 0x1e8   : >> { %3994 = vmatprep.subr.bf16.mxu0 %v12399_v19  ;;  %4035 = vmatprep.subr.bf16.mxu1 %v12402_v20  ;;  %v12471_v19 = vld [vmem:[%s17376_s1 + $0x10a4] ss:$16 sps:$4 sm:$0xff]   ;;  %v12474_v20 = vld [vmem:[%s17376_s1 + $0x10ac] ss:$16 sps:$4 sm:$0xff]  }
 0x1eb   : >> { %3995 = vmatpush1.bf16.msra.mxu0 %v12397_v21  ;;  %4036 = vmatpush1.bf16.msra.mxu1 %v12400_v22  ;;  %v12469_v21 = vld [vmem:[%s17376_s1 + $0x10a0] ss:$16 sps:$4 sm:$0xff]   ;;  %v12472_v22 = vld [vmem:[%s17376_s1 + $0x10a8] ss:$16 sps:$4 sm:$0xff]  }
 0x1ec   : >> { %3996 = vmatprep.subr.bf16.mxu0 %v12405_v23  ;;  %4037 = vmatprep.subr.bf16.mxu1 %v12408_v24 }
 0x1ef   : >> { %3997 = vmatpush1.bf16.msra.mxu0 %v12403_v25  ;;  %4038 = vmatpush1.bf16.msra.mxu1 %v12406_v26  ;;  %v12480_v26 = vld [vmem:[%s17376_s1 + $0x108c] ss:$16 sps:$4 sm:$0xff]  }
 0x1f0   : >> { %3998 = vmatprep.subr.bf16.mxu0 %v12411_v27  ;;  %4039 = vmatprep.subr.bf16.mxu1 %v12414_v28  ;;  %v12475_v27 = vld [vmem:[%s17376_s1 + $0x1080] ss:$16 sps:$4 sm:$0xff]   ;;  %v12478_v28 = vld [vmem:[%s17376_s1 + $0x1088] ss:$16 sps:$4 sm:$0xff]  }
 0x1f3   : >> { %3999 = vmatpush2.bf16.msra.mxu0 %v12409_v29  ;;  %4040 = vmatpush2.bf16.msra.mxu1 %v12412_v32  ;;  %v12483_v29 = vld [vmem:[%s17376_s1 + $0x1064] ss:$16 sps:$4 sm:$0xff]   ;;  %v12486_v32 = vld [vmem:[%s17376_s1 + $0x106c] ss:$16 sps:$4 sm:$0xff]  }
 0x1f4   : >> { %4000 = vmatprep.subr.bf16.mxu0 %v12417_v33  ;;  %4041 = vmatprep.subr.bf16.mxu1 %v12420_v34  ;;  %v12481_v33 = vld [vmem:[%s17376_s1 + $0x1060] ss:$16 sps:$4 sm:$0xff]   ;;  %v12484_v34 = vld [vmem:[%s17376_s1 + $0x1068] ss:$16 sps:$4 sm:$0xff]  }
 0x1f7   : >> { %4001 = vmatpush2.bf16.msra.mxu0 %v12415_v35  ;;  %4042 = vmatpush2.bf16.msra.mxu1 %v12418_v54  ;;  %v12489_v35 = vld [vmem:[%s17376_s1 + $0x1044] ss:$16 sps:$4 sm:$0xff]   ;;  %v12492_v54 = vld [vmem:[%s17376_s1 + $0x104c] ss:$16 sps:$4 sm:$0xff]  }
 0x1f8   : >> { %4002 = vmatprep.subr.bf16.mxu0 %v12423_v50  ;;  %4043 = vmatprep.subr.bf16.mxu1 %v12426_v55  ;;  %v12487_v50 = vld [vmem:[%s17376_s1 + $0x1040] ss:$16 sps:$4 sm:$0xff]   ;;  %v12490_v55 = vld [vmem:[%s17376_s1 + $0x1048] ss:$16 sps:$4 sm:$0xff]  }
 0x1fb   : >> { %4003 = vmatpush2.bf16.msra.mxu0 %v12421_v36  ;;  %4044 = vmatpush2.bf16.msra.mxu1 %v12424_v63  ;;  %v12495_v36 = vld [vmem:[%s17376_s1 + $0x1024] ss:$16 sps:$4 sm:$0xff]   ;;  %v12498_v63 = vld [vmem:[%s17376_s1 + $0x102c] ss:$16 sps:$4 sm:$0xff]  }
 0x1fc   : >> { %4004 = vmatprep.subr.bf16.mxu0 %v12429_v42  ;;  %4045 = vmatprep.subr.bf16.mxu1 %v12432_v43  ;;  %v12493_v42 = vld [vmem:[%s17376_s1 + $0x1020] ss:$16 sps:$4 sm:$0xff]   ;;  %v12496_v43 = vld [vmem:[%s17376_s1 + $0x1028] ss:$16 sps:$4 sm:$0xff]  }
 0x1ff   : >> { %4005 = vmatpush2.bf16.msra.mxu0 %v12427_v5  ;;  %4046 = vmatpush2.bf16.msra.mxu1 %v12430_v37  ;;  %v12501_v5 = vld [vmem:[%s17376_s1 + $0x1004] ss:$16 sps:$4 sm:$0xff]   ;;  %v12504_v37 = vld [vmem:[%s17376_s1 + $0x100c] ss:$16 sps:$4 sm:$0xff]  }
 0x200   : >> { %4006 = vmatprep.subr.bf16.mxu0 %v12435_v38  ;;  %4047 = vmatprep.subr.bf16.mxu1 %v12438_v39  ;;  %v12499_v38 = vld [vmem:[%s17376_s1 + $0x1000] ss:$16 sps:$4 sm:$0xff]   ;;  %v12502_v39 = vld [vmem:[%s17376_s1 + $0x1008] ss:$16 sps:$4 sm:$0xff]  }
 0x203   : >> { %4007 = vmatpush2.bf16.msra.mxu0 %v12433_v40  ;;  %4048 = vmatpush2.bf16.msra.mxu1 %v12436_v44  ;;  %v12507_v40 = vld [vmem:[%s17376_s1 + $0x11e4] ss:$16 sps:$4 sm:$0xff]   ;;  %v12510_v44 = vld [vmem:[%s17376_s1 + $0x11ec] ss:$16 sps:$4 sm:$0xff]  }
 0x204   : >> { %4008 = vmatprep.subr.bf16.mxu0 %v12441_v59  ;;  %4049 = vmatprep.subr.bf16.mxu1 %v12444_v41  ;;  %v12505_v59 = vld [vmem:[%s17376_s1 + $0x11e0] ss:$16 sps:$4 sm:$0xff]   ;;  %v12508_v41 = vld [vmem:[%s17376_s1 + $0x11e8] ss:$16 sps:$4 sm:$0xff]  }
 0x207   : >> { %4009 = vmatpush2.bf16.msra.mxu0 %v12439_v49  ;;  %4050 = vmatpush2.bf16.msra.mxu1 %v12442_v45  ;;  %v12513_v49 = vld [vmem:[%s17376_s1 + $0x11c4] ss:$16 sps:$4 sm:$0xff]   ;;  %v12516_v45 = vld [vmem:[%s17376_s1 + $0x11cc] ss:$16 sps:$4 sm:$0xff]  }
 0x208   : >> { %4010 = vmatprep.subr.bf16.mxu0 %v12447_v46  ;;  %4051 = vmatprep.subr.bf16.mxu1 %v12450_v51  ;;  %v12511_v46 = vld [vmem:[%s17376_s1 + $0x11c0] ss:$16 sps:$4 sm:$0xff]   ;;  %v12514_v51 = vld [vmem:[%s17376_s1 + $0x11c8] ss:$16 sps:$4 sm:$0xff]  }
 0x20b   : >> { %4011 = vmatpush2.bf16.msra.mxu0 %v12445_v56  ;;  %4052 = vmatpush2.bf16.msra.mxu1 %v12448_v57  ;;  %v12519_v56 = vld [vmem:[%s17376_s1 + $0x11a4] ss:$16 sps:$4 sm:$0xff]   ;;  %v12522_v57 = vld [vmem:[%s17376_s1 + $0x11ac] ss:$16 sps:$4 sm:$0xff]  }
 0x20c   : >> { %4012 = vmatprep.subr.bf16.mxu0 %v12453_v58  ;;  %4053 = vmatprep.subr.bf16.mxu1 %v12456_v60  ;;  %v12517_v58 = vld [vmem:[%s17376_s1 + $0x11a0] ss:$16 sps:$4 sm:$0xff]   ;;  %v12520_v60 = vld [vmem:[%s17376_s1 + $0x11a8] ss:$16 sps:$4 sm:$0xff]  }
 0x20f   : >> { %4013 = vmatpush2.bf16.msra.mxu0 %v12451_v62  ;;  %4054 = vmatpush2.bf16.msra.mxu1 %v12454_v10  ;;  %v12525_v62 = vld [vmem:[%s17376_s1 + $0x1184] ss:$16 sps:$4 sm:$0xff]   ;;  %v12526_v10 = vld [vmem:[%s17376_s1 + $0x1188] ss:$16 sps:$4 sm:$0xff]  }
 0x210   : >> { %4465 = vmatprep.subr.bf16.mxu0 %v12459_v3  ;;  %4506 = vmatprep.subr.bf16.mxu1 %v12462_v7  ;;  %v12531_v3 = vld [vmem:[%s17376_s1 + $0x1164] ss:$16 sps:$4 sm:$0xff]   ;;  %v12534_v7 = vld [vmem:[%s17376_s1 + $0x116c] ss:$16 sps:$4 sm:$0xff]  }
 0x212   : >> { %v2575_v14 = vpop.f32.mrf.mxu0  ;;  %v2616_v15 = vpop.f32.mrf.mxu1  ;;  %4015 = vmatmul.mubr.bf16.vlgmr.msra.gmra.mxu0 %v3656_v8  ;;  %4056 = vmatmul.mubr.bf16.vlgmr.msra.gmra.mxu1 %v3656_v8  ;;  %v12537_v8 = vld [vmem:[%s17376_s1 + $0x1144] ss:$16 sps:$4 sm:$0xff]  }
 0x213   : >> { %v15027_v17 = vadd.f32 %v2575_v14, %v14812_v52  ;;  %v15030_v18 = vadd.f32 %v2616_v15, %v14815_v53  ;;  %4466 = vmatpush1.bf16.msra.mxu0 %v12457_v61  ;;  %4507 = vmatpush1.bf16.msra.mxu1 %v12460_v11  ;;  %v12529_v61 = vld [vmem:[%s17376_s1 + $0x1160] ss:$16 sps:$4 sm:$0xff]   ;;  %v12532_v11 = vld [vmem:[%s17376_s1 + $0x1168] ss:$16 sps:$4 sm:$0xff]   ;;  %v12546_v14 = vld [vmem:[%s17376_s1 + $0x112c] ss:$16 sps:$4 sm:$0xff]  }
 0x214   : >> { %v2577_v47 = vpop.f32.mrf.mxu0  ;;  %v2618_v48 = vpop.f32.mrf.mxu1  ;;  %4467 = vmatprep.subr.bf16.mxu0 %v12465_v4  ;;  %4508 = vmatprep.subr.bf16.mxu1 %v12468_v6  ;;  %v12540_v4 = vld [vmem:[%s17376_s1 + $0x114c] ss:$16 sps:$4 sm:$0xff]   ;;  %v12535_v6 = vld [vmem:[%s17376_s1 + $0x1140] ss:$16 sps:$4 sm:$0xff]  }
 0x215   : >> { %v15039_v52 = vadd.f32 %v2577_v47, %v14824_v30  ;;  %v15042_v53 = vadd.f32 %v2618_v48, %v14827_v31  ;;  %4497 = vmatprep.mubr.bf16.mxu0 %v15024_v13  ;;  %4538 = vmatprep.mubr.bf16.mxu1 %v15024_v13  ;;  %v12477_v31 = vld [vmem:[%s17376_s1 + $0x1084] ss:$16 sps:$4 sm:$0xff]   ;;  %v12541_v15 = vld [vmem:[%s17376_s1 + $0x1120] ss:$16 sps:$4 sm:$0xff]   ;;  %v12544_v47 = vld [vmem:[%s17376_s1 + $0x1128] ss:$16 sps:$4 sm:$0xff]  }
 0x216   : >> { %v2579_v23 = vpop.f32.mrf.mxu0  ;;  %v2620_v24 = vpop.f32.mrf.mxu1  ;;  %v12549_v48 = vld [vmem:[%s17376_s1 + $0x1104] ss:$16 sps:$4 sm:$0xff]  }
 0x217   : >> { %4468 = vmatpush1.bf16.msra.mxu0 %v12463_v9  ;;  %4509 = vmatpush1.bf16.msra.mxu1 %v12466_v12  ;;  %v12538_v9 = vld [vmem:[%s17376_s1 + $0x1148] ss:$16 sps:$4 sm:$0xff]   ;;  %v12543_v12 = vld [vmem:[%s17376_s1 + $0x1124] ss:$16 sps:$4 sm:$0xff]   ;;  %v12560_v24 = vld [vmem:[%s17376_s1 + $0x12ec] ss:$16 sps:$4 sm:$0xff]  }
 0x218   : >> { %v2580_v30 = vpop.f32.mrf.mxu0  ;;  %v2621_v25 = vpop.f32.mrf.mxu1  ;;  %4469 = vmatprep.subr.bf16.mxu0 %v12471_v19  ;;  %4510 = vmatprep.subr.bf16.mxu1 %v12474_v20  ;;  %v12552_v19 = vld [vmem:[%s17376_s1 + $0x110c] ss:$16 sps:$4 sm:$0xff]   ;;  %v4626_v20 = vshll.u32 %v15024_v13, 16  ;;  %v12557_v23 = vld [vmem:[%s17376_s1 + $0x12e4] ss:$16 sps:$4 sm:$0xff]  }
 0x219   : >> { %v12555_v30 = vld [vmem:[%s17376_s1 + $0x12e0] ss:$16 sps:$4 sm:$0xff]   ;;  %v12558_v25 = vld [vmem:[%s17376_s1 + $0x12e8] ss:$16 sps:$4 sm:$0xff]  }
 0x21b   : >> { %4470 = vmatpush1.bf16.msra.mxu0 %v12469_v21  ;;  %4511 = vmatpush1.bf16.msra.mxu1 %v12472_v22  ;;  %v12547_v21 = vld [vmem:[%s17376_s1 + $0x1100] ss:$16 sps:$4 sm:$0xff]   ;;  %v12550_v22 = vld [vmem:[%s17376_s1 + $0x1108] ss:$16 sps:$4 sm:$0xff]  }
 0x21c   : >> { %4471 = vmatprep.subr.bf16.mxu0 %v12477_v31  ;;  %4512 = vmatprep.subr.bf16.mxu1 %v12480_v26  ;;  %v4624_v31 = vshrl.u32 %v15024_v13, 16  ;;  %v4628_v26 = vrot.slane %v4626_v20, 1 }
 0x21f   : >> { %4472 = vmatpush1.bf16.msra.mxu0 %v12475_v27  ;;  %4513 = vmatpush1.bf16.msra.mxu1 %v12478_v28  ;;  %v15226_v27 = vcombine.low %v15002_v16, %v15002_v16  ;;  %v12563_v28 = vld [vmem:[%s17376_s1 + $0x12c4] ss:$16 sps:$4 sm:$0xff]  }
 0x220   : >> { %4473 = vmatprep.subr.bf16.mxu0 %v12483_v29  ;;  %4514 = vmatprep.subr.bf16.mxu1 %v12486_v32  ;;  %v12566_v29 = vld [vmem:[%s17376_s1 + $0x12cc] ss:$16 sps:$4 sm:$0xff]   ;;  %v4629_v32 = vor.u32 %v4628_v26, %v4624_v31 }
 0x221   : >> { %v12632_v26 = vld [vmem:[%s17376_s1 + $0x136c] ss:$16 sps:$4 sm:$0xff]  }
 0x223   : >> { %4474 = vmatpush1.bf16.msra.mxu0 %v12481_v33  ;;  %4515 = vmatpush1.bf16.msra.mxu1 %v12484_v34 }
 0x224   : >> { %4475 = vmatprep.subr.bf16.mxu0 %v12489_v35  ;;  %4516 = vmatprep.subr.bf16.mxu1 %v12492_v54  ;;  %v12561_v54 = vld [vmem:[%s17376_s1 + $0x12c0] ss:$16 sps:$4 sm:$0xff]  }
 0x227   : >> { %4476 = vmatpush1.bf16.msra.mxu0 %v12487_v50  ;;  %4517 = vmatpush1.bf16.msra.mxu1 %v12490_v55  ;;  %v12564_v50 = vld [vmem:[%s17376_s1 + $0x12c8] ss:$16 sps:$4 sm:$0xff]  }
 0x228   : >> { %4477 = vmatprep.subr.bf16.mxu0 %v12495_v36  ;;  %4518 = vmatprep.subr.bf16.mxu1 %v12498_v63 }
 0x22b   : >> { %4478 = vmatpush1.bf16.msra.mxu0 %v12493_v42  ;;  %4519 = vmatpush1.bf16.msra.mxu1 %v12496_v43 }
 0x22c   : >> { %4479 = vmatprep.subr.bf16.mxu0 %v12501_v5  ;;  %4520 = vmatprep.subr.bf16.mxu1 %v12504_v37  ;;  %v12567_v37 = vld [vmem:[%s17376_s1 + $0x12a0] ss:$16 sps:$4 sm:$0xff]  }
 0x22f   : >> { %4480 = vmatpush1.bf16.msra.mxu0 %v12499_v38  ;;  %4521 = vmatpush1.bf16.msra.mxu1 %v12502_v39  ;;  %v12570_v38 = vld [vmem:[%s17376_s1 + $0x12a8] ss:$16 sps:$4 sm:$0xff]  }
 0x230   : >> { %4481 = vmatprep.subr.bf16.mxu0 %v12507_v40  ;;  %4522 = vmatprep.subr.bf16.mxu1 %v12510_v44  ;;  %v12578_v40 = vld [vmem:[%s17376_s1 + $0x128c] ss:$16 sps:$4 sm:$0xff]   ;;  %v12573_v44 = vld [vmem:[%s17376_s1 + $0x1280] ss:$16 sps:$4 sm:$0xff]  }
 0x233   : >> { %4482 = vmatpush2.bf16.msra.mxu0 %v12505_v59  ;;  %4523 = vmatpush2.bf16.msra.mxu1 %v12508_v41  ;;  %v12576_v59 = vld [vmem:[%s17376_s1 + $0x1288] ss:$16 sps:$4 sm:$0xff]   ;;  %v12581_v41 = vld [vmem:[%s17376_s1 + $0x1264] ss:$16 sps:$4 sm:$0xff]  }
 0x234   : >> { %4483 = vmatprep.subr.bf16.mxu0 %v12513_v49  ;;  %4524 = vmatprep.subr.bf16.mxu1 %v12516_v45  ;;  %v12584_v49 = vld [vmem:[%s17376_s1 + $0x126c] ss:$16 sps:$4 sm:$0xff]   ;;  %v12579_v45 = vld [vmem:[%s17376_s1 + $0x1260] ss:$16 sps:$4 sm:$0xff]  }
 0x237   : >> { %4484 = vmatpush2.bf16.msra.mxu0 %v12511_v46  ;;  %4525 = vmatpush2.bf16.msra.mxu1 %v12514_v51  ;;  %v12582_v46 = vld [vmem:[%s17376_s1 + $0x1268] ss:$16 sps:$4 sm:$0xff]   ;;  %v12587_v51 = vld [vmem:[%s17376_s1 + $0x1244] ss:$16 sps:$4 sm:$0xff]  }
 0x238   : >> { %4485 = vmatprep.subr.bf16.mxu0 %v12519_v56  ;;  %4526 = vmatprep.subr.bf16.mxu1 %v12522_v57  ;;  %v12590_v56 = vld [vmem:[%s17376_s1 + $0x124c] ss:$16 sps:$4 sm:$0xff]   ;;  %v12585_v57 = vld [vmem:[%s17376_s1 + $0x1240] ss:$16 sps:$4 sm:$0xff]  }
 0x23b   : >> { %4486 = vmatpush2.bf16.msra.mxu0 %v12517_v58  ;;  %4527 = vmatpush2.bf16.msra.mxu1 %v12520_v60  ;;  %v12588_v58 = vld [vmem:[%s17376_s1 + $0x1248] ss:$16 sps:$4 sm:$0xff]   ;;  %v12593_v60 = vld [vmem:[%s17376_s1 + $0x1224] ss:$16 sps:$4 sm:$0xff]  }
 0x23c   : >> { %4487 = vmatprep.subr.bf16.mxu0 %v12525_v62  ;;  %4528 = vmatprep.subr.bf16.mxu1 %v12528_v0  ;;  %v12596_v62 = vld [vmem:[%s17376_s1 + $0x122c] ss:$16 sps:$4 sm:$0xff]   ;;  %v12591_v0 = vld [vmem:[%s17376_s1 + $0x1220] ss:$16 sps:$4 sm:$0xff]  }
 0x23f   : >> { %4488 = vmatpush2.bf16.msra.mxu0 %v12523_v2  ;;  %4529 = vmatpush2.bf16.msra.mxu1 %v12526_v10  ;;  %v12594_v2 = vld [vmem:[%s17376_s1 + $0x1228] ss:$16 sps:$4 sm:$0xff]   ;;  %v12599_v10 = vld [vmem:[%s17376_s1 + $0x1204] ss:$16 sps:$4 sm:$0xff]  }
 0x240   : >> { %4489 = vmatprep.subr.bf16.mxu0 %v12531_v3  ;;  %4530 = vmatprep.subr.bf16.mxu1 %v12534_v7  ;;  %v12602_v3 = vld [vmem:[%s17376_s1 + $0x120c] ss:$16 sps:$4 sm:$0xff]   ;;  %v12597_v7 = vld [vmem:[%s17376_s1 + $0x1200] ss:$16 sps:$4 sm:$0xff]  }
 0x243   : >> { %4490 = vmatpush2.bf16.msra.mxu0 %v12529_v61  ;;  %4531 = vmatpush2.bf16.msra.mxu1 %v12532_v11  ;;  %v12600_v61 = vld [vmem:[%s17376_s1 + $0x1208] ss:$16 sps:$4 sm:$0xff]   ;;  %v12605_v11 = vld [vmem:[%s17376_s1 + $0x13e4] ss:$16 sps:$4 sm:$0xff]  }
 0x244   : >> { %4491 = vmatprep.subr.bf16.mxu0 %v12537_v8  ;;  %4532 = vmatprep.subr.bf16.mxu1 %v12540_v4  ;;  %v12608_v8 = vld [vmem:[%s17376_s1 + $0x13ec] ss:$16 sps:$4 sm:$0xff]   ;;  %v12603_v4 = vld [vmem:[%s17376_s1 + $0x13e0] ss:$16 sps:$4 sm:$0xff]  }
 0x247   : >> { %4492 = vmatpush2.bf16.msra.mxu0 %v12535_v6  ;;  %4533 = vmatpush2.bf16.msra.mxu1 %v12538_v9  ;;  %v12606_v6 = vld [vmem:[%s17376_s1 + $0x13e8] ss:$16 sps:$4 sm:$0xff]   ;;  %v12611_v9 = vld [vmem:[%s17376_s1 + $0x13c4] ss:$16 sps:$4 sm:$0xff]  }
 0x248   : >> { %4493 = vmatprep.subr.bf16.mxu0 %v12543_v12  ;;  %4534 = vmatprep.subr.bf16.mxu1 %v12546_v14  ;;  %v12614_v12 = vld [vmem:[%s17376_s1 + $0x13cc] ss:$16 sps:$4 sm:$0xff]   ;;  %v12609_v14 = vld [vmem:[%s17376_s1 + $0x13c0] ss:$16 sps:$4 sm:$0xff]  }
 0x24b   : >> { %4494 = vmatpush2.bf16.msra.mxu0 %v12541_v15  ;;  %4535 = vmatpush2.bf16.msra.mxu1 %v12544_v47  ;;  %v12612_v15 = vld [vmem:[%s17376_s1 + $0x13c8] ss:$16 sps:$4 sm:$0xff]   ;;  %v12617_v47 = vld [vmem:[%s17376_s1 + $0x13a4] ss:$16 sps:$4 sm:$0xff]  }
 0x24c   : >> { %4495 = vmatprep.subr.bf16.mxu0 %v12549_v48  ;;  %4536 = vmatprep.subr.bf16.mxu1 %v12552_v19  ;;  %v12620_v48 = vld [vmem:[%s17376_s1 + $0x13ac] ss:$16 sps:$4 sm:$0xff]   ;;  %v12615_v19 = vld [vmem:[%s17376_s1 + $0x13a0] ss:$16 sps:$4 sm:$0xff]  }
 0x24f   : >> { %4496 = vmatpush2.bf16.msra.mxu0 %v12547_v21  ;;  %4537 = vmatpush2.bf16.msra.mxu1 %v12550_v22  ;;  %v12618_v21 = vld [vmem:[%s17376_s1 + $0x13a8] ss:$16 sps:$4 sm:$0xff]   ;;  %v12623_v22 = vld [vmem:[%s17376_s1 + $0x1384] ss:$16 sps:$4 sm:$0xff]  }
 0x250   : >> { %4952 = vmatprep.subr.bf16.mxu0 %v12557_v23  ;;  %4993 = vmatprep.subr.bf16.mxu1 %v12560_v24  ;;  %v12626_v23 = vld [vmem:[%s17376_s1 + $0x138c] ss:$16 sps:$4 sm:$0xff]   ;;  %v12621_v24 = vld [vmem:[%s17376_s1 + $0x1380] ss:$16 sps:$4 sm:$0xff]  }
 0x252   : >> { %v3062_v33 = vpop.f32.mrf.mxu0  ;;  %v3103_v34 = vpop.f32.mrf.mxu1  ;;  %4498 = vmatmul.mubr.bf16.vlgmr.msra.gmra.mxu0 %v15226_v27  ;;  %4539 = vmatmul.mubr.bf16.vlgmr.msra.gmra.mxu1 %v15226_v27 }
 0x253   : >> { %v15239_v16 = vadd.f32 %v3062_v33, %v15027_v17  ;;  %v15242_v35 = vadd.f32 %v3103_v34, %v15030_v18  ;;  %4953 = vmatpush1.bf16.msra.mxu0 %v12555_v30  ;;  %4994 = vmatpush1.bf16.msra.mxu1 %v12558_v25  ;;  %v12569_v17 = vld [vmem:[%s17376_s1 + $0x12a4] ss:$16 sps:$4 sm:$0xff]   ;;  %v12572_v18 = vld [vmem:[%s17376_s1 + $0x12ac] ss:$16 sps:$4 sm:$0xff]   ;;  %v12624_v30 = vld [vmem:[%s17376_s1 + $0x1388] ss:$16 sps:$4 sm:$0xff]  }
 0x254   : >> { %v3064_v55 = vpop.f32.mrf.mxu0  ;;  %v3105_v36 = vpop.f32.mrf.mxu1  ;;  %4954 = vmatprep.subr.bf16.mxu0 %v12563_v28  ;;  %4995 = vmatprep.subr.bf16.mxu1 %v12566_v29  ;;  %v12629_v25 = vld [vmem:[%s17376_s1 + $0x1364] ss:$16 sps:$4 sm:$0xff]   ;;  %v12627_v28 = vld [vmem:[%s17376_s1 + $0x1360] ss:$16 sps:$4 sm:$0xff]   ;;  %v12630_v29 = vld [vmem:[%s17376_s1 + $0x1368] ss:$16 sps:$4 sm:$0xff]  }
 0x255   : >> { %v15257_v63 = vadd.f32 %v3064_v55, %v15039_v52  ;;  %v15260_v42 = vadd.f32 %v3105_v36, %v15042_v53  ;;  %4984 = vmatprep.mubr.bf16.mxu0 %v4629_v32  ;;  %5025 = vmatprep.mubr.bf16.mxu1 %v4629_v32  ;;  %v12575_v53 = vld [vmem:[%s17376_s1 + $0x1284] ss:$16 sps:$4 sm:$0xff]   ;;  %v12638_v33 = vld [vmem:[%s17376_s1 + $0x134c] ss:$16 sps:$4 sm:$0xff]   ;;  %v12633_v34 = vld [vmem:[%s17376_s1 + $0x1340] ss:$16 sps:$4 sm:$0xff]  }
 0x256   : >> { %v3066_v43 = vpop.f32.mrf.mxu0  ;;  %v3107_v5 = vpop.f32.mrf.mxu1  ;;  %v12635_v32 = vld [vmem:[%s17376_s1 + $0x1344] ss:$16 sps:$4 sm:$0xff]   ;;  %v12644_v55 = vld [vmem:[%s17376_s1 + $0x132c] ss:$16 sps:$4 sm:$0xff]   ;;  %v4619_v36 = vshll.u32 %v15226_v27, 16 }
 0x257   : >> { %4955 = vmatpush1.bf16.msra.mxu0 %v12561_v54  ;;  %4996 = vmatpush1.bf16.msra.mxu1 %v12564_v50  ;;  %v12636_v54 = vld [vmem:[%s17376_s1 + $0x1348] ss:$16 sps:$4 sm:$0xff]   ;;  %v12641_v50 = vld [vmem:[%s17376_s1 + $0x1324] ss:$16 sps:$4 sm:$0xff]   ;;  %v12650_v5 = vld [vmem:[%s17376_s1 + $0x130c] ss:$16 sps:$4 sm:$0xff]  }
 0x258   : >> { %v3067_v39 = vpop.f32.mrf.mxu0  ;;  %v3108_v52 = vpop.f32.mrf.mxu1  ;;  %4956 = vmatprep.subr.bf16.mxu0 %v12569_v17  ;;  %4997 = vmatprep.subr.bf16.mxu1 %v12572_v18  ;;  %v12639_v17 = vld [vmem:[%s17376_s1 + $0x1320] ss:$16 sps:$4 sm:$0xff]   ;;  %v12642_v18 = vld [vmem:[%s17376_s1 + $0x1328] ss:$16 sps:$4 sm:$0xff]   ;;  %v12647_v43 = vld [vmem:[%s17376_s1 + $0x1304] ss:$16 sps:$4 sm:$0xff]  }
 0x259   : >> { %v12645_v39 = vld [vmem:[%s17376_s1 + $0x1300] ss:$16 sps:$4 sm:$0xff]   ;;  %v12648_v52 = vld [vmem:[%s17376_s1 + $0x1308] ss:$16 sps:$4 sm:$0xff]  }
 0x25b   : >> { %4957 = vmatpush1.bf16.msra.mxu0 %v12567_v37  ;;  %4998 = vmatpush1.bf16.msra.mxu1 %v12570_v38  ;;  %v4617_v37 = vshrl.u32 %v15226_v27, 16  ;;  %v4621_v38 = vrot.slane %v4619_v36, 1 }
 0x25c   : >> { %4958 = vmatprep.subr.bf16.mxu0 %v12575_v53  ;;  %4999 = vmatprep.subr.bf16.mxu1 %v12578_v40  ;;  %v12653_v53 = vld [vmem:[%s17376_s1 + $0x14e4] ss:$16 sps:$4 sm:$0xff]   ;;  %v12656_v40 = vld [vmem:[%s17376_s1 + $0x14ec] ss:$16 sps:$4 sm:$0xff]  }
 0x25f   : >> { %4959 = vmatpush1.bf16.msra.mxu0 %v12573_v44  ;;  %5000 = vmatpush1.bf16.msra.mxu1 %v12576_v59  ;;  %v4622_v44 = vor.u32 %v4621_v38, %v4617_v37  ;;  %v12651_v59 = vld [vmem:[%s17376_s1 + $0x14e0] ss:$16 sps:$4 sm:$0xff]   ;;  %v12713_v38 = vld [vmem:[%s17376_s1 + $0x15a4] ss:$16 sps:$4 sm:$0xff]  }
 0x260   : >> { %4960 = vmatprep.subr.bf16.mxu0 %v12581_v41  ;;  %5001 = vmatprep.subr.bf16.mxu1 %v12584_v49  ;;  %v12654_v41 = vld [vmem:[%s17376_s1 + $0x14e8] ss:$16 sps:$4 sm:$0xff]   ;;  %v12659_v49 = vld [vmem:[%s17376_s1 + $0x14c4] ss:$16 sps:$4 sm:$0xff]  }
 0x263   : >> { %4961 = vmatpush1.bf16.msra.mxu0 %v12579_v45  ;;  %5002 = vmatpush1.bf16.msra.mxu1 %v12582_v46  ;;  %v12662_v45 = vld [vmem:[%s17376_s1 + $0x14cc] ss:$16 sps:$4 sm:$0xff]   ;;  %v5104_v46 = vrot.slane %v15024_v13, 1 }
 0x264   : >> { %4962 = vmatprep.subr.bf16.mxu0 %v12587_v51  ;;  %5003 = vmatprep.subr.bf16.mxu1 %v12590_v56  ;;  %v12758_v13 = vld [vmem:[%s17376_s1 + $0x16cc] ss:$16 sps:$4 sm:$0xff]  }
 0x267   : >> { %4963 = vmatpush1.bf16.msra.mxu0 %v12585_v57  ;;  %5004 = vmatpush1.bf16.msra.mxu1 %v12588_v58 }
 0x268   : >> { %4964 = vmatprep.subr.bf16.mxu0 %v12593_v60  ;;  %5005 = vmatprep.subr.bf16.mxu1 %v12596_v62  ;;  %v12657_v60 = vld [vmem:[%s17376_s1 + $0x14c0] ss:$16 sps:$4 sm:$0xff]   ;;  %v12660_v62 = vld [vmem:[%s17376_s1 + $0x14c8] ss:$16 sps:$4 sm:$0xff]  }
 0x26b   : >> { %4965 = vmatpush1.bf16.msra.mxu0 %v12591_v0  ;;  %5006 = vmatpush1.bf16.msra.mxu1 %v12594_v2 }
 0x26c   : >> { %4966 = vmatprep.subr.bf16.mxu0 %v12599_v10  ;;  %5007 = vmatprep.subr.bf16.mxu1 %v12602_v3 }
 0x26f   : >> { %4967 = vmatpush1.bf16.msra.mxu0 %v12597_v7  ;;  %5008 = vmatpush1.bf16.msra.mxu1 %v12600_v61 }
 0x270   : >> { %4968 = vmatprep.subr.bf16.mxu0 %v12605_v11  ;;  %5009 = vmatprep.subr.bf16.mxu1 %v12608_v8  ;;  %v12663_v11 = vld [vmem:[%s17376_s1 + $0x14a0] ss:$16 sps:$4 sm:$0xff]   ;;  %v12666_v8 = vld [vmem:[%s17376_s1 + $0x14a8] ss:$16 sps:$4 sm:$0xff]  }
 0x273   : >> { %4969 = vmatpush2.bf16.msra.mxu0 %v12603_v4  ;;  %5010 = vmatpush2.bf16.msra.mxu1 %v12606_v6  ;;  %v12674_v6 = vld [vmem:[%s17376_s1 + $0x148c] ss:$16 sps:$4 sm:$0xff]  }
 0x274   : >> { %4970 = vmatprep.subr.bf16.mxu0 %v12611_v9  ;;  %5011 = vmatprep.subr.bf16.mxu1 %v12614_v12  ;;  %v12669_v9 = vld [vmem:[%s17376_s1 + $0x1480] ss:$16 sps:$4 sm:$0xff]   ;;  %v12672_v12 = vld [vmem:[%s17376_s1 + $0x1488] ss:$16 sps:$4 sm:$0xff]  }
 0x277   : >> { %4971 = vmatpush2.bf16.msra.mxu0 %v12609_v14  ;;  %5012 = vmatpush2.bf16.msra.mxu1 %v12612_v15  ;;  %v12677_v14 = vld [vmem:[%s17376_s1 + $0x1464] ss:$16 sps:$4 sm:$0xff]   ;;  %v12680_v15 = vld [vmem:[%s17376_s1 + $0x146c] ss:$16 sps:$4 sm:$0xff]  }
 0x278   : >> { %4972 = vmatprep.subr.bf16.mxu0 %v12617_v47  ;;  %5013 = vmatprep.subr.bf16.mxu1 %v12620_v48  ;;  %v12675_v47 = vld [vmem:[%s17376_s1 + $0x1460] ss:$16 sps:$4 sm:$0xff]   ;;  %v12678_v48 = vld [vmem:[%s17376_s1 + $0x1468] ss:$16 sps:$4 sm:$0xff]  }
 0x27b   : >> { %4973 = vmatpush2.bf16.msra.mxu0 %v12615_v19  ;;  %5014 = vmatpush2.bf16.msra.mxu1 %v12618_v21  ;;  %v12683_v19 = vld [vmem:[%s17376_s1 + $0x1444] ss:$16 sps:$4 sm:$0xff]   ;;  %v12686_v21 = vld [vmem:[%s17376_s1 + $0x144c] ss:$16 sps:$4 sm:$0xff]  }
 0x27c   : >> { %4974 = vmatprep.subr.bf16.mxu0 %v12623_v22  ;;  %5015 = vmatprep.subr.bf16.mxu1 %v12626_v23  ;;  %v12681_v22 = vld [vmem:[%s17376_s1 + $0x1440] ss:$16 sps:$4 sm:$0xff]   ;;  %v12684_v23 = vld [vmem:[%s17376_s1 + $0x1448] ss:$16 sps:$4 sm:$0xff]  }
 0x27f   : >> { %4975 = vmatpush2.bf16.msra.mxu0 %v12621_v24  ;;  %5016 = vmatpush2.bf16.msra.mxu1 %v12624_v30  ;;  %v12689_v24 = vld [vmem:[%s17376_s1 + $0x1424] ss:$16 sps:$4 sm:$0xff]   ;;  %v12692_v30 = vld [vmem:[%s17376_s1 + $0x142c] ss:$16 sps:$4 sm:$0xff]  }
 0x280   : >> { %4976 = vmatprep.subr.bf16.mxu0 %v12629_v25  ;;  %5017 = vmatprep.subr.bf16.mxu1 %v12632_v26  ;;  %v12687_v25 = vld [vmem:[%s17376_s1 + $0x1420] ss:$16 sps:$4 sm:$0xff]   ;;  %v12690_v26 = vld [vmem:[%s17376_s1 + $0x1428] ss:$16 sps:$4 sm:$0xff]  }
 0x283   : >> { %4977 = vmatpush2.bf16.msra.mxu0 %v12627_v28  ;;  %5018 = vmatpush2.bf16.msra.mxu1 %v12630_v29  ;;  %v12695_v28 = vld [vmem:[%s17376_s1 + $0x1404] ss:$16 sps:$4 sm:$0xff]   ;;  %v12698_v29 = vld [vmem:[%s17376_s1 + $0x140c] ss:$16 sps:$4 sm:$0xff]  }
 0x284   : >> { %4978 = vmatprep.subr.bf16.mxu0 %v12635_v32  ;;  %5019 = vmatprep.subr.bf16.mxu1 %v12638_v33  ;;  %v12693_v32 = vld [vmem:[%s17376_s1 + $0x1400] ss:$16 sps:$4 sm:$0xff]   ;;  %v12696_v33 = vld [vmem:[%s17376_s1 + $0x1408] ss:$16 sps:$4 sm:$0xff]  }
 0x287   : >> { %4979 = vmatpush2.bf16.msra.mxu0 %v12633_v34  ;;  %5020 = vmatpush2.bf16.msra.mxu1 %v12636_v54  ;;  %v12701_v34 = vld [vmem:[%s17376_s1 + $0x15e4] ss:$16 sps:$4 sm:$0xff]   ;;  %v12704_v54 = vld [vmem:[%s17376_s1 + $0x15ec] ss:$16 sps:$4 sm:$0xff]  }
 0x288   : >> { %4980 = vmatprep.subr.bf16.mxu0 %v12641_v50  ;;  %5021 = vmatprep.subr.bf16.mxu1 %v12644_v55  ;;  %v12699_v50 = vld [vmem:[%s17376_s1 + $0x15e0] ss:$16 sps:$4 sm:$0xff]   ;;  %v12702_v55 = vld [vmem:[%s17376_s1 + $0x15e8] ss:$16 sps:$4 sm:$0xff]  }
 0x28b   : >> { %4981 = vmatpush2.bf16.msra.mxu0 %v12639_v17  ;;  %5022 = vmatpush2.bf16.msra.mxu1 %v12642_v18  ;;  %v12707_v17 = vld [vmem:[%s17376_s1 + $0x15c4] ss:$16 sps:$4 sm:$0xff]   ;;  %v12710_v18 = vld [vmem:[%s17376_s1 + $0x15cc] ss:$16 sps:$4 sm:$0xff]  }
 0x28c   : >> { %4982 = vmatprep.subr.bf16.mxu0 %v12647_v43  ;;  %5023 = vmatprep.subr.bf16.mxu1 %v12650_v5  ;;  %v12705_v43 = vld [vmem:[%s17376_s1 + $0x15c0] ss:$16 sps:$4 sm:$0xff]   ;;  %v12708_v5 = vld [vmem:[%s17376_s1 + $0x15c8] ss:$16 sps:$4 sm:$0xff]  }
 0x28f   : >> { %4983 = vmatpush2.bf16.msra.mxu0 %v12645_v39  ;;  %5024 = vmatpush2.bf16.msra.mxu1 %v12648_v52  ;;  %v12716_v39 = vld [vmem:[%s17376_s1 + $0x15ac] ss:$16 sps:$4 sm:$0xff]   ;;  %v12711_v52 = vld [vmem:[%s17376_s1 + $0x15a0] ss:$16 sps:$4 sm:$0xff]  }
 0x290   : >> { %5427 = vmatprep.subr.bf16.mxu0 %v12653_v53  ;;  %5468 = vmatprep.subr.bf16.mxu1 %v12656_v40  ;;  %v12714_v53 = vld [vmem:[%s17376_s1 + $0x15a8] ss:$16 sps:$4 sm:$0xff]   ;;  %v12719_v40 = vld [vmem:[%s17376_s1 + $0x1584] ss:$16 sps:$4 sm:$0xff]  }
 0x292   : >> { %v3537_v51 = vpop.f32.mrf.mxu0  ;;  %v3578_v56 = vpop.f32.mrf.mxu1  ;;  %4985 = vmatmul.mubr.bf16.vlgmr.msra.gmra.mxu0 %v4622_v44  ;;  %5026 = vmatmul.mubr.bf16.vlgmr.msra.gmra.mxu1 %v4622_v44  ;;  %v12722_v44 = vld [vmem:[%s17376_s1 + $0x158c] ss:$16 sps:$4 sm:$0xff]  }
 0x293   : >> { %v15450_v57 = vadd.f32 %v3537_v51, %v15239_v16  ;;  %v15453_v58 = vadd.f32 %v3578_v56, %v15242_v35  ;;  %5428 = vmatpush1.bf16.msra.mxu0 %v12651_v59  ;;  %5469 = vmatpush1.bf16.msra.mxu1 %v12654_v41  ;;  %v12665_v16 = vld [vmem:[%s17376_s1 + $0x14a4] ss:$16 sps:$4 sm:$0xff]   ;;  %v12668_v35 = vld [vmem:[%s17376_s1 + $0x14ac] ss:$16 sps:$4 sm:$0xff]   ;;  %v12717_v59 = vld [vmem:[%s17376_s1 + $0x1580] ss:$16 sps:$4 sm:$0xff]  }
 0x294   : >> { %v3539_v0 = vpop.f32.mrf.mxu0  ;;  %v3580_v2 = vpop.f32.mrf.mxu1  ;;  %5429 = vmatprep.subr.bf16.mxu0 %v12659_v49  ;;  %5470 = vmatprep.subr.bf16.mxu1 %v12662_v45  ;;  %v12720_v41 = vld [vmem:[%s17376_s1 + $0x1588] ss:$16 sps:$4 sm:$0xff]   ;;  %v12725_v49 = vld [vmem:[%s17376_s1 + $0x1564] ss:$16 sps:$4 sm:$0xff]   ;;  %v12728_v45 = vld [vmem:[%s17376_s1 + $0x156c] ss:$16 sps:$4 sm:$0xff]  }
 0x295   : >> { %v15468_v10 = vadd.f32 %v3539_v0, %v15257_v63  ;;  %v15471_v3 = vadd.f32 %v3580_v2, %v15260_v42  ;;  %5459 = vmatprep.mubr.bf16.mxu0 %v5104_v46  ;;  %5500 = vmatprep.mubr.bf16.mxu1 %v5104_v46  ;;  %v12671_v42 = vld [vmem:[%s17376_s1 + $0x1484] ss:$16 sps:$4 sm:$0xff]   ;;  %v12723_v46 = vld [vmem:[%s17376_s1 + $0x1560] ss:$16 sps:$4 sm:$0xff]   ;;  %v12726_v51 = vld [vmem:[%s17376_s1 + $0x1568] ss:$16 sps:$4 sm:$0xff]  }
 0x296   : >> { %v3541_v7 = vpop.f32.mrf.mxu0  ;;  %v3582_v61 = vpop.f32.mrf.mxu1  ;;  %v12731_v56 = vld [vmem:[%s17376_s1 + $0x1544] ss:$16 sps:$4 sm:$0xff]   ;;  %v12732_v0 = vld [vmem:[%s17376_s1 + $0x1548] ss:$16 sps:$4 sm:$0xff]  }
 0x297   : >> { %5430 = vmatpush1.bf16.msra.mxu0 %v12657_v60  ;;  %5471 = vmatpush1.bf16.msra.mxu1 %v12660_v62  ;;  %v12734_v60 = vld [vmem:[%s17376_s1 + $0x154c] ss:$16 sps:$4 sm:$0xff]   ;;  %v12729_v62 = vld [vmem:[%s17376_s1 + $0x1540] ss:$16 sps:$4 sm:$0xff]   ;;  %v12737_v2 = vld [vmem:[%s17376_s1 + $0x1524] ss:$16 sps:$4 sm:$0xff]  }
 0x298   : >> { %v3542_v4 = vpop.f32.mrf.mxu0  ;;  %v3583_v63 = vpop.f32.mrf.mxu1  ;;  %5431 = vmatprep.subr.bf16.mxu0 %v12665_v16  ;;  %5472 = vmatprep.subr.bf16.mxu1 %v12668_v35  ;;  %v12740_v16 = vld [vmem:[%s17376_s1 + $0x152c] ss:$16 sps:$4 sm:$0xff]   ;;  %v12735_v35 = vld [vmem:[%s17376_s1 + $0x1520] ss:$16 sps:$4 sm:$0xff]   ;;  %v12738_v7 = vld [vmem:[%s17376_s1 + $0x1528] ss:$16 sps:$4 sm:$0xff]  }
 0x299   : >> { %v12743_v61 = vld [vmem:[%s17376_s1 + $0x1504] ss:$16 sps:$4 sm:$0xff]   ;;  %v12744_v4 = vld [vmem:[%s17376_s1 + $0x1508] ss:$16 sps:$4 sm:$0xff]  }
 0x29a   : >> { %v12749_v63 = vld [vmem:[%s17376_s1 + $0x16e4] ss:$16 sps:$4 sm:$0xff]  }
 0x29b   : >> { %5432 = vmatpush1.bf16.msra.mxu0 %v12663_v11  ;;  %5473 = vmatpush1.bf16.msra.mxu1 %v12666_v8  ;;  %v12746_v11 = vld [vmem:[%s17376_s1 + $0x150c] ss:$16 sps:$4 sm:$0xff]   ;;  %v12741_v8 = vld [vmem:[%s17376_s1 + $0x1500] ss:$16 sps:$4 sm:$0xff]  }
 0x29c   : >> { %5433 = vmatprep.subr.bf16.mxu0 %v12671_v42  ;;  %5474 = vmatprep.subr.bf16.mxu1 %v12674_v6  ;;  %v12752_v42 = vld [vmem:[%s17376_s1 + $0x16ec] ss:$16 sps:$4 sm:$0xff]   ;;  %v5581_v6 = vrot.slane %v4624_v31, 1  ;;  %v12755_v31 = vld [vmem:[%s17376_s1 + $0x16c4] ss:$16 sps:$4 sm:$0xff]  }
 0x29f   : >> { %5434 = vmatpush1.bf16.msra.mxu0 %v12669_v9  ;;  %5475 = vmatpush1.bf16.msra.mxu1 %v12672_v12  ;;  %v5582_v9 = vrot.slane %v4626_v20, 2  ;;  %v5103_v12 = vrot.slane %v15226_v27, 1  ;;  %v12848_v27 = vld [vmem:[%s17376_s1 + $0x18ec] ss:$16 sps:$4 sm:$0xff]  }
 0x2a0   : >> { %5435 = vmatprep.subr.bf16.mxu0 %v12677_v14  ;;  %5476 = vmatprep.subr.bf16.mxu1 %v12680_v15  ;;  %v12747_v14 = vld [vmem:[%s17376_s1 + $0x16e0] ss:$16 sps:$4 sm:$0xff]   ;;  %v12750_v15 = vld [vmem:[%s17376_s1 + $0x16e8] ss:$16 sps:$4 sm:$0xff]  }
 0x2a1   : >> { %v5583_v20 = vor.u32 %v5582_v9, %v5581_v6  ;;  %v12813_v6 = vld [vmem:[%s17376_s1 + $0x1780] ss:$16 sps:$4 sm:$0xff]   ;;  %v12816_v9 = vld [vmem:[%s17376_s1 + $0x1788] ss:$16 sps:$4 sm:$0xff]  }
 0x2a3   : >> { %5436 = vmatpush1.bf16.msra.mxu0 %v12675_v47  ;;  %5477 = vmatpush1.bf16.msra.mxu1 %v12678_v48 }
 0x2a4   : >> { %5437 = vmatprep.subr.bf16.mxu0 %v12683_v19  ;;  %5478 = vmatprep.subr.bf16.mxu1 %v12686_v21 }
 0x2a7   : >> { %5438 = vmatpush1.bf16.msra.mxu0 %v12681_v22  ;;  %5479 = vmatpush1.bf16.msra.mxu1 %v12684_v23  ;;  %v12753_v22 = vld [vmem:[%s17376_s1 + $0x16c0] ss:$16 sps:$4 sm:$0xff]   ;;  %v12756_v23 = vld [vmem:[%s17376_s1 + $0x16c8] ss:$16 sps:$4 sm:$0xff]  }
 0x2a8   : >> { %5439 = vmatprep.subr.bf16.mxu0 %v12689_v24  ;;  %5480 = vmatprep.subr.bf16.mxu1 %v12692_v30 }
 0x2ab   : >> { %5440 = vmatpush1.bf16.msra.mxu0 %v12687_v25  ;;  %5481 = vmatpush1.bf16.msra.mxu1 %v12690_v26 }
 0x2ac   : >> { %5441 = vmatprep.subr.bf16.mxu0 %v12695_v28  ;;  %5482 = vmatprep.subr.bf16.mxu1 %v12698_v29 }
 0x2af   : >> { %5442 = vmatpush1.bf16.msra.mxu0 %v12693_v32  ;;  %5483 = vmatpush1.bf16.msra.mxu1 %v12696_v33  ;;  %v12759_v32 = vld [vmem:[%s17376_s1 + $0x16a0] ss:$16 sps:$4 sm:$0xff]   ;;  %v12762_v33 = vld [vmem:[%s17376_s1 + $0x16a8] ss:$16 sps:$4 sm:$0xff]  }
 0x2b0   : >> { %5443 = vmatprep.subr.bf16.mxu0 %v12701_v34  ;;  %5484 = vmatprep.subr.bf16.mxu1 %v12704_v54  ;;  %v12770_v54 = vld [vmem:[%s17376_s1 + $0x168c] ss:$16 sps:$4 sm:$0xff]  }
 0x2b3   : >> { %5444 = vmatpush2.bf16.msra.mxu0 %v12699_v50  ;;  %5485 = vmatpush2.bf16.msra.mxu1 %v12702_v55  ;;  %v12765_v50 = vld [vmem:[%s17376_s1 + $0x1680] ss:$16 sps:$4 sm:$0xff]   ;;  %v12768_v55 = vld [vmem:[%s17376_s1 + $0x1688] ss:$16 sps:$4 sm:$0xff]  }
 0x2b4   : >> { %5445 = vmatprep.subr.bf16.mxu0 %v12707_v17  ;;  %5486 = vmatprep.subr.bf16.mxu1 %v12710_v18  ;;  %v12773_v17 = vld [vmem:[%s17376_s1 + $0x1664] ss:$16 sps:$4 sm:$0xff]   ;;  %v12776_v18 = vld [vmem:[%s17376_s1 + $0x166c] ss:$16 sps:$4 sm:$0xff]  }
 0x2b7   : >> { %5446 = vmatpush2.bf16.msra.mxu0 %v12705_v43  ;;  %5487 = vmatpush2.bf16.msra.mxu1 %v12708_v5  ;;  %v12771_v43 = vld [vmem:[%s17376_s1 + $0x1660] ss:$16 sps:$4 sm:$0xff]   ;;  %v12774_v5 = vld [vmem:[%s17376_s1 + $0x1668] ss:$16 sps:$4 sm:$0xff]  }
 0x2b8   : >> { %5447 = vmatprep.subr.bf16.mxu0 %v12713_v38  ;;  %5488 = vmatprep.subr.bf16.mxu1 %v12716_v39  ;;  %v12779_v38 = vld [vmem:[%s17376_s1 + $0x1644] ss:$16 sps:$4 sm:$0xff]   ;;  %v12782_v39 = vld [vmem:[%s17376_s1 + $0x164c] ss:$16 sps:$4 sm:$0xff]  }
 0x2bb   : >> { %5448 = vmatpush2.bf16.msra.mxu0 %v12711_v52  ;;  %5489 = vmatpush2.bf16.msra.mxu1 %v12714_v53  ;;  %v12777_v52 = vld [vmem:[%s17376_s1 + $0x1640] ss:$16 sps:$4 sm:$0xff]   ;;  %v12780_v53 = vld [vmem:[%s17376_s1 + $0x1648] ss:$16 sps:$4 sm:$0xff]  }
 0x2bc   : >> { %5449 = vmatprep.subr.bf16.mxu0 %v12719_v40  ;;  %5490 = vmatprep.subr.bf16.mxu1 %v12722_v44  ;;  %v12785_v40 = vld [vmem:[%s17376_s1 + $0x1624] ss:$16 sps:$4 sm:$0xff]   ;;  %v12788_v44 = vld [vmem:[%s17376_s1 + $0x162c] ss:$16 sps:$4 sm:$0xff]  }
 0x2bf   : >> { %5450 = vmatpush2.bf16.msra.mxu0 %v12717_v59  ;;  %5491 = vmatpush2.bf16.msra.mxu1 %v12720_v41  ;;  %v12783_v59 = vld [vmem:[%s17376_s1 + $0x1620] ss:$16 sps:$4 sm:$0xff]   ;;  %v12786_v41 = vld [vmem:[%s17376_s1 + $0x1628] ss:$16 sps:$4 sm:$0xff]  }
 0x2c0   : >> { %5451 = vmatprep.subr.bf16.mxu0 %v12725_v49  ;;  %5492 = vmatprep.subr.bf16.mxu1 %v12728_v45  ;;  %v12791_v49 = vld [vmem:[%s17376_s1 + $0x1604] ss:$16 sps:$4 sm:$0xff]   ;;  %v12794_v45 = vld [vmem:[%s17376_s1 + $0x160c] ss:$16 sps:$4 sm:$0xff]  }
 0x2c3   : >> { %5452 = vmatpush2.bf16.msra.mxu0 %v12723_v46  ;;  %5493 = vmatpush2.bf16.msra.mxu1 %v12726_v51  ;;  %v12789_v46 = vld [vmem:[%s17376_s1 + $0x1600] ss:$16 sps:$4 sm:$0xff]   ;;  %v12792_v51 = vld [vmem:[%s17376_s1 + $0x1608] ss:$16 sps:$4 sm:$0xff]  }
 0x2c4   : >> { %5453 = vmatprep.subr.bf16.mxu0 %v12731_v56  ;;  %5494 = vmatprep.subr.bf16.mxu1 %v12734_v60  ;;  %v12797_v56 = vld [vmem:[%s17376_s1 + $0x17e4] ss:$16 sps:$4 sm:$0xff]   ;;  %v12800_v60 = vld [vmem:[%s17376_s1 + $0x17ec] ss:$16 sps:$4 sm:$0xff]  }
 0x2c7   : >> { %5454 = vmatpush2.bf16.msra.mxu0 %v12729_v62  ;;  %5495 = vmatpush2.bf16.msra.mxu1 %v12732_v0  ;;  %v12795_v62 = vld [vmem:[%s17376_s1 + $0x17e0] ss:$16 sps:$4 sm:$0xff]   ;;  %v12798_v0 = vld [vmem:[%s17376_s1 + $0x17e8] ss:$16 sps:$4 sm:$0xff]  }
 0x2c8   : >> { %5455 = vmatprep.subr.bf16.mxu0 %v12737_v2  ;;  %5496 = vmatprep.subr.bf16.mxu1 %v12740_v16  ;;  %v12803_v2 = vld [vmem:[%s17376_s1 + $0x17c4] ss:$16 sps:$4 sm:$0xff]   ;;  %v12806_v16 = vld [vmem:[%s17376_s1 + $0x17cc] ss:$16 sps:$4 sm:$0xff]  }
 0x2cb   : >> { %5456 = vmatpush2.bf16.msra.mxu0 %v12735_v35  ;;  %5497 = vmatpush2.bf16.msra.mxu1 %v12738_v7  ;;  %v12801_v35 = vld [vmem:[%s17376_s1 + $0x17c0] ss:$16 sps:$4 sm:$0xff]   ;;  %v12804_v7 = vld [vmem:[%s17376_s1 + $0x17c8] ss:$16 sps:$4 sm:$0xff]  }
 0x2cc   : >> { %5457 = vmatprep.subr.bf16.mxu0 %v12743_v61  ;;  %5498 = vmatprep.subr.bf16.mxu1 %v12746_v11  ;;  %v12809_v61 = vld [vmem:[%s17376_s1 + $0x17a4] ss:$16 sps:$4 sm:$0xff]   ;;  %v12812_v11 = vld [vmem:[%s17376_s1 + $0x17ac] ss:$16 sps:$4 sm:$0xff]  }
 0x2cf   : >> { %5458 = vmatpush2.bf16.msra.mxu0 %v12741_v8  ;;  %5499 = vmatpush2.bf16.msra.mxu1 %v12744_v4  ;;  %v12807_v8 = vld [vmem:[%s17376_s1 + $0x17a0] ss:$16 sps:$4 sm:$0xff]   ;;  %v12810_v4 = vld [vmem:[%s17376_s1 + $0x17a8] ss:$16 sps:$4 sm:$0xff]  }
 0x2d0   : >> { %5906 = vmatprep.subr.bf16.mxu0 %v12749_v63  ;;  %5947 = vmatprep.subr.bf16.mxu1 %v12752_v42  ;;  %v12815_v63 = vld [vmem:[%s17376_s1 + $0x1784] ss:$16 sps:$4 sm:$0xff]   ;;  %v12818_v42 = vld [vmem:[%s17376_s1 + $0x178c] ss:$16 sps:$4 sm:$0xff]  }
 0x2d2   : >> { %v4016_v47 = vpop.f32.mrf.mxu0  ;;  %v4057_v48 = vpop.f32.mrf.mxu1  ;;  %5460 = vmatmul.mubr.bf16.vlgmr.msra.gmra.mxu0 %v5103_v12  ;;  %5501 = vmatmul.mubr.bf16.vlgmr.msra.gmra.mxu1 %v5103_v12  ;;  %v12821_v12 = vld [vmem:[%s17376_s1 + $0x1764] ss:$16 sps:$4 sm:$0xff]  }
 0x2d3   : >> { %v15659_v19 = vadd.f32 %v4016_v47, %v15450_v57  ;;  %v15662_v21 = vadd.f32 %v4057_v48, %v15453_v58  ;;  %5907 = vmatpush1.bf16.msra.mxu0 %v12747_v14  ;;  %5948 = vmatpush1.bf16.msra.mxu1 %v12750_v15  ;;  %v12761_v57 = vld [vmem:[%s17376_s1 + $0x16a4] ss:$16 sps:$4 sm:$0xff]   ;;  %v12764_v58 = vld [vmem:[%s17376_s1 + $0x16ac] ss:$16 sps:$4 sm:$0xff]   ;;  %v12819_v15 = vld [vmem:[%s17376_s1 + $0x1760] ss:$16 sps:$4 sm:$0xff]  }
 0x2d4   : >> { %v4018_v24 = vpop.f32.mrf.mxu0  ;;  %v4059_v30 = vpop.f32.mrf.mxu1  ;;  %5908 = vmatprep.subr.bf16.mxu0 %v12755_v31  ;;  %5949 = vmatprep.subr.bf16.mxu1 %v12758_v13  ;;  %v12824_v14 = vld [vmem:[%s17376_s1 + $0x176c] ss:$16 sps:$4 sm:$0xff]   ;;  %v12822_v31 = vld [vmem:[%s17376_s1 + $0x1768] ss:$16 sps:$4 sm:$0xff]   ;;  %v12827_v13 = vld [vmem:[%s17376_s1 + $0x1744] ss:$16 sps:$4 sm:$0xff]  }
 0x2d5   : >> { %v15677_v25 = vadd.f32 %v4018_v24, %v15468_v10  ;;  %v15680_v26 = vadd.f32 %v4059_v30, %v15471_v3  ;;  %5938 = vmatprep.mubr.bf16.mxu0 %v5583_v20  ;;  %5979 = vmatprep.mubr.bf16.mxu1 %v5583_v20  ;;  %v12767_v3 = vld [vmem:[%s17376_s1 + $0x1684] ss:$16 sps:$4 sm:$0xff]   ;;  %v12830_v20 = vld [vmem:[%s17376_s1 + $0x174c] ss:$16 sps:$4 sm:$0xff]   ;;  %v12825_v47 = vld [vmem:[%s17376_s1 + $0x1740] ss:$16 sps:$4 sm:$0xff]  }
 0x2d6   : >> { %v4020_v28 = vpop.f32.mrf.mxu0  ;;  %v4061_v29 = vpop.f32.mrf.mxu1  ;;  %v12828_v48 = vld [vmem:[%s17376_s1 + $0x1748] ss:$16 sps:$4 sm:$0xff]   ;;  %v12831_v24 = vld [vmem:[%s17376_s1 + $0x1720] ss:$16 sps:$4 sm:$0xff]  }
 0x2d7   : >> { %5909 = vmatpush1.bf16.msra.mxu0 %v12753_v22  ;;  %5950 = vmatpush1.bf16.msra.mxu1 %v12756_v23  ;;  %v12833_v22 = vld [vmem:[%s17376_s1 + $0x1724] ss:$16 sps:$4 sm:$0xff]   ;;  %v12836_v23 = vld [vmem:[%s17376_s1 + $0x172c] ss:$16 sps:$4 sm:$0xff]   ;;  %v12834_v30 = vld [vmem:[%s17376_s1 + $0x1728] ss:$16 sps:$4 sm:$0xff]  }
 0x2d8   : >> { %v4021_v34 = vpop.f32.mrf.mxu0  ;;  %v4062_v10 = vpop.f32.mrf.mxu1  ;;  %5910 = vmatprep.subr.bf16.mxu0 %v12761_v57  ;;  %5951 = vmatprep.subr.bf16.mxu1 %v12764_v58  ;;  %v12839_v57 = vld [vmem:[%s17376_s1 + $0x1704] ss:$16 sps:$4 sm:$0xff]   ;;  %v12842_v58 = vld [vmem:[%s17376_s1 + $0x170c] ss:$16 sps:$4 sm:$0xff]   ;;  %v5578_v28 = vrot.slane %v4617_v37, 1  ;;  %v5579_v29 = vrot.slane %v4619_v36, 2 }
 0x2d9   : >> { %v12845_v34 = vld [vmem:[%s17376_s1 + $0x18e4] ss:$16 sps:$4 sm:$0xff]   ;;  %v15855_v37 = vld [vmem:[%s13477_s11 + $0x18] sm:$0x77]  ;;  %v12843_v10 = vld [vmem:[%s17376_s1 + $0x18e0] ss:$16 sps:$4 sm:$0xff]  }
 0x2da   : >> { %v5580_v36 = vor.u32 %v5579_v29, %v5578_v28  ;;  %v12911_v28 = vld [vmem:[%s17376_s1 + $0x1984] ss:$16 sps:$4 sm:$0xff]   ;;  %v12914_v29 = vld [vmem:[%s17376_s1 + $0x198c] ss:$16 sps:$4 sm:$0xff]  }
 0x2db   : >> { %5911 = vmatpush1.bf16.msra.mxu0 %v12759_v32  ;;  %5952 = vmatpush1.bf16.msra.mxu1 %v12762_v33  ;;  %v12837_v32 = vld [vmem:[%s17376_s1 + $0x1700] ss:$16 sps:$4 sm:$0xff]   ;;  %v12840_v33 = vld [vmem:[%s17376_s1 + $0x1708] ss:$16 sps:$4 sm:$0xff]  }
 0x2dc   : >> { %5912 = vmatprep.subr.bf16.mxu0 %v12767_v3  ;;  %5953 = vmatprep.subr.bf16.mxu1 %v12770_v54  ;;  %v12846_v3 = vld [vmem:[%s17376_s1 + $0x18e8] ss:$16 sps:$4 sm:$0xff]   ;;  %v12851_v54 = vld [vmem:[%s17376_s1 + $0x18c4] ss:$16 sps:$4 sm:$0xff]  }
 0x2df   : >> { %5913 = vmatpush1.bf16.msra.mxu0 %v12765_v50  ;;  %5954 = vmatpush1.bf16.msra.mxu1 %v12768_v55  ;;  %v12854_v50 = vld [vmem:[%s17376_s1 + $0x18cc] ss:$16 sps:$4 sm:$0xff]   ;;  %v15871_v55 = vcombine.high %v15855_v37, %v15855_v37 }
 0x2e0   : >> { %5914 = vmatprep.subr.bf16.mxu0 %v12773_v17  ;;  %5955 = vmatprep.subr.bf16.mxu1 %v12776_v18 }
 0x2e3   : >> { %5915 = vmatpush1.bf16.msra.mxu0 %v12771_v43  ;;  %5956 = vmatpush1.bf16.msra.mxu1 %v12774_v5 }
 0x2e4   : >> { %5916 = vmatprep.subr.bf16.mxu0 %v12779_v38  ;;  %5957 = vmatprep.subr.bf16.mxu1 %v12782_v39  ;;  %v12849_v38 = vld [vmem:[%s17376_s1 + $0x18c0] ss:$16 sps:$4 sm:$0xff]   ;;  %v12852_v39 = vld [vmem:[%s17376_s1 + $0x18c8] ss:$16 sps:$4 sm:$0xff]  }
 0x2e7   : >> { %5917 = vmatpush1.bf16.msra.mxu0 %v12777_v52  ;;  %5958 = vmatpush1.bf16.msra.mxu1 %v12780_v53 }
 0x2e8   : >> { %5918 = vmatprep.subr.bf16.mxu0 %v12785_v40  ;;  %5959 = vmatprep.subr.bf16.mxu1 %v12788_v44 }
 0x2eb   : >> { %5919 = vmatpush1.bf16.msra.mxu0 %v12783_v59  ;;  %5960 = vmatpush1.bf16.msra.mxu1 %v12786_v41 }
 0x2ec   : >> { %5920 = vmatprep.subr.bf16.mxu0 %v12791_v49  ;;  %5961 = vmatprep.subr.bf16.mxu1 %v12794_v45  ;;  %v12855_v49 = vld [vmem:[%s17376_s1 + $0x18a0] ss:$16 sps:$4 sm:$0xff]  }
 0x2ef   : >> { %5921 = vmatpush1.bf16.msra.mxu0 %v12789_v46  ;;  %5962 = vmatpush1.bf16.msra.mxu1 %v12792_v51  ;;  %v12866_v51 = vld [vmem:[%s17376_s1 + $0x188c] ss:$16 sps:$4 sm:$0xff]  }
 0x2f0   : >> { %5922 = vmatprep.subr.bf16.mxu0 %v12797_v56  ;;  %5963 = vmatprep.subr.bf16.mxu1 %v12800_v60  ;;  %v12861_v56 = vld [vmem:[%s17376_s1 + $0x1880] ss:$16 sps:$4 sm:$0xff]   ;;  %v12864_v60 = vld [vmem:[%s17376_s1 + $0x1888] ss:$16 sps:$4 sm:$0xff]  }
 0x2f3   : >> { %5923 = vmatpush2.bf16.msra.mxu0 %v12795_v62  ;;  %5964 = vmatpush2.bf16.msra.mxu1 %v12798_v0  ;;  %v12869_v62 = vld [vmem:[%s17376_s1 + $0x1864] ss:$16 sps:$4 sm:$0xff]   ;;  %v12872_v0 = vld [vmem:[%s17376_s1 + $0x186c] ss:$16 sps:$4 sm:$0xff]  }
 0x2f4   : >> { %5924 = vmatprep.subr.bf16.mxu0 %v12803_v2  ;;  %5965 = vmatprep.subr.bf16.mxu1 %v12806_v16  ;;  %v12867_v2 = vld [vmem:[%s17376_s1 + $0x1860] ss:$16 sps:$4 sm:$0xff]   ;;  %v12870_v16 = vld [vmem:[%s17376_s1 + $0x1868] ss:$16 sps:$4 sm:$0xff]  }
 0x2f7   : >> { %5925 = vmatpush2.bf16.msra.mxu0 %v12801_v35  ;;  %5966 = vmatpush2.bf16.msra.mxu1 %v12804_v7  ;;  %v12875_v35 = vld [vmem:[%s17376_s1 + $0x1844] ss:$16 sps:$4 sm:$0xff]   ;;  %v12878_v7 = vld [vmem:[%s17376_s1 + $0x184c] ss:$16 sps:$4 sm:$0xff]  }
 0x2f8   : >> { %5926 = vmatprep.subr.bf16.mxu0 %v12809_v61  ;;  %5967 = vmatprep.subr.bf16.mxu1 %v12812_v11  ;;  %v12873_v61 = vld [vmem:[%s17376_s1 + $0x1840] ss:$16 sps:$4 sm:$0xff]   ;;  %v12876_v11 = vld [vmem:[%s17376_s1 + $0x1848] ss:$16 sps:$4 sm:$0xff]  }
 0x2fb   : >> { %5927 = vmatpush2.bf16.msra.mxu0 %v12807_v8  ;;  %5968 = vmatpush2.bf16.msra.mxu1 %v12810_v4  ;;  %v12881_v8 = vld [vmem:[%s17376_s1 + $0x1824] ss:$16 sps:$4 sm:$0xff]   ;;  %v12884_v4 = vld [vmem:[%s17376_s1 + $0x182c] ss:$16 sps:$4 sm:$0xff]  }
 0x2fc   : >> { %5928 = vmatprep.subr.bf16.mxu0 %v12815_v63  ;;  %5969 = vmatprep.subr.bf16.mxu1 %v12818_v42  ;;  %v12879_v63 = vld [vmem:[%s17376_s1 + $0x1820] ss:$16 sps:$4 sm:$0xff]   ;;  %v12882_v42 = vld [vmem:[%s17376_s1 + $0x1828] ss:$16 sps:$4 sm:$0xff]  }
 0x2ff   : >> { %5929 = vmatpush2.bf16.msra.mxu0 %v12813_v6  ;;  %5970 = vmatpush2.bf16.msra.mxu1 %v12816_v9  ;;  %v12887_v6 = vld [vmem:[%s17376_s1 + $0x1804] ss:$16 sps:$4 sm:$0xff]   ;;  %v12890_v9 = vld [vmem:[%s17376_s1 + $0x180c] ss:$16 sps:$4 sm:$0xff]  }
 0x300   : >> { %5930 = vmatprep.subr.bf16.mxu0 %v12821_v12  ;;  %5971 = vmatprep.subr.bf16.mxu1 %v12824_v14  ;;  %v12885_v12 = vld [vmem:[%s17376_s1 + $0x1800] ss:$16 sps:$4 sm:$0xff]   ;;  %v12888_v14 = vld [vmem:[%s17376_s1 + $0x1808] ss:$16 sps:$4 sm:$0xff]  }
 0x303   : >> { %5931 = vmatpush2.bf16.msra.mxu0 %v12819_v15  ;;  %5972 = vmatpush2.bf16.msra.mxu1 %v12822_v31  ;;  %v12893_v15 = vld [vmem:[%s17376_s1 + $0x19e4] ss:$16 sps:$4 sm:$0xff]   ;;  %v12896_v31 = vld [vmem:[%s17376_s1 + $0x19ec] ss:$16 sps:$4 sm:$0xff]  }
 0x304   : >> { %5932 = vmatprep.subr.bf16.mxu0 %v12827_v13  ;;  %5973 = vmatprep.subr.bf16.mxu1 %v12830_v20  ;;  %v12891_v13 = vld [vmem:[%s17376_s1 + $0x19e0] ss:$16 sps:$4 sm:$0xff]   ;;  %v12894_v20 = vld [vmem:[%s17376_s1 + $0x19e8] ss:$16 sps:$4 sm:$0xff]  }
 0x307   : >> { %5933 = vmatpush2.bf16.msra.mxu0 %v12825_v47  ;;  %5974 = vmatpush2.bf16.msra.mxu1 %v12828_v48  ;;  %v12899_v47 = vld [vmem:[%s17376_s1 + $0x19c4] ss:$16 sps:$4 sm:$0xff]   ;;  %v12902_v48 = vld [vmem:[%s17376_s1 + $0x19cc] ss:$16 sps:$4 sm:$0xff]  }
 0x308   : >> { %5934 = vmatprep.subr.bf16.mxu0 %v12833_v22  ;;  %5975 = vmatprep.subr.bf16.mxu1 %v12836_v23  ;;  %v12897_v22 = vld [vmem:[%s17376_s1 + $0x19c0] ss:$16 sps:$4 sm:$0xff]   ;;  %v12900_v23 = vld [vmem:[%s17376_s1 + $0x19c8] ss:$16 sps:$4 sm:$0xff]  }
 0x30b   : >> { %5935 = vmatpush2.bf16.msra.mxu0 %v12831_v24  ;;  %5976 = vmatpush2.bf16.msra.mxu1 %v12834_v30  ;;  %v12905_v24 = vld [vmem:[%s17376_s1 + $0x19a4] ss:$16 sps:$4 sm:$0xff]   ;;  %v12908_v30 = vld [vmem:[%s17376_s1 + $0x19ac] ss:$16 sps:$4 sm:$0xff]  }
 0x30c   : >> { %5936 = vmatprep.subr.bf16.mxu0 %v12839_v57  ;;  %5977 = vmatprep.subr.bf16.mxu1 %v12842_v58  ;;  %v12903_v57 = vld [vmem:[%s17376_s1 + $0x19a0] ss:$16 sps:$4 sm:$0xff]   ;;  %v12906_v58 = vld [vmem:[%s17376_s1 + $0x19a8] ss:$16 sps:$4 sm:$0xff]  }
 0x30f   : >> { %5937 = vmatpush2.bf16.msra.mxu0 %v12837_v32  ;;  %5978 = vmatpush2.bf16.msra.mxu1 %v12840_v33  ;;  %v12909_v32 = vld [vmem:[%s17376_s1 + $0x1980] ss:$16 sps:$4 sm:$0xff]   ;;  %v12912_v33 = vld [vmem:[%s17376_s1 + $0x1988] ss:$16 sps:$4 sm:$0xff]  }
 0x310   : >> { %6389 = vmatprep.subr.bf16.mxu0 %v12845_v34  ;;  %6430 = vmatprep.subr.bf16.mxu1 %v12848_v27  ;;  %v12917_v34 = vld [vmem:[%s17376_s1 + $0x1964] ss:$16 sps:$4 sm:$0xff]   ;;  %v12920_v27 = vld [vmem:[%s17376_s1 + $0x196c] ss:$16 sps:$4 sm:$0xff]  }
 0x312   : >> { %v4499_v17 = vpop.f32.mrf.mxu0  ;;  %v4540_v18 = vpop.f32.mrf.mxu1  ;;  %5939 = vmatmul.mubr.bf16.vlgmr.msra.gmra.mxu0 %v5580_v36  ;;  %5980 = vmatmul.mubr.bf16.vlgmr.msra.gmra.mxu1 %v5580_v36  ;;  %v12915_v36 = vld [vmem:[%s17376_s1 + $0x1960] ss:$16 sps:$4 sm:$0xff]  }
 0x313   : >> { %v15874_v43 = vadd.f32 %v4499_v17, %v15659_v19  ;;  %v15877_v5 = vadd.f32 %v4540_v18, %v15662_v21  ;;  %6390 = vmatpush1.bf16.msra.mxu0 %v12843_v10  ;;  %6431 = vmatpush1.bf16.msra.mxu1 %v12846_v3  ;;  %v12857_v19 = vld [vmem:[%s17376_s1 + $0x18a4] ss:$16 sps:$4 sm:$0xff]   ;;  %v12860_v21 = vld [vmem:[%s17376_s1 + $0x18ac] ss:$16 sps:$4 sm:$0xff]   ;;  %v12918_v10 = vld [vmem:[%s17376_s1 + $0x1968] ss:$16 sps:$4 sm:$0xff]  }
 0x314   : >> { %v4501_v52 = vpop.f32.mrf.mxu0  ;;  %v4542_v53 = vpop.f32.mrf.mxu1  ;;  %6391 = vmatprep.subr.bf16.mxu0 %v12851_v54  ;;  %6432 = vmatprep.subr.bf16.mxu1 %v12854_v50  ;;  %v12923_v3 = vld [vmem:[%s17376_s1 + $0x1944] ss:$16 sps:$4 sm:$0xff]   ;;  %v12926_v54 = vld [vmem:[%s17376_s1 + $0x194c] ss:$16 sps:$4 sm:$0xff]   ;;  %v12921_v50 = vld [vmem:[%s17376_s1 + $0x1940] ss:$16 sps:$4 sm:$0xff]  }
 0x315   : >> { %v15892_v40 = vadd.f32 %v4501_v52, %v15677_v25  ;;  %v15895_v44 = vadd.f32 %v4542_v53, %v15680_v26  ;;  %6421 = vmatprep.mubr.bf16.mxu0 %v15871_v55  ;;  %6462 = vmatprep.mubr.bf16.mxu1 %v15871_v55  ;;  %v12858_v25 = vld [vmem:[%s17376_s1 + $0x18a8] ss:$16 sps:$4 sm:$0xff]   ;;  %v12863_v26 = vld [vmem:[%s17376_s1 + $0x1884] ss:$16 sps:$4 sm:$0xff]  }
 0x316   : >> { %v4503_v59 = vpop.f32.mrf.mxu0  ;;  %v4544_v41 = vpop.f32.mrf.mxu1  ;;  %v12924_v17 = vld [vmem:[%s17376_s1 + $0x1948] ss:$16 sps:$4 sm:$0xff]   ;;  %v12929_v18 = vld [vmem:[%s17376_s1 + $0x1924] ss:$16 sps:$4 sm:$0xff]  }
 0x317   : >> { %6392 = vmatpush1.bf16.msra.mxu0 %v12849_v38  ;;  %6433 = vmatpush1.bf16.msra.mxu1 %v12852_v39  ;;  %v12932_v38 = vld [vmem:[%s17376_s1 + $0x192c] ss:$16 sps:$4 sm:$0xff]   ;;  %v12927_v39 = vld [vmem:[%s17376_s1 + $0x1920] ss:$16 sps:$4 sm:$0xff]   ;;  %v12930_v52 = vld [vmem:[%s17376_s1 + $0x1928] ss:$16 sps:$4 sm:$0xff]  }
 0x318   : >> { %v4504_v45 = vpop.f32.mrf.mxu0  ;;  %v4545_v46 = vpop.f32.mrf.mxu1  ;;  %6393 = vmatprep.subr.bf16.mxu0 %v12857_v19  ;;  %6434 = vmatprep.subr.bf16.mxu1 %v12860_v21  ;;  %v12935_v53 = vld [vmem:[%s17376_s1 + $0x1904] ss:$16 sps:$4 sm:$0xff]   ;;  %v12938_v19 = vld [vmem:[%s17376_s1 + $0x190c] ss:$16 sps:$4 sm:$0xff]   ;;  %v6550_v21 = vshll.u32 %v15871_v55, 16 }
 0x319   : >> { %v12933_v59 = vld [vmem:[%s17376_s1 + $0x1900] ss:$16 sps:$4 sm:$0xff]   ;;  %v12936_v41 = vld [vmem:[%s17376_s1 + $0x1908] ss:$16 sps:$4 sm:$0xff]   ;;  %v6548_v45 = vshrl.u32 %v15871_v55, 16 }
 0x31a   : >> { %v6552_v46 = vrot.slane %v6550_v21, 1 }
 0x31b   : >> { %6394 = vmatpush1.bf16.msra.mxu0 %v12855_v49  ;;  %6435 = vmatpush1.bf16.msra.mxu1 %v12858_v25  ;;  %v12943_v49 = vld [vmem:[%s17376_s1 + $0x1ae4] ss:$16 sps:$4 sm:$0xff]   ;;  %v12946_v25 = vld [vmem:[%s17376_s1 + $0x1aec] ss:$16 sps:$4 sm:$0xff]  }
 0x31c   : >> { %6395 = vmatprep.subr.bf16.mxu0 %v12863_v26  ;;  %6436 = vmatprep.subr.bf16.mxu1 %v12866_v51  ;;  %v16073_v26 = vcombine.low %v15855_v37, %v15855_v37  ;;  %v12941_v51 = vld [vmem:[%s17376_s1 + $0x1ae0] ss:$16 sps:$4 sm:$0xff]   ;;  %v12952_v37 = vld [vmem:[%s17376_s1 + $0x1acc] ss:$16 sps:$4 sm:$0xff]  }
 0x31f   : >> { %6396 = vmatpush1.bf16.msra.mxu0 %v12861_v56  ;;  %6437 = vmatpush1.bf16.msra.mxu1 %v12864_v60  ;;  %v12944_v56 = vld [vmem:[%s17376_s1 + $0x1ae8] ss:$16 sps:$4 sm:$0xff]   ;;  %v12949_v60 = vld [vmem:[%s17376_s1 + $0x1ac4] ss:$16 sps:$4 sm:$0xff]  }
 0x320   : >> { %6397 = vmatprep.subr.bf16.mxu0 %v12869_v62  ;;  %6438 = vmatprep.subr.bf16.mxu1 %v12872_v0  ;;  %v6553_v62 = vor.u32 %v6552_v46, %v6548_v45  ;;  %v13010_v46 = vld [vmem:[%s17376_s1 + $0x1b88] ss:$16 sps:$4 sm:$0xff]  }
 0x323   : >> { %6398 = vmatpush1.bf16.msra.mxu0 %v12867_v2  ;;  %6439 = vmatpush1.bf16.msra.mxu1 %v12870_v16 }
 0x324   : >> { %6399 = vmatprep.subr.bf16.mxu0 %v12875_v35  ;;  %6440 = vmatprep.subr.bf16.mxu1 %v12878_v7  ;;  %v12947_v7 = vld [vmem:[%s17376_s1 + $0x1ac0] ss:$16 sps:$4 sm:$0xff]  }
 0x327   : >> { %6400 = vmatpush1.bf16.msra.mxu0 %v12873_v61  ;;  %6441 = vmatpush1.bf16.msra.mxu1 %v12876_v11  ;;  %v12950_v61 = vld [vmem:[%s17376_s1 + $0x1ac8] ss:$16 sps:$4 sm:$0xff]  }
 0x328   : >> { %6401 = vmatprep.subr.bf16.mxu0 %v12881_v8  ;;  %6442 = vmatprep.subr.bf16.mxu1 %v12884_v4 }
 0x32b   : >> { %6402 = vmatpush1.bf16.msra.mxu0 %v12879_v63  ;;  %6443 = vmatpush1.bf16.msra.mxu1 %v12882_v42 }
 0x32c   : >> { %6403 = vmatprep.subr.bf16.mxu0 %v12887_v6  ;;  %6444 = vmatprep.subr.bf16.mxu1 %v12890_v9  ;;  %v12953_v9 = vld [vmem:[%s17376_s1 + $0x1aa0] ss:$16 sps:$4 sm:$0xff]  }
 0x32f   : >> { %6404 = vmatpush1.bf16.msra.mxu0 %v12885_v12  ;;  %6445 = vmatpush1.bf16.msra.mxu1 %v12888_v14  ;;  %v12956_v12 = vld [vmem:[%s17376_s1 + $0x1aa8] ss:$16 sps:$4 sm:$0xff]  }
 0x330   : >> { %6405 = vmatprep.subr.bf16.mxu0 %v12893_v15  ;;  %6446 = vmatprep.subr.bf16.mxu1 %v12896_v31  ;;  %v12964_v15 = vld [vmem:[%s17376_s1 + $0x1a8c] ss:$16 sps:$4 sm:$0xff]   ;;  %v12959_v31 = vld [vmem:[%s17376_s1 + $0x1a80] ss:$16 sps:$4 sm:$0xff]  }
 0x333   : >> { %6406 = vmatpush2.bf16.msra.mxu0 %v12891_v13  ;;  %6447 = vmatpush2.bf16.msra.mxu1 %v12894_v20  ;;  %v12962_v13 = vld [vmem:[%s17376_s1 + $0x1a88] ss:$16 sps:$4 sm:$0xff]   ;;  %v12967_v20 = vld [vmem:[%s17376_s1 + $0x1a64] ss:$16 sps:$4 sm:$0xff]  }
 0x334   : >> { %6407 = vmatprep.subr.bf16.mxu0 %v12899_v47  ;;  %6448 = vmatprep.subr.bf16.mxu1 %v12902_v48  ;;  %v12970_v47 = vld [vmem:[%s17376_s1 + $0x1a6c] ss:$16 sps:$4 sm:$0xff]   ;;  %v12965_v48 = vld [vmem:[%s17376_s1 + $0x1a60] ss:$16 sps:$4 sm:$0xff]  }
 0x337   : >> { %6408 = vmatpush2.bf16.msra.mxu0 %v12897_v22  ;;  %6449 = vmatpush2.bf16.msra.mxu1 %v12900_v23  ;;  %v12968_v22 = vld [vmem:[%s17376_s1 + $0x1a68] ss:$16 sps:$4 sm:$0xff]   ;;  %v12973_v23 = vld [vmem:[%s17376_s1 + $0x1a44] ss:$16 sps:$4 sm:$0xff]  }
 0x338   : >> { %6409 = vmatprep.subr.bf16.mxu0 %v12905_v24  ;;  %6450 = vmatprep.subr.bf16.mxu1 %v12908_v30  ;;  %v12976_v24 = vld [vmem:[%s17376_s1 + $0x1a4c] ss:$16 sps:$4 sm:$0xff]   ;;  %v12971_v30 = vld [vmem:[%s17376_s1 + $0x1a40] ss:$16 sps:$4 sm:$0xff]  }
 0x33b   : >> { %6410 = vmatpush2.bf16.msra.mxu0 %v12903_v57  ;;  %6451 = vmatpush2.bf16.msra.mxu1 %v12906_v58  ;;  %v12974_v57 = vld [vmem:[%s17376_s1 + $0x1a48] ss:$16 sps:$4 sm:$0xff]   ;;  %v12979_v58 = vld [vmem:[%s17376_s1 + $0x1a24] ss:$16 sps:$4 sm:$0xff]  }
 0x33c   : >> { %6411 = vmatprep.subr.bf16.mxu0 %v12911_v28  ;;  %6452 = vmatprep.subr.bf16.mxu1 %v12914_v29  ;;  %v12982_v28 = vld [vmem:[%s17376_s1 + $0x1a2c] ss:$16 sps:$4 sm:$0xff]   ;;  %v12977_v29 = vld [vmem:[%s17376_s1 + $0x1a20] ss:$16 sps:$4 sm:$0xff]  }
 0x33f   : >> { %6412 = vmatpush2.bf16.msra.mxu0 %v12909_v32  ;;  %6453 = vmatpush2.bf16.msra.mxu1 %v12912_v33  ;;  %v12980_v32 = vld [vmem:[%s17376_s1 + $0x1a28] ss:$16 sps:$4 sm:$0xff]   ;;  %v12985_v33 = vld [vmem:[%s17376_s1 + $0x1a04] ss:$16 sps:$4 sm:$0xff]  }
 0x340   : >> { %6413 = vmatprep.subr.bf16.mxu0 %v12917_v34  ;;  %6454 = vmatprep.subr.bf16.mxu1 %v12920_v27  ;;  %v12988_v34 = vld [vmem:[%s17376_s1 + $0x1a0c] ss:$16 sps:$4 sm:$0xff]   ;;  %v12983_v27 = vld [vmem:[%s17376_s1 + $0x1a00] ss:$16 sps:$4 sm:$0xff]  }
 0x343   : >> { %6414 = vmatpush2.bf16.msra.mxu0 %v12915_v36  ;;  %6455 = vmatpush2.bf16.msra.mxu1 %v12918_v10  ;;  %v12986_v36 = vld [vmem:[%s17376_s1 + $0x1a08] ss:$16 sps:$4 sm:$0xff]   ;;  %v12991_v10 = vld [vmem:[%s17376_s1 + $0x1be4] ss:$16 sps:$4 sm:$0xff]  }
 0x344   : >> { %6415 = vmatprep.subr.bf16.mxu0 %v12923_v3  ;;  %6456 = vmatprep.subr.bf16.mxu1 %v12926_v54  ;;  %v12994_v3 = vld [vmem:[%s17376_s1 + $0x1bec] ss:$16 sps:$4 sm:$0xff]   ;;  %v12989_v54 = vld [vmem:[%s17376_s1 + $0x1be0] ss:$16 sps:$4 sm:$0xff]  }
 0x347   : >> { %6416 = vmatpush2.bf16.msra.mxu0 %v12921_v50  ;;  %6457 = vmatpush2.bf16.msra.mxu1 %v12924_v17  ;;  %v12992_v50 = vld [vmem:[%s17376_s1 + $0x1be8] ss:$16 sps:$4 sm:$0xff]   ;;  %v12997_v17 = vld [vmem:[%s17376_s1 + $0x1bc4] ss:$16 sps:$4 sm:$0xff]  }
 0x348   : >> { %6417 = vmatprep.subr.bf16.mxu0 %v12929_v18  ;;  %6458 = vmatprep.subr.bf16.mxu1 %v12932_v38  ;;  %v13000_v18 = vld [vmem:[%s17376_s1 + $0x1bcc] ss:$16 sps:$4 sm:$0xff]   ;;  %v12995_v38 = vld [vmem:[%s17376_s1 + $0x1bc0] ss:$16 sps:$4 sm:$0xff]  }
 0x34b   : >> { %6418 = vmatpush2.bf16.msra.mxu0 %v12927_v39  ;;  %6459 = vmatpush2.bf16.msra.mxu1 %v12930_v52  ;;  %v12998_v39 = vld [vmem:[%s17376_s1 + $0x1bc8] ss:$16 sps:$4 sm:$0xff]   ;;  %v13003_v52 = vld [vmem:[%s17376_s1 + $0x1ba4] ss:$16 sps:$4 sm:$0xff]  }
 0x34c   : >> { %6419 = vmatprep.subr.bf16.mxu0 %v12935_v53  ;;  %6460 = vmatprep.subr.bf16.mxu1 %v12938_v19  ;;  %v13006_v53 = vld [vmem:[%s17376_s1 + $0x1bac] ss:$16 sps:$4 sm:$0xff]   ;;  %v13001_v19 = vld [vmem:[%s17376_s1 + $0x1ba0] ss:$16 sps:$4 sm:$0xff]  }
 0x34f   : >> { %6420 = vmatpush2.bf16.msra.mxu0 %v12933_v59  ;;  %6461 = vmatpush2.bf16.msra.mxu1 %v12936_v41  ;;  %v13004_v59 = vld [vmem:[%s17376_s1 + $0x1ba8] ss:$16 sps:$4 sm:$0xff]   ;;  %v13009_v41 = vld [vmem:[%s17376_s1 + $0x1b84] ss:$16 sps:$4 sm:$0xff]  }
 0x350   : >> { %6876 = vmatprep.subr.bf16.mxu0 %v12943_v49  ;;  %6917 = vmatprep.subr.bf16.mxu1 %v12946_v25  ;;  %v13012_v49 = vld [vmem:[%s17376_s1 + $0x1b8c] ss:$16 sps:$4 sm:$0xff]   ;;  %v13007_v25 = vld [vmem:[%s17376_s1 + $0x1b80] ss:$16 sps:$4 sm:$0xff]  }
 0x352   : >> { %v4986_v0 = vpop.f32.mrf.mxu0  ;;  %v5027_v2 = vpop.f32.mrf.mxu1  ;;  %6422 = vmatmul.mubr.bf16.vlgmr.msra.gmra.mxu0 %v16073_v26  ;;  %6463 = vmatmul.mubr.bf16.vlgmr.msra.gmra.mxu1 %v16073_v26 }
 0x353   : >> { %v16092_v16 = vadd.f32 %v4986_v0, %v15874_v43  ;;  %v16095_v35 = vadd.f32 %v5027_v2, %v15877_v5  ;;  %6877 = vmatpush1.bf16.msra.mxu0 %v12941_v51  ;;  %6918 = vmatpush1.bf16.msra.mxu1 %v12944_v56  ;;  %v12955_v43 = vld [vmem:[%s17376_s1 + $0x1aa4] ss:$16 sps:$4 sm:$0xff]   ;;  %v12958_v5 = vld [vmem:[%s17376_s1 + $0x1aac] ss:$16 sps:$4 sm:$0xff]   ;;  %v13019_v2 = vld [vmem:[%s17376_s1 + $0x1b40] ss:$16 sps:$4 sm:$0xff]  }
 0x354   : >> { %v4988_v11 = vpop.f32.mrf.mxu0  ;;  %v5029_v8 = vpop.f32.mrf.mxu1  ;;  %6878 = vmatprep.subr.bf16.mxu0 %v12949_v60  ;;  %6919 = vmatprep.subr.bf16.mxu1 %v12952_v37  ;;  %v13015_v51 = vld [vmem:[%s17376_s1 + $0x1b64] ss:$16 sps:$4 sm:$0xff]   ;;  %v13018_v56 = vld [vmem:[%s17376_s1 + $0x1b6c] ss:$16 sps:$4 sm:$0xff]   ;;  %v13013_v60 = vld [vmem:[%s17376_s1 + $0x1b60] ss:$16 sps:$4 sm:$0xff]  }
 0x355   : >> { %v16110_v4 = vadd.f32 %v4988_v11, %v15892_v40  ;;  %v16113_v63 = vadd.f32 %v5029_v8, %v15895_v44  ;;  %6908 = vmatprep.mubr.bf16.mxu0 %v6553_v62  ;;  %6949 = vmatprep.mubr.bf16.mxu1 %v6553_v62  ;;  %v12961_v44 = vld [vmem:[%s17376_s1 + $0x1a84] ss:$16 sps:$4 sm:$0xff]   ;;  %v13016_v37 = vld [vmem:[%s17376_s1 + $0x1b68] ss:$16 sps:$4 sm:$0xff]   ;;  %v13024_v0 = vld [vmem:[%s17376_s1 + $0x1b4c] ss:$16 sps:$4 sm:$0xff]  }
 0x356   : >> { %v4990_v42 = vpop.f32.mrf.mxu0  ;;  %v5031_v6 = vpop.f32.mrf.mxu1  ;;  %v13021_v62 = vld [vmem:[%s17376_s1 + $0x1b44] ss:$16 sps:$4 sm:$0xff]   ;;  %v13030_v11 = vld [vmem:[%s17376_s1 + $0x1b2c] ss:$16 sps:$4 sm:$0xff]   ;;  %v6543_v8 = vshll.u32 %v16073_v26, 16 }
 0x357   : >> { %6879 = vmatpush1.bf16.msra.mxu0 %v12947_v7  ;;  %6920 = vmatpush1.bf16.msra.mxu1 %v12950_v61  ;;  %v13022_v7 = vld [vmem:[%s17376_s1 + $0x1b48] ss:$16 sps:$4 sm:$0xff]   ;;  %v13027_v61 = vld [vmem:[%s17376_s1 + $0x1b24] ss:$16 sps:$4 sm:$0xff]   ;;  %v13036_v6 = vld [vmem:[%s17376_s1 + $0x1b0c] ss:$16 sps:$4 sm:$0xff]  }
 0x358   : >> { %v4991_v14 = vpop.f32.mrf.mxu0  ;;  %v5032_v40 = vpop.f32.mrf.mxu1  ;;  %6880 = vmatprep.subr.bf16.mxu0 %v12955_v43  ;;  %6921 = vmatprep.subr.bf16.mxu1 %v12958_v5  ;;  %v13025_v43 = vld [vmem:[%s17376_s1 + $0x1b20] ss:$16 sps:$4 sm:$0xff]   ;;  %v13028_v5 = vld [vmem:[%s17376_s1 + $0x1b28] ss:$16 sps:$4 sm:$0xff]   ;;  %v13033_v42 = vld [vmem:[%s17376_s1 + $0x1b04] ss:$16 sps:$4 sm:$0xff]  }
 0x359   : >> { %v13031_v14 = vld [vmem:[%s17376_s1 + $0x1b00] ss:$16 sps:$4 sm:$0xff]   ;;  %v13034_v40 = vld [vmem:[%s17376_s1 + $0x1b08] ss:$16 sps:$4 sm:$0xff]  }
 0x35b   : >> { %6881 = vmatpush1.bf16.msra.mxu0 %v12953_v9  ;;  %6922 = vmatpush1.bf16.msra.mxu1 %v12956_v12  ;;  %v6541_v9 = vshrl.u32 %v16073_v26, 16  ;;  %v6545_v12 = vrot.slane %v6543_v8, 1 }
 0x35c   : >> { %6882 = vmatprep.subr.bf16.mxu0 %v12961_v44  ;;  %6923 = vmatprep.subr.bf16.mxu1 %v12964_v15  ;;  %v13039_v44 = vld [vmem:[%s17376_s1 + $0x1ce4] ss:$16 sps:$4 sm:$0xff]   ;;  %v13042_v15 = vld [vmem:[%s17376_s1 + $0x1cec] ss:$16 sps:$4 sm:$0xff]  }
 0x35f   : >> { %6883 = vmatpush1.bf16.msra.mxu0 %v12959_v31  ;;  %6924 = vmatpush1.bf16.msra.mxu1 %v12962_v13  ;;  %v6546_v31 = vor.u32 %v6545_v12, %v6541_v9  ;;  %v13037_v13 = vld [vmem:[%s17376_s1 + $0x1ce0] ss:$16 sps:$4 sm:$0xff]   ;;  %v13099_v12 = vld [vmem:[%s17376_s1 + $0x1da4] ss:$16 sps:$4 sm:$0xff]  }
 0x360   : >> { %6884 = vmatprep.subr.bf16.mxu0 %v12967_v20  ;;  %6925 = vmatprep.subr.bf16.mxu1 %v12970_v47  ;;  %v13040_v20 = vld [vmem:[%s17376_s1 + $0x1ce8] ss:$16 sps:$4 sm:$0xff]   ;;  %v13045_v47 = vld [vmem:[%s17376_s1 + $0x1cc4] ss:$16 sps:$4 sm:$0xff]  }
 0x363   : >> { %6885 = vmatpush1.bf16.msra.mxu0 %v12965_v48  ;;  %6926 = vmatpush1.bf16.msra.mxu1 %v12968_v22  ;;  %v13048_v48 = vld [vmem:[%s17376_s1 + $0x1ccc] ss:$16 sps:$4 sm:$0xff]   ;;  %v7028_v22 = vrot.slane %v15871_v55, 1 }
 0x364   : >> { %6886 = vmatprep.subr.bf16.mxu0 %v12973_v23  ;;  %6927 = vmatprep.subr.bf16.mxu1 %v12976_v24  ;;  %v13144_v55 = vld [vmem:[%s17376_s1 + $0x1ecc] ss:$16 sps:$4 sm:$0xff]  }
 0x367   : >> { %6887 = vmatpush1.bf16.msra.mxu0 %v12971_v30  ;;  %6928 = vmatpush1.bf16.msra.mxu1 %v12974_v57 }
 0x368   : >> { %6888 = vmatprep.subr.bf16.mxu0 %v12979_v58  ;;  %6929 = vmatprep.subr.bf16.mxu1 %v12982_v28  ;;  %v13043_v58 = vld [vmem:[%s17376_s1 + $0x1cc0] ss:$16 sps:$4 sm:$0xff]   ;;  %v13046_v28 = vld [vmem:[%s17376_s1 + $0x1cc8] ss:$16 sps:$4 sm:$0xff]  }
 0x36b   : >> { %6889 = vmatpush1.bf16.msra.mxu0 %v12977_v29  ;;  %6930 = vmatpush1.bf16.msra.mxu1 %v12980_v32 }
 0x36c   : >> { %6890 = vmatprep.subr.bf16.mxu0 %v12985_v33  ;;  %6931 = vmatprep.subr.bf16.mxu1 %v12988_v34 }
 0x36f   : >> { %6891 = vmatpush1.bf16.msra.mxu0 %v12983_v27  ;;  %6932 = vmatpush1.bf16.msra.mxu1 %v12986_v36 }
 0x370   : >> { %6892 = vmatprep.subr.bf16.mxu0 %v12991_v10  ;;  %6933 = vmatprep.subr.bf16.mxu1 %v12994_v3  ;;  %v13049_v10 = vld [vmem:[%s17376_s1 + $0x1ca0] ss:$16 sps:$4 sm:$0xff]   ;;  %v13052_v3 = vld [vmem:[%s17376_s1 + $0x1ca8] ss:$16 sps:$4 sm:$0xff]  }
 0x373   : >> { %6893 = vmatpush2.bf16.msra.mxu0 %v12989_v54  ;;  %6934 = vmatpush2.bf16.msra.mxu1 %v12992_v50  ;;  %v13060_v50 = vld [vmem:[%s17376_s1 + $0x1c8c] ss:$16 sps:$4 sm:$0xff]  }
 0x374   : >> { %6894 = vmatprep.subr.bf16.mxu0 %v12997_v17  ;;  %6935 = vmatprep.subr.bf16.mxu1 %v13000_v18  ;;  %v13055_v17 = vld [vmem:[%s17376_s1 + $0x1c80] ss:$16 sps:$4 sm:$0xff]   ;;  %v13058_v18 = vld [vmem:[%s17376_s1 + $0x1c88] ss:$16 sps:$4 sm:$0xff]  }
 0x377   : >> { %6895 = vmatpush2.bf16.msra.mxu0 %v12995_v38  ;;  %6936 = vmatpush2.bf16.msra.mxu1 %v12998_v39  ;;  %v13063_v38 = vld [vmem:[%s17376_s1 + $0x1c64] ss:$16 sps:$4 sm:$0xff]   ;;  %v13066_v39 = vld [vmem:[%s17376_s1 + $0x1c6c] ss:$16 sps:$4 sm:$0xff]  }
 0x378   : >> { %6896 = vmatprep.subr.bf16.mxu0 %v13003_v52  ;;  %6937 = vmatprep.subr.bf16.mxu1 %v13006_v53  ;;  %v13061_v52 = vld [vmem:[%s17376_s1 + $0x1c60] ss:$16 sps:$4 sm:$0xff]   ;;  %v13064_v53 = vld [vmem:[%s17376_s1 + $0x1c68] ss:$16 sps:$4 sm:$0xff]  }
 0x37b   : >> { %6897 = vmatpush2.bf16.msra.mxu0 %v13001_v19  ;;  %6938 = vmatpush2.bf16.msra.mxu1 %v13004_v59  ;;  %v13069_v19 = vld [vmem:[%s17376_s1 + $0x1c44] ss:$16 sps:$4 sm:$0xff]   ;;  %v13072_v59 = vld [vmem:[%s17376_s1 + $0x1c4c] ss:$16 sps:$4 sm:$0xff]  }
 0x37c   : >> { %6898 = vmatprep.subr.bf16.mxu0 %v13009_v41  ;;  %6939 = vmatprep.subr.bf16.mxu1 %v13012_v49  ;;  %v13067_v41 = vld [vmem:[%s17376_s1 + $0x1c40] ss:$16 sps:$4 sm:$0xff]   ;;  %v13070_v49 = vld [vmem:[%s17376_s1 + $0x1c48] ss:$16 sps:$4 sm:$0xff]  }
 0x37f   : >> { %6899 = vmatpush2.bf16.msra.mxu0 %v13007_v25  ;;  %6940 = vmatpush2.bf16.msra.mxu1 %v13010_v46  ;;  %v13075_v25 = vld [vmem:[%s17376_s1 + $0x1c24] ss:$16 sps:$4 sm:$0xff]   ;;  %v13078_v46 = vld [vmem:[%s17376_s1 + $0x1c2c] ss:$16 sps:$4 sm:$0xff]  }
 0x380   : >> { %6900 = vmatprep.subr.bf16.mxu0 %v13015_v51  ;;  %6941 = vmatprep.subr.bf16.mxu1 %v13018_v56  ;;  %v13073_v51 = vld [vmem:[%s17376_s1 + $0x1c20] ss:$16 sps:$4 sm:$0xff]   ;;  %v13076_v56 = vld [vmem:[%s17376_s1 + $0x1c28] ss:$16 sps:$4 sm:$0xff]  }
 0x383   : >> { %6901 = vmatpush2.bf16.msra.mxu0 %v13013_v60  ;;  %6942 = vmatpush2.bf16.msra.mxu1 %v13016_v37  ;;  %v13081_v60 = vld [vmem:[%s17376_s1 + $0x1c04] ss:$16 sps:$4 sm:$0xff]   ;;  %v13084_v37 = vld [vmem:[%s17376_s1 + $0x1c0c] ss:$16 sps:$4 sm:$0xff]  }
 0x384   : >> { %6902 = vmatprep.subr.bf16.mxu0 %v13021_v62  ;;  %6943 = vmatprep.subr.bf16.mxu1 %v13024_v0  ;;  %v13079_v62 = vld [vmem:[%s17376_s1 + $0x1c00] ss:$16 sps:$4 sm:$0xff]   ;;  %v13082_v0 = vld [vmem:[%s17376_s1 + $0x1c08] ss:$16 sps:$4 sm:$0xff]  }
 0x387   : >> { %6903 = vmatpush2.bf16.msra.mxu0 %v13019_v2  ;;  %6944 = vmatpush2.bf16.msra.mxu1 %v13022_v7  ;;  %v13087_v2 = vld [vmem:[%s17376_s1 + $0x1de4] ss:$16 sps:$4 sm:$0xff]   ;;  %v13090_v7 = vld [vmem:[%s17376_s1 + $0x1dec] ss:$16 sps:$4 sm:$0xff]  }
 0x388   : >> { %6904 = vmatprep.subr.bf16.mxu0 %v13027_v61  ;;  %6945 = vmatprep.subr.bf16.mxu1 %v13030_v11  ;;  %v13085_v61 = vld [vmem:[%s17376_s1 + $0x1de0] ss:$16 sps:$4 sm:$0xff]   ;;  %v13088_v11 = vld [vmem:[%s17376_s1 + $0x1de8] ss:$16 sps:$4 sm:$0xff]  }
 0x38b   : >> { %6905 = vmatpush2.bf16.msra.mxu0 %v13025_v43  ;;  %6946 = vmatpush2.bf16.msra.mxu1 %v13028_v5  ;;  %v13093_v43 = vld [vmem:[%s17376_s1 + $0x1dc4] ss:$16 sps:$4 sm:$0xff]   ;;  %v13096_v5 = vld [vmem:[%s17376_s1 + $0x1dcc] ss:$16 sps:$4 sm:$0xff]  }
 0x38c   : >> { %6906 = vmatprep.subr.bf16.mxu0 %v13033_v42  ;;  %6947 = vmatprep.subr.bf16.mxu1 %v13036_v6  ;;  %v13091_v42 = vld [vmem:[%s17376_s1 + $0x1dc0] ss:$16 sps:$4 sm:$0xff]   ;;  %v13094_v6 = vld [vmem:[%s17376_s1 + $0x1dc8] ss:$16 sps:$4 sm:$0xff]  }
 0x38f   : >> { %6907 = vmatpush2.bf16.msra.mxu0 %v13031_v14  ;;  %6948 = vmatpush2.bf16.msra.mxu1 %v13034_v40  ;;  %v13102_v14 = vld [vmem:[%s17376_s1 + $0x1dac] ss:$16 sps:$4 sm:$0xff]   ;;  %v13097_v40 = vld [vmem:[%s17376_s1 + $0x1da0] ss:$16 sps:$4 sm:$0xff]  }
 0x390   : >> { %7351 = vmatprep.subr.bf16.mxu0 %v13039_v44  ;;  %7392 = vmatprep.subr.bf16.mxu1 %v13042_v15  ;;  %v13100_v44 = vld [vmem:[%s17376_s1 + $0x1da8] ss:$16 sps:$4 sm:$0xff]   ;;  %v13105_v15 = vld [vmem:[%s17376_s1 + $0x1d84] ss:$16 sps:$4 sm:$0xff]  }
 0x392   : >> { %v5461_v23 = vpop.f32.mrf.mxu0  ;;  %v5502_v24 = vpop.f32.mrf.mxu1  ;;  %6909 = vmatmul.mubr.bf16.vlgmr.msra.gmra.mxu0 %v6546_v31  ;;  %6950 = vmatmul.mubr.bf16.vlgmr.msra.gmra.mxu1 %v6546_v31  ;;  %v13108_v31 = vld [vmem:[%s17376_s1 + $0x1d8c] ss:$16 sps:$4 sm:$0xff]  }
 0x393   : >> { %v16303_v30 = vadd.f32 %v5461_v23, %v16092_v16  ;;  %v16306_v57 = vadd.f32 %v5502_v24, %v16095_v35  ;;  %7352 = vmatpush1.bf16.msra.mxu0 %v13037_v13  ;;  %7393 = vmatpush1.bf16.msra.mxu1 %v13040_v20  ;;  %v13051_v16 = vld [vmem:[%s17376_s1 + $0x1ca4] ss:$16 sps:$4 sm:$0xff]   ;;  %v13054_v35 = vld [vmem:[%s17376_s1 + $0x1cac] ss:$16 sps:$4 sm:$0xff]   ;;  %v13103_v13 = vld [vmem:[%s17376_s1 + $0x1d80] ss:$16 sps:$4 sm:$0xff]  }
 0x394   : >> { %v5463_v29 = vpop.f32.mrf.mxu0  ;;  %v5504_v32 = vpop.f32.mrf.mxu1  ;;  %7353 = vmatprep.subr.bf16.mxu0 %v13045_v47  ;;  %7394 = vmatprep.subr.bf16.mxu1 %v13048_v48  ;;  %v13106_v20 = vld [vmem:[%s17376_s1 + $0x1d88] ss:$16 sps:$4 sm:$0xff]   ;;  %v13111_v47 = vld [vmem:[%s17376_s1 + $0x1d64] ss:$16 sps:$4 sm:$0xff]   ;;  %v13114_v48 = vld [vmem:[%s17376_s1 + $0x1d6c] ss:$16 sps:$4 sm:$0xff]  }
 0x395   : >> { %v16321_v33 = vadd.f32 %v5463_v29, %v16110_v4  ;;  %v16324_v34 = vadd.f32 %v5504_v32, %v16113_v63  ;;  %7383 = vmatprep.mubr.bf16.mxu0 %v7028_v22  ;;  %7424 = vmatprep.mubr.bf16.mxu1 %v7028_v22  ;;  %v13057_v63 = vld [vmem:[%s17376_s1 + $0x1c84] ss:$16 sps:$4 sm:$0xff]   ;;  %v13109_v22 = vld [vmem:[%s17376_s1 + $0x1d60] ss:$16 sps:$4 sm:$0xff]   ;;  %v13112_v23 = vld [vmem:[%s17376_s1 + $0x1d68] ss:$16 sps:$4 sm:$0xff]  }
 0x396   : >> { %v5465_v27 = vpop.f32.mrf.mxu0  ;;  %v5506_v36 = vpop.f32.mrf.mxu1  ;;  %v13117_v24 = vld [vmem:[%s17376_s1 + $0x1d44] ss:$16 sps:$4 sm:$0xff]   ;;  %v13118_v29 = vld [vmem:[%s17376_s1 + $0x1d48] ss:$16 sps:$4 sm:$0xff]  }
 0x397   : >> { %7354 = vmatpush1.bf16.msra.mxu0 %v13043_v58  ;;  %7395 = vmatpush1.bf16.msra.mxu1 %v13046_v28  ;;  %v13120_v58 = vld [vmem:[%s17376_s1 + $0x1d4c] ss:$16 sps:$4 sm:$0xff]   ;;  %v13115_v28 = vld [vmem:[%s17376_s1 + $0x1d40] ss:$16 sps:$4 sm:$0xff]   ;;  %v13123_v32 = vld [vmem:[%s17376_s1 + $0x1d24] ss:$16 sps:$4 sm:$0xff]  }
 0x398   : >> { %v5466_v54 = vpop.f32.mrf.mxu0  ;;  %v5507_v4 = vpop.f32.mrf.mxu1  ;;  %7355 = vmatprep.subr.bf16.mxu0 %v13051_v16  ;;  %7396 = vmatprep.subr.bf16.mxu1 %v13054_v35  ;;  %v13126_v16 = vld [vmem:[%s17376_s1 + $0x1d2c] ss:$16 sps:$4 sm:$0xff]   ;;  %v13121_v35 = vld [vmem:[%s17376_s1 + $0x1d20] ss:$16 sps:$4 sm:$0xff]   ;;  %v13124_v27 = vld [vmem:[%s17376_s1 + $0x1d28] ss:$16 sps:$4 sm:$0xff]  }
 0x399   : >> { %v13129_v36 = vld [vmem:[%s17376_s1 + $0x1d04] ss:$16 sps:$4 sm:$0xff]   ;;  %v13130_v54 = vld [vmem:[%s17376_s1 + $0x1d08] ss:$16 sps:$4 sm:$0xff]  }
 0x39a   : >> { %v13135_v4 = vld [vmem:[%s17376_s1 + $0x1ee4] ss:$16 sps:$4 sm:$0xff]  }
 0x39b   : >> { %7356 = vmatpush1.bf16.msra.mxu0 %v13049_v10  ;;  %7397 = vmatpush1.bf16.msra.mxu1 %v13052_v3  ;;  %v13132_v10 = vld [vmem:[%s17376_s1 + $0x1d0c] ss:$16 sps:$4 sm:$0xff]   ;;  %v13127_v3 = vld [vmem:[%s17376_s1 + $0x1d00] ss:$16 sps:$4 sm:$0xff]  }
 0x39c   : >> { %7357 = vmatprep.subr.bf16.mxu0 %v13057_v63  ;;  %7398 = vmatprep.subr.bf16.mxu1 %v13060_v50  ;;  %v13138_v63 = vld [vmem:[%s17376_s1 + $0x1eec] ss:$16 sps:$4 sm:$0xff]   ;;  %v7505_v50 = vrot.slane %v6548_v45, 1  ;;  %v13141_v45 = vld [vmem:[%s17376_s1 + $0x1ec4] ss:$16 sps:$4 sm:$0xff]  }
 0x39f   : >> { %7358 = vmatpush1.bf16.msra.mxu0 %v13055_v17  ;;  %7399 = vmatpush1.bf16.msra.mxu1 %v13058_v18  ;;  %v7506_v17 = vrot.slane %v6550_v21, 2  ;;  %v7027_v18 = vrot.slane %v16073_v26, 1 }
 0x3a0   : >> { %7359 = vmatprep.subr.bf16.mxu0 %v13063_v38  ;;  %7400 = vmatprep.subr.bf16.mxu1 %v13066_v39  ;;  %v13133_v38 = vld [vmem:[%s17376_s1 + $0x1ee0] ss:$16 sps:$4 sm:$0xff]   ;;  %v13136_v39 = vld [vmem:[%s17376_s1 + $0x1ee8] ss:$16 sps:$4 sm:$0xff]  }
 0x3a1   : >> { %v7507_v21 = vor.u32 %v7506_v17, %v7505_v50  ;;  %v13199_v50 = vld [vmem:[%s17376_s1 + $0x1f80] ss:$16 sps:$4 sm:$0xff]   ;;  %v13202_v17 = vld [vmem:[%s17376_s1 + $0x1f88] ss:$16 sps:$4 sm:$0xff]  }
 0x3a3   : >> { %7360 = vmatpush1.bf16.msra.mxu0 %v13061_v52  ;;  %7401 = vmatpush1.bf16.msra.mxu1 %v13064_v53 }
 0x3a4   : >> { %7361 = vmatprep.subr.bf16.mxu0 %v13069_v19  ;;  %7402 = vmatprep.subr.bf16.mxu1 %v13072_v59 }
 0x3a7   : >> { %7362 = vmatpush1.bf16.msra.mxu0 %v13067_v41  ;;  %7403 = vmatpush1.bf16.msra.mxu1 %v13070_v49  ;;  %v13139_v41 = vld [vmem:[%s17376_s1 + $0x1ec0] ss:$16 sps:$4 sm:$0xff]   ;;  %v13142_v49 = vld [vmem:[%s17376_s1 + $0x1ec8] ss:$16 sps:$4 sm:$0xff]  }
 0x3a8   : >> { %7363 = vmatprep.subr.bf16.mxu0 %v13075_v25  ;;  %7404 = vmatprep.subr.bf16.mxu1 %v13078_v46 }
 0x3ab   : >> { %7364 = vmatpush1.bf16.msra.mxu0 %v13073_v51  ;;  %7405 = vmatpush1.bf16.msra.mxu1 %v13076_v56 }
 0x3ac   : >> { %7365 = vmatprep.subr.bf16.mxu0 %v13081_v60  ;;  %7406 = vmatprep.subr.bf16.mxu1 %v13084_v37 }
 0x3af   : >> { %7366 = vmatpush1.bf16.msra.mxu0 %v13079_v62  ;;  %7407 = vmatpush1.bf16.msra.mxu1 %v13082_v0  ;;  %v13145_v62 = vld [vmem:[%s17376_s1 + $0x1ea0] ss:$16 sps:$4 sm:$0xff]   ;;  %v13148_v0 = vld [vmem:[%s17376_s1 + $0x1ea8] ss:$16 sps:$4 sm:$0xff]  }
 0x3b0   : >> { %7367 = vmatprep.subr.bf16.mxu0 %v13087_v2  ;;  %7408 = vmatprep.subr.bf16.mxu1 %v13090_v7  ;;  %v13156_v7 = vld [vmem:[%s17376_s1 + $0x1e8c] ss:$16 sps:$4 sm:$0xff]  }
 0x3b3   : >> { %7368 = vmatpush2.bf16.msra.mxu0 %v13085_v61  ;;  %7409 = vmatpush2.bf16.msra.mxu1 %v13088_v11  ;;  %v13151_v61 = vld [vmem:[%s17376_s1 + $0x1e80] ss:$16 sps:$4 sm:$0xff]   ;;  %v13154_v11 = vld [vmem:[%s17376_s1 + $0x1e88] ss:$16 sps:$4 sm:$0xff]  }
 0x3b4   : >> { %7369 = vmatprep.subr.bf16.mxu0 %v13093_v43  ;;  %7410 = vmatprep.subr.bf16.mxu1 %v13096_v5  ;;  %v13159_v43 = vld [vmem:[%s17376_s1 + $0x1e64] ss:$16 sps:$4 sm:$0xff]   ;;  %v13162_v5 = vld [vmem:[%s17376_s1 + $0x1e6c] ss:$16 sps:$4 sm:$0xff]  }
 0x3b7   : >> { %7370 = vmatpush2.bf16.msra.mxu0 %v13091_v42  ;;  %7411 = vmatpush2.bf16.msra.mxu1 %v13094_v6  ;;  %v13157_v42 = vld [vmem:[%s17376_s1 + $0x1e60] ss:$16 sps:$4 sm:$0xff]   ;;  %v13160_v6 = vld [vmem:[%s17376_s1 + $0x1e68] ss:$16 sps:$4 sm:$0xff]  }
 0x3b8   : >> { %7371 = vmatprep.subr.bf16.mxu0 %v13099_v12  ;;  %7412 = vmatprep.subr.bf16.mxu1 %v13102_v14  ;;  %v13165_v12 = vld [vmem:[%s17376_s1 + $0x1e44] ss:$16 sps:$4 sm:$0xff]   ;;  %v13168_v14 = vld [vmem:[%s17376_s1 + $0x1e4c] ss:$16 sps:$4 sm:$0xff]  }
 0x3bb   : >> { %7372 = vmatpush2.bf16.msra.mxu0 %v13097_v40  ;;  %7413 = vmatpush2.bf16.msra.mxu1 %v13100_v44  ;;  %v13163_v40 = vld [vmem:[%s17376_s1 + $0x1e40] ss:$16 sps:$4 sm:$0xff]   ;;  %v13166_v44 = vld [vmem:[%s17376_s1 + $0x1e48] ss:$16 sps:$4 sm:$0xff]  }
 0x3bc   : >> { %7373 = vmatprep.subr.bf16.mxu0 %v13105_v15  ;;  %7414 = vmatprep.subr.bf16.mxu1 %v13108_v31  ;;  %v13171_v15 = vld [vmem:[%s17376_s1 + $0x1e24] ss:$16 sps:$4 sm:$0xff]   ;;  %v13174_v31 = vld [vmem:[%s17376_s1 + $0x1e2c] ss:$16 sps:$4 sm:$0xff]  }
 0x3bf   : >> { %7374 = vmatpush2.bf16.msra.mxu0 %v13103_v13  ;;  %7415 = vmatpush2.bf16.msra.mxu1 %v13106_v20  ;;  %v13169_v13 = vld [vmem:[%s17376_s1 + $0x1e20] ss:$16 sps:$4 sm:$0xff]   ;;  %v13172_v20 = vld [vmem:[%s17376_s1 + $0x1e28] ss:$16 sps:$4 sm:$0xff]  }
 0x3c0   : >> { %7375 = vmatprep.subr.bf16.mxu0 %v13111_v47  ;;  %7416 = vmatprep.subr.bf16.mxu1 %v13114_v48  ;;  %v13177_v47 = vld [vmem:[%s17376_s1 + $0x1e04] ss:$16 sps:$4 sm:$0xff]   ;;  %v13180_v48 = vld [vmem:[%s17376_s1 + $0x1e0c] ss:$16 sps:$4 sm:$0xff]  }
 0x3c3   : >> { %7376 = vmatpush2.bf16.msra.mxu0 %v13109_v22  ;;  %7417 = vmatpush2.bf16.msra.mxu1 %v13112_v23  ;;  %v13175_v22 = vld [vmem:[%s17376_s1 + $0x1e00] ss:$16 sps:$4 sm:$0xff]   ;;  %v13178_v23 = vld [vmem:[%s17376_s1 + $0x1e08] ss:$16 sps:$4 sm:$0xff]  }
 0x3c4   : >> { %7377 = vmatprep.subr.bf16.mxu0 %v13117_v24  ;;  %7418 = vmatprep.subr.bf16.mxu1 %v13120_v58  ;;  %v13183_v24 = vld [vmem:[%s17376_s1 + $0x1fe4] ss:$16 sps:$4 sm:$0xff]   ;;  %v13186_v58 = vld [vmem:[%s17376_s1 + $0x1fec] ss:$16 sps:$4 sm:$0xff]  }
 0x3c7   : >> { %7378 = vmatpush2.bf16.msra.mxu0 %v13115_v28  ;;  %7419 = vmatpush2.bf16.msra.mxu1 %v13118_v29  ;;  %v13181_v28 = vld [vmem:[%s17376_s1 + $0x1fe0] ss:$16 sps:$4 sm:$0xff]   ;;  %v13184_v29 = vld [vmem:[%s17376_s1 + $0x1fe8] ss:$16 sps:$4 sm:$0xff]  }
 0x3c8   : >> { %7379 = vmatprep.subr.bf16.mxu0 %v13123_v32  ;;  %7420 = vmatprep.subr.bf16.mxu1 %v13126_v16  ;;  %v13189_v32 = vld [vmem:[%s17376_s1 + $0x1fc4] ss:$16 sps:$4 sm:$0xff]   ;;  %v13192_v16 = vld [vmem:[%s17376_s1 + $0x1fcc] ss:$16 sps:$4 sm:$0xff]  }
 0x3cb   : >> { %7380 = vmatpush2.bf16.msra.mxu0 %v13121_v35  ;;  %7421 = vmatpush2.bf16.msra.mxu1 %v13124_v27  ;;  %v13187_v35 = vld [vmem:[%s17376_s1 + $0x1fc0] ss:$16 sps:$4 sm:$0xff]   ;;  %v13190_v27 = vld [vmem:[%s17376_s1 + $0x1fc8] ss:$16 sps:$4 sm:$0xff]  }
 0x3cc   : >> { %7381 = vmatprep.subr.bf16.mxu0 %v13129_v36  ;;  %7422 = vmatprep.subr.bf16.mxu1 %v13132_v10  ;;  %v13195_v36 = vld [vmem:[%s17376_s1 + $0x1fa4] ss:$16 sps:$4 sm:$0xff]   ;;  %v13198_v10 = vld [vmem:[%s17376_s1 + $0x1fac] ss:$16 sps:$4 sm:$0xff]  }
 0x3cf   : >> { %7382 = vmatpush2.bf16.msra.mxu0 %v13127_v3  ;;  %7423 = vmatpush2.bf16.msra.mxu1 %v13130_v54  ;;  %v13193_v3 = vld [vmem:[%s17376_s1 + $0x1fa0] ss:$16 sps:$4 sm:$0xff]   ;;  %v13196_v54 = vld [vmem:[%s17376_s1 + $0x1fa8] ss:$16 sps:$4 sm:$0xff]  }
 0x3d0   : >> { %7830 = vmatprep.subr.bf16.mxu0 %v13135_v4  ;;  %7871 = vmatprep.subr.bf16.mxu1 %v13138_v63  ;;  %v13201_v4 = vld [vmem:[%s17376_s1 + $0x1f84] ss:$16 sps:$4 sm:$0xff]   ;;  %v13204_v63 = vld [vmem:[%s17376_s1 + $0x1f8c] ss:$16 sps:$4 sm:$0xff]  }
 0x3d2   : >> { %v5940_v52 = vpop.f32.mrf.mxu0  ;;  %v5981_v53 = vpop.f32.mrf.mxu1  ;;  %7384 = vmatmul.mubr.bf16.vlgmr.msra.gmra.mxu0 %v7027_v18  ;;  %7425 = vmatmul.mubr.bf16.vlgmr.msra.gmra.mxu1 %v7027_v18  ;;  %v13207_v18 = vld [vmem:[%s17376_s1 + $0x1f64] ss:$16 sps:$4 sm:$0xff]  }
 0x3d3   : >> { %v16512_v19 = vadd.f32 %v5940_v52, %v16303_v30  ;;  %v16515_v59 = vadd.f32 %v5981_v53, %v16306_v57  ;;  %7831 = vmatpush1.bf16.msra.mxu0 %v13133_v38  ;;  %7872 = vmatpush1.bf16.msra.mxu1 %v13136_v39  ;;  %v13147_v30 = vld [vmem:[%s17376_s1 + $0x1ea4] ss:$16 sps:$4 sm:$0xff]   ;;  %v13150_v57 = vld [vmem:[%s17376_s1 + $0x1eac] ss:$16 sps:$4 sm:$0xff]   ;;  %v13205_v39 = vld [vmem:[%s17376_s1 + $0x1f60] ss:$16 sps:$4 sm:$0xff]  }
 0x3d4   : >> { %v5942_v25 = vpop.f32.mrf.mxu0  ;;  %v5983_v46 = vpop.f32.mrf.mxu1  ;;  %7832 = vmatprep.subr.bf16.mxu0 %v13141_v45  ;;  %7873 = vmatprep.subr.bf16.mxu1 %v13144_v55  ;;  %v13210_v38 = vld [vmem:[%s17376_s1 + $0x1f6c] ss:$16 sps:$4 sm:$0xff]   ;;  %v13208_v45 = vld [vmem:[%s17376_s1 + $0x1f68] ss:$16 sps:$4 sm:$0xff]   ;;  %v13213_v55 = vld [vmem:[%s17376_s1 + $0x1f44] ss:$16 sps:$4 sm:$0xff]  }
 0x3d5   : >> { %v16530_v51 = vadd.f32 %v5942_v25, %v16321_v33  ;;  %v16533_v56 = vadd.f32 %v5983_v46, %v16324_v34  ;;  %7862 = vmatprep.mubr.bf16.mxu0 %v7507_v21  ;;  %7903 = vmatprep.mubr.bf16.mxu1 %v7507_v21  ;;  %v13153_v34 = vld [vmem:[%s17376_s1 + $0x1e84] ss:$16 sps:$4 sm:$0xff]   ;;  %v13216_v21 = vld [vmem:[%s17376_s1 + $0x1f4c] ss:$16 sps:$4 sm:$0xff]   ;;  %v13211_v52 = vld [vmem:[%s17376_s1 + $0x1f40] ss:$16 sps:$4 sm:$0xff]  }
 0x3d6   : >> { %v5944_v60 = vpop.f32.mrf.mxu0  ;;  %v5985_v37 = vpop.f32.mrf.mxu1  ;;  %v13214_v53 = vld [vmem:[%s17376_s1 + $0x1f48] ss:$16 sps:$4 sm:$0xff]   ;;  %v13217_v25 = vld [vmem:[%s17376_s1 + $0x1f20] ss:$16 sps:$4 sm:$0xff]  }
 0x3d7   : >> { %7833 = vmatpush1.bf16.msra.mxu0 %v13139_v41  ;;  %7874 = vmatpush1.bf16.msra.mxu1 %v13142_v49  ;;  %v13219_v41 = vld [vmem:[%s17376_s1 + $0x1f24] ss:$16 sps:$4 sm:$0xff]   ;;  %v13222_v49 = vld [vmem:[%s17376_s1 + $0x1f2c] ss:$16 sps:$4 sm:$0xff]   ;;  %v13220_v46 = vld [vmem:[%s17376_s1 + $0x1f28] ss:$16 sps:$4 sm:$0xff]  }
 0x3d8   : >> { %v5945_v2 = vpop.f32.mrf.mxu0  ;;  %v5986_v33 = vpop.f32.mrf.mxu1  ;;  %7834 = vmatprep.subr.bf16.mxu0 %v13147_v30  ;;  %7875 = vmatprep.subr.bf16.mxu1 %v13150_v57  ;;  %v13225_v30 = vld [vmem:[%s17376_s1 + $0x1f04] ss:$16 sps:$4 sm:$0xff]   ;;  %v13228_v57 = vld [vmem:[%s17376_s1 + $0x1f0c] ss:$16 sps:$4 sm:$0xff]   ;;  %v7502_v60 = vrot.slane %v6541_v9, 1  ;;  %v7503_v37 = vrot.slane %v6543_v8, 2 }
 0x3da   : >> { %v7504_v2 = vor.u32 %v7503_v37, %v7502_v60 }
 0x3db   : >> { %7835 = vmatpush1.bf16.msra.mxu0 %v13145_v62  ;;  %7876 = vmatpush1.bf16.msra.mxu1 %v13148_v0  ;;  %v13223_v62 = vld [vmem:[%s17376_s1 + $0x1f00] ss:$16 sps:$4 sm:$0xff]   ;;  %v13226_v0 = vld [vmem:[%s17376_s1 + $0x1f08] ss:$16 sps:$4 sm:$0xff]  }
 0x3dc   : >> { %7836 = vmatprep.subr.bf16.mxu0 %v13153_v34  ;;  %7877 = vmatprep.subr.bf16.mxu1 %v13156_v7 }
 0x3df   : >> { %7837 = vmatpush1.bf16.msra.mxu0 %v13151_v61  ;;  %7878 = vmatpush1.bf16.msra.mxu1 %v13154_v11 }
 0x3e0   : >> { %7838 = vmatprep.subr.bf16.mxu0 %v13159_v43  ;;  %7879 = vmatprep.subr.bf16.mxu1 %v13162_v5 }
 0x3e3   : >> { %7839 = vmatpush1.bf16.msra.mxu0 %v13157_v42  ;;  %7880 = vmatpush1.bf16.msra.mxu1 %v13160_v6 }
 0x3e4   : >> { %7840 = vmatprep.subr.bf16.mxu0 %v13165_v12  ;;  %7881 = vmatprep.subr.bf16.mxu1 %v13168_v14 }
 0x3e7   : >> { %7841 = vmatpush1.bf16.msra.mxu0 %v13163_v40  ;;  %7882 = vmatpush1.bf16.msra.mxu1 %v13166_v44 }
 0x3e8   : >> { %7842 = vmatprep.subr.bf16.mxu0 %v13171_v15  ;;  %7883 = vmatprep.subr.bf16.mxu1 %v13174_v31 }
 0x3eb   : >> { %7843 = vmatpush1.bf16.msra.mxu0 %v13169_v13  ;;  %7884 = vmatpush1.bf16.msra.mxu1 %v13172_v20 }
 0x3ec   : >> { %7844 = vmatprep.subr.bf16.mxu0 %v13177_v47  ;;  %7885 = vmatprep.subr.bf16.mxu1 %v13180_v48 }
 0x3ef   : >> { %7845 = vmatpush1.bf16.msra.mxu0 %v13175_v22  ;;  %7886 = vmatpush1.bf16.msra.mxu1 %v13178_v23 }
 0x3f0   : >> { %7846 = vmatprep.subr.bf16.mxu0 %v13183_v24  ;;  %7887 = vmatprep.subr.bf16.mxu1 %v13186_v58 }
 0x3f3   : >> { %7847 = vmatpush2.bf16.msra.mxu0 %v13181_v28  ;;  %7888 = vmatpush2.bf16.msra.mxu1 %v13184_v29 }
 0x3f4   : >> { %7848 = vmatprep.subr.bf16.mxu0 %v13189_v32  ;;  %7889 = vmatprep.subr.bf16.mxu1 %v13192_v16 }
 0x3f7   : >> { %7849 = vmatpush2.bf16.msra.mxu0 %v13187_v35  ;;  %7890 = vmatpush2.bf16.msra.mxu1 %v13190_v27  ;;  %v7917_v35 = vlaneseq }
 0x3f8   : >> { %7850 = vmatprep.subr.bf16.mxu0 %v13195_v36  ;;  %7891 = vmatprep.subr.bf16.mxu1 %v13198_v10 }
 0x3f9   : >> { %v16705_v27 = vshrl.u32 %v7917_v35, 7 }
 0x3fb   : >> { %7851 = vmatpush2.bf16.msra.mxu0 %v13193_v3  ;;  %7892 = vmatpush2.bf16.msra.mxu1 %v13196_v54  ;;  %v16708_v36 = vsub.s32 0, %v16705_v27  ;;  %v16711_v10 = vsub.s32 2, %v16705_v27  ;;  %v16714_v3 = vsub.s32 1, %v16705_v27  ;;  %v16717_v54 = vsub.s32 3, %v16705_v27 }
 0x3fc   : >> { %7852 = vmatprep.subr.bf16.mxu0 %v13201_v4  ;;  %7893 = vmatprep.subr.bf16.mxu1 %v13204_v63 }
 0x3fd   : >> { %v7920_v63 = vrot.slane %v13324_v1, %v16708_v36 }
 0x3ff   : >> { %7853 = vmatpush2.bf16.msra.mxu0 %v13199_v50  ;;  %7894 = vmatpush2.bf16.msra.mxu1 %v13202_v17  ;;  %v7928_v17 = vrot.slane %v13324_v1, %v16711_v10 }
 0x400   : >> { %7854 = vmatprep.subr.bf16.mxu0 %v13207_v18  ;;  %7895 = vmatprep.subr.bf16.mxu1 %v13210_v38  ;;  %v7924_v18 = vrot.slane %v13324_v1, %v16714_v3  ;;  %v7932_v38 = vrot.slane %v13324_v1, %v16717_v54 }
 0x403   : >> { %7855 = vmatpush2.bf16.msra.mxu0 %v13205_v39  ;;  %7896 = vmatpush2.bf16.msra.mxu1 %v13208_v45 }
 0x404   : >> { %7856 = vmatprep.subr.bf16.mxu0 %v13213_v55  ;;  %7897 = vmatprep.subr.bf16.mxu1 %v13216_v21 }
 0x407   : >> { %7857 = vmatpush2.bf16.msra.mxu0 %v13211_v52  ;;  %7898 = vmatpush2.bf16.msra.mxu1 %v13214_v53 }
 0x408   : >> { %7858 = vmatprep.subr.bf16.mxu0 %v13219_v41  ;;  %7899 = vmatprep.subr.bf16.mxu1 %v13222_v49 }
 0x40b   : >> { %7859 = vmatpush2.bf16.msra.mxu0 %v13217_v25  ;;  %7900 = vmatpush2.bf16.msra.mxu1 %v13220_v46 }
 0x40c   : >> { %7860 = vmatprep.subr.bf16.mxu0 %v13225_v30  ;;  %7901 = vmatprep.subr.bf16.mxu1 %v13228_v57 }
 0x40f   : >> { %7861 = vmatpush2.bf16.msra.mxu0 %v13223_v62  ;;  %7902 = vmatpush2.bf16.msra.mxu1 %v13226_v0 }
 0x412   : >> { %v6423_v33 = vpop.f32.mrf.mxu0  ;;  %v6464_v9 = vpop.f32.mrf.mxu1  ;;  %7863 = vmatmul.mubr.bf16.vlgmr.msra.gmra.mxu0 %v7504_v2  ;;  %7904 = vmatmul.mubr.bf16.vlgmr.msra.gmra.mxu1 %v7504_v2 }
 0x413   : >> { %v6471_v26 = vadd.f32 %v6423_v33, %v16512_v19  ;;  %v6473_v8 = vadd.f32 %v6464_v9, %v16515_v59 }
 0x414   : >> { %v6425_v34 = vpop.f32.mrf.mxu0  ;;  %v6466_v7 = vpop.f32.mrf.mxu1 }
 0x415   : >> { %v6472_v61 = vadd.f32 %v6425_v34, %v16530_v51  ;;  %v6474_v11 = vadd.f32 %v6466_v7, %v16533_v56 }
 0x416   : >> { %v6427_v43 = vpop.f32.mrf.mxu0  ;;  %v6468_v5 = vpop.f32.mrf.mxu1 }
 0x418   : >> { %v6428_v42 = vpop.f32.mrf.mxu0  ;;  %v6469_v6 = vpop.f32.mrf.mxu1 }
 0x452   : >> { %v6910_v12 = vpop.f32.mrf.mxu0  ;;  %v6951_v14 = vpop.f32.mrf.mxu1 }
 0x453   : >> { %v6958_v40 = vadd.f32 %v6910_v12, %v6471_v26  ;;  %v6960_v44 = vadd.f32 %v6951_v14, %v6473_v8 }
 0x454   : >> { %v6912_v15 = vpop.f32.mrf.mxu0  ;;  %v6953_v31 = vpop.f32.mrf.mxu1 }
 0x455   : >> { %v6959_v13 = vadd.f32 %v6912_v15, %v6472_v61  ;;  %v6961_v19 = vadd.f32 %v6953_v31, %v6474_v11 }
 0x456   : >> { %v6914_v20 = vpop.f32.mrf.mxu0  ;;  %v6955_v59 = vpop.f32.mrf.mxu1 }
 0x458   : >> { %v6915_v47 = vpop.f32.mrf.mxu0  ;;  %v6956_v48 = vpop.f32.mrf.mxu1 }
 0x492   : >> { %v7385_v22 = vpop.f32.mrf.mxu0  ;;  %v7426_v51 = vpop.f32.mrf.mxu1 }
 0x493   : >> { %v7433_v23 = vadd.f32 %v7385_v22, %v6958_v40  ;;  %v7435_v56 = vadd.f32 %v7426_v51, %v6960_v44 }
 0x494   : >> { %v7387_v24 = vpop.f32.mrf.mxu0  ;;  %v7428_v58 = vpop.f32.mrf.mxu1 }
 0x495   : >> { %v7434_v39 = vadd.f32 %v7387_v24, %v6959_v13  ;;  %v7436_v45 = vadd.f32 %v7428_v58, %v6961_v19 }
 0x496   : >> { %v7389_v28 = vpop.f32.mrf.mxu0  ;;  %v7430_v29 = vpop.f32.mrf.mxu1 }
 0x498   : >> { %v7390_v32 = vpop.f32.mrf.mxu0  ;;  %v7431_v16 = vpop.f32.mrf.mxu1 }
 0x4d2   : >> { %v7864_v4 = vpop.f32.mrf.mxu0  ;;  %v7905_v50 = vpop.f32.mrf.mxu1 }
 0x4d3   : >> { %v7912_v55 = vadd.f32 %v7864_v4, %v7433_v23  ;;  %v7914_v21 = vadd.f32 %v7905_v50, %v7435_v56 }
 0x4d4   : >> { %v7866_v52 = vpop.f32.mrf.mxu0  ;;  %v7907_v53 = vpop.f32.mrf.mxu1 }
 0x4d5   : >> { %v7913_v41 = vadd.f32 %v7866_v52, %v7434_v39  ;;  %v7915_v49 = vadd.f32 %v7907_v53, %v7436_v45  ;;  %v7937_v30 = vadd.f32 %v7920_v63, %v7912_v55  ;;  %v7939_v57 = vadd.f32 %v7928_v17, %v7914_v21 }
 0x4d6   : >> { %v7868_v25 = vpop.f32.mrf.mxu0  ;;  %v7909_v46 = vpop.f32.mrf.mxu1 }
 0x4d7   : >> { %v7938_v60 = vadd.f32 %v7924_v18, %v7913_v41  ;;  %v7940_v37 = vadd.f32 %v7932_v38, %v7915_v49  ;;  %228 = sbr.rel (!%p226_p4) target bundleno = 17 (0x11), region = 121 }
 0x4d8   : >> { %v7869_v62 = vpop.f32.mrf.mxu0  ;;  %v7910_v0 = vpop.f32.mrf.mxu1 }
 0x4d9   : >> { %v7945_v2 = vcombine.low %v7937_v30, %v7938_v60  ;;  %v7946_v33 = vcombine.low %v7939_v57, %v7940_v37 }
 0x4db   : >> { %7952 = vst [vmem:[%s7951_s8] sm:$0x77] %v7945_v2  ;;  %7953 = vst [vmem:[%s7951_s8 + $0x8] sm:$0x77] %v7946_v33 }
 0x4e2   : > { %v16731_v9 = vld [vmem:[#allocation2] sm:$0x77]  ;;  %v16733_v26 = vld [vmem:[#allocation2 + $0x8] sm:$0x77]  ;;  %v16735_v8 = vld [vmem:[#allocation2 + $0x10] sm:$0x77] }
 0x4e3   : > { %v16737_v34 = vld [vmem:[#allocation2 + $0x18] sm:$0x77]  ;;  %v16739_v7 = vld [vmem:[#allocation2 + $0x20] sm:$0x77]  ;;  %v16741_v61 = vld [vmem:[#allocation2 + $0x28] sm:$0x77]  ;;  %v7966_v11 = vcombine.high %v16731_v9, %v16731_v9  ;;  %v7967_v43 = vcombine.high %v16733_v26, %v16733_v26  ;;  %v7968_v1 = vcombine.high %v16735_v8, %v16735_v8 }
 0x4e4   : > { %v7969_v5 = vcombine.high %v16737_v34, %v16737_v34  ;;  %v7970_v42 = vcombine.high %v16739_v7, %v16739_v7  ;;  %v7971_v6 = vcombine.high %v16741_v61, %v16741_v61  ;;  %v7979_v12 = vsel %vm7978_vm0, %v16731_v9, 0.0 }
 0x4e5   : > { %v7980_v14 = vsel %vm7978_vm0, %v16735_v8, 0.0  ;;  %v7982_v40 = vsel %vm7978_vm0, %v16739_v7, 0.0  ;;  %v7984_v44 = vsel %vm7978_vm0, %v7966_v11, 0.0  ;;  %v7985_v31 = vsel %vm7978_vm0, %v7968_v1, 0.0 }
 0x4e6   : > { %v7981_v15 = vadd.f32 %v7980_v14, %v7979_v12  ;;  %v7987_v13 = vsel %vm7978_vm0, %v7970_v42, 0.0  ;;  %v7989_v19 = vsel %vm7978_vm0, %v16733_v26, 0.0  ;;  %v7986_v20 = vadd.f32 %v7985_v31, %v7984_v44 }
 0x4e7   : > { %v7990_v59 = vsel %vm7978_vm0, %v16737_v34, 0.0  ;;  %v7992_v47 = vsel %vm7978_vm0, %v16741_v61, 0.0  ;;  %v7994_v48 = vsel %vm7978_vm0, %v7967_v43, 0.0  ;;  %v7995_v23 = vsel %vm7978_vm0, %v7969_v5, 0.0 }
 0x4e8   : > { %v7983_v22 = vadd.f32 %v7982_v40, %v7981_v15  ;;  %v7991_v51 = vadd.f32 %v7990_v59, %v7989_v19  ;;  %v7997_v56 = vsel %vm7978_vm0, %v7971_v6, 0.0  ;;  %v7988_v24 = vadd.f32 %v7987_v13, %v7986_v20 }
 0x4e9   : > { %v7996_v58 = vadd.f32 %v7995_v23, %v7994_v48 }
 0x4ea   : > { %v7993_v28 = vadd.f32 %v7992_v47, %v7991_v51  ;;  %v7999_v29 = vsel %vm7978_vm0, %v7983_v22, 0.0  ;;  %v8006_v35 = vsel %vm7978_vm0, %v7988_v24, 0.0 }
 0x4eb   : > { %v7998_v32 = vadd.f32 %v7997_v56, %v7996_v58  ;;  %v8000_v16 = vrot.slane %v7999_v29, 4  ;;  %v8007_v4 = vrot.slane %v8006_v35, 4 }
 0x4ec   : > { %v8013_v63 = vsel %vm7978_vm0, %v7993_v28, 0.0 }
 0x4ed   : > { %v8001_v50 = vadd.f32 %v8000_v16, %v7999_v29  ;;  %v8014_v17 = vrot.slane %v8013_v63, 4  ;;  %v8020_v18 = vsel %vm7978_vm0, %v7998_v32, 0.0  ;;  %v8008_v38 = vadd.f32 %v8007_v4, %v8006_v35 }
 0x4ee   : > { %v8021_v39 = vrot.slane %v8020_v18, 4 }
 0x4ef   : > { %v8002_v45 = vrot.slane %v8001_v50, 2  ;;  %v8015_v55 = vadd.f32 %v8014_v17, %v8013_v63  ;;  %v8009_v21 = vrot.slane %v8008_v38, 2 }
 0x4f0   : > { %v8022_v52 = vadd.f32 %v8021_v39, %v8020_v18 }
 0x4f1   : > { %v8003_v53 = vadd.f32 %v8002_v45, %v8001_v50  ;;  %v8016_v41 = vrot.slane %v8015_v55, 2  ;;  %v8010_v49 = vadd.f32 %v8009_v21, %v8008_v38 }
 0x4f2   : > { %v8023_v25 = vrot.slane %v8022_v52, 2 }
 0x4f3   : > { %v8004_v46 = vrot.slane %v8003_v53, 1  ;;  %v8017_v30 = vadd.f32 %v8016_v41, %v8015_v55  ;;  %v8011_v57 = vrot.slane %v8010_v49, 1 }
 0x4f4   : > { %v8024_v60 = vadd.f32 %v8023_v25, %v8022_v52 }
 0x4f5   : > { %v8005_v37 = vadd.f32 %v8004_v46, %v8003_v53  ;;  %v8018_v62 = vrot.slane %v8017_v30, 1  ;;  %v8012_v0 = vadd.f32 %v8011_v57, %v8010_v49 }
 0x4f6   : > { %v8025_v2 = vrot.slane %v8024_v60, 1 }
 0x4f7   : > { %v8019_v33 = vadd.f32 %v8018_v62, %v8017_v30  ;;  %v8027_v11 = vmul.f32 0.11111111, %v8005_v37  ;;  %v8028_v1 = vmul.f32 0.11111111, %v8012_v0 }
 0x4f8   : > { %v8026_v43 = vadd.f32 %v8025_v2, %v8024_v60 }
 0x4f9   : > { %v8029_v5 = vmul.f32 0.11111111, %v8019_v33  ;;  %v8035_v6 = vcombine.low %v8027_v11, %v8028_v1 }
 0x4fa   : > { %v8030_v42 = vmul.f32 0.11111111, %v8026_v43 }
 0x4fb   : > { %v16778_v14 = vsub.f32 %v16731_v9, %v8035_v6  ;;  %v16781_v40 = vsub.f32 %v16735_v8, %v8035_v6  ;;  %v16784_v44 = vsub.f32 %v16739_v7, %v8035_v6 }
 0x4fc   : > { %v8036_v12 = vcombine.low %v8029_v5, %v8030_v42 }
 0x4fd   : > { %v8045_v19 = vmul.f32 %v16778_v14, %v16778_v14  ;;  %v8047_v9 = vmul.f32 %v16781_v40, %v16781_v40  ;;  %v8049_v8 = vmul.f32 %v16784_v44, %v16784_v44 }
 0x4fe   : > { %v16787_v15 = vsub.f32 %v16733_v26, %v8036_v12  ;;  %v16790_v31 = vsub.f32 %v16737_v34, %v8036_v12  ;;  %v16793_v13 = vsub.f32 %v16741_v61, %v8036_v12 }
 0x4ff   : > { %v8057_v61 = vcombine.high %v8045_v19, %v8045_v19  ;;  %v8059_v20 = vcombine.high %v8047_v9, %v8047_v9  ;;  %v8061_v59 = vcombine.high %v8049_v8, %v8049_v8  ;;  %v8069_v47 = vsel %vm7978_vm0, %v8045_v19, 0.0 }
 0x500   : > { %v8046_v7 = vmul.f32 %v16787_v15, %v16787_v15  ;;  %v8048_v26 = vmul.f32 %v16790_v31, %v16790_v31  ;;  %v8050_v34 = vmul.f32 %v16793_v13, %v16793_v13  ;;  %v8070_v48 = vsel %vm7978_vm0, %v8047_v9, 0.0 }
 0x501   : > { %v8071_v56 = vadd.f32 %v8070_v48, %v8069_v47  ;;  %v8072_v24 = vsel %vm7978_vm0, %v8049_v8, 0.0  ;;  %v8074_v58 = vsel %vm7978_vm0, %v8057_v61, 0.0  ;;  %v8075_v28 = vsel %vm7978_vm0, %v8059_v20, 0.0 }
 0x502   : > { %v8058_v22 = vcombine.high %v8046_v7, %v8046_v7  ;;  %v8060_v51 = vcombine.high %v8048_v26, %v8048_v26  ;;  %v8062_v23 = vcombine.high %v8050_v34, %v8050_v34  ;;  %v8077_v29 = vsel %vm7978_vm0, %v8061_v59, 0.0 }
 0x503   : > { %v8073_v32 = vadd.f32 %v8072_v24, %v8071_v56  ;;  %v8076_v16 = vadd.f32 %v8075_v28, %v8074_v58  ;;  %v8079_v35 = vsel %vm7978_vm0, %v8046_v7, 0.0  ;;  %v8080_v4 = vsel %vm7978_vm0, %v8048_v26, 0.0 }
 0x504   : > { %v8081_v63 = vadd.f32 %v8080_v4, %v8079_v35  ;;  %v8082_v50 = vsel %vm7978_vm0, %v8050_v34, 0.0  ;;  %v8084_v17 = vsel %vm7978_vm0, %v8058_v22, 0.0  ;;  %v8085_v18 = vsel %vm7978_vm0, %v8060_v51, 0.0 }
 0x505   : > { %v8078_v38 = vadd.f32 %v8077_v29, %v8076_v16  ;;  %v8086_v39 = vadd.f32 %v8085_v18, %v8084_v17  ;;  %v8087_v45 = vsel %vm7978_vm0, %v8062_v23, 0.0  ;;  %v8089_v55 = vsel %vm7978_vm0, %v8073_v32, 0.0  ;;  %v16826_v29 = vld [vmem:[%s17378_s3 + $0x1] ss:$8 sm:$0xf] }
 0x506   : > { %v8083_v21 = vadd.f32 %v8082_v50, %v8081_v63  ;;  %v8090_v52 = vrot.slane %v8089_v55, 4  ;;  %v13279_v24 = vmov 1966171168   ;;  %v16831_v32 = vld [vmem:[%s17378_s3 + $0x2] ss:$8 sm:$0xf]  ;;  %v8218_v50 = vrot.slane %v16826_v29, %v16708_v36 }
 0x507   : > { %v8088_v53 = vadd.f32 %v8087_v45, %v8086_v39  ;;  %v8096_v41 = vsel %vm7978_vm0, %v8078_v38, 0.0  ;;  %v8246_v58 = vunpack.c.l.s4 %v13279_v24  ;;  %v8222_v17 = vrot.slane %v16826_v29, %v16714_v3  ;;  %v16842_v38 = vld [vmem:[%s17378_s3 + $0x4] ss:$8 sm:$0xf] }
 0x508   : > { %v8091_v49 = vadd.f32 %v8090_v52, %v8089_v55  ;;  %v8097_v25 = vrot.slane %v8096_v41, 4  ;;  %v8103_v46 = vsel %vm7978_vm0, %v8083_v21, 0.0  ;;  %v8226_v18 = vrot.slane %v16826_v29, %v16711_v10 }
 0x509   : > { %v8104_v30 = vrot.slane %v8103_v46, 4  ;;  %v8110_v57 = vsel %vm7978_vm0, %v8088_v53, 0.0  ;;  %v8247_v35 = vunpack.c.0.s8 %v8246_v58  ;;  %v8230_v45 = vrot.slane %v16826_v29, %v16717_v54 }
 0x50a   : > { %v8092_v60 = vrot.slane %v8091_v49, 2  ;;  %v8098_v37 = vadd.f32 %v8097_v25, %v8096_v41  ;;  %v8111_v62 = vrot.slane %v8110_v57, 4  ;;  %v8319_v55 = vrot.slane %v16831_v32, %v16708_v36 }
 0x50b   : > { %v8105_v0 = vadd.f32 %v8104_v30, %v8103_v46  ;;  %v8323_v21 = vrot.slane %v16831_v32, %v16714_v3  ;;  %v8327_v52 = vrot.slane %v16831_v32, %v16711_v10  ;;  %v16856_v46 = vsub.s32 %v8247_v35, %v16705_v27  ;;  %v16870_v27 = vld [vmem:[%s17378_s3 + $0x5] ss:$8 sm:$0xf] }
 0x50c   : > { %v8093_v2 = vadd.f32 %v8092_v60, %v8091_v49  ;;  %v8099_v33 = vrot.slane %v8098_v37, 2  ;;  %v8112_v11 = vadd.f32 %v8111_v62, %v8110_v57  ;;  %v8331_v30 = vrot.slane %v16831_v32, %v16717_v54 }
 0x50d   : > { %v8106_v43 = vrot.slane %v8105_v0, 2 }
 0x50e   : > { %v8094_v1 = vrot.slane %v8093_v2, 1  ;;  %v8100_v5 = vadd.f32 %v8099_v33, %v8098_v37  ;;  %v8113_v42 = vrot.slane %v8112_v11, 2 }
 0x50f   : > { %v8107_v6 = vadd.f32 %v8106_v43, %v8105_v0  ;;  %v16875_v0 = vld [vmem:[%s17378_s3 + $0x6] ss:$8 sm:$0xf] }
 0x510   : > { %v8095_v12 = vadd.f32 %v8094_v1, %v8093_v2  ;;  %v8101_v19 = vrot.slane %v8100_v5, 1  ;;  %v8114_v9 = vadd.f32 %v8113_v42, %v8112_v11  ;;  %v16884_v42 = vld [vmem:[%s17378_s3 + $0x7] ss:$8 sm:$0xf] }
 0x511   : > { %v8108_v8 = vrot.slane %v8107_v6, 1 }
 0x512   : > { %v8102_v7 = vadd.f32 %v8101_v19, %v8100_v5  ;;  %v8115_v26 = vrot.slane %v8114_v9, 1  ;;  %v8117_v34 = vmul.f32 0.11111111, %v8095_v12 }
 0x513   : > { %v8109_v61 = vadd.f32 %v8108_v8, %v8107_v6  ;;  %v16892_v8 = vld [vmem:[%s17378_s3 + $0x20] ss:$8 sm:$0xf] }
 0x514   : > { %v8116_v20 = vadd.f32 %v8115_v26, %v8114_v9  ;;  %v8118_v59 = vmul.f32 0.11111111, %v8102_v7  ;;  %v8121_v47 = vadd.f32 1e-05, %v8117_v34 }
 0x515   : > { %v8119_v48 = vmul.f32 0.11111111, %v8109_v61 }
 0x516   : > { %v8120_v22 = vmul.f32 0.11111111, %v8116_v20  ;;  %v8122_v51 = vadd.f32 1e-05, %v8118_v59  ;;  %13255 = vrsqrt.f32 %v8121_v47 }
 0x517   : > { %v8123_v23 = vadd.f32 1e-05, %v8119_v48  ;;  %v16905_v20 = vld [vmem:[%s17378_s3 + $0x21] ss:$8 sm:$0xf] }
 0x518   : > { %v8124_v56 = vadd.f32 1e-05, %v8120_v22  ;;  %13257 = vrsqrt.f32 %v8122_v51  ;;  %v16918_v51 = vld [vmem:[%s17378_s3 + $0x22] ss:$8 sm:$0xf] }
 0x519   : > { %13259 = vrsqrt.f32 %v8123_v23 }
 0x51a   : > { %13261 = vrsqrt.f32 %v8124_v56 }
 0x523   : > { %v13256_v28 = vpop.eup %13255 }
 0x525   : > { %v13258_v16 = vpop.eup %13257 }
 0x526   : > { %v13260_v4 = vpop.eup %13259  ;;  %v8133_v63 = vcombine.low %v13256_v28, %v13258_v16  ;;  %v16931_v28 = vld [vmem:[%s17378_s3 + $0x23] ss:$8 sm:$0xf] }
 0x527   : > { %v13262_v39 = vpop.eup %13261 }
 0x528   : > { %v8134_v53 = vcombine.low %v13260_v4, %v13262_v39  ;;  %v8137_v41 = vmul.f32 %v8133_v63, %v16778_v14  ;;  %v8139_v49 = vmul.f32 %v8133_v63, %v16781_v40  ;;  %v8141_v25 = vmul.f32 %v8133_v63, %v16784_v44  ;;  %v8170_v39 = vld [vmem:[%s17378_s3] ss:$8 sm:$0xf] }
 0x52a   : > { %v8138_v37 = vmul.f32 %v8134_v53, %v16787_v15  ;;  %v8140_v14 = vmul.f32 %v8134_v53, %v16790_v31  ;;  %v8142_v40 = vmul.f32 %v8134_v53, %v16793_v13  ;;  %vm8143_vm1 = vcmp.ge.f32.partialorder %v8137_v41, 0.0 }
 0x52b   : > { %vm8145_vm2 = vcmp.ge.f32.partialorder %v8139_v49, 0.0  ;;  %vm8147_vm3 = vcmp.ge.f32.partialorder %v8141_v25, 0.0  ;;  %v8149_v44 = vmul.f32 0.2, %v8137_v41  ;;  %v8151_v62 = vmul.f32 0.2, %v8139_v49 }
 0x52c   : > { %vm8144_vm5 = vcmp.ge.f32.partialorder %v8138_v37, 0.0  ;;  %vm8146_vm6 = vcmp.ge.f32.partialorder %v8140_v14, 0.0  ;;  %vm8148_vm7 = vcmp.ge.f32.partialorder %v8142_v40, 0.0  ;;  %v8150_v15 = vmul.f32 0.2, %v8138_v37 }
 0x52d   : > { %v8152_v31 = vmul.f32 0.2, %v8140_v14  ;;  %v8153_v13 = vmul.f32 0.2, %v8141_v25  ;;  %v8154_v2 = vmul.f32 0.2, %v8142_v40  ;;  %v8155_v33 = vsel %vm8143_vm1, %v8137_v41, %v8149_v44 }
 0x52e   : > { %v8156_v11 = vsel %vm8144_vm5, %v8138_v37, %v8150_v15  ;;  %v8157_v43 = vsel %vm8145_vm2, %v8139_v49, %v8151_v62  ;;  %8161 = vst [vmem:[#allocation2] sm:$0x77] %v8155_v33 }
 0x52f   : > { %v8158_v6 = vsel %vm8146_vm6, %v8140_v14, %v8152_v31  ;;  %v8159_v12 = vsel %vm8147_vm3, %v8141_v25, %v8153_v13  ;;  %v8160_v19 = vsel %vm8148_vm7, %v8142_v40, %v8154_v2  ;;  %8162 = vst [vmem:[#allocation2 + $0x8] sm:$0x77] %v8156_v11  ;;  %8163 = vst [vmem:[#allocation2 + $0x10] sm:$0x77] %v8157_v43 }
 0x530   : > { %8164 = vst [vmem:[#allocation2 + $0x18] sm:$0x77] %v8158_v6  ;;  %8165 = vst [vmem:[#allocation2 + $0x20] sm:$0x77] %v8159_v12 }
 0x531   : > { %8166 = vst [vmem:[#allocation2 + $0x28] sm:$0x77] %v8160_v19 }
 0x535   : > { %v8173_v37 = vld [vmem:[#allocation2] sm:$0x33] }
 0x536   : > { %v16952_v14 = vld [vmem:[#allocation2] sm:$0x66]  ;;  %v16962_v31 = vld [vmem:[#allocation2] ss:$4 sm:$0xf]  ;;  %v8179_v2 = vcombine.high %v8173_v37, %v8173_v37  ;;  %v16965_v33 = vsel %vm8183_vm4, %v8173_v37, 0.0 }
 0x537   : > { %v8174_v13 = vld [vmem:[#allocation2 + $0x8] sm:$0x33]  ;;  %v16969_v11 = vcombine.high %v16952_v14, %v16952_v14  ;;  %v16974_v6 = vmul.f32 %v8170_v39, %v16962_v31  ;;  %v8185_v19 = vrot.slane %v16965_v33, 4  ;;  %v8277_v39 = vrot.slane %v16952_v14, 1 }
 0x538   : > { %v8180_v12 = vcombine.high %v8174_v13, %v8174_v13  ;;  %v16978_v15 = vsel %vm8183_vm4, %v8174_v13, 0.0  ;;  %v16980_v62 = vld [vmem:[#allocation2 + $0x8] sm:$0x66]  ;;  %v16983_v37 = vsel %vm8183_vm4, %v8179_v2, 0.0 }
 0x539   : > { %v8199_v44 = vrot.slane %v16978_v15, 4  ;;  %v16988_v40 = vcombine.high %v16980_v62, %v16980_v62  ;;  %v8186_v43 = vadd.f32 %v8185_v19, %v16965_v33  ;;  %v8192_v25 = vrot.slane %v16983_v37, 4 }
 0x53a   : > { %v16994_v13 = vsel %vm8183_vm4, %v8180_v12, 0.0  ;;  %v8278_v49 = vrot.slane %v16969_v11, 1  ;;  %v8279_v53 = vrot.slane %v16980_v62, 1  ;;  %v8285_v19 = vsel %vm8183_vm4, %v8277_v39, 0.0 }
 0x53b   : > { %v8200_v2 = vadd.f32 %v8199_v44, %v16978_v15  ;;  %v8206_v41 = vrot.slane %v16994_v13, 4  ;;  %v8280_v63 = vrot.slane %v16988_v40, 1  ;;  %v8187_v4 = vrot.slane %v8186_v43, 2 }
 0x53c   : > { %v8193_v35 = vadd.f32 %v8192_v25, %v16983_v37  ;;  %v8292_v16 = vsel %vm8183_vm4, %v8278_v49, 0.0  ;;  %v8286_v24 = vrot.slane %v8285_v19, 4  ;;  %v8299_v22 = vsel %vm8183_vm4, %v8279_v53, 0.0 }
 0x53d   : > { %v8201_v58 = vrot.slane %v8200_v2, 2  ;;  %v8207_v12 = vadd.f32 %v8206_v41, %v16994_v13  ;;  %v8293_v56 = vrot.slane %v8292_v16, 4  ;;  %v8188_v23 = vadd.f32 %v8187_v4, %v8186_v43 }
 0x53e   : > { %v8194_v44 = vrot.slane %v8193_v35, 2  ;;  %v8306_v48 = vsel %vm8183_vm4, %v8280_v63, 0.0  ;;  %v8287_v61 = vadd.f32 %v8286_v24, %v8285_v19  ;;  %v8300_v39 = vrot.slane %v8299_v22, 4  ;;  %v8379_v19 = vld [vmem:[#allocation2 + $0x10] ss:$4 sm:$0xf] }
 0x53f   : > { %v8202_v47 = vadd.f32 %v8201_v58, %v8200_v2  ;;  %v8208_v59 = vrot.slane %v8207_v12, 2  ;;  %v8294_v34 = vadd.f32 %v8293_v56, %v8292_v16  ;;  %v8189_v25 = vrot.slane %v8188_v23, 1  ;;  %v11650_v56 = vld [vmem:[%s17378_s3 + $0x3] ss:$8 sm:$0xf] }
 0x540   : > { %v8195_v7 = vadd.f32 %v8194_v44, %v8193_v35  ;;  %v8307_v26 = vrot.slane %v8306_v48, 4  ;;  %v8288_v5 = vrot.slane %v8287_v61, 2  ;;  %v8301_v4 = vadd.f32 %v8300_v39, %v8299_v22 }
 0x541   : > { %v8203_v49 = vrot.slane %v8202_v47, 1  ;;  %v8209_v9 = vadd.f32 %v8208_v59, %v8207_v12  ;;  %v8295_v41 = vrot.slane %v8294_v34, 2  ;;  %v8190_v1 = vadd.f32 %v8189_v25, %v8188_v23 }
 0x542   : > { %v8196_v60 = vrot.slane %v8195_v7, 1  ;;  %v8308_v43 = vadd.f32 %v8307_v26, %v8306_v48  ;;  %v8289_v63 = vadd.f32 %v8288_v5, %v8287_v61  ;;  %v8302_v16 = vrot.slane %v8301_v4, 2  ;;  %v17016_v5 = vld [vmem:[#allocation2 + $0x2] ss:$4 sm:$0xf] }
 0x543   : > { %v8204_v53 = vadd.f32 %v8203_v49, %v8202_v47  ;;  %v8210_v57 = vrot.slane %v8209_v9, 1  ;;  %v8296_v58 = vadd.f32 %v8295_v41, %v8294_v34  ;;  %v8235_v59 = vmul.f32 %v8218_v50, %v8190_v1 }
 0x544   : > { %v8197_v24 = vadd.f32 %v8196_v60, %v8195_v7  ;;  %v8309_v35 = vrot.slane %v8308_v43, 2  ;;  %v8290_v47 = vrot.slane %v8289_v63, 1  ;;  %v8303_v60 = vadd.f32 %v8302_v16, %v8301_v4 }
 0x545   : > { %v8211_v23 = vadd.f32 %v8210_v57, %v8209_v9  ;;  %v8237_v26 = vmul.f32 %v8226_v18, %v8204_v53  ;;  %v8297_v48 = vrot.slane %v8296_v58, 1  ;;  %v17022_v61 = vmul.f32 %v11650_v56, %v17016_v5 }
 0x546   : > { %v8236_v34 = vmul.f32 %v8222_v17, %v8197_v24  ;;  %v8310_v7 = vadd.f32 %v8309_v35, %v8308_v43  ;;  %v8291_v57 = vadd.f32 %v8290_v47, %v8289_v63  ;;  %v8385_v18 = vrot.slane %v16962_v31, %v16708_v36 }
 0x547   : > { %v8238_v50 = vmul.f32 %v8230_v45, %v8211_v23  ;;  %v8298_v1 = vadd.f32 %v8297_v48, %v8296_v58  ;;  %v8304_v22 = vrot.slane %v8303_v60, 1  ;;  %v8389_v17 = vrot.slane %v16962_v31, %v16714_v3 }
 0x548   : > { %v8243_v9 = vcombine.low %v8235_v59, %v8236_v34  ;;  %v8311_v2 = vrot.slane %v8310_v7, 1  ;;  %v8336_v44 = vmul.f32 %v8319_v55, %v8291_v57  ;;  %v8393_v45 = vrot.slane %v16962_v31, %v16711_v10  ;;  %v8496_v34 = vld [vmem:[#allocation2 + $0x10] sm:$0x33] }
 0x549   : > { %v8244_v12 = vcombine.low %v8237_v26, %v8238_v50  ;;  %v8337_v29 = vmul.f32 %v8323_v21, %v8298_v1  ;;  %v8305_v39 = vadd.f32 %v8304_v22, %v8303_v60  ;;  %v8397_v41 = vrot.slane %v16962_v31, %v16717_v54  ;;  %v8497_v60 = vld [vmem:[#allocation2 + $0x18] sm:$0x33] }
 0x54a   : > { %v8251_v25 = vrot.slane %v8243_v9, %v16856_v46  ;;  %v8312_v49 = vadd.f32 %v8311_v2, %v8310_v7  ;;  %v8401_v53 = vrot.slane %v8379_v19, %v16708_v36  ;;  %v8405_v55 = vrot.slane %v8379_v19, %v16714_v3 }
 0x54b   : > { %v8258_v4 = vrot.slane %v8244_v12, %v16856_v46  ;;  %v8344_v43 = vcombine.low %v8336_v44, %v8337_v29  ;;  %v8338_v21 = vmul.f32 %v8327_v52, %v8305_v39  ;;  %v8409_v58 = vrot.slane %v8379_v19, %v16711_v10 }
 0x54c   : > { %v8339_v63 = vmul.f32 %v8331_v30, %v8312_v49  ;;  %v8413_v56 = vrot.slane %v8379_v19, %v16717_v54  ;;  %v8423_v59 = vsel %vm8422_vm8, %v8385_v18, 0.0  ;;  %v8424_v16 = vsel %vm8422_vm8, %v8401_v53, 0.0 }
 0x54d   : > { %v8259_v31 = vcombine.low %v8251_v25, %v8258_v4  ;;  %v8352_v24 = vrot.slane %v8344_v43, %v16856_v46  ;;  %v8425_v23 = vadd.f32 %v8424_v16, %v8423_v59  ;;  %v8426_v26 = vsel %vm8422_vm8, %v8389_v17, 0.0 }
 0x54e   : > { %v8345_v35 = vcombine.low %v8338_v21, %v8339_v63  ;;  %v8427_v52 = vsel %vm8422_vm8, %v8405_v55, 0.0  ;;  %v8429_v47 = vsel %vm8422_vm8, %v8393_v45, 0.0  ;;  %v8430_v48 = vsel %vm8422_vm8, %v8409_v58, 0.0 }
 0x54f   : > { %v8266_v32 = vrot.slane %v8259_v31, %v16856_v46  ;;  %v8428_v30 = vadd.f32 %v8427_v52, %v8426_v26  ;;  %v8431_v50 = vadd.f32 %v8430_v48, %v8429_v47  ;;  %v8432_v57 = vsel %vm8422_vm8, %v8397_v41, 0.0  ;;  %v8607_v31 = vld [vmem:[#allocation2 + $0x10] sm:$0x66] }
 0x550   : > { %v8359_v7 = vrot.slane %v8345_v35, %v16856_v46  ;;  %v8433_v1 = vsel %vm8422_vm8, %v8413_v56, 0.0  ;;  %v17381_v22 = vrot.slane %v16842_v38, %v16708_v36  ;;  %v17382_v19 = vrot.slane %v16842_v38, %v16714_v3 }
 0x551   : > { %v8268_v18 = vadd.f32 %v8266_v32, %v16974_v6  ;;  %v8434_v9 = vadd.f32 %v8433_v1, %v8432_v57  ;;  %v17383_v44 = vrot.slane %v16842_v38, %v16711_v10  ;;  %v8504_v45 = vcombine.high %v8496_v34, %v8496_v34 }
 0x552   : > { %v8462_v2 = vmul.f32 %v17381_v22, %v8425_v23  ;;  %v8463_v17 = vmul.f32 %v17382_v19, %v8428_v30  ;;  %v8360_v12 = vcombine.low %v8352_v24, %v8359_v7  ;;  %v8505_v25 = vcombine.high %v8497_v60, %v8497_v60 }
 0x553   : > { %v8464_v29 = vmul.f32 %v17383_v44, %v8431_v50  ;;  %v17384_v39 = vrot.slane %v16842_v38, %v16717_v54  ;;  %v8511_v41 = vsel %vm8183_vm4, %v8496_v34, 0.0  ;;  %v8517_v4 = vsel %vm8183_vm4, %v8497_v60, 0.0 }
 0x554   : > { %v8470_v49 = vcombine.low %v8462_v2, %v8463_v17  ;;  %v8367_v43 = vrot.slane %v8360_v12, %v16856_v46  ;;  %v8512_v53 = vadd.f32 %v8511_v41, %v16965_v33  ;;  %v8514_v55 = vsel %vm8183_vm4, %v8504_v45, 0.0 }
 0x555   : > { %v8465_v6 = vmul.f32 %v17384_v39, %v8434_v9  ;;  %v8518_v21 = vadd.f32 %v8517_v4, %v16978_v15  ;;  %v8515_v56 = vadd.f32 %v8514_v55, %v16983_v37  ;;  %v8520_v38 = vsel %vm8183_vm4, %v8505_v25, 0.0  ;;  %v8608_v37 = vld [vmem:[#allocation2 + $0x18] sm:$0x66] }
 0x556   : > { %v8478_v58 = vrot.slane %v8470_v49, %v16856_v46  ;;  %v8369_v24 = vadd.f32 %v8367_v43, %v8268_v18  ;;  %v8521_v59 = vadd.f32 %v8520_v38, %v16994_v13  ;;  %v8522_v16 = vsel %vm8183_vm4, %v8512_v53, 0.0 }
 0x557   : > { %v8471_v63 = vcombine.low %v8464_v29, %v8465_v6  ;;  %v8536_v35 = vsel %vm8183_vm4, %v8518_v21, 0.0  ;;  %v8523_v23 = vrot.slane %v8522_v16, 4  ;;  %v8529_v15 = vsel %vm8183_vm4, %v8515_v56, 0.0 }
 0x558   : > { %v8537_v26 = vrot.slane %v8536_v35, 4  ;;  %v8530_v52 = vrot.slane %v8529_v15, 4  ;;  %v8543_v32 = vsel %vm8183_vm4, %v8521_v59, 0.0  ;;  %v8615_v30 = vcombine.high %v8607_v31, %v8607_v31 }
 0x559   : > { %v8485_v33 = vrot.slane %v8471_v63, %v16856_v46  ;;  %v9281_v47 = vrot.slane %v16931_v28, %v16711_v10  ;;  %v8524_v13 = vadd.f32 %v8523_v23, %v8522_v16  ;;  %v8544_v60 = vrot.slane %v8543_v32, 4 }
 0x55a   : > { %v8538_v34 = vadd.f32 %v8537_v26, %v8536_v35  ;;  %v8377_v7 = vadd.f32 %v17022_v61, %v8369_v24  ;;  %v8531_v50 = vadd.f32 %v8530_v52, %v8529_v15  ;;  %v8622_v57 = vsel %vm8621_vm9, %v16952_v14, 0.0 }
 0x55b   : > { %v8486_v48 = vcombine.low %v8478_v58, %v8485_v33  ;;  %v8623_v1 = vsel %vm8621_vm9, %v8607_v31, 0.0  ;;  %v8525_v18 = vrot.slane %v8524_v13, 2  ;;  %v8545_v22 = vadd.f32 %v8544_v60, %v8543_v32 }
 0x55c   : > { %v8539_v9 = vrot.slane %v8538_v34, 2  ;;  %v8616_v2 = vcombine.high %v8608_v37, %v8608_v37  ;;  %v8532_v19 = vrot.slane %v8531_v50, 2  ;;  %v8624_v17 = vadd.f32 %v8623_v1, %v8622_v57 }
 0x55d   : > { %v8625_v12 = vsel %vm8621_vm9, %v16969_v11, 0.0  ;;  %v8626_v44 = vsel %vm8621_vm9, %v8615_v30, 0.0  ;;  %v8493_v29 = vrot.slane %v8486_v48, %v16856_v46  ;;  %v8526_v61 = vadd.f32 %v8525_v18, %v8524_v13 }
 0x55e   : > { %v8540_v45 = vadd.f32 %v8539_v9, %v8538_v34  ;;  %v8546_v25 = vrot.slane %v8545_v22, 2  ;;  %v8533_v39 = vadd.f32 %v8532_v19, %v8531_v50  ;;  %v8627_v14 = vadd.f32 %v8626_v44, %v8625_v12  ;;  %v8732_v12 = vld [vmem:[#allocation2 + $0x12] ss:$4 sm:$0xf] }
 0x55f   : > { %v8628_v6 = vsel %vm8621_vm9, %v16980_v62, 0.0  ;;  %v8629_v49 = vsel %vm8621_vm9, %v8608_v37, 0.0  ;;  %v8527_v41 = vrot.slane %v8526_v61, 1  ;;  %v8631_v11 = vsel %vm8621_vm9, %v16988_v40, 0.0 }
 0x560   : > { %v8541_v4 = vrot.slane %v8540_v45, 1  ;;  %v8547_v43 = vadd.f32 %v8546_v25, %v8545_v22  ;;  %v8630_v53 = vadd.f32 %v8629_v49, %v8628_v6  ;;  %v8534_v55 = vrot.slane %v8533_v39, 1 }
 0x561   : > { %v8632_v21 = vsel %vm8621_vm9, %v8616_v2, 0.0  ;;  %v8638_v63 = vrot.slane %v8624_v17, 1  ;;  %v8528_v58 = vadd.f32 %v8527_v41, %v8526_v61  ;;  %v8639_v59 = vrot.slane %v8627_v14, 1 }
 0x562   : > { %v8542_v56 = vadd.f32 %v8541_v4, %v8540_v45  ;;  %v8548_v38 = vrot.slane %v8547_v43, 1  ;;  %v8633_v31 = vadd.f32 %v8632_v21, %v8631_v11  ;;  %v8535_v24 = vadd.f32 %v8534_v55, %v8533_v39 }
 0x563   : > { %v8640_v62 = vrot.slane %v8630_v53, 1  ;;  %v8646_v16 = vsel %vm8183_vm4, %v8638_v63, 0.0  ;;  %v17385_v33 = vrot.slane %v16870_v27, %v16708_v36  ;;  %v17386_v40 = vrot.slane %v16870_v27, %v16711_v10 }
 0x564   : > { %v8549_v35 = vadd.f32 %v8548_v38, %v8547_v43  ;;  %v8641_v26 = vrot.slane %v8633_v31, 1  ;;  %v17387_v52 = vrot.slane %v16870_v27, %v16714_v3  ;;  %v8647_v37 = vrot.slane %v8646_v16, 4 }
 0x565   : > { %v8573_v23 = vmul.f32 %v17385_v33, %v8528_v58  ;;  %v8575_v15 = vmul.f32 %v17386_v40, %v8542_v56  ;;  %v8653_v30 = vsel %vm8183_vm4, %v8639_v59, 0.0  ;;  %v8660_v48 = vsel %vm8183_vm4, %v8640_v62, 0.0 }
 0x566   : > { %v8574_v32 = vmul.f32 %v17387_v52, %v8535_v24  ;;  %v17388_v13 = vrot.slane %v16870_v27, %v16717_v54  ;;  %v8654_v60 = vrot.slane %v8653_v30, 4  ;;  %v8661_v50 = vrot.slane %v8660_v48, 4 }
 0x567   : > { %v8667_v57 = vsel %vm8183_vm4, %v8641_v26, 0.0  ;;  %v17124_v1 = vadd.f32 %v8493_v29, %v8377_v7  ;;  %v8648_v9 = vadd.f32 %v8647_v37, %v8646_v16  ;;  %v8738_v44 = vrot.slane %v17016_v5, %v16708_v36 }
 0x568   : > { %v8576_v34 = vmul.f32 %v17388_v13, %v8549_v35  ;;  %v8581_v18 = vcombine.low %v8573_v23, %v8574_v32  ;;  %v8668_v22 = vrot.slane %v8667_v57, 4  ;;  %v8655_v19 = vadd.f32 %v8654_v60, %v8653_v30 }
 0x569   : > { %v8662_v17 = vadd.f32 %v8661_v50, %v8660_v48  ;;  %v8649_v27 = vrot.slane %v8648_v9, 2  ;;  %v8742_v25 = vrot.slane %v17016_v5, %v16714_v3  ;;  %v8746_v14 = vrot.slane %v17016_v5, %v16711_v10  ;;  %v8849_v48 = vld [vmem:[#allocation2 + $0x10] ss:$4 sm:$0xf] }
 0x56a   : > { %v8582_v2 = vcombine.low %v8575_v15, %v8576_v34  ;;  %v8589_v61 = vrot.slane %v8581_v18, %v16856_v46  ;;  %v8669_v45 = vadd.f32 %v8668_v22, %v8667_v57  ;;  %v8656_v29 = vrot.slane %v8655_v19, 2 }
 0x56b   : > { %v8663_v39 = vrot.slane %v8662_v17, 2  ;;  %v8650_v6 = vadd.f32 %v8649_v27, %v8648_v9  ;;  %v8750_v41 = vrot.slane %v17016_v5, %v16717_v54  ;;  %v8754_v4 = vrot.slane %v8732_v12, %v16708_v36 }
 0x56c   : > { %v8596_v7 = vrot.slane %v8582_v2, %v16856_v46  ;;  %v8670_v49 = vrot.slane %v8669_v45, 2  ;;  %v8657_v53 = vadd.f32 %v8656_v29, %v8655_v19  ;;  %v8758_v11 = vrot.slane %v8732_v12, %v16714_v3 }
 0x56d   : > { %v8664_v55 = vadd.f32 %v8663_v39, %v8662_v17  ;;  %v8651_v21 = vrot.slane %v8650_v6, 1  ;;  %v8762_v58 = vrot.slane %v8732_v12, %v16711_v10  ;;  %v8775_v56 = vsel %vm8422_vm8, %v8738_v44, 0.0 }
 0x56e   : > { %v8597_v43 = vcombine.low %v8589_v61, %v8596_v7  ;;  %v8671_v63 = vadd.f32 %v8670_v49, %v8669_v45  ;;  %v8658_v38 = vrot.slane %v8657_v53, 1  ;;  %v8766_v24 = vrot.slane %v8732_v12, %v16717_v54 }
 0x56f   : > { %v8665_v31 = vrot.slane %v8664_v55, 1  ;;  %v8776_v59 = vsel %vm8422_vm8, %v8754_v4, 0.0  ;;  %v8652_v5 = vadd.f32 %v8651_v21, %v8650_v6  ;;  %v8778_v35 = vsel %vm8422_vm8, %v8742_v25, 0.0  ;;  %v8851_v25 = vld [vmem:[#allocation2 + $0x20] ss:$4 sm:$0xf] }
 0x570   : > { %v8672_v62 = vrot.slane %v8671_v63, 1  ;;  %v8777_v16 = vadd.f32 %v8776_v59, %v8775_v56  ;;  %v8604_v33 = vrot.slane %v8597_v43, %v16856_v46  ;;  %v8659_v23 = vadd.f32 %v8658_v38, %v8657_v53 }
 0x571   : > { %v8666_v40 = vadd.f32 %v8665_v31, %v8664_v55  ;;  %v8779_v15 = vsel %vm8422_vm8, %v8758_v11, 0.0  ;;  %v17389_v52 = vrot.slane %v16875_v0, %v16708_v36  ;;  %v8781_v30 = vsel %vm8422_vm8, %v8746_v14, 0.0 }
 0x572   : > { %v8673_v26 = vadd.f32 %v8672_v62, %v8671_v63  ;;  %v8780_v37 = vadd.f32 %v8779_v15, %v8778_v35  ;;  %v17390_v13 = vrot.slane %v16875_v0, %v16714_v3  ;;  %v17391_v60 = vrot.slane %v16875_v0, %v16711_v10  ;;  %v8968_v15 = vld [vmem:[#allocation2 + $0x18] sm:$0x33] }
 0x573   : > { %v8697_v32 = vmul.f32 %v17389_v52, %v8652_v5  ;;  %v8782_v57 = vsel %vm8422_vm8, %v8762_v58, 0.0  ;;  %v8784_v18 = vsel %vm8422_vm8, %v8750_v41, 0.0  ;;  %v17392_v9 = vrot.slane %v16875_v0, %v16717_v54 }
 0x574   : > { %v8698_v34 = vmul.f32 %v17390_v13, %v8659_v23  ;;  %v8699_v50 = vmul.f32 %v17391_v60, %v8666_v40  ;;  %v8783_v2 = vadd.f32 %v8782_v57, %v8781_v30  ;;  %v8785_v19 = vsel %vm8422_vm8, %v8766_v24, 0.0  ;;  %v8967_v40 = vld [vmem:[#allocation2 + $0x10] sm:$0x33]  ;;  %v8970_v57 = vld [vmem:[#allocation2 + $0x28] sm:$0x33] }
 0x575   : > { %v8700_v22 = vmul.f32 %v17392_v9, %v8673_v26  ;;  %v17393_v17 = vrot.slane %v16884_v42, %v16708_v36  ;;  %v8786_v61 = vadd.f32 %v8785_v19, %v8784_v18  ;;  %v17394_v27 = vrot.slane %v16884_v42, %v16714_v3 }
 0x576   : > { %v8705_v44 = vcombine.low %v8697_v32, %v8698_v34  ;;  %v8857_v7 = vrot.slane %v8849_v48, %v16708_v36  ;;  %v17395_v0 = vrot.slane %v16884_v42, %v16711_v10  ;;  %v8861_v14 = vrot.slane %v8849_v48, %v16714_v3 }
 0x577   : > { %v8814_v12 = vmul.f32 %v17393_v17, %v8777_v16  ;;  %v8815_v45 = vmul.f32 %v17394_v27, %v8780_v37  ;;  %v8706_v29 = vcombine.low %v8699_v50, %v8700_v22  ;;  %v8865_v6 = vrot.slane %v8849_v48, %v16711_v10  ;;  %v8969_v37 = vld [vmem:[#allocation2 + $0x20] sm:$0x33] }
 0x578   : > { %v8816_v39 = vmul.f32 %v17395_v0, %v8783_v2  ;;  %v8713_v49 = vrot.slane %v8705_v44, %v16856_v46  ;;  %v17396_v41 = vrot.slane %v16884_v42, %v16717_v54  ;;  %v8869_v53 = vrot.slane %v8849_v48, %v16717_v54  ;;  %v17206_v17 = vld [vmem:[%s17378_s3 + $0x25] ss:$8 sm:$0xf] }
 0x579   : > { %v8822_v43 = vcombine.low %v8814_v12, %v8815_v45  ;;  %v8720_v55 = vrot.slane %v8706_v29, %v16856_v46  ;;  %v8873_v11 = vrot.slane %v8851_v25, %v16708_v36  ;;  %v8877_v21 = vrot.slane %v8851_v25, %v16714_v3 }
 0x57a   : > { %v8817_v4 = vmul.f32 %v17396_v41, %v8786_v61  ;;  %v8881_v63 = vrot.slane %v8851_v25, %v16711_v10  ;;  %v8885_v38 = vrot.slane %v8851_v25, %v16717_v54  ;;  %v8894_v31 = vsel %vm8422_vm8, %v8857_v7, 0.0 }
 0x57b   : > { %v8830_v56 = vrot.slane %v8822_v43, %v16856_v46  ;;  %v8721_v42 = vcombine.low %v8713_v49, %v8720_v55  ;;  %v8895_v24 = vsel %vm8422_vm8, %v8873_v11, 0.0  ;;  %v8897_v59 = vsel %vm8422_vm8, %v8861_v14, 0.0  ;;  %v9080_v43 = vld [vmem:[#allocation2 + $0x10] sm:$0x66] }
 0x57c   : > { %v8823_v58 = vcombine.low %v8816_v39, %v8817_v4  ;;  %v8898_v5 = vsel %vm8422_vm8, %v8877_v21, 0.0  ;;  %v8896_v16 = vadd.f32 %v8895_v24, %v8894_v31  ;;  %v8900_v23 = vsel %vm8422_vm8, %v8865_v6, 0.0 }
 0x57d   : > { %v8899_v35 = vadd.f32 %v8898_v5, %v8897_v59  ;;  %v8901_v26 = vsel %vm8422_vm8, %v8881_v63, 0.0  ;;  %v8903_v52 = vsel %vm8422_vm8, %v8869_v53, 0.0  ;;  %v8904_v32 = vsel %vm8422_vm8, %v8885_v38, 0.0  ;;  %v9081_v63 = vld [vmem:[#allocation2 + $0x18] sm:$0x66] }
 0x57e   : > { %v8837_v62 = vrot.slane %v8823_v58, %v16856_v46  ;;  %v9285_v30 = vrot.slane %v16931_v28, %v16717_v54  ;;  %v8606_v48 = vadd.f32 %v8604_v33, %v17124_v1  ;;  %v8902_v13 = vadd.f32 %v8901_v26, %v8900_v23  ;;  %v9082_v58 = vld [vmem:[#allocation2 + $0x20] sm:$0x66]  ;;  %v9083_v23 = vld [vmem:[#allocation2 + $0x28] sm:$0x66] }
 0x57f   : > { %v8905_v34 = vadd.f32 %v8904_v32, %v8903_v52  ;;  %v17397_v60 = vrot.slane %v16892_v8, %v16708_v36  ;;  %v8728_v18 = vrot.slane %v8721_v42, %v16856_v46  ;;  %v17398_v22 = vrot.slane %v16892_v8, %v16714_v3 }
 0x580   : > { %v8838_v9 = vcombine.low %v8830_v56, %v8837_v62  ;;  %v8975_v19 = vcombine.high %v8967_v40, %v8967_v40  ;;  %v17399_v1 = vrot.slane %v16892_v8, %v16711_v10  ;;  %v17400_v12 = vrot.slane %v16892_v8, %v16717_v54 }
 0x581   : > { %v8933_v50 = vmul.f32 %v17397_v60, %v8896_v16  ;;  %v8934_v2 = vmul.f32 %v17398_v22, %v8899_v35  ;;  %v8976_v61 = vcombine.high %v8968_v15, %v8968_v15  ;;  %v8977_v27 = vcombine.high %v8969_v37, %v8969_v37 }
 0x582   : > { %v8935_v33 = vmul.f32 %v17399_v1, %v8902_v13  ;;  %v8936_v44 = vmul.f32 %v17400_v12, %v8905_v34  ;;  %v8978_v25 = vcombine.high %v8970_v57, %v8970_v57  ;;  %v8983_v7 = vsel %vm8183_vm4, %v8967_v40, 0.0 }
 0x583   : > { %v8941_v45 = vcombine.low %v8933_v50, %v8934_v2  ;;  %v8984_v29 = vsel %vm8183_vm4, %v8969_v37, 0.0  ;;  %v8986_v14 = vsel %vm8183_vm4, %v8975_v19, 0.0  ;;  %v9376_v6 = vrot.slane %v17206_v17, %v16708_v36 }
 0x584   : > { %v8942_v0 = vcombine.low %v8935_v33, %v8936_v44  ;;  %v8985_v39 = vadd.f32 %v8984_v29, %v8983_v7  ;;  %v8987_v8 = vsel %vm8183_vm4, %v8977_v27, 0.0  ;;  %v8989_v41 = vsel %vm8183_vm4, %v8968_v15, 0.0 }
 0x585   : > { %v17220_v49 = vrot.slane %v8941_v45, %v16856_v46  ;;  %v8990_v4 = vsel %vm8183_vm4, %v8970_v57, 0.0  ;;  %v8988_v55 = vadd.f32 %v8987_v8, %v8986_v14  ;;  %v8992_v21 = vsel %vm8183_vm4, %v8976_v61, 0.0 }
 0x586   : > { %v17226_v53 = vrot.slane %v8942_v0, %v16856_v46  ;;  %v8991_v11 = vadd.f32 %v8990_v4, %v8989_v41  ;;  %v17229_v56 = vadd.f32 %v8728_v18, %v8606_v48  ;;  %v17232_v38 = vrot.slane %v8838_v9, %v16856_v46 }
 0x587   : > { %v8993_v31 = vsel %vm8183_vm4, %v8978_v25, 0.0  ;;  %v8995_v42 = vsel %vm8183_vm4, %v8985_v39, 0.0  ;;  %v9002_v5 = vsel %vm8183_vm4, %v8988_v55, 0.0  ;;  %v9088_v62 = vcombine.high %v9080_v43, %v9080_v43 }
 0x588   : > { %v8994_v24 = vadd.f32 %v8993_v31, %v8992_v21  ;;  %v8996_v59 = vrot.slane %v8995_v42, 4  ;;  %v9003_v16 = vrot.slane %v9002_v5, 4  ;;  %v9009_v35 = vsel %vm8183_vm4, %v8991_v11, 0.0 }
 0x589   : > { %v9089_v40 = vcombine.high %v9081_v63, %v9081_v63  ;;  %v9090_v15 = vcombine.high %v9082_v58, %v9082_v58  ;;  %v8957_v26 = vcombine.low %v17220_v49, %v17226_v53  ;;  %v9010_v32 = vrot.slane %v9009_v35, 4 }
 0x58a   : > { %v8997_v52 = vadd.f32 %v8996_v59, %v8995_v42  ;;  %v9016_v37 = vsel %vm8183_vm4, %v8994_v24, 0.0  ;;  %v9004_v48 = vadd.f32 %v9003_v16, %v9002_v5  ;;  %v9096_v34 = vsel %vm8621_vm9, %v9080_v43, 0.0 }
 0x58b   : > { %v9017_v13 = vrot.slane %v9016_v37, 4  ;;  %v9097_v60 = vsel %vm8621_vm9, %v9082_v58, 0.0  ;;  %v9011_v57 = vadd.f32 %v9010_v32, %v9009_v35  ;;  %v9091_v18 = vcombine.high %v9083_v23, %v9083_v23 }
 0x58c   : > { %v8998_v50 = vrot.slane %v8997_v52, 2  ;;  %v9098_v9 = vadd.f32 %v9097_v60, %v9096_v34  ;;  %v9005_v22 = vrot.slane %v9004_v48, 2  ;;  %v9099_v19 = vsel %vm8621_vm9, %v9088_v62, 0.0  ;;  %v9206_v34 = vld [vmem:[#allocation2 + $0x12] ss:$4 sm:$0xf] }
 0x58d   : > { %v9018_v2 = vadd.f32 %v9017_v13, %v9016_v37  ;;  %v9100_v1 = vsel %vm8621_vm9, %v9090_v15, 0.0  ;;  %v9012_v12 = vrot.slane %v9011_v57, 2  ;;  %v9102_v61 = vsel %vm8621_vm9, %v9081_v63, 0.0 }
 0x58e   : > { %v8999_v33 = vadd.f32 %v8998_v50, %v8997_v52  ;;  %v9101_v44 = vadd.f32 %v9100_v1, %v9099_v19  ;;  %v9006_v27 = vadd.f32 %v9005_v22, %v9004_v48  ;;  %v9103_v25 = vsel %vm8621_vm9, %v9083_v23, 0.0 }
 0x58f   : > { %v9019_v45 = vrot.slane %v9018_v2, 2  ;;  %v9105_v7 = vsel %vm8621_vm9, %v9089_v40, 0.0  ;;  %v9013_v0 = vadd.f32 %v9012_v12, %v9011_v57  ;;  %v9104_v39 = vadd.f32 %v9103_v25, %v9102_v61 }
 0x590   : > { %v9000_v29 = vrot.slane %v8999_v33, 1  ;;  %v9106_v14 = vsel %vm8621_vm9, %v9091_v18, 0.0  ;;  %v9007_v49 = vrot.slane %v9006_v27, 1  ;;  %v9112_v4 = vrot.slane %v9098_v9, 1 }
 0x591   : > { %v9020_v8 = vadd.f32 %v9019_v45, %v9018_v2  ;;  %v9107_v41 = vadd.f32 %v9106_v14, %v9105_v7  ;;  %v9014_v53 = vrot.slane %v9013_v0, 1  ;;  %v9113_v55 = vrot.slane %v9101_v44, 1 }
 0x592   : > { %v9001_v43 = vadd.f32 %v9000_v29, %v8999_v33  ;;  %v9114_v11 = vrot.slane %v9104_v39, 1  ;;  %v9008_v21 = vadd.f32 %v9007_v49, %v9006_v27  ;;  %v9120_v31 = vsel %vm8183_vm4, %v9112_v4, 0.0  ;;  %v9208_v33 = vld [vmem:[#allocation2 + $0x22] ss:$4 sm:$0xf] }
 0x593   : > { %v9021_v63 = vrot.slane %v9020_v8, 1  ;;  %v9115_v58 = vrot.slane %v9107_v41, 1  ;;  %v9015_v42 = vadd.f32 %v9014_v53, %v9013_v0  ;;  %v17401_v24 = vrot.slane %v16905_v20, %v16708_v36 }
 0x594   : > { %v9121_v5 = vrot.slane %v9120_v31, 4  ;;  %v9127_v62 = vsel %vm8183_vm4, %v9113_v55, 0.0  ;;  %v17402_v35 = vrot.slane %v16905_v20, %v16714_v3  ;;  %v9134_v15 = vsel %vm8183_vm4, %v9114_v11, 0.0 }
 0x595   : > { %v9046_v59 = vmul.f32 %v17401_v24, %v9001_v43  ;;  %v9022_v16 = vadd.f32 %v9021_v63, %v9020_v8  ;;  %v9128_v40 = vrot.slane %v9127_v62, 4  ;;  %v17403_v52 = vrot.slane %v16905_v20, %v16711_v10 }
 0x596   : > { %v9047_v23 = vmul.f32 %v17402_v35, %v9008_v21  ;;  %v9122_v37 = vadd.f32 %v9121_v5, %v9120_v31  ;;  %v9135_v48 = vrot.slane %v9134_v15, 4  ;;  %v9141_v13 = vsel %vm8183_vm4, %v9115_v58, 0.0 }
 0x597   : > { %v9048_v32 = vmul.f32 %v17403_v52, %v9015_v42  ;;  %v17404_v60 = vrot.slane %v16905_v20, %v16717_v54  ;;  %v9129_v18 = vadd.f32 %v9128_v40, %v9127_v62  ;;  %v9142_v9 = vrot.slane %v9141_v13, 4 }
 0x598   : > { %v9054_v57 = vcombine.low %v9046_v59, %v9047_v23  ;;  %v8847_v22 = vadd.f32 %v17232_v38, %v17229_v56  ;;  %v8964_v2 = vrot.slane %v8957_v26, %v16856_v46  ;;  %v9123_v19 = vrot.slane %v9122_v37, 2 }
 0x599   : > { %v9049_v50 = vmul.f32 %v17404_v60, %v9022_v16  ;;  %v9136_v1 = vadd.f32 %v9135_v48, %v9134_v15  ;;  %v9130_v44 = vrot.slane %v9129_v18, 2  ;;  %v9143_v61 = vadd.f32 %v9142_v9, %v9141_v13  ;;  %v9332_v60 = vld [vmem:[#allocation2 + $0x20] sm:$0x33] }
 0x59a   : > { %v9214_v27 = vrot.slane %v9206_v34, %v16708_v36  ;;  %v9062_v45 = vrot.slane %v9054_v57, %v16856_v46  ;;  %v9124_v20 = vadd.f32 %v9123_v19, %v9122_v37  ;;  %v9218_v7 = vrot.slane %v9206_v34, %v16714_v3  ;;  %v9333_v19 = vld [vmem:[#allocation2 + $0x28] sm:$0x33] }
 0x59b   : > { %v9055_v12 = vcombine.low %v9048_v32, %v9049_v50  ;;  %v9137_v25 = vrot.slane %v9136_v1, 2  ;;  %v9131_v0 = vadd.f32 %v9130_v44, %v9129_v18  ;;  %v9144_v56 = vrot.slane %v9143_v61, 2 }
 0x59c   : > { %v9230_v38 = vrot.slane %v9208_v33, %v16708_v36  ;;  %v9125_v26 = vrot.slane %v9124_v20, 1  ;;  %v9222_v14 = vrot.slane %v9206_v34, %v16711_v10  ;;  %v9234_v49 = vrot.slane %v9208_v33, %v16714_v3 }
 0x59d   : > { %v9069_v29 = vrot.slane %v9055_v12, %v16856_v46  ;;  %v9138_v39 = vadd.f32 %v9137_v25, %v9136_v1  ;;  %v9132_v8 = vrot.slane %v9131_v0, 1  ;;  %v9145_v41 = vadd.f32 %v9144_v56, %v9143_v61  ;;  %v9427_v56 = vld [vmem:[#allocation2 + $0x20] sm:$0x66] }
 0x59e   : > { %v9226_v4 = vrot.slane %v9206_v34, %v16717_v54  ;;  %v9238_v43 = vrot.slane %v9208_v33, %v16711_v10  ;;  %v9126_v53 = vadd.f32 %v9125_v26, %v9124_v20  ;;  %v9251_v11 = vsel %vm8422_vm8, %v9214_v27, 0.0 }
 0x59f   : > { %v9139_v55 = vrot.slane %v9138_v39, 1  ;;  %v9252_v21 = vsel %vm8422_vm8, %v9230_v38, 0.0  ;;  %v9070_v63 = vcombine.low %v9062_v45, %v9069_v29  ;;  %v9133_v58 = vadd.f32 %v9132_v8, %v9131_v0 }
 0x5a0   : > { %v9146_v31 = vrot.slane %v9145_v41, 1  ;;  %v9242_v42 = vrot.slane %v9208_v33, %v16717_v54  ;;  %v17405_v59 = vrot.slane %v16918_v51, %v16708_v36  ;;  %v9254_v62 = vsel %vm8422_vm8, %v9218_v7, 0.0 }
 0x5a1   : > { %v9140_v24 = vadd.f32 %v9139_v55, %v9138_v39  ;;  %v9255_v16 = vsel %vm8422_vm8, %v9234_v49, 0.0  ;;  %v17406_v23 = vrot.slane %v16918_v51, %v16714_v3  ;;  %v9253_v15 = vadd.f32 %v9252_v21, %v9251_v11  ;;  %v9428_v55 = vld [vmem:[#allocation2 + $0x28] sm:$0x66] }
 0x5a2   : > { %v9171_v5 = vmul.f32 %v17405_v59, %v9126_v53  ;;  %v9147_v35 = vadd.f32 %v9146_v31, %v9145_v41  ;;  %v9256_v52 = vadd.f32 %v9255_v16, %v9254_v62  ;;  %v17407_v32 = vrot.slane %v16918_v51, %v16711_v10 }
 0x5a3   : > { %v9172_v40 = vmul.f32 %v17406_v23, %v9133_v58  ;;  %v9257_v48 = vsel %vm8422_vm8, %v9222_v14, 0.0  ;;  %v9258_v13 = vsel %vm8422_vm8, %v9238_v43, 0.0  ;;  %v9260_v34 = vsel %vm8422_vm8, %v9226_v4, 0.0 }
 0x5a4   : > { %v9173_v37 = vmul.f32 %v17407_v32, %v9140_v24  ;;  %v17408_v50 = vrot.slane %v16918_v51, %v16717_v54  ;;  %v9259_v18 = vadd.f32 %v9258_v13, %v9257_v48  ;;  %v9261_v9 = vsel %vm8422_vm8, %v9242_v42, 0.0 }
 0x5a5   : > { %v9380_v1 = vrot.slane %v17206_v17, %v16714_v3  ;;  %v8966_v33 = vadd.f32 %v8964_v2, %v8847_v22  ;;  %v9179_v12 = vcombine.low %v9171_v5, %v9172_v40  ;;  %v9262_v44 = vadd.f32 %v9261_v9, %v9260_v34 }
 0x5a6   : > { %v9174_v57 = vmul.f32 %v17408_v50, %v9147_v35  ;;  %v9384_v61 = vrot.slane %v17206_v17, %v16711_v10  ;;  %v9077_v27 = vrot.slane %v9070_v63, %v16856_v46  ;;  %v17409_v45 = vrot.slane %v16931_v28, %v16708_v36 }
 0x5a7   : > { %v17410_v20 = vrot.slane %v16931_v28, %v16714_v3  ;;  %v9338_v7 = vcombine.high %v9332_v60, %v9332_v60  ;;  %v9292_v22 = vmul.f32 %v9281_v47, %v9259_v18  ;;  %v9339_v2 = vcombine.high %v9333_v19, %v9333_v19 }
 0x5a8   : > { %v9290_v51 = vmul.f32 %v17409_v45, %v9253_v15  ;;  %v9180_v29 = vcombine.low %v9173_v37, %v9174_v57  ;;  %v9342_v0 = vsel %vm8183_vm4, %v9332_v60, 0.0  ;;  %v9293_v38 = vmul.f32 %v9285_v30, %v9262_v44 }
 0x5a9   : > { %v9291_v25 = vmul.f32 %v17410_v20, %v9256_v52  ;;  %v9343_v26 = vrot.slane %v9342_v0, 4  ;;  %v9349_v39 = vsel %vm8183_vm4, %v9338_v7, 0.0  ;;  %v9356_v14 = vsel %vm8183_vm4, %v9333_v19, 0.0 }
 0x5aa   : > { %v9187_v49 = vrot.slane %v9179_v12, %v16856_v46  ;;  %v9350_v8 = vrot.slane %v9349_v39, 4  ;;  %v9357_v41 = vrot.slane %v9356_v14, 4  ;;  %v9388_v47 = vrot.slane %v17206_v17, %v16717_v54 }
 0x5ab   : > { %v9298_v4 = vcombine.low %v9290_v51, %v9291_v25  ;;  %v9344_v43 = vadd.f32 %v9343_v26, %v9342_v0  ;;  %v9363_v53 = vsel %vm8183_vm4, %v9339_v2, 0.0  ;;  %v9433_v11 = vcombine.high %v9427_v56, %v9427_v56 }
 0x5ac   : > { %v9194_v28 = vrot.slane %v9180_v29, %v16856_v46  ;;  %v9351_v30 = vadd.f32 %v9350_v8, %v9349_v39  ;;  %v9358_v21 = vadd.f32 %v9357_v41, %v9356_v14  ;;  %v9364_v63 = vrot.slane %v9363_v53, 4 }
 0x5ad   : > { %v9079_v58 = vadd.f32 %v9077_v27, %v8966_v33  ;;  %v9299_v31 = vcombine.low %v9292_v22, %v9293_v38  ;;  %v9345_v42 = vrot.slane %v9344_v43, 2  ;;  %v9435_v24 = vrot.slane %v9427_v56, 1 }
 0x5ae   : > { %v9352_v59 = vrot.slane %v9351_v30, 2  ;;  %v9359_v5 = vrot.slane %v9358_v21, 2  ;;  %v9365_v62 = vadd.f32 %v9364_v63, %v9363_v53  ;;  %v9434_v16 = vcombine.high %v9428_v55, %v9428_v55 }
 0x5af   : > { %v9306_v35 = vrot.slane %v9298_v4, %v16856_v46  ;;  %v9346_v23 = vadd.f32 %v9345_v42, %v9344_v43  ;;  %v9436_v40 = vrot.slane %v9433_v11, 1  ;;  %v9437_v15 = vrot.slane %v9428_v55, 1 }
 0x5b0   : > { %v9195_v52 = vcombine.low %v9187_v49, %v9194_v28  ;;  %v9353_v32 = vadd.f32 %v9352_v59, %v9351_v30  ;;  %v9360_v37 = vadd.f32 %v9359_v5, %v9358_v21  ;;  %v9366_v48 = vrot.slane %v9365_v62, 2 }
 0x5b1   : > { %v9313_v13 = vrot.slane %v9299_v31, %v16856_v46  ;;  %v9347_v34 = vrot.slane %v9346_v23, 1  ;;  %v9443_v60 = vsel %vm8183_vm4, %v9435_v24, 0.0  ;;  %v9450_v50 = vsel %vm8183_vm4, %v9436_v40, 0.0 }
 0x5b2   : > { %v9354_v57 = vrot.slane %v9353_v32, 1  ;;  %v9361_v18 = vrot.slane %v9360_v37, 1  ;;  %v9367_v9 = vadd.f32 %v9366_v48, %v9365_v62  ;;  %v9438_v19 = vrot.slane %v9434_v16, 1  ;;  %v9325_v62 = vld [vmem:[#allocation2 + $0x20] ss:$4 sm:$0xf] }
 0x5b3   : > { %v9348_v33 = vadd.f32 %v9347_v34, %v9346_v23  ;;  %v9444_v12 = vrot.slane %v9443_v60, 4  ;;  %v9451_v44 = vrot.slane %v9450_v50, 4  ;;  %v9457_v27 = vsel %vm8183_vm4, %v9437_v15, 0.0 }
 0x5b4   : > { %v9202_v45 = vrot.slane %v9195_v52, %v16856_v46  ;;  %v9355_v51 = vadd.f32 %v9354_v57, %v9353_v32  ;;  %v9362_v20 = vadd.f32 %v9361_v18, %v9360_v37  ;;  %v9368_v25 = vrot.slane %v9367_v9, 1 }
 0x5b5   : > { %v9393_v7 = vmul.f32 %v9376_v6, %v9348_v33  ;;  %v9445_v29 = vadd.f32 %v9444_v12, %v9443_v60  ;;  %v9452_v22 = vadd.f32 %v9451_v44, %v9450_v50  ;;  %v9458_v2 = vrot.slane %v9457_v27, 4  ;;  %v11661_v6 = vld [vmem:[%s17378_s3 + $0x26] ss:$8 sm:$0xf] }
 0x5b6   : > { %v9369_v0 = vadd.f32 %v9368_v25, %v9367_v9  ;;  %v9394_v56 = vmul.f32 %v9380_v1, %v9355_v51  ;;  %v9395_v38 = vmul.f32 %v9384_v61, %v9362_v20  ;;  %v9464_v26 = vsel %vm8183_vm4, %v9438_v19, 0.0  ;;  %v11662_v51 = vld [vmem:[%s17378_s3 + $0x27] ss:$8 sm:$0xf] }
 0x5b7   : > { %v9446_v39 = vrot.slane %v9445_v29, 2  ;;  %v9453_v14 = vrot.slane %v9452_v22, 2  ;;  %v9459_v49 = vadd.f32 %v9458_v2, %v9457_v27  ;;  %v9465_v8 = vrot.slane %v9464_v26, 4 }
 0x5b8   : > { %v9314_v41 = vcombine.low %v9306_v35, %v9313_v13  ;;  %v9396_v4 = vmul.f32 %v9388_v47, %v9369_v0  ;;  %v9401_v43 = vcombine.low %v9393_v7, %v9394_v56  ;;  %v9204_v28 = vadd.f32 %v9202_v45, %v9079_v58  ;;  %v11659_v47 = vld [vmem:[%s17378_s3 + $0x24] ss:$8 sm:$0xf]  ;;  %v9529_v45 = vld [vmem:[#allocation2 + $0x22] ss:$4 sm:$0xf] }
 0x5b9   : > { %v9447_v53 = vadd.f32 %v9446_v39, %v9445_v29  ;;  %v9454_v55 = vadd.f32 %v9453_v14, %v9452_v22  ;;  %v9460_v1 = vrot.slane %v9459_v49, 2  ;;  %v9466_v11 = vadd.f32 %v9465_v8, %v9464_v26 }
 0x5ba   : > { %v9402_v17 = vcombine.low %v9395_v38, %v9396_v4  ;;  %v9477_v61 = vrot.slane %v11661_v6, %v16708_v36  ;;  %v9481_v30 = vrot.slane %v11661_v6, %v16714_v3  ;;  %v9321_v24 = vrot.slane %v9314_v41, %v16856_v46  ;;  %v9567_v4 = vld [vmem:[#allocation3] sm:$0x1] }
 0x5bb   : > { %v9448_v21 = vrot.slane %v9447_v53, 1  ;;  %v9455_v63 = vrot.slane %v9454_v55, 1  ;;  %v9461_v31 = vadd.f32 %v9460_v1, %v9459_v49  ;;  %v9467_v42 = vrot.slane %v9466_v11, 2 }
 0x5bc   : > { %v9409_v59 = vrot.slane %v9401_v43, %v16856_v46  ;;  %v9416_v5 = vrot.slane %v9402_v17, %v16856_v46  ;;  %v9485_v58 = vrot.slane %v11661_v6, %v16711_v10  ;;  %v9489_v15 = vrot.slane %v11661_v6, %v16717_v54 }
 0x5bd   : > { %v9449_v16 = vadd.f32 %v9448_v21, %v9447_v53  ;;  %v9456_v35 = vadd.f32 %v9455_v63, %v9454_v55  ;;  %v9462_v23 = vrot.slane %v9461_v31, 1  ;;  %v9468_v40 = vadd.f32 %v9467_v42, %v9466_v11 }
 0x5be   : > { %v9323_v13 = vadd.f32 %v9321_v24, %v9204_v28  ;;  %v9330_v34 = vmul.f32 %v11659_v47, %v9325_v62  ;;  %v9417_v60 = vcombine.low %v9409_v59, %v9416_v5  ;;  %v9534_v29 = vmul.f32 %v11662_v51, %v9529_v45 }
 0x5bf   : > { %v9463_v52 = vadd.f32 %v9462_v23, %v9461_v31  ;;  %v9469_v32 = vrot.slane %v9468_v40, 1  ;;  %v9494_v37 = vmul.f32 %v9477_v61, %v9449_v16  ;;  %v9495_v48 = vmul.f32 %v9481_v30, %v9456_v35 }
 0x5c0   : > { %v9331_v19 = vadd.f32 %v9330_v34, %v9323_v13  ;;  %v9424_v33 = vrot.slane %v9417_v60, %v16856_v46 }
 0x5c1   : > { %v9470_v50 = vadd.f32 %v9469_v32, %v9468_v40  ;;  %v9496_v57 = vmul.f32 %v9485_v58, %v9463_v52  ;;  %v9502_v18 = vcombine.low %v9494_v37, %v9495_v48 }
 0x5c2   : > { %v9426_v20 = vadd.f32 %v9424_v33, %v9331_v19 }
 0x5c3   : > { %v9497_v9 = vmul.f32 %v9489_v15, %v9470_v50  ;;  %v9510_v44 = vrot.slane %v9502_v18, %v16856_v46 }
 0x5c5   : > { %v9503_v12 = vcombine.low %v9496_v57, %v9497_v9 }
 0x5c7   : > { %v9517_v27 = vrot.slane %v9503_v12, %v16856_v46 }
 0x5c9   : > { %v9518_v25 = vcombine.low %v9510_v44, %v9517_v27 }
 0x5cb   : > { %v9525_v7 = vrot.slane %v9518_v25, %v16856_v46 }
 0x5cd   : > { %v9527_v22 = vadd.f32 %v9525_v7, %v9426_v20 }
 0x5cf   : > { %v9535_v2 = vadd.f32 %v9534_v29, %v9527_v22 }
 0x5d1   : > { %v9540_v0 = vrot.slane %v9535_v2, %v16708_v36  ;;  %v9544_v56 = vrot.slane %v9535_v2, %v16714_v3  ;;  %v9548_v38 = vrot.slane %v9535_v2, %v16711_v10  ;;  %v9552_v26 = vrot.slane %v9535_v2, %v16717_v54 }
 0x5d3   : > { %v9557_v39 = vsel %vm8422_vm8, %v9540_v0, 0.0  ;;  %v9558_v14 = vsel %vm8422_vm8, %v9544_v56, 0.0  ;;  %v9560_v49 = vsel %vm8422_vm8, %v9548_v38, 0.0  ;;  %v9562_v46 = vsel %vm8422_vm8, %v9552_v26, 0.0 }
 0x5d4   : > { %v9559_v8 = vadd.f32 %v9558_v14, %v9557_v39 }
 0x5d6   : > { %v9561_v6 = vadd.f32 %v9560_v49, %v9559_v8 }
 0x5d8   : > { %v9563_v41 = vadd.f32 %v9562_v46, %v9561_v6 }
 0x5da   : > { %9564 = vadd.xlane.f32.xlu0 %v9563_v41 }
 0x663   : > { %v9565_v36 = vpop.xlane.xlu0 %9564 }
 0x664   : > { %v9566_v3 = vmul.f32 0.25, %v9565_v36 }
 0x666   : > { %v9568_v43 = vadd.f32 %v9567_v4, %v9566_v3 }
 0x668   : > { %9570 = vst.msk [vmem:[%s222_s26] sm:$0x1] %vm9569_vm10, %v9568_v43 }
 0x669 PF: > { %s17_s20 = sadd.s32 1, %s13273_s20  }
 0x66a   : > { %p14_p5 = scmp.ge.s32.totalorder %s17_s20, 4  }
 0x66c   :  { %16 = sbr.rel (!%p14_p5) target bundleno = 3 (0x3), region = 132 }

</bundles_post_ra>
